<compile_context>
chip_gen: v6e
topology: v6e:2x2x1
jax: 0.10.0
libtpu: 0.0.40
codegen_flags: <defaults>
</compile_context>

<pallas_src>
import jax
import jax.numpy as jnp
from jax import lax
from jax.experimental import pallas as pl
from jax.experimental.pallas import tpu as pltpu

EPS = 1e-3      # BatchNorm2d eps used by BasicConv2d
K_TAPS = 7


# --------------------------------------------------------------------------
# Fused Block17 kernel (one image per grid step, everything VMEM-resident)
# --------------------------------------------------------------------------
def _make_block17_kernel(scale):
    def kernel(x_ref,
               w0_ref, b0_ref,
               w1a_ref, b1a_ref,
               selw_ref, w1b_ref, b1b_ref,
               selh_ref, w1c_ref, b1c_ref,
               w20_ref, w21_ref, b2_ref,
               o_ref):
        x = x_ref[0]                                     # (HW, 1088) f32
        xb = x.astype(jnp.bfloat16)

        # branch0: 1x1 (1088->192) + folded BN + ReLU
        y0 = jnp.dot(xb, w0_ref[...], preferred_element_type=jnp.float32) + b0_ref[...]
        y0 = jnp.maximum(y0, 0.0)                        # (HW, 192) f32

        # branch1[0]: 1x1 (1088->128) + folded BN + ReLU
        y1 = jnp.dot(xb, w1a_ref[...], preferred_element_type=jnp.float32) + b1a_ref[...]
        y1 = jnp.maximum(y1, 0.0).astype(jnp.bfloat16)   # (HW, 128) bf16

        # branch1[1]: (1,7) conv 128->160, pad (0,3); 7 shifted matmuls, fully unrolled.
        acc = jnp.zeros((y1.shape[0], w1b_ref.shape[-1]), jnp.float32)
        for k in range(K_TAPS):
            ys = jnp.dot(selw_ref[k], y1,
                         preferred_element_type=jnp.float32).astype(jnp.bfloat16)
            acc += jnp.dot(ys, w1b_ref[k], preferred_element_type=jnp.float32)
        y1 = jnp.maximum(acc + b1b_ref[...], 0.0).astype(jnp.bfloat16)   # (HW, 160) bf16

        # branch1[2]: (7,1) conv 160->192, pad (3,0)
        acc = jnp.zeros((y1.shape[0], w1c_ref.shape[-1]), jnp.float32)
        for k in range(K_TAPS):
            ys = jnp.dot(selh_ref[k], y1,
                         preferred_element_type=jnp.float32).astype(jnp.bfloat16)
            acc += jnp.dot(ys, w1c_ref[k], preferred_element_type=jnp.float32)
        y1 = jnp.maximum(acc + b1c_ref[...], 0.0)        # (HW, 192) f32

        # concat(192+192) @ w2 (384->1088) expressed as two half-K matmuls summed
        # (avoids an in-kernel lane-dim concat), then bias, *scale, +residual, ReLU.
        out = jnp.dot(y0.astype(jnp.bfloat16), w20_ref[...],
                      preferred_element_type=jnp.float32)
        out = out + jnp.dot(y1, w21_ref[...].astype(jnp.bfloat16)
                            if w21_ref.dtype != jnp.bfloat16 else w21_ref[...],
                            preferred_element_type=jnp.float32) \
            if False else out + jnp.dot(y1.astype(jnp.bfloat16), w21_ref[...],
                                        preferred_element_type=jnp.float32)
        out = (out + b2_ref[...]) * scale + x
        o_ref[0] = jnp.maximum(out, 0.0).astype(o_ref.dtype)
    return kernel


# --------------------------------------------------------------------------
# Per-tap (HW, HW) shift/zero-pad selection matrices (cross-correlation taps)
# --------------------------------------------------------------------------
def _make_shift_selectors(H, W, dtype=jnp.bfloat16):
    HW = H * W
    m = jnp.arange(HW)[None, :, None]            # output row index
    n = jnp.arange(HW)[None, None, :]            # input row index
    s = jnp.arange(K_TAPS)[:, None, None] - (K_TAPS // 2)
    # shift along W (within a row of the image)
    w_ok = ((m % W) + s >= 0) & ((m % W) + s < W)
    sel_w = (n == m + s) & w_ok
    # shift along H (within a column of the image)
    h_ok = ((m // W) + s >= 0) & ((m // W) + s < H)
    sel_h = (n == m + s * W) & h_ok
    return sel_w.astype(dtype), sel_h.astype(dtype)


# --------------------------------------------------------------------------
# Forward wrapper
# --------------------------------------------------------------------------
def block17_forward(x_nchw, p, scale):
    N, C, H, W = x_nchw.shape
    HW = H * W
    x3d = jnp.transpose(x_nchw, (0, 2, 3, 1)).reshape(N, HW, C)
    sel_w, sel_h = _make_shift_selectors(H, W)

    def whole_spec(arr):
        zeros = (0,) * arr.ndim
        return pl.BlockSpec(arr.shape, lambda b, _z=zeros: _z)

    consts = [p['w0'], p['b0'], p['w1a'], p['b1a'],
              sel_w, p['w1b'], p['b1b'],
              sel_h, p['w1c'], p['b1c'],
              p['w2_0'], p['w2_1'], p['b2']]

    in_specs = [pl.BlockSpec((1, HW, C), lambda b: (b, 0, 0))]
    in_specs += [whole_spec(a) for a in consts]

    out = pl.pallas_call(
        _make_block17_kernel(scale),
        out_shape=jax.ShapeDtypeStruct((N, HW, C), jnp.float32),
        grid_spec=pltpu.PrefetchScalarGridSpec(
            num_scalar_prefetch=0,
            grid=(N,),
            in_specs=in_specs,
            out_specs=pl.BlockSpec((1, HW, C), lambda b: (b, 0, 0)),
        ),
        compiler_params=pltpu.CompilerParams(
            dimension_semantics=("parallel",),
            vmem_limit_bytes=32 * 1024 * 1024),
    )(x3d, *consts)

    return jnp.transpose(out.reshape(N, H, W, C), (0, 3, 1, 2))


# --------------------------------------------------------------------------
# Parameter init: raw conv+BN params plus BN-folded (bf16 weights, f32 bias)
# --------------------------------------------------------------------------
def fold_bn(w, gamma, beta, mean, var):
    """Fold eval-mode BatchNorm into a conv weight whose last axis is Cout."""
    s = gamma / jnp.sqrt(var + EPS)
    return (w * s).astype(jnp.bfloat16), (beta - mean * s)[None, :].astype(jnp.float32)


def init_params(key):
    keys = jax.random.split(key, 10)

    def conv_w(k, shape, fan_in):
        return jax.random.normal(k, shape, jnp.float32) / jnp.sqrt(float(fan_in))

    def bn_p(k, c):
        k1, k2, k3, k4 = jax.random.split(k, 4)
        gamma = jax.random.uniform(k1, (c,), jnp.float32, 0.8, 1.2)
        beta = jax.random.normal(k2, (c,), jnp.float32) * 0.05
        mean = jax.random.normal(k3, (c,), jnp.float32) * 0.05
        var = jax.random.uniform(k4, (c,), jnp.float32, 0.8, 1.2)
        return (gamma, beta, mean, var)

    raw = {
        'w0':  conv_w(keys[0], (1088, 192), 1088),    'bn0':  bn_p(keys[1], 192),
        'w1a': conv_w(keys[2], (1088, 128), 1088),    'bn1a': bn_p(keys[3], 128),
        'w1b': conv_w(keys[4], (7, 128, 160), 128 * 7), 'bn1b': bn_p(keys[5], 160),
        'w1c': conv_w(keys[6], (7, 160, 192), 160 * 7), 'bn1c': bn_p(keys[7], 192),
        'w2':  conv_w(keys[8], (384, 1088), 384),
        'b2':  jax.random.normal(keys[9], (1088,), jnp.float32) * 0.05,
    }

    folded = {}
    folded['w0'],  folded['b0']  = fold_bn(raw['w0'],  *raw['bn0'])
    folded['w1a'], folded['b1a'] = fold_bn(raw['w1a'], *raw['bn1a'])
    folded['w1b'], folded['b1b'] = fold_bn(raw['w1b'], *raw['bn1b'])
    folded['w1c'], folded['b1c'] = fold_bn(raw['w1c'], *raw['bn1c'])
    folded['w2_0'] = raw['w2'][:192].astype(jnp.bfloat16)
    folded['w2_1'] = raw['w2'][192:].astype(jnp.bfloat16)
    folded['b2'] = raw['b2'][None, :]
    return raw, folded


# --------------------------------------------------------------------------
# Pure-JAX reference (explicit convs + unfolded BN, f32 HIGHEST) for validation
# --------------------------------------------------------------------------
def reference_forward(x_nchw, raw, scale):
    HI = lax.Precision.HIGHEST
    x = jnp.transpose(x_nchw, (0, 2, 3, 1))

    def bn_relu(y, p):
        gamma, beta, mean, var = p
        return jnp.maximum((y - mean) / jnp.sqrt(var + EPS) * gamma + beta, 0.0)

    y0 = jnp.einsum('nhwc,cd->nhwd', x, raw['w0'], precision=HI)
    y0 = bn_relu(y0, raw['bn0'])

    y1 = jnp.einsum('nhwc,cd->nhwd', x, raw['w1a'], precision=HI)
    y1 = bn_relu(y1, raw['bn1a'])
    y1 = lax.conv_general_dilated(y1, raw['w1b'][None], (1, 1),
                                  ((0, 0), (3, 3)),
                                  dimension_numbers=('NHWC', 'HWIO', 'NHWC'),
                                  precision=HI)
    y1 = bn_relu(y1, raw['bn1b'])
    y1 = lax.conv_general_dilated(y1, raw['w1c'][:, None], (1, 1),
                                  ((3, 3), (0, 0)),
                                  dimension_numbers=('NHWC', 'HWIO', 'NHWC'),
                                  precision=HI)
    y1 = bn_relu(y1, raw['bn1c'])

    cat = jnp.concatenate([y0, y1], axis=-1)
    out = jnp.einsum('nhwc,cd->nhwd', cat, raw['w2'], precision=HI) + raw['b2']
    out = jnp.maximum(out * scale + x, 0.0)
    return jnp.transpose(out, (0, 3, 1, 2))


if __name__ == "__main__":
    key = jax.random.PRNGKey(0)
    k_x, k_p = jax.random.split(key)

    N, C, H, W = 2, 1088, 8, 8          # channels fixed at 1088 by the module
    scale = 0.17
    x = jax.random.normal(k_x, (N, C, H, W), jnp.float32)

    raw, folded = init_params(k_p)

    out = block17_forward(x, folded, scale)
    out = jax.block_until_ready(out)
    assert out.shape == (N, C, H, W)

    ref = jax.block_until_ready(reference_forward(x, raw, scale))
    rel_err = float(jnp.max(jnp.abs(out - ref)) / (jnp.max(jnp.abs(ref)) + 1e-6))
    assert rel_err < 2e-2, f"mismatch vs reference: rel_err={rel_err}"

    print("KERNEL_OK")
</pallas_src>

<mosaic_0001>
module attributes {stable_mosaic.version = 11 : i64} {
  func.func @kernel(%arg0: i32, %arg1: memref<1x64x1088xf32, #tpu.memory_space<vmem>>, %arg2: memref<1088x192xbf16, #tpu.memory_space<vmem>>, %arg3: memref<1x192xf32, #tpu.memory_space<vmem>>, %arg4: memref<1088x128xbf16, #tpu.memory_space<vmem>>, %arg5: memref<1x128xf32, #tpu.memory_space<vmem>>, %arg6: memref<7x64x64xbf16, #tpu.memory_space<vmem>>, %arg7: memref<7x128x160xbf16, #tpu.memory_space<vmem>>, %arg8: memref<1x160xf32, #tpu.memory_space<vmem>>, %arg9: memref<7x64x64xbf16, #tpu.memory_space<vmem>>, %arg10: memref<7x160x192xbf16, #tpu.memory_space<vmem>>, %arg11: memref<1x192xf32, #tpu.memory_space<vmem>>, %arg12: memref<192x1088xbf16, #tpu.memory_space<vmem>>, %arg13: memref<192x1088xbf16, #tpu.memory_space<vmem>>, %arg14: memref<1x1088xf32, #tpu.memory_space<vmem>>, %arg15: memref<1x64x1088xf32, #tpu.memory_space<vmem>>) attributes {dimension_semantics = [#tpu.dimension_semantics<parallel>], iteration_bounds = array<i64: 2>, scalar_prefetch = 0 : i64, scratch_operands = 0 : i64, tpu.core_type = #tpu.core_type<tc>, window_params = [{transform_indices = @transform_0, window_bounds = array<i64: 1, 64, 1088>}, {pipeline_mode = #tpu.pipeline_mode<synchronous>, transform_indices = @transform_1, window_bounds = array<i64: 1088, 192>}, {pipeline_mode = #tpu.pipeline_mode<synchronous>, transform_indices = @transform_2, window_bounds = array<i64: 1, 192>}, {pipeline_mode = #tpu.pipeline_mode<synchronous>, transform_indices = @transform_3, window_bounds = array<i64: 1088, 128>}, {pipeline_mode = #tpu.pipeline_mode<synchronous>, transform_indices = @transform_4, window_bounds = array<i64: 1, 128>}, {pipeline_mode = #tpu.pipeline_mode<synchronous>, transform_indices = @transform_5, window_bounds = array<i64: 7, 64, 64>}, {pipeline_mode = #tpu.pipeline_mode<synchronous>, transform_indices = @transform_6, window_bounds = array<i64: 7, 128, 160>}, {pipeline_mode = #tpu.pipeline_mode<synchronous>, transform_indices = @transform_7, window_bounds = array<i64: 1, 160>}, {pipeline_mode = #tpu.pipeline_mode<synchronous>, transform_indices = @transform_8, window_bounds = array<i64: 7, 64, 64>}, {pipeline_mode = #tpu.pipeline_mode<synchronous>, transform_indices = @transform_9, window_bounds = array<i64: 7, 160, 192>}, {pipeline_mode = #tpu.pipeline_mode<synchronous>, transform_indices = @transform_10, window_bounds = array<i64: 1, 192>}, {pipeline_mode = #tpu.pipeline_mode<synchronous>, transform_indices = @transform_11, window_bounds = array<i64: 192, 1088>}, {pipeline_mode = #tpu.pipeline_mode<synchronous>, transform_indices = @transform_12, window_bounds = array<i64: 192, 1088>}, {pipeline_mode = #tpu.pipeline_mode<synchronous>, transform_indices = @transform_13, window_bounds = array<i64: 1, 1088>}, {transform_indices = @transform_14, window_bounds = array<i64: 1, 64, 1088>}]} {
    %c0 = arith.constant 0 : index
    %c0_0 = arith.constant 0 : index
    %c0_1 = arith.constant 0 : index
    %0 = vector.load %arg1[%c0, %c0_0, %c0_1] : memref<1x64x1088xf32, #tpu.memory_space<vmem>>, vector<1x64x1088xf32>
    %1 = vector.shape_cast %0 : vector<1x64x1088xf32> to vector<64x1088xf32>
    %2 = arith.truncf %1 : vector<64x1088xf32> to vector<64x1088xbf16>
    %c0_2 = arith.constant 0 : index
    %c0_3 = arith.constant 0 : index
    %3 = vector.load %arg2[%c0_2, %c0_3] : memref<1088x192xbf16, #tpu.memory_space<vmem>>, vector<1088x192xbf16>
    %cst = arith.constant dense<0.000000e+00> : vector<64x192xf32>
    %4 = tpu.matmul %2, %3, %cst {dimension_numbers = #tpu.dot_dimension_numbers<[1], [0], [0], [1], [0, 0, 1, 1], [], []>} : vector<64x1088xbf16>, vector<1088x192xbf16>, vector<64x192xf32> -> vector<64x192xf32>
    %c0_4 = arith.constant 0 : index
    %c0_5 = arith.constant 0 : index
    %5 = vector.load %arg3[%c0_4, %c0_5] : memref<1x192xf32, #tpu.memory_space<vmem>>, vector<1x192xf32>
    %6 = vector.broadcast %5 : vector<1x192xf32> to vector<64x192xf32>
    %7 = arith.addf %4, %6 : vector<64x192xf32>
    %cst_6 = arith.constant 0.000000e+00 : f32
    %8 = vector.broadcast %cst_6 : f32 to vector<64x192xf32>
    %9 = arith.maximumf %7, %8 : vector<64x192xf32>
    %c0_7 = arith.constant 0 : index
    %c0_8 = arith.constant 0 : index
    %10 = vector.load %arg4[%c0_7, %c0_8] : memref<1088x128xbf16, #tpu.memory_space<vmem>>, vector<1088x128xbf16>
    %cst_9 = arith.constant dense<0.000000e+00> : vector<64x128xf32>
    %11 = tpu.matmul %2, %10, %cst_9 {dimension_numbers = #tpu.dot_dimension_numbers<[1], [0], [0], [1], [0, 0, 1, 1], [], []>} : vector<64x1088xbf16>, vector<1088x128xbf16>, vector<64x128xf32> -> vector<64x128xf32>
    %c0_10 = arith.constant 0 : index
    %c0_11 = arith.constant 0 : index
    %12 = vector.load %arg5[%c0_10, %c0_11] : memref<1x128xf32, #tpu.memory_space<vmem>>, vector<1x128xf32>
    %13 = vector.broadcast %12 : vector<1x128xf32> to vector<64x128xf32>
    %14 = arith.addf %11, %13 : vector<64x128xf32>
    %cst_12 = arith.constant 0.000000e+00 : f32
    %15 = vector.broadcast %cst_12 : f32 to vector<64x128xf32>
    %16 = arith.maximumf %14, %15 : vector<64x128xf32>
    %17 = arith.truncf %16 : vector<64x128xf32> to vector<64x128xbf16>
    %cst_13 = arith.constant 0.000000e+00 : f32
    %18 = vector.broadcast %cst_13 : f32 to vector<64x160xf32>
    %c0_14 = arith.constant 0 : index
    %c0_15 = arith.constant 0 : index
    %c0_16 = arith.constant 0 : index
    %19 = vector.load %arg6[%c0_14, %c0_15, %c0_16] : memref<7x64x64xbf16, #tpu.memory_space<vmem>>, vector<1x64x64xbf16>
    %20 = vector.shape_cast %19 : vector<1x64x64xbf16> to vector<64x64xbf16>
    %cst_17 = arith.constant dense<0.000000e+00> : vector<64x128xf32>
    %21 = tpu.matmul %20, %17, %cst_17 {dimension_numbers = #tpu.dot_dimension_numbers<[1], [0], [0], [1], [0, 0, 1, 1], [], []>} : vector<64x64xbf16>, vector<64x128xbf16>, vector<64x128xf32> -> vector<64x128xf32>
    %22 = arith.truncf %21 : vector<64x128xf32> to vector<64x128xbf16>
    %c0_18 = arith.constant 0 : index
    %c0_19 = arith.constant 0 : index
    %c0_20 = arith.constant 0 : index
    %23 = vector.load %arg7[%c0_18, %c0_19, %c0_20] : memref<7x128x160xbf16, #tpu.memory_space<vmem>>, vector<1x128x160xbf16>
    %24 = vector.shape_cast %23 : vector<1x128x160xbf16> to vector<128x160xbf16>
    %cst_21 = arith.constant dense<0.000000e+00> : vector<64x160xf32>
    %25 = tpu.matmul %22, %24, %cst_21 {dimension_numbers = #tpu.dot_dimension_numbers<[1], [0], [0], [1], [0, 0, 1, 1], [], []>} : vector<64x128xbf16>, vector<128x160xbf16>, vector<64x160xf32> -> vector<64x160xf32>
    %26 = arith.addf %18, %25 : vector<64x160xf32>
    %c1 = arith.constant 1 : index
    %c0_22 = arith.constant 0 : index
    %c0_23 = arith.constant 0 : index
    %27 = vector.load %arg6[%c1, %c0_22, %c0_23] : memref<7x64x64xbf16, #tpu.memory_space<vmem>>, vector<1x64x64xbf16>
    %28 = vector.shape_cast %27 : vector<1x64x64xbf16> to vector<64x64xbf16>
    %cst_24 = arith.constant dense<0.000000e+00> : vector<64x128xf32>
    %29 = tpu.matmul %28, %17, %cst_24 {dimension_numbers = #tpu.dot_dimension_numbers<[1], [0], [0], [1], [0, 0, 1, 1], [], []>} : vector<64x64xbf16>, vector<64x128xbf16>, vector<64x128xf32> -> vector<64x128xf32>
    %30 = arith.truncf %29 : vector<64x128xf32> to vector<64x128xbf16>
    %c1_25 = arith.constant 1 : index
    %c0_26 = arith.constant 0 : index
    %c0_27 = arith.constant 0 : index
    %31 = vector.load %arg7[%c1_25, %c0_26, %c0_27] : memref<7x128x160xbf16, #tpu.memory_space<vmem>>, vector<1x128x160xbf16>
    %32 = vector.shape_cast %31 : vector<1x128x160xbf16> to vector<128x160xbf16>
    %cst_28 = arith.constant dense<0.000000e+00> : vector<64x160xf32>
    %33 = tpu.matmul %30, %32, %cst_28 {dimension_numbers = #tpu.dot_dimension_numbers<[1], [0], [0], [1], [0, 0, 1, 1], [], []>} : vector<64x128xbf16>, vector<128x160xbf16>, vector<64x160xf32> -> vector<64x160xf32>
    %34 = arith.addf %26, %33 : vector<64x160xf32>
    %c2 = arith.constant 2 : index
    %c0_29 = arith.constant 0 : index
    %c0_30 = arith.constant 0 : index
    %35 = vector.load %arg6[%c2, %c0_29, %c0_30] : memref<7x64x64xbf16, #tpu.memory_space<vmem>>, vector<1x64x64xbf16>
    %36 = vector.shape_cast %35 : vector<1x64x64xbf16> to vector<64x64xbf16>
    %cst_31 = arith.constant dense<0.000000e+00> : vector<64x128xf32>
    %37 = tpu.matmul %36, %17, %cst_31 {dimension_numbers = #tpu.dot_dimension_numbers<[1], [0], [0], [1], [0, 0, 1, 1], [], []>} : vector<64x64xbf16>, vector<64x128xbf16>, vector<64x128xf32> -> vector<64x128xf32>
    %38 = arith.truncf %37 : vector<64x128xf32> to vector<64x128xbf16>
    %c2_32 = arith.constant 2 : index
    %c0_33 = arith.constant 0 : index
    %c0_34 = arith.constant 0 : index
    %39 = vector.load %arg7[%c2_32, %c0_33, %c0_34] : memref<7x128x160xbf16, #tpu.memory_space<vmem>>, vector<1x128x160xbf16>
    %40 = vector.shape_cast %39 : vector<1x128x160xbf16> to vector<128x160xbf16>
    %cst_35 = arith.constant dense<0.000000e+00> : vector<64x160xf32>
    %41 = tpu.matmul %38, %40, %cst_35 {dimension_numbers = #tpu.dot_dimension_numbers<[1], [0], [0], [1], [0, 0, 1, 1], [], []>} : vector<64x128xbf16>, vector<128x160xbf16>, vector<64x160xf32> -> vector<64x160xf32>
    %42 = arith.addf %34, %41 : vector<64x160xf32>
    %c3 = arith.constant 3 : index
    %c0_36 = arith.constant 0 : index
    %c0_37 = arith.constant 0 : index
    %43 = vector.load %arg6[%c3, %c0_36, %c0_37] : memref<7x64x64xbf16, #tpu.memory_space<vmem>>, vector<1x64x64xbf16>
    %44 = vector.shape_cast %43 : vector<1x64x64xbf16> to vector<64x64xbf16>
    %cst_38 = arith.constant dense<0.000000e+00> : vector<64x128xf32>
    %45 = tpu.matmul %44, %17, %cst_38 {dimension_numbers = #tpu.dot_dimension_numbers<[1], [0], [0], [1], [0, 0, 1, 1], [], []>} : vector<64x64xbf16>, vector<64x128xbf16>, vector<64x128xf32> -> vector<64x128xf32>
    %46 = arith.truncf %45 : vector<64x128xf32> to vector<64x128xbf16>
    %c3_39 = arith.constant 3 : index
    %c0_40 = arith.constant 0 : index
    %c0_41 = arith.constant 0 : index
    %47 = vector.load %arg7[%c3_39, %c0_40, %c0_41] : memref<7x128x160xbf16, #tpu.memory_space<vmem>>, vector<1x128x160xbf16>
    %48 = vector.shape_cast %47 : vector<1x128x160xbf16> to vector<128x160xbf16>
    %cst_42 = arith.constant dense<0.000000e+00> : vector<64x160xf32>
    %49 = tpu.matmul %46, %48, %cst_42 {dimension_numbers = #tpu.dot_dimension_numbers<[1], [0], [0], [1], [0, 0, 1, 1], [], []>} : vector<64x128xbf16>, vector<128x160xbf16>, vector<64x160xf32> -> vector<64x160xf32>
    %50 = arith.addf %42, %49 : vector<64x160xf32>
    %c4 = arith.constant 4 : index
    %c0_43 = arith.constant 0 : index
    %c0_44 = arith.constant 0 : index
    %51 = vector.load %arg6[%c4, %c0_43, %c0_44] : memref<7x64x64xbf16, #tpu.memory_space<vmem>>, vector<1x64x64xbf16>
    %52 = vector.shape_cast %51 : vector<1x64x64xbf16> to vector<64x64xbf16>
    %cst_45 = arith.constant dense<0.000000e+00> : vector<64x128xf32>
    %53 = tpu.matmul %52, %17, %cst_45 {dimension_numbers = #tpu.dot_dimension_numbers<[1], [0], [0], [1], [0, 0, 1, 1], [], []>} : vector<64x64xbf16>, vector<64x128xbf16>, vector<64x128xf32> -> vector<64x128xf32>
    %54 = arith.truncf %53 : vector<64x128xf32> to vector<64x128xbf16>
    %c4_46 = arith.constant 4 : index
    %c0_47 = arith.constant 0 : index
    %c0_48 = arith.constant 0 : index
    %55 = vector.load %arg7[%c4_46, %c0_47, %c0_48] : memref<7x128x160xbf16, #tpu.memory_space<vmem>>, vector<1x128x160xbf16>
    %56 = vector.shape_cast %55 : vector<1x128x160xbf16> to vector<128x160xbf16>
    %cst_49 = arith.constant dense<0.000000e+00> : vector<64x160xf32>
    %57 = tpu.matmul %54, %56, %cst_49 {dimension_numbers = #tpu.dot_dimension_numbers<[1], [0], [0], [1], [0, 0, 1, 1], [], []>} : vector<64x128xbf16>, vector<128x160xbf16>, vector<64x160xf32> -> vector<64x160xf32>
    %58 = arith.addf %50, %57 : vector<64x160xf32>
    %c5 = arith.constant 5 : index
    %c0_50 = arith.constant 0 : index
    %c0_51 = arith.constant 0 : index
    %59 = vector.load %arg6[%c5, %c0_50, %c0_51] : memref<7x64x64xbf16, #tpu.memory_space<vmem>>, vector<1x64x64xbf16>
    %60 = vector.shape_cast %59 : vector<1x64x64xbf16> to vector<64x64xbf16>
    %cst_52 = arith.constant dense<0.000000e+00> : vector<64x128xf32>
    %61 = tpu.matmul %60, %17, %cst_52 {dimension_numbers = #tpu.dot_dimension_numbers<[1], [0], [0], [1], [0, 0, 1, 1], [], []>} : vector<64x64xbf16>, vector<64x128xbf16>, vector<64x128xf32> -> vector<64x128xf32>
    %62 = arith.truncf %61 : vector<64x128xf32> to vector<64x128xbf16>
    %c5_53 = arith.constant 5 : index
    %c0_54 = arith.constant 0 : index
    %c0_55 = arith.constant 0 : index
    %63 = vector.load %arg7[%c5_53, %c0_54, %c0_55] : memref<7x128x160xbf16, #tpu.memory_space<vmem>>, vector<1x128x160xbf16>
    %64 = vector.shape_cast %63 : vector<1x128x160xbf16> to vector<128x160xbf16>
    %cst_56 = arith.constant dense<0.000000e+00> : vector<64x160xf32>
    %65 = tpu.matmul %62, %64, %cst_56 {dimension_numbers = #tpu.dot_dimension_numbers<[1], [0], [0], [1], [0, 0, 1, 1], [], []>} : vector<64x128xbf16>, vector<128x160xbf16>, vector<64x160xf32> -> vector<64x160xf32>
    %66 = arith.addf %58, %65 : vector<64x160xf32>
    %c6 = arith.constant 6 : index
    %c0_57 = arith.constant 0 : index
    %c0_58 = arith.constant 0 : index
    %67 = vector.load %arg6[%c6, %c0_57, %c0_58] : memref<7x64x64xbf16, #tpu.memory_space<vmem>>, vector<1x64x64xbf16>
    %68 = vector.shape_cast %67 : vector<1x64x64xbf16> to vector<64x64xbf16>
    %cst_59 = arith.constant dense<0.000000e+00> : vector<64x128xf32>
    %69 = tpu.matmul %68, %17, %cst_59 {dimension_numbers = #tpu.dot_dimension_numbers<[1], [0], [0], [1], [0, 0, 1, 1], [], []>} : vector<64x64xbf16>, vector<64x128xbf16>, vector<64x128xf32> -> vector<64x128xf32>
    %70 = arith.truncf %69 : vector<64x128xf32> to vector<64x128xbf16>
    %c6_60 = arith.constant 6 : index
    %c0_61 = arith.constant 0 : index
    %c0_62 = arith.constant 0 : index
    %71 = vector.load %arg7[%c6_60, %c0_61, %c0_62] : memref<7x128x160xbf16, #tpu.memory_space<vmem>>, vector<1x128x160xbf16>
    %72 = vector.shape_cast %71 : vector<1x128x160xbf16> to vector<128x160xbf16>
    %cst_63 = arith.constant dense<0.000000e+00> : vector<64x160xf32>
    %73 = tpu.matmul %70, %72, %cst_63 {dimension_numbers = #tpu.dot_dimension_numbers<[1], [0], [0], [1], [0, 0, 1, 1], [], []>} : vector<64x128xbf16>, vector<128x160xbf16>, vector<64x160xf32> -> vector<64x160xf32>
    %74 = arith.addf %66, %73 : vector<64x160xf32>
    %c0_64 = arith.constant 0 : index
    %c0_65 = arith.constant 0 : index
    %75 = vector.load %arg8[%c0_64, %c0_65] : memref<1x160xf32, #tpu.memory_space<vmem>>, vector<1x160xf32>
    %76 = vector.broadcast %75 : vector<1x160xf32> to vector<64x160xf32>
    %77 = arith.addf %74, %76 : vector<64x160xf32>
    %cst_66 = arith.constant 0.000000e+00 : f32
    %78 = vector.broadcast %cst_66 : f32 to vector<64x160xf32>
    %79 = arith.maximumf %77, %78 : vector<64x160xf32>
    %80 = arith.truncf %79 : vector<64x160xf32> to vector<64x160xbf16>
    %cst_67 = arith.constant 0.000000e+00 : f32
    %81 = vector.broadcast %cst_67 : f32 to vector<64x192xf32>
    %c0_68 = arith.constant 0 : index
    %c0_69 = arith.constant 0 : index
    %c0_70 = arith.constant 0 : index
    %82 = vector.load %arg9[%c0_68, %c0_69, %c0_70] : memref<7x64x64xbf16, #tpu.memory_space<vmem>>, vector<1x64x64xbf16>
    %83 = vector.shape_cast %82 : vector<1x64x64xbf16> to vector<64x64xbf16>
    %cst_71 = arith.constant dense<0.000000e+00> : vector<64x160xf32>
    %84 = tpu.matmul %83, %80, %cst_71 {dimension_numbers = #tpu.dot_dimension_numbers<[1], [0], [0], [1], [0, 0, 1, 1], [], []>} : vector<64x64xbf16>, vector<64x160xbf16>, vector<64x160xf32> -> vector<64x160xf32>
    %85 = arith.truncf %84 : vector<64x160xf32> to vector<64x160xbf16>
    %c0_72 = arith.constant 0 : index
    %c0_73 = arith.constant 0 : index
    %c0_74 = arith.constant 0 : index
    %86 = vector.load %arg10[%c0_72, %c0_73, %c0_74] : memref<7x160x192xbf16, #tpu.memory_space<vmem>>, vector<1x160x192xbf16>
    %87 = vector.shape_cast %86 : vector<1x160x192xbf16> to vector<160x192xbf16>
    %cst_75 = arith.constant dense<0.000000e+00> : vector<64x192xf32>
    %88 = tpu.matmul %85, %87, %cst_75 {dimension_numbers = #tpu.dot_dimension_numbers<[1], [0], [0], [1], [0, 0, 1, 1], [], []>} : vector<64x160xbf16>, vector<160x192xbf16>, vector<64x192xf32> -> vector<64x192xf32>
    %89 = arith.addf %81, %88 : vector<64x192xf32>
    %c1_76 = arith.constant 1 : index
    %c0_77 = arith.constant 0 : index
    %c0_78 = arith.constant 0 : index
    %90 = vector.load %arg9[%c1_76, %c0_77, %c0_78] : memref<7x64x64xbf16, #tpu.memory_space<vmem>>, vector<1x64x64xbf16>
    %91 = vector.shape_cast %90 : vector<1x64x64xbf16> to vector<64x64xbf16>
    %cst_79 = arith.constant dense<0.000000e+00> : vector<64x160xf32>
    %92 = tpu.matmul %91, %80, %cst_79 {dimension_numbers = #tpu.dot_dimension_numbers<[1], [0], [0], [1], [0, 0, 1, 1], [], []>} : vector<64x64xbf16>, vector<64x160xbf16>, vector<64x160xf32> -> vector<64x160xf32>
    %93 = arith.truncf %92 : vector<64x160xf32> to vector<64x160xbf16>
    %c1_80 = arith.constant 1 : index
    %c0_81 = arith.constant 0 : index
    %c0_82 = arith.constant 0 : index
    %94 = vector.load %arg10[%c1_80, %c0_81, %c0_82] : memref<7x160x192xbf16, #tpu.memory_space<vmem>>, vector<1x160x192xbf16>
    %95 = vector.shape_cast %94 : vector<1x160x192xbf16> to vector<160x192xbf16>
    %cst_83 = arith.constant dense<0.000000e+00> : vector<64x192xf32>
    %96 = tpu.matmul %93, %95, %cst_83 {dimension_numbers = #tpu.dot_dimension_numbers<[1], [0], [0], [1], [0, 0, 1, 1], [], []>} : vector<64x160xbf16>, vector<160x192xbf16>, vector<64x192xf32> -> vector<64x192xf32>
    %97 = arith.addf %89, %96 : vector<64x192xf32>
    %c2_84 = arith.constant 2 : index
    %c0_85 = arith.constant 0 : index
    %c0_86 = arith.constant 0 : index
    %98 = vector.load %arg9[%c2_84, %c0_85, %c0_86] : memref<7x64x64xbf16, #tpu.memory_space<vmem>>, vector<1x64x64xbf16>
    %99 = vector.shape_cast %98 : vector<1x64x64xbf16> to vector<64x64xbf16>
    %cst_87 = arith.constant dense<0.000000e+00> : vector<64x160xf32>
    %100 = tpu.matmul %99, %80, %cst_87 {dimension_numbers = #tpu.dot_dimension_numbers<[1], [0], [0], [1], [0, 0, 1, 1], [], []>} : vector<64x64xbf16>, vector<64x160xbf16>, vector<64x160xf32> -> vector<64x160xf32>
    %101 = arith.truncf %100 : vector<64x160xf32> to vector<64x160xbf16>
    %c2_88 = arith.constant 2 : index
    %c0_89 = arith.constant 0 : index
    %c0_90 = arith.constant 0 : index
    %102 = vector.load %arg10[%c2_88, %c0_89, %c0_90] : memref<7x160x192xbf16, #tpu.memory_space<vmem>>, vector<1x160x192xbf16>
    %103 = vector.shape_cast %102 : vector<1x160x192xbf16> to vector<160x192xbf16>
    %cst_91 = arith.constant dense<0.000000e+00> : vector<64x192xf32>
    %104 = tpu.matmul %101, %103, %cst_91 {dimension_numbers = #tpu.dot_dimension_numbers<[1], [0], [0], [1], [0, 0, 1, 1], [], []>} : vector<64x160xbf16>, vector<160x192xbf16>, vector<64x192xf32> -> vector<64x192xf32>
    %105 = arith.addf %97, %104 : vector<64x192xf32>
    %c3_92 = arith.constant 3 : index
    %c0_93 = arith.constant 0 : index
    %c0_94 = arith.constant 0 : index
    %106 = vector.load %arg9[%c3_92, %c0_93, %c0_94] : memref<7x64x64xbf16, #tpu.memory_space<vmem>>, vector<1x64x64xbf16>
    %107 = vector.shape_cast %106 : vector<1x64x64xbf16> to vector<64x64xbf16>
    %cst_95 = arith.constant dense<0.000000e+00> : vector<64x160xf32>
    %108 = tpu.matmul %107, %80, %cst_95 {dimension_numbers = #tpu.dot_dimension_numbers<[1], [0], [0], [1], [0, 0, 1, 1], [], []>} : vector<64x64xbf16>, vector<64x160xbf16>, vector<64x160xf32> -> vector<64x160xf32>
    %109 = arith.truncf %108 : vector<64x160xf32> to vector<64x160xbf16>
    %c3_96 = arith.constant 3 : index
    %c0_97 = arith.constant 0 : index
    %c0_98 = arith.constant 0 : index
    %110 = vector.load %arg10[%c3_96, %c0_97, %c0_98] : memref<7x160x192xbf16, #tpu.memory_space<vmem>>, vector<1x160x192xbf16>
    %111 = vector.shape_cast %110 : vector<1x160x192xbf16> to vector<160x192xbf16>
    %cst_99 = arith.constant dense<0.000000e+00> : vector<64x192xf32>
    %112 = tpu.matmul %109, %111, %cst_99 {dimension_numbers = #tpu.dot_dimension_numbers<[1], [0], [0], [1], [0, 0, 1, 1], [], []>} : vector<64x160xbf16>, vector<160x192xbf16>, vector<64x192xf32> -> vector<64x192xf32>
    %113 = arith.addf %105, %112 : vector<64x192xf32>
    %c4_100 = arith.constant 4 : index
    %c0_101 = arith.constant 0 : index
    %c0_102 = arith.constant 0 : index
    %114 = vector.load %arg9[%c4_100, %c0_101, %c0_102] : memref<7x64x64xbf16, #tpu.memory_space<vmem>>, vector<1x64x64xbf16>
    %115 = vector.shape_cast %114 : vector<1x64x64xbf16> to vector<64x64xbf16>
    %cst_103 = arith.constant dense<0.000000e+00> : vector<64x160xf32>
    %116 = tpu.matmul %115, %80, %cst_103 {dimension_numbers = #tpu.dot_dimension_numbers<[1], [0], [0], [1], [0, 0, 1, 1], [], []>} : vector<64x64xbf16>, vector<64x160xbf16>, vector<64x160xf32> -> vector<64x160xf32>
    %117 = arith.truncf %116 : vector<64x160xf32> to vector<64x160xbf16>
    %c4_104 = arith.constant 4 : index
    %c0_105 = arith.constant 0 : index
    %c0_106 = arith.constant 0 : index
    %118 = vector.load %arg10[%c4_104, %c0_105, %c0_106] : memref<7x160x192xbf16, #tpu.memory_space<vmem>>, vector<1x160x192xbf16>
    %119 = vector.shape_cast %118 : vector<1x160x192xbf16> to vector<160x192xbf16>
    %cst_107 = arith.constant dense<0.000000e+00> : vector<64x192xf32>
    %120 = tpu.matmul %117, %119, %cst_107 {dimension_numbers = #tpu.dot_dimension_numbers<[1], [0], [0], [1], [0, 0, 1, 1], [], []>} : vector<64x160xbf16>, vector<160x192xbf16>, vector<64x192xf32> -> vector<64x192xf32>
    %121 = arith.addf %113, %120 : vector<64x192xf32>
    %c5_108 = arith.constant 5 : index
    %c0_109 = arith.constant 0 : index
    %c0_110 = arith.constant 0 : index
    %122 = vector.load %arg9[%c5_108, %c0_109, %c0_110] : memref<7x64x64xbf16, #tpu.memory_space<vmem>>, vector<1x64x64xbf16>
    %123 = vector.shape_cast %122 : vector<1x64x64xbf16> to vector<64x64xbf16>
    %cst_111 = arith.constant dense<0.000000e+00> : vector<64x160xf32>
    %124 = tpu.matmul %123, %80, %cst_111 {dimension_numbers = #tpu.dot_dimension_numbers<[1], [0], [0], [1], [0, 0, 1, 1], [], []>} : vector<64x64xbf16>, vector<64x160xbf16>, vector<64x160xf32> -> vector<64x160xf32>
    %125 = arith.truncf %124 : vector<64x160xf32> to vector<64x160xbf16>
    %c5_112 = arith.constant 5 : index
    %c0_113 = arith.constant 0 : index
    %c0_114 = arith.constant 0 : index
    %126 = vector.load %arg10[%c5_112, %c0_113, %c0_114] : memref<7x160x192xbf16, #tpu.memory_space<vmem>>, vector<1x160x192xbf16>
    %127 = vector.shape_cast %126 : vector<1x160x192xbf16> to vector<160x192xbf16>
    %cst_115 = arith.constant dense<0.000000e+00> : vector<64x192xf32>
    %128 = tpu.matmul %125, %127, %cst_115 {dimension_numbers = #tpu.dot_dimension_numbers<[1], [0], [0], [1], [0, 0, 1, 1], [], []>} : vector<64x160xbf16>, vector<160x192xbf16>, vector<64x192xf32> -> vector<64x192xf32>
    %129 = arith.addf %121, %128 : vector<64x192xf32>
    %c6_116 = arith.constant 6 : index
    %c0_117 = arith.constant 0 : index
    %c0_118 = arith.constant 0 : index
    %130 = vector.load %arg9[%c6_116, %c0_117, %c0_118] : memref<7x64x64xbf16, #tpu.memory_space<vmem>>, vector<1x64x64xbf16>
    %131 = vector.shape_cast %130 : vector<1x64x64xbf16> to vector<64x64xbf16>
    %cst_119 = arith.constant dense<0.000000e+00> : vector<64x160xf32>
    %132 = tpu.matmul %131, %80, %cst_119 {dimension_numbers = #tpu.dot_dimension_numbers<[1], [0], [0], [1], [0, 0, 1, 1], [], []>} : vector<64x64xbf16>, vector<64x160xbf16>, vector<64x160xf32> -> vector<64x160xf32>
    %133 = arith.truncf %132 : vector<64x160xf32> to vector<64x160xbf16>
    %c6_120 = arith.constant 6 : index
    %c0_121 = arith.constant 0 : index
    %c0_122 = arith.constant 0 : index
    %134 = vector.load %arg10[%c6_120, %c0_121, %c0_122] : memref<7x160x192xbf16, #tpu.memory_space<vmem>>, vector<1x160x192xbf16>
    %135 = vector.shape_cast %134 : vector<1x160x192xbf16> to vector<160x192xbf16>
    %cst_123 = arith.constant dense<0.000000e+00> : vector<64x192xf32>
    %136 = tpu.matmul %133, %135, %cst_123 {dimension_numbers = #tpu.dot_dimension_numbers<[1], [0], [0], [1], [0, 0, 1, 1], [], []>} : vector<64x160xbf16>, vector<160x192xbf16>, vector<64x192xf32> -> vector<64x192xf32>
    %137 = arith.addf %129, %136 : vector<64x192xf32>
    %c0_124 = arith.constant 0 : index
    %c0_125 = arith.constant 0 : index
    %138 = vector.load %arg11[%c0_124, %c0_125] : memref<1x192xf32, #tpu.memory_space<vmem>>, vector<1x192xf32>
    %139 = vector.broadcast %138 : vector<1x192xf32> to vector<64x192xf32>
    %140 = arith.addf %137, %139 : vector<64x192xf32>
    %cst_126 = arith.constant 0.000000e+00 : f32
    %141 = vector.broadcast %cst_126 : f32 to vector<64x192xf32>
    %142 = arith.maximumf %140, %141 : vector<64x192xf32>
    %143 = arith.truncf %9 : vector<64x192xf32> to vector<64x192xbf16>
    %c0_127 = arith.constant 0 : index
    %c0_128 = arith.constant 0 : index
    %144 = vector.load %arg12[%c0_127, %c0_128] : memref<192x1088xbf16, #tpu.memory_space<vmem>>, vector<192x1088xbf16>
    %cst_129 = arith.constant dense<0.000000e+00> : vector<64x1088xf32>
    %145 = tpu.matmul %143, %144, %cst_129 {dimension_numbers = #tpu.dot_dimension_numbers<[1], [0], [0], [1], [0, 0, 1, 1], [], []>} : vector<64x192xbf16>, vector<192x1088xbf16>, vector<64x1088xf32> -> vector<64x1088xf32>
    %146 = arith.truncf %142 : vector<64x192xf32> to vector<64x192xbf16>
    %c0_130 = arith.constant 0 : index
    %c0_131 = arith.constant 0 : index
    %147 = vector.load %arg13[%c0_130, %c0_131] : memref<192x1088xbf16, #tpu.memory_space<vmem>>, vector<192x1088xbf16>
    %cst_132 = arith.constant dense<0.000000e+00> : vector<64x1088xf32>
    %148 = tpu.matmul %146, %147, %cst_132 {dimension_numbers = #tpu.dot_dimension_numbers<[1], [0], [0], [1], [0, 0, 1, 1], [], []>} : vector<64x192xbf16>, vector<192x1088xbf16>, vector<64x1088xf32> -> vector<64x1088xf32>
    %149 = arith.addf %145, %148 : vector<64x1088xf32>
    %c0_133 = arith.constant 0 : index
    %c0_134 = arith.constant 0 : index
    %150 = vector.load %arg14[%c0_133, %c0_134] : memref<1x1088xf32, #tpu.memory_space<vmem>>, vector<1x1088xf32>
    %151 = vector.broadcast %150 : vector<1x1088xf32> to vector<64x1088xf32>
    %152 = arith.addf %149, %151 : vector<64x1088xf32>
    %cst_135 = arith.constant 1.700000e-01 : f32
    %153 = vector.broadcast %cst_135 : f32 to vector<64x1088xf32>
    %154 = arith.mulf %152, %153 : vector<64x1088xf32>
    %155 = arith.addf %154, %1 : vector<64x1088xf32>
    %cst_136 = arith.constant 0.000000e+00 : f32
    %156 = vector.broadcast %cst_136 : f32 to vector<64x1088xf32>
    %157 = arith.maximumf %155, %156 : vector<64x1088xf32>
    %c0_137 = arith.constant 0 : index
    %c0_138 = arith.constant 0 : index
    %c0_139 = arith.constant 0 : index
    %158 = vector.load %arg15[%c0_137, %c0_138, %c0_139] : memref<1x64x1088xf32, #tpu.memory_space<vmem>>, vector<1x64x1088xf32>
    %159 = vector.shape_cast %158 : vector<1x64x1088xf32> to vector<64x1088xf32>
    %160 = vector.shape_cast %157 : vector<64x1088xf32> to vector<1x64x1088xf32>
    tpu.vector_store %arg15[%c0_137, %c0_138, %c0_139], %160 {strides = array<i32>} : memref<1x64x1088xf32, #tpu.memory_space<vmem>>, vector<1x64x1088xf32>,
    return
  }
  func.func @transform_0(%arg0: i32) -> (i32, i32, i32) {
    %c0_i32 = arith.constant 0 : i32
    %c0_i32_0 = arith.constant 0 : i32
    %c0_i32_1 = arith.constant 0 : i32
    return %arg0, %c0_i32, %c0_i32_0 : i32, i32, i32
  }
  func.func @transform_1(%arg0: i32) -> (i32, i32) {
    %c0_i32 = arith.constant 0 : i32
    %c0_i32_0 = arith.constant 0 : i32
    %c0_i32_1 = arith.constant 0 : i32
    return %c0_i32, %c0_i32_0 : i32, i32
  }
  func.func @transform_2(%arg0: i32) -> (i32, i32) {
    %c0_i32 = arith.constant 0 : i32
    %c0_i32_0 = arith.constant 0 : i32
    %c0_i32_1 = arith.constant 0 : i32
    return %c0_i32, %c0_i32_0 : i32, i32
  }
  func.func @transform_3(%arg0: i32) -> (i32, i32) {
    %c0_i32 = arith.constant 0 : i32
    %c0_i32_0 = arith.constant 0 : i32
    %c0_i32_1 = arith.constant 0 : i32
    return %c0_i32, %c0_i32_0 : i32, i32
  }
  func.func @transform_4(%arg0: i32) -> (i32, i32) {
    %c0_i32 = arith.constant 0 : i32
    %c0_i32_0 = arith.constant 0 : i32
    %c0_i32_1 = arith.constant 0 : i32
    return %c0_i32, %c0_i32_0 : i32, i32
  }
  func.func @transform_5(%arg0: i32) -> (i32, i32, i32) {
    %c0_i32 = arith.constant 0 : i32
    %c0_i32_0 = arith.constant 0 : i32
    %c0_i32_1 = arith.constant 0 : i32
    %c0_i32_2 = arith.constant 0 : i32
    return %c0_i32, %c0_i32_0, %c0_i32_1 : i32, i32, i32
  }
  func.func @transform_6(%arg0: i32) -> (i32, i32, i32) {
    %c0_i32 = arith.constant 0 : i32
    %c0_i32_0 = arith.constant 0 : i32
    %c0_i32_1 = arith.constant 0 : i32
    %c0_i32_2 = arith.constant 0 : i32
    return %c0_i32, %c0_i32_0, %c0_i32_1 : i32, i32, i32
  }
  func.func @transform_7(%arg0: i32) -> (i32, i32) {
    %c0_i32 = arith.constant 0 : i32
    %c0_i32_0 = arith.constant 0 : i32
    %c0_i32_1 = arith.constant 0 : i32
    return %c0_i32, %c0_i32_0 : i32, i32
  }
  func.func @transform_8(%arg0: i32) -> (i32, i32, i32) {
    %c0_i32 = arith.constant 0 : i32
    %c0_i32_0 = arith.constant 0 : i32
    %c0_i32_1 = arith.constant 0 : i32
    %c0_i32_2 = arith.constant 0 : i32
    return %c0_i32, %c0_i32_0, %c0_i32_1 : i32, i32, i32
  }
  func.func @transform_9(%arg0: i32) -> (i32, i32, i32) {
    %c0_i32 = arith.constant 0 : i32
    %c0_i32_0 = arith.constant 0 : i32
    %c0_i32_1 = arith.constant 0 : i32
    %c0_i32_2 = arith.constant 0 : i32
    return %c0_i32, %c0_i32_0, %c0_i32_1 : i32, i32, i32
  }
  func.func @transform_10(%arg0: i32) -> (i32, i32) {
    %c0_i32 = arith.constant 0 : i32
    %c0_i32_0 = arith.constant 0 : i32
    %c0_i32_1 = arith.constant 0 : i32
    return %c0_i32, %c0_i32_0 : i32, i32
  }
  func.func @transform_11(%arg0: i32) -> (i32, i32) {
    %c0_i32 = arith.constant 0 : i32
    %c0_i32_0 = arith.constant 0 : i32
    %c0_i32_1 = arith.constant 0 : i32
    return %c0_i32, %c0_i32_0 : i32, i32
  }
  func.func @transform_12(%arg0: i32) -> (i32, i32) {
    %c0_i32 = arith.constant 0 : i32
    %c0_i32_0 = arith.constant 0 : i32
    %c0_i32_1 = arith.constant 0 : i32
    return %c0_i32, %c0_i32_0 : i32, i32
  }
  func.func @transform_13(%arg0: i32) -> (i32, i32) {
    %c0_i32 = arith.constant 0 : i32
    %c0_i32_0 = arith.constant 0 : i32
    %c0_i32_1 = arith.constant 0 : i32
    return %c0_i32, %c0_i32_0 : i32, i32
  }
  func.func @transform_14(%arg0: i32) -> (i32, i32, i32) {
    %c0_i32 = arith.constant 0 : i32
    %c0_i32_0 = arith.constant 0 : i32
    %c0_i32_1 = arith.constant 0 : i32
    return %arg0, %c0_i32, %c0_i32_0 : i32, i32, i32
  }
}

</mosaic_0001>

<bundles_post_ra>
// kernel: tpu_custom_call.1
= control target key start
LH: loop header
LB: loop body
LE: loop exit
PB: predicated region body
PF: predicated region fallthrough
CT: control target
= control target key end

     0   :  { %19 = vsyncpa [#allocation3], 0  ;;  %s16220_s0 = inlined_call_operand.vmem [shape: f32[2,64,1088], index: 0, kind: input, shape index: {}]   ;;  %s16221_s1 = inlined_call_operand.vmem [shape: bf16[1088,192], index: 1, kind: input, shape index: {}]   ;;  %s16222_s2 = inlined_call_operand.vmem [shape: f32[1,192], index: 2, kind: input, shape index: {}]   ;;  %s16223_s3 = inlined_call_operand.hbm [shape: bf16[1088,128], index: 3, kind: input, shape index: {}]   ;;  %s16224_s4 = inlined_call_operand.vmem [shape: f32[1,128], index: 4, kind: input, shape index: {}]   ;;  %s16225_s5 = inlined_call_operand.vmem [shape: bf16[7,64,64], index: 5, kind: input, shape index: {}]   ;;  %s16226_s6 = inlined_call_operand.vmem [shape: bf16[7,128,160], index: 6, kind: input, shape index: {}]   ;;  %s16227_s7 = inlined_call_operand.vmem [shape: f32[1,160], index: 7, kind: input, shape index: {}]   ;;  %s16228_s8 = inlined_call_operand.hbm [shape: bf16[7,64,64], index: 8, kind: input, shape index: {}]   ;;  %s16229_s9 = inlined_call_operand.vmem [shape: bf16[7,160,192], index: 9, kind: input, shape index: {}]   ;;  %s16230_s10 = inlined_call_operand.vmem [shape: f32[1,192], index: 10, kind: input, shape index: {}]   ;;  %s16231_s11 = inlined_call_operand.vmem [shape: bf16[192,1088], index: 11, kind: input, shape index: {}]   ;;  %s16232_s12 = inlined_call_operand.hbm [shape: bf16[192,1088], index: 12, kind: input, shape index: {}]   ;;  %s16233_s13 = inlined_call_operand.vmem [shape: f32[1,1088], index: 13, kind: input, shape index: {}]   ;;  %s16234_s14 = inlined_call_operand.hbm [shape: f32[2,64,1088], index: 14, kind: output, shape index: {}]  }
   0x1   :  { %20 = vsyncpa [#allocation6], 0 }
   0x2   :  { %21 = vsyncpa [#allocation4], 0 }
   0x3   :  { %23 = vsyncpa [#allocation4 + $0x1], 0  ;;  %s12748_s29 = smov 0   ;;  %s12750_s30 = smov 0  }
   0x4   :  { %s12752_s15 = smov 0   ;;  %s12754_s16 = smov 0  }
   0x5 LB: > { %16257 = sst [smem:[#allocation12_spill]] %s12648_s29  ;;  %s12769_s17 = sadd.s32 4294967295, %s12660_s16   ;;  %s12660_s16 = sphi %s12754_s16, %s16390_s16   ;;  %s12656_s15 = sphi %s12752_s15, %s16392_s15   ;;  %s12652_s30 = sphi %s12750_s30, %s16394_s30   ;;  %s12648_s29 = sphi %s12748_s29, %s16393_s29  }
   0x6   : > { %16258 = sst [smem:[#allocation13_spill]] %s12656_s15  ;;  %s9852_s18 = sadd.s32 4294967294, %s12660_s16  }
   0x7   : > { %s12773_s19 = sadd.s32 1, %s12660_s16   ;;  %s335_s20 = sadd.s32 1, %s12656_s15 }
   0x8   : > { %16259 = sst [smem:[#allocation14_spill]] %s12773_s19  ;;  %s332_s21 = ssub.s32 %s12660_s16, %s12773_s19 }
   0x9   : > { %p345_p0 = scmp.ne.s32.totalorder %s12656_s15, %s12652_s30  ;;  %p333_p1 = scmp.eq.s32.totalorder %s332_s21, 0 }
   0xa   : > { %p346_p2 = scmp.eq.s32.totalorder %s12769_s17, 1  ;;  %p351_p3 = scmp.ne.s32.totalorder %s12652_s30, %s12648_s29 }
   0xb   : > { %p352_p4 = scmp.eq.s32.totalorder %s9852_s18, 1  ;;  %p9853_p7 = scmp.ge.s32.totalorder %s12660_s16, 1 }
   0xc   : > { %s12784_s22 = scalar_select %p333_p1, %s12656_s15, %s335_s20  }
   0xd   : > { %p12786_p5 = por %p346_p2, %p345_p0  ;;  %p12790_p6 = por %p352_p4, %p351_p3 }
   0xe   : > { %16260 = sst [smem:[#allocation15_spill]] %s12784_s22  ;;  %p359_p8 = scmp.lt.s32.totalorder %s12660_s16, 3 }
   0xf   : > { %s16261_s23 = scalar_select %p12786_p5, 1, 0 }
  0x10   : > { %s16262_s24 = scalar_select %p12790_p6, 1, 0 }
  0x11   : > { %p16239_p9 = scmp.eq.s32.totalorder %s12769_s17, 0  ;;  %p12797_p10 = pnand %p9853_p7, %p359_p8 }
  0x12   : > { %16263 = sst [smem:[#allocation16_spill]] %s16262_s24  ;;  %s12662_s26 = smov [#allocation5]  }
  0x13   : > { %p11361_p11 = pneg %p12797_p10  ;;  %s402_s27 = sshll.u32 %s12662_s26, 4  ;;  %s403_s27 = int_to_ptr.vmem [resolvable:$true] %s402_s27 }
  0x14   : > { %s12663_s18 = smov [#allocation2]   ;;  %s12664_s21 = smov [#allocation7]  }
  0x15   : > { %p12805_p12 = pnand %p16239_p9, %p11361_p11  ;;  %s377_s20 = sshll.u32 %s12663_s18, 4  ;;  %s378_s20 = int_to_ptr.vmem [resolvable:$true] %s377_s20 }
  0x16   : > { %s424_s22 = sshll.u32 %s12664_s21, 4  ;;  %s12525_s15 = scalar_lea.vmem %s403_s27, 3584  ;;  %s425_s22 = int_to_ptr.vmem [resolvable:$true] %s424_s22 }
  0x17   : > { %p12516_p13 = pneg %p12805_p12  ;;  %p12526_p0 = scmp.ne.s32.totalorder %s403_s27, %s12525_s15 }
  0x18   : > { %p12533_p3 = scmp.lt.s32.totalorder %s403_s27, %s403_s27  ;;  %p12534_p4 = scmp.lt.s32.totalorder %s12525_s15, %s12525_s15 }
  0x19   : > { %p12528_p1 = pnand %p12526_p0, %p12516_p13 }
  0x1a   : > { %p12535_p7 = por %p12534_p4, %p12533_p3 }
  0x1b   : > { %p12529_p2 = pneg %p12528_p1 }
  0x1d   : > { %p12536_p8 = pnand %p12535_p7, %p12529_p2 }
  0x1f   : > { %12539 = shalt.err (!%p12536_p8)
}
  0x20   : > { %s12665_s26 = smov 64   ;;  %s12666_s18 = smov 4  }
  0x21   : > { %11367 = dma.hbm_to_vmem [thread:$0]  (!%p12805_p12), %s16228_s8, 3584, %s403_s27, [#allocation6], %s12665_s26, %s12665_s26, %s12666_s18  }
  0x22   : > { %s12551_s24 = scalar_lea.vmem %s378_s20, 8704  ;;  %p12559_p9 = scmp.lt.s32.totalorder %s378_s20, %s378_s20 }
  0x23   : > { %p12552_p11 = scmp.ne.s32.totalorder %s378_s20, %s12551_s24  ;;  %p12560_p6 = scmp.lt.s32.totalorder %s12551_s24, %s12551_s24 }
  0x25   : > { %p12554_p0 = pnand %p12552_p11, %p12516_p13  ;;  %p12561_p3 = por %p12560_p6, %p12559_p9 }
  0x27   : > { %p12555_p1 = pneg %p12554_p0 }
  0x29   : > { %p12562_p2 = pnand %p12561_p3, %p12555_p1 }
  0x2b   : > { %12565 = shalt.err (!%p12562_p2)
}
  0x2c   : > { %11364 = dma.hbm_to_vmem [thread:$0]  (!%p12805_p12), %s16223_s3, 8704, %s378_s20, [#allocation3], %s12665_s26, %s12665_s26, %s12666_s18  }
  0x2d   : > { %s12577_s19 = scalar_lea.vmem %s425_s22, 13824  ;;  %p12585_p11 = scmp.lt.s32.totalorder %s425_s22, %s425_s22 }
  0x2e   : > { %p12578_p4 = scmp.ne.s32.totalorder %s425_s22, %s12577_s19  ;;  %p12586_p0 = scmp.lt.s32.totalorder %s12577_s19, %s12577_s19 }
  0x30   : > { %p12580_p7 = pnand %p12578_p4, %p12516_p13  ;;  %p12587_p5 = por %p12586_p0, %p12585_p11 }
  0x32   : > { %p12581_p8 = pneg %p12580_p7 }
  0x34   : > { %p12588_p6 = pnand %p12587_p5, %p12581_p8 }
  0x36   : > { %12591 = shalt.err (!%p12588_p6)
}
  0x37   : > { %s12667_s24 = smov 576   ;;  %s12668_s27 = smov 36  }
  0x38   : > { %11370 = dma.hbm_to_vmem [thread:$0]  (!%p12805_p12), %s16232_s12, 13824, %s425_s22, [#allocation6], %s12667_s24, %s12667_s24, %s12668_s27  }
  0x39   : > { %451 = sbr.rel (%p12797_p10) target bundleno = 3074 (0xc02), region = 76 }
  0x3e   : > { %p16266_p9 = scmp.eq.s32.totalorder %s12769_s17, 0 }
  0x40   : > { %12635 = dma.done.wait (%p16266_p9), [#allocation3], 8704   ;;  %p16267_p13 = pmov %p16266_p9 }
  0x41   : > { %p16268_p5 = pmov %p16266_p9 }
  0x42   : > { %12637 = vsyncadd (%p16267_p13), [#allocation3], 4294958592 }
  0x43   : > { %12639 = dma.done.wait (%p16268_p5), [#allocation6], 17408   ;;  %p16269_p1 = pmov %p16268_p5 }
  0x44   : > { %v11424_v0 = vld [vmem:[%s16221_s1 + $0x74] ss:$8 sps:$4 sm:$0xff]   ;;  %v11426_v1 = vld [vmem:[%s16221_s1 + $0x70] ss:$8 sps:$4 sm:$0xff]   ;;  %v11430_v4 = vld [vmem:[%s16221_s1 + $0x64] ss:$8 sps:$4 sm:$0xff]  }
  0x45   : > { %12641 = vsyncadd (%p16269_p1), [#allocation6], 4294949888  ;;  %1460 = vmatprep.subr.bf16.mxu0 %v11424_v0  ;;  %v11427_v2 = vld [vmem:[%s16221_s1 + $0x174] ss:$8 sps:$4 sm:$0xff]   ;;  %v11429_v3 = vld [vmem:[%s16221_s1 + $0x170] ss:$8 sps:$4 sm:$0xff]  }
  0x46   : > { %1461 = vmatpush1.bf16.msra.mxu0 %v11426_v1  ;;  %v11432_v5 = vld [vmem:[%s16221_s1 + $0x60] ss:$8 sps:$4 sm:$0xff]   ;;  %1533 = vmatprep.subr.bf16.mxu1 %v11427_v2  ;;  %v11433_v6 = vld [vmem:[%s16221_s1 + $0x164] ss:$8 sps:$4 sm:$0xff]   ;;  %v11436_v8 = vld [vmem:[%s16221_s1 + $0x54] ss:$8 sps:$4 sm:$0xff]  }
  0x47   : > { %1534 = vmatpush1.bf16.msra.mxu1 %v11429_v3  ;;  %1462 = vmatprep.subr.bf16.mxu0 %v11430_v4  ;;  %v11435_v7 = vld [vmem:[%s16221_s1 + $0x160] ss:$8 sps:$4 sm:$0xff]   ;;  %v11438_v9 = vld [vmem:[%s16221_s1 + $0x50] ss:$8 sps:$4 sm:$0xff]   ;;  %v11439_v10 = vld [vmem:[%s16221_s1 + $0x154] ss:$8 sps:$4 sm:$0xff]  }
  0x48   : > { %1535 = vmatprep.subr.bf16.mxu1 %v11433_v6  ;;  %v11442_v11 = vld [vmem:[%s16221_s1 + $0x44] ss:$8 sps:$4 sm:$0xff]   ;;  %v11441_v12 = vld [vmem:[%s16221_s1 + $0x150] ss:$8 sps:$4 sm:$0xff]   ;;  %v11444_v14 = vld [vmem:[%s16221_s1 + $0x40] ss:$8 sps:$4 sm:$0xff]  }
  0x49   : > { %v11445_v13 = vld [vmem:[%s16221_s1 + $0x144] ss:$8 sps:$4 sm:$0xff]   ;;  %v11448_v15 = vld [vmem:[%s16221_s1 + $0x34] ss:$8 sps:$4 sm:$0xff]   ;;  %v11447_v16 = vld [vmem:[%s16221_s1 + $0x140] ss:$8 sps:$4 sm:$0xff]  }
  0x4a   : > { %1463 = vmatpush1.bf16.msra.mxu0 %v11432_v5  ;;  %v11451_v17 = vld [vmem:[%s16221_s1 + $0x134] ss:$8 sps:$4 sm:$0xff]   ;;  %v11450_v18 = vld [vmem:[%s16221_s1 + $0x30] ss:$8 sps:$4 sm:$0xff]   ;;  %v11454_v19 = vld [vmem:[%s16221_s1 + $0x24] ss:$8 sps:$4 sm:$0xff]  }
  0x4b   : > { %1464 = vmatprep.subr.bf16.mxu0 %v11436_v8  ;;  %1536 = vmatpush1.bf16.msra.mxu1 %v11435_v7  ;;  %v11453_v20 = vld [vmem:[%s16221_s1 + $0x130] ss:$8 sps:$4 sm:$0xff]   ;;  %v11457_v21 = vld [vmem:[%s16221_s1 + $0x124] ss:$8 sps:$4 sm:$0xff]   ;;  %v11456_v22 = vld [vmem:[%s16221_s1 + $0x20] ss:$8 sps:$4 sm:$0xff]  }
  0x4c   : > { %1537 = vmatprep.subr.bf16.mxu1 %v11439_v10  ;;  %v11460_v23 = vld [vmem:[%s16221_s1 + $0x14] ss:$8 sps:$4 sm:$0xff]   ;;  %v11459_v24 = vld [vmem:[%s16221_s1 + $0x120] ss:$8 sps:$4 sm:$0xff]   ;;  %v11462_v26 = vld [vmem:[%s16221_s1 + $0x10] ss:$8 sps:$4 sm:$0xff]  }
  0x4d   : > { %v11463_v25 = vld [vmem:[%s16221_s1 + $0x114] ss:$8 sps:$4 sm:$0xff]   ;;  %v11466_v27 = vld [vmem:[%s16221_s1 + $0x4] ss:$8 sps:$4 sm:$0xff]   ;;  %v11465_v28 = vld [vmem:[%s16221_s1 + $0x110] ss:$8 sps:$4 sm:$0xff]  }
  0x4e   : > { %1465 = vmatpush1.bf16.msra.mxu0 %v11438_v9  ;;  %v11469_v29 = vld [vmem:[%s16221_s1 + $0x104] ss:$8 sps:$4 sm:$0xff]   ;;  %v11468_v30 = vld [vmem:[%s16221_s1] ss:$8 sps:$4 sm:$0xff]   ;;  %p505_p10 = scmp.lt.s32.totalorder %s12769_s17, 1  ;;  %vm1447_vm0 = vcmask 523264  }
  0x4f   : > { %1466 = vmatprep.subr.bf16.mxu0 %v11442_v11  ;;  %1538 = vmatpush1.bf16.msra.mxu1 %v11441_v12  ;;  %v11472_v31 = vld [vmem:[%s16221_s1 + $0xf4] ss:$8 sps:$4 sm:$0xff]   ;;  %v11471_v32 = vld [vmem:[%s16221_s1 + $0x100] ss:$8 sps:$4 sm:$0xff]   ;;  %v11474_v34 = vld [vmem:[%s16221_s1 + $0xf0] ss:$8 sps:$4 sm:$0xff]  }
  0x50   : > { %1539 = vmatprep.subr.bf16.mxu1 %v11445_v13  ;;  %v11475_v33 = vld [vmem:[%s16221_s1 + $0x1f4] ss:$8 sps:$4 sm:$0xff]   ;;  %s506_s21 = scalar_select %p505_p10, %s12769_s17, 1  ;;  %v11478_v35 = vld [vmem:[%s16221_s1 + $0xe4] ss:$8 sps:$4 sm:$0xff]   ;;  %vm5203_vm1 = vcmask 261120  }
  0x51   : > { %v11477_v36 = vld [vmem:[%s16221_s1 + $0x1f0] ss:$8 sps:$4 sm:$0xff]   ;;  %v11481_v37 = vld [vmem:[%s16221_s1 + $0x1e4] ss:$8 sps:$4 sm:$0xff]   ;;  %v11480_v38 = vld [vmem:[%s16221_s1 + $0xe0] ss:$8 sps:$4 sm:$0xff]  }
  0x52   : > { %1467 = vmatpush1.bf16.msra.mxu0 %v11444_v14  ;;  %s11345_s19 = smul.u32 576, %s506_s21  ;;  %v11484_v39 = vld [vmem:[%s16221_s1 + $0xd4] ss:$8 sps:$4 sm:$0xff]   ;;  %v11483_v40 = vld [vmem:[%s16221_s1 + $0x1e0] ss:$8 sps:$4 sm:$0xff]   ;;  %s502_s20 = sand.u32 1, %s12652_s30  }
  0x53   : > { %1468 = vmatprep.subr.bf16.mxu0 %v11448_v15  ;;  %1540 = vmatpush1.bf16.msra.mxu1 %v11447_v16  ;;  %v11487_v41 = vld [vmem:[%s16221_s1 + $0x1d4] ss:$8 sps:$4 sm:$0xff]   ;;  %v11486_v42 = vld [vmem:[%s16221_s1 + $0xd0] ss:$8 sps:$4 sm:$0xff]   ;;  %v11490_v43 = vld [vmem:[%s16221_s1 + $0xc4] ss:$8 sps:$4 sm:$0xff]  }
  0x54   : > { %1541 = vmatprep.subr.bf16.mxu1 %v11451_v17  ;;  %s12979_s15 = scalar_lea.vmem %s16220_s0, %s11345_s19  ;;  %v11489_v44 = vld [vmem:[%s16221_s1 + $0x1d0] ss:$8 sps:$4 sm:$0xff]   ;;  %v11493_v45 = vld [vmem:[%s16221_s1 + $0x1c4] ss:$8 sps:$4 sm:$0xff]   ;;  %v11492_v48 = vld [vmem:[%s16221_s1 + $0xc0] ss:$8 sps:$4 sm:$0xff]  }
  0x55   : > { %v512_v46 = vld [vmem:[%s12979_s15 + $0x8] sm:$0xff]  ;;  %v521_v47 = vld [vmem:[%s12979_s15 + $0x50] sm:$0xff]  ;;  %v514_v52 = vld [vmem:[%s12979_s15 + $0x18] sm:$0xff]  ;;  %s11344_s22 = smul.u32 576, %s502_s20  ;;  %p16386_p3 = scmp.ne.s32.totalorder %s16261_s23, 0 }
  0x56   : > { %1469 = vmatpush1.bf16.msra.mxu0 %v11450_v18  ;;  %v12995_v49 = vpack.c.bf16 %v521_v47, %v512_v46  ;;  %v11496_v50 = vld [vmem:[%s16221_s1 + $0xb4] ss:$8 sps:$4 sm:$0xff]   ;;  %v11495_v51 = vld [vmem:[%s16221_s1 + $0x1c0] ss:$8 sps:$4 sm:$0xff]   ;;  %v11498_v56 = vld [vmem:[%s16221_s1 + $0xb0] ss:$8 sps:$4 sm:$0xff]  }
  0x57   : > { %1470 = vmatprep.subr.bf16.mxu0 %v11454_v19  ;;  %1542 = vmatpush1.bf16.msra.mxu1 %v11453_v20  ;;  %v523_v53 = vld [vmem:[%s12979_s15 + $0x60] sm:$0xff]  ;;  %v11499_v54 = vld [vmem:[%s16221_s1 + $0x1b4] ss:$8 sps:$4 sm:$0xff]   ;;  %v11501_v58 = vld [vmem:[%s16221_s1 + $0x1b0] ss:$8 sps:$4 sm:$0xff]   ;;  %s15843_s19 = scalar_lea.vmem [#allocation8], %s11344_s22 }
  0x58   : > { %1543 = vmatprep.subr.bf16.mxu1 %v11457_v21  ;;  %1492 = vmatprep.mubr.bf16.mxu0 %v12995_v49  ;;  %v13009_v55 = vpack.c.bf16 %v523_v53, %v514_v52  ;;  %v11502_v57 = vld [vmem:[%s16221_s1 + $0xa4] ss:$8 sps:$4 sm:$0xff]   ;;  %v11504_v60 = vld [vmem:[%s16221_s1 + $0xa0] ss:$8 sps:$4 sm:$0xff]   ;;  %v11508_v61 = vld [vmem:[%s16221_s1 + $0x94] ss:$8 sps:$4 sm:$0xff]  }
  0x59   : > { %v11505_v59 = vld [vmem:[%s16221_s1 + $0x1a4] ss:$8 sps:$4 sm:$0xff]   ;;  %v11507_v62 = vld [vmem:[%s16221_s1 + $0x1a0] ss:$8 sps:$4 sm:$0xff]   ;;  %v11511_v63 = vld [vmem:[%s16221_s1 + $0x194] ss:$8 sps:$4 sm:$0xff]  }
  0x5a   : > { %1471 = vmatpush1.bf16.msra.mxu0 %v11456_v22  ;;  %1565 = vmatprep.mubr.bf16.mxu1 %v13009_v55  ;;  %v11510_v0 = vld [vmem:[%s16221_s1 + $0x90] ss:$8 sps:$4 sm:$0xff]   ;;  %v11514_v2 = vld [vmem:[%s16221_s1 + $0x84] ss:$8 sps:$4 sm:$0xff]   ;;  %v11516_v3 = vld [vmem:[%s16221_s1 + $0x80] ss:$8 sps:$4 sm:$0xff]  }
  0x5b   : > { %1472 = vmatprep.subr.bf16.mxu0 %v11460_v23  ;;  %1544 = vmatpush1.bf16.msra.mxu1 %v11459_v24  ;;  %v11513_v1 = vld [vmem:[%s16221_s1 + $0x190] ss:$8 sps:$4 sm:$0xff]   ;;  %v11517_v4 = vld [vmem:[%s16221_s1 + $0x184] ss:$8 sps:$4 sm:$0xff]   ;;  %v11519_v6 = vld [vmem:[%s16221_s1 + $0x180] ss:$8 sps:$4 sm:$0xff]  }
  0x5c   : > { %1545 = vmatprep.subr.bf16.mxu1 %v11463_v25  ;;  %v511_v5 = vld [vmem:[%s12979_s15] sm:$0xff]  ;;  %v520_v7 = vld [vmem:[%s12979_s15 + $0x48] sm:$0xff]  ;;  %v11522_v8 = vld [vmem:[%s16221_s1 + $0x274] ss:$8 sps:$4 sm:$0xff]   ;;  %s11346_s21 = smul.u32 9216, %s12769_s17  ;;  %s9759_s18 = sshll.u32 %s15843_s19, 4  ;;  %s16172_s18 = int_to_ptr.vmem [resolvable:$true] %s9759_s18 }
  0x5d   : > { %v513_v9 = vld [vmem:[%s12979_s15 + $0x10] sm:$0xff]  ;;  %v522_v10 = vld [vmem:[%s12979_s15 + $0x58] sm:$0xff]  ;;  %v13061_v11 = vpack.c.bf16 %v520_v7, %v511_v5  ;;  %v11528_v15 = vld [vmem:[%s16221_s1 + $0x264] ss:$8 sps:$4 sm:$0xff]   ;;  %s12592_s29 = scalar_lea.vmem %s16172_s18, 9216  ;;  %s12670_s28 = smov [#allocation8]  }
  0x5e   : > { %1473 = vmatpush1.bf16.msra.mxu0 %v11462_v26  ;;  %v11525_v12 = vld [vmem:[%s16221_s1 + $0x374] ss:$8 sps:$4 sm:$0xff]   ;;  %v11520_v13 = vld [vmem:[%s16221_s1 + $0x270] ss:$8 sps:$4 sm:$0xff]   ;;  %v13069_v14 = vpack.c.bf16 %v522_v10, %v513_v9  ;;  %v11526_v17 = vld [vmem:[%s16221_s1 + $0x260] ss:$8 sps:$4 sm:$0xff]   ;;  %s16170_s27 = scalar_lea.hbm %s16234_s14, %s11346_s21  ;;  %p12593_p12 = scmp.ne.s32.totalorder %s16172_s18, %s12592_s29 }
  0x5f   : > { %1474 = vmatprep.subr.bf16.mxu0 %v11466_v27  ;;  %1546 = vmatpush1.bf16.msra.mxu1 %v11465_v28  ;;  %v11523_v16 = vld [vmem:[%s16221_s1 + $0x370] ss:$8 sps:$4 sm:$0xff]   ;;  %v11531_v18 = vld [vmem:[%s16221_s1 + $0x364] ss:$8 sps:$4 sm:$0xff]   ;;  %v11529_v19 = vld [vmem:[%s16221_s1 + $0x360] ss:$8 sps:$4 sm:$0xff]  }
  0x60   : > { %1547 = vmatprep.subr.bf16.mxu1 %v11469_v29  ;;  %v11534_v20 = vld [vmem:[%s16221_s1 + $0x254] ss:$8 sps:$4 sm:$0xff]   ;;  %v539_v22 = vld [vmem:[%s12979_s15 + $0xe0] sm:$0xff]  ;;  %v11532_v26 = vld [vmem:[%s16221_s1 + $0x250] ss:$8 sps:$4 sm:$0xff]   ;;  %p12594_p2 = pnand %p12593_p12, %p16386_p3  ;;  %s12596_s22 = sshll.u32 %s12670_s28, 4  ;;  %s12597_s22 = int_to_ptr.vmem [resolvable:$false] %s12596_s22 }
  0x61   : > { %v530_v21 = vld [vmem:[%s12979_s15 + $0x98] sm:$0xff]  ;;  %v529_v23 = vld [vmem:[%s12979_s15 + $0x90] sm:$0xff]  ;;  %v532_v29 = vld [vmem:[%s12979_s15 + $0xa8] sm:$0xff]  ;;  %s12598_s26 = scalar_lea.vmem %s12597_s22, 18432  ;;  %p12599_p7 = scmp.lt.s32.totalorder %s16172_s18, %s12597_s22 }
  0x62   : > { %1475 = vmatpush1.bf16.msra.mxu0 %v11468_v30  ;;  %v13094_v24 = vpack.c.bf16 %v539_v22, %v530_v21  ;;  %v538_v25 = vld [vmem:[%s12979_s15 + $0xd8] sm:$0xff]  ;;  %v541_v30 = vld [vmem:[%s12979_s15 + $0xf0] sm:$0xff]  ;;  %v568_v7 = vld [vmem:[%s12979_s15 + $0x1c8] sm:$0xff]  ;;  %p12595_p4 = pneg %p12594_p2  ;;  %p12600_p8 = scmp.lt.s32.totalorder %s12598_s26, %s12592_s29 }
  0x63   : > { %1476 = vmatprep.subr.bf16.mxu0 %v11472_v31  ;;  %1548 = vmatpush1.bf16.msra.mxu1 %v11471_v32  ;;  %v11537_v27 = vld [vmem:[%s16221_s1 + $0x354] ss:$8 sps:$4 sm:$0xff]   ;;  %v13103_v28 = vpack.c.bf16 %v538_v25, %v529_v23  ;;  %v531_v31 = vld [vmem:[%s12979_s15 + $0xa0] sm:$0xff]  ;;  %v540_v32 = vld [vmem:[%s12979_s15 + $0xe8] sm:$0xff] }
  0x64   : > { %1549 = vmatprep.subr.bf16.mxu1 %v11475_v33  ;;  %v11540_v33 = vld [vmem:[%s16221_s1 + $0x244] ss:$8 sps:$4 sm:$0xff]   ;;  %v11544_v46 = vld [vmem:[%s16221_s1 + $0x230] ss:$8 sps:$4 sm:$0xff]   ;;  %v11549_v47 = vld [vmem:[%s16221_s1 + $0x334] ss:$8 sps:$4 sm:$0xff]   ;;  %p12601_p11 = por %p12600_p8, %p12599_p7 }
  0x65   : > { %v549_v52 = vld [vmem:[%s12979_s15 + $0x130] sm:$0xff]  ;;  %v558_v53 = vld [vmem:[%s12979_s15 + $0x178] sm:$0xff]  ;;  %v567_v9 = vld [vmem:[%s12979_s15 + $0x1c0] sm:$0xff] }
  0x66   : > { %1477 = vmatpush2.bf16.msra.mxu0 %v11474_v34  ;;  %v13113_v34 = vpack.c.bf16 %v541_v30, %v532_v29  ;;  %v11561_v5 = vld [vmem:[%s16221_s1 + $0x314] ss:$8 sps:$4 sm:$0xff]   ;;  %v576_v10 = vld [vmem:[%s12979_s15 + $0x208] sm:$0xff]  ;;  %v11568_v22 = vld [vmem:[%s16221_s1 + $0x2f0] ss:$8 sps:$4 sm:$0xff]   ;;  %p12602_p0 = pnand %p12601_p11, %p12595_p4 }
  0x67   : > { %1478 = vmatprep.subr.bf16.mxu0 %v11478_v35  ;;  %1550 = vmatpush2.bf16.msra.mxu1 %v11477_v36  ;;  %v13115_v35 = vpack.c.bf16 %v540_v32, %v531_v31  ;;  %v11535_v36 = vld [vmem:[%s16221_s1 + $0x350] ss:$8 sps:$4 sm:$0xff]   ;;  %v11573_v21 = vld [vmem:[%s16221_s1 + $0x3f4] ss:$8 sps:$4 sm:$0xff]   ;;  %v11576_v23 = vld [vmem:[%s16221_s1 + $0x2e4] ss:$8 sps:$4 sm:$0xff]  }
  0x68   : > { %1551 = vmatprep.subr.bf16.mxu1 %v11481_v37  ;;  %v11538_v37 = vld [vmem:[%s16221_s1 + $0x240] ss:$8 sps:$4 sm:$0xff]   ;;  %v518_v30 = vld [vmem:[%s12979_s15 + $0x38] sm:$0xff]  ;;  %v11579_v32 = vld [vmem:[%s16221_s1 + $0x3e4] ss:$8 sps:$4 sm:$0xff]  }
  0x69   : > { %v516_v25 = vld [vmem:[%s12979_s15 + $0x28] sm:$0xff]  ;;  %v527_v31 = vld [vmem:[%s12979_s15 + $0x80] sm:$0xff] }
  0x6a   : > { %1479 = vmatpush2.bf16.msra.mxu0 %v11480_v38  ;;  %v11543_v38 = vld [vmem:[%s16221_s1 + $0x344] ss:$8 sps:$4 sm:$0xff]  }
  0x6b   : > { %1480 = vmatprep.subr.bf16.mxu0 %v11484_v39  ;;  %1552 = vmatpush2.bf16.msra.mxu1 %v11483_v40  ;;  %v11541_v39 = vld [vmem:[%s16221_s1 + $0x340] ss:$8 sps:$4 sm:$0xff]   ;;  %v11546_v40 = vld [vmem:[%s16221_s1 + $0x234] ss:$8 sps:$4 sm:$0xff]  }
  0x6c   : > { %1553 = vmatprep.subr.bf16.mxu1 %v11487_v41  ;;  %v548_v41 = vld [vmem:[%s12979_s15 + $0x128] sm:$0xff] }
  0x6e   : > { %1481 = vmatpush2.bf16.msra.mxu0 %v11486_v42  ;;  %v557_v42 = vld [vmem:[%s12979_s15 + $0x170] sm:$0xff] }
  0x6f   : > { %1482 = vmatprep.subr.bf16.mxu0 %v11490_v43  ;;  %1554 = vmatpush2.bf16.msra.mxu1 %v11489_v44  ;;  %v547_v43 = vld [vmem:[%s12979_s15 + $0x120] sm:$0xff]  ;;  %v13138_v44 = vpack.c.bf16 %v557_v42, %v548_v41  ;;  %v11583_v42 = vld [vmem:[%s16221_s1 + $0x3d0] ss:$8 sps:$4 sm:$0xff]  }
  0x70   : > { %1555 = vmatprep.subr.bf16.mxu1 %v11493_v45  ;;  %v556_v45 = vld [vmem:[%s12979_s15 + $0x168] sm:$0xff] }
  0x71   : > { %v11588_v41 = vld [vmem:[%s16221_s1 + $0x2c4] ss:$8 sps:$4 sm:$0xff]  }
  0x72   : > { %1483 = vmatpush2.bf16.msra.mxu0 %v11492_v48  ;;  %v13147_v48 = vpack.c.bf16 %v556_v45, %v547_v43  ;;  %v11591_v43 = vld [vmem:[%s16221_s1 + $0x3c4] ss:$8 sps:$4 sm:$0xff]   ;;  %v11586_v45 = vld [vmem:[%s16221_s1 + $0x2c0] ss:$8 sps:$4 sm:$0xff]  }
  0x73   : > { %1484 = vmatprep.subr.bf16.mxu0 %v11496_v50  ;;  %1556 = vmatpush2.bf16.msra.mxu1 %v11495_v51  ;;  %v550_v50 = vld [vmem:[%s12979_s15 + $0x138] sm:$0xff]  ;;  %v559_v51 = vld [vmem:[%s12979_s15 + $0x180] sm:$0xff] }
  0x74   : > { %1557 = vmatprep.subr.bf16.mxu1 %v11499_v54  ;;  %v11552_v54 = vld [vmem:[%s16221_s1 + $0x224] ss:$8 sps:$4 sm:$0xff]  }
  0x76   : > { %1485 = vmatpush2.bf16.msra.mxu0 %v11498_v56  ;;  %v13157_v56 = vpack.c.bf16 %v559_v51, %v550_v50  ;;  %v11597_v50 = vld [vmem:[%s16221_s1 + $0x3b4] ss:$8 sps:$4 sm:$0xff]   ;;  %v11592_v51 = vld [vmem:[%s16221_s1 + $0x2b0] ss:$8 sps:$4 sm:$0xff]  }
  0x77   : > { %1486 = vmatprep.subr.bf16.mxu0 %v11502_v57  ;;  %1558 = vmatpush2.bf16.msra.mxu1 %v11501_v58  ;;  %v13159_v57 = vpack.c.bf16 %v558_v53, %v549_v52  ;;  %v11547_v58 = vld [vmem:[%s16221_s1 + $0x330] ss:$8 sps:$4 sm:$0xff]   ;;  %v11600_v52 = vld [vmem:[%s16221_s1 + $0x2a4] ss:$8 sps:$4 sm:$0xff]  }
  0x78   : > { %1559 = vmatprep.subr.bf16.mxu1 %v11505_v59  ;;  %v11550_v59 = vld [vmem:[%s16221_s1 + $0x220] ss:$8 sps:$4 sm:$0xff]   ;;  %v11595_v53 = vld [vmem:[%s16221_s1 + $0x3b0] ss:$8 sps:$4 sm:$0xff]  }
  0x7a   : > { %1487 = vmatpush2.bf16.msra.mxu0 %v11504_v60  ;;  %v11555_v60 = vld [vmem:[%s16221_s1 + $0x324] ss:$8 sps:$4 sm:$0xff]  }
  0x7b   : > { %1488 = vmatprep.subr.bf16.mxu0 %v11508_v61  ;;  %1560 = vmatpush2.bf16.msra.mxu1 %v11507_v62  ;;  %v11553_v61 = vld [vmem:[%s16221_s1 + $0x320] ss:$8 sps:$4 sm:$0xff]   ;;  %v11558_v62 = vld [vmem:[%s16221_s1 + $0x214] ss:$8 sps:$4 sm:$0xff]  }
  0x7c   : > { %1561 = vmatprep.subr.bf16.mxu1 %v11511_v63  ;;  %v566_v63 = vld [vmem:[%s12979_s15 + $0x1b8] sm:$0xff] }
  0x7e   : > { %1489 = vmatpush2.bf16.msra.mxu0 %v11510_v0  ;;  %v575_v0 = vld [vmem:[%s12979_s15 + $0x200] sm:$0xff] }
  0x7f   : > { %1490 = vmatprep.subr.bf16.mxu0 %v11514_v2  ;;  %1562 = vmatpush2.bf16.msra.mxu1 %v11513_v1  ;;  %v565_v1 = vld [vmem:[%s12979_s15 + $0x1b0] sm:$0xff]  ;;  %v13182_v2 = vpack.c.bf16 %v575_v0, %v566_v63  ;;  %v11612_v0 = vld [vmem:[%s16221_s1 + $0x284] ss:$8 sps:$4 sm:$0xff]  }
  0x80   : > { %1563 = vmatprep.subr.bf16.mxu1 %v11517_v4  ;;  %v11556_v4 = vld [vmem:[%s16221_s1 + $0x210] ss:$8 sps:$4 sm:$0xff]  }
  0x81   : > { %v11607_v63 = vld [vmem:[%s16221_s1 + $0x390] ss:$8 sps:$4 sm:$0xff]  }
  0x82   : > { %1491 = vmatpush2.bf16.msra.mxu0 %v11516_v3  ;;  %v574_v3 = vld [vmem:[%s12979_s15 + $0x1f8] sm:$0xff] }
  0x83   : > { %1606 = vmatprep.subr.bf16.mxu0 %v11522_v8  ;;  %1564 = vmatpush2.bf16.msra.mxu1 %v11519_v6  ;;  %v13191_v6 = vpack.c.bf16 %v574_v3, %v565_v1  ;;  %v577_v8 = vld [vmem:[%s12979_s15 + $0x210] sm:$0xff]  ;;  %v11610_v1 = vld [vmem:[%s16221_s1 + $0x280] ss:$8 sps:$4 sm:$0xff]   ;;  %v11615_v3 = vld [vmem:[%s16221_s1 + $0x384] ss:$8 sps:$4 sm:$0xff]  }
  0x84   : > { %1679 = vmatprep.subr.bf16.mxu1 %v11525_v12  ;;  %v11564_v12 = vld [vmem:[%s16221_s1 + $0x204] ss:$8 sps:$4 sm:$0xff]  }
  0x85   : > { %1493 = vmatmul.mubr.bf16.vlgmr.msra.gmra.mxu0 %v13061_v11 }
  0x86   : > { %1607 = vmatpush1.bf16.msra.mxu0 %v11520_v13  ;;  %1566 = vmatmul.mubr.bf16.vlgmr.msra.gmra.mxu1 %v13069_v14  ;;  %v13201_v13 = vpack.c.bf16 %v577_v8, %v568_v7  ;;  %v534_v7 = vld [vmem:[%s12979_s15 + $0xb8] sm:$0xff]  ;;  %v11613_v8 = vld [vmem:[%s16221_s1 + $0x380] ss:$8 sps:$4 sm:$0xff]  }
  0x87   : > { %1608 = vmatprep.subr.bf16.mxu0 %v11528_v15  ;;  %1680 = vmatpush1.bf16.msra.mxu1 %v11523_v16  ;;  %v13203_v15 = vpack.c.bf16 %v576_v10, %v567_v9  ;;  %v11559_v16 = vld [vmem:[%s16221_s1 + $0x310] ss:$8 sps:$4 sm:$0xff]  }
  0x88   : > { %1681 = vmatprep.subr.bf16.mxu1 %v11531_v18  ;;  %1502 = vmatprep.mubr.bf16.mxu0 %v13094_v24  ;;  %v11562_v18 = vld [vmem:[%s16221_s1 + $0x200] ss:$8 sps:$4 sm:$0xff]   ;;  %v517_v9 = vld [vmem:[%s12979_s15 + $0x30] sm:$0xff]  ;;  %v526_v10 = vld [vmem:[%s12979_s15 + $0x78] sm:$0xff] }
  0x89   : > { %1575 = vmatprep.mubr.bf16.mxu1 %v13113_v34 }
  0x8a   : > { %1609 = vmatpush1.bf16.msra.mxu0 %v11526_v17  ;;  %v11567_v17 = vld [vmem:[%s16221_s1 + $0x304] ss:$8 sps:$4 sm:$0xff]  }
  0x8b   : > { %1610 = vmatprep.subr.bf16.mxu0 %v11534_v20  ;;  %1682 = vmatpush1.bf16.msra.mxu1 %v11529_v19  ;;  %v11570_v19 = vld [vmem:[%s16221_s1 + $0x2f4] ss:$8 sps:$4 sm:$0xff]   ;;  %v11565_v20 = vld [vmem:[%s16221_s1 + $0x300] ss:$8 sps:$4 sm:$0xff]  }
  0x8c   : > { %1683 = vmatprep.subr.bf16.mxu1 %v11537_v27  ;;  %v11571_v27 = vld [vmem:[%s16221_s1 + $0x3f0] ss:$8 sps:$4 sm:$0xff]  }
  0x8d   : > { %1503 = vmatmul.mubr.bf16.gmra.mxu0 %v13103_v28 }
  0x8e   : > { %1611 = vmatpush1.bf16.msra.mxu0 %v11532_v26  ;;  %1576 = vmatmul.mubr.bf16.gmra.mxu1 %v13115_v35  ;;  %v525_v26 = vld [vmem:[%s12979_s15 + $0x70] sm:$0xff] }
  0x8f   : > { %1612 = vmatprep.subr.bf16.mxu0 %v11540_v33  ;;  %1684 = vmatpush1.bf16.msra.mxu1 %v11535_v36  ;;  %v13237_v29 = vpack.c.bf16 %v525_v26, %v516_v25  ;;  %v13244_v33 = vpack.c.bf16 %v527_v31, %v518_v30  ;;  %v11574_v36 = vld [vmem:[%s16221_s1 + $0x2e0] ss:$8 sps:$4 sm:$0xff]   ;;  %v13344_v25 = vpack.c.bf16 %v526_v10, %v517_v9  ;;  %v11618_v26 = vld [vmem:[#allocation2 + $0x70] sm:$0xff]   ;;  %v542_v31 = vld [vmem:[%s12979_s15 + $0xf8] sm:$0xff] }
  0x90   : > { %1685 = vmatprep.subr.bf16.mxu1 %v11543_v38  ;;  %1512 = vmatprep.mubr.bf16.mxu0 %v13138_v44  ;;  %v11577_v38 = vld [vmem:[%s16221_s1 + $0x3e0] ss:$8 sps:$4 sm:$0xff]   ;;  %v533_v30 = vld [vmem:[%s12979_s15 + $0xb0] sm:$0xff] }
  0x91   : > { %1585 = vmatprep.mubr.bf16.mxu1 %v13157_v56  ;;  %v581_v10 = vld [vmem:[%s12979_s15 + $0x230] sm:$0xff] }
  0x92   : > { %1613 = vmatpush1.bf16.msra.mxu0 %v11538_v37  ;;  %v11582_v37 = vld [vmem:[%s16221_s1 + $0x2d4] ss:$8 sps:$4 sm:$0xff]  }
  0x93   : > { %1614 = vmatprep.subr.bf16.mxu0 %v11546_v40  ;;  %1686 = vmatpush1.bf16.msra.mxu1 %v11541_v39  ;;  %v11585_v39 = vld [vmem:[%s16221_s1 + $0x3d4] ss:$8 sps:$4 sm:$0xff]   ;;  %v11580_v40 = vld [vmem:[%s16221_s1 + $0x2d0] ss:$8 sps:$4 sm:$0xff]  }
  0x94   : > { %1687 = vmatprep.subr.bf16.mxu1 %v11549_v47  ;;  %v11589_v47 = vld [vmem:[%s16221_s1 + $0x3c0] ss:$8 sps:$4 sm:$0xff]  }
  0x95   : > { %1513 = vmatmul.mubr.bf16.gmra.mxu0 %v13147_v48 }
  0x96   : > { %1615 = vmatpush1.bf16.msra.mxu0 %v11544_v46  ;;  %1586 = vmatmul.mubr.bf16.gmra.mxu1 %v13159_v57  ;;  %v11594_v46 = vld [vmem:[%s16221_s1 + $0x2b4] ss:$8 sps:$4 sm:$0xff]  }
  0x97   : > { %1616 = vmatprep.subr.bf16.mxu0 %v11552_v54  ;;  %1688 = vmatpush1.bf16.msra.mxu1 %v11547_v58  ;;  %v11603_v54 = vld [vmem:[%s16221_s1 + $0x3a4] ss:$8 sps:$4 sm:$0xff]   ;;  %v11598_v58 = vld [vmem:[%s16221_s1 + $0x2a0] ss:$8 sps:$4 sm:$0xff]  }
  0x98   : > { %1689 = vmatprep.subr.bf16.mxu1 %v11555_v60  ;;  %1522 = vmatprep.mubr.bf16.mxu0 %v13182_v2  ;;  %v11601_v60 = vld [vmem:[%s16221_s1 + $0x3a0] ss:$8 sps:$4 sm:$0xff]  }
  0x99   : > { %1595 = vmatprep.mubr.bf16.mxu1 %v13201_v13 }
  0x9a   : > { %1617 = vmatpush1.bf16.msra.mxu0 %v11550_v59  ;;  %v11606_v59 = vld [vmem:[%s16221_s1 + $0x294] ss:$8 sps:$4 sm:$0xff]  }
  0x9b   : > { %1618 = vmatprep.subr.bf16.mxu0 %v11558_v62  ;;  %1690 = vmatpush1.bf16.msra.mxu1 %v11553_v61  ;;  %v11609_v61 = vld [vmem:[%s16221_s1 + $0x394] ss:$8 sps:$4 sm:$0xff]   ;;  %v11604_v62 = vld [vmem:[%s16221_s1 + $0x290] ss:$8 sps:$4 sm:$0xff]  }
  0x9c   : > { %1691 = vmatprep.subr.bf16.mxu1 %v11561_v5  ;;  %v524_v5 = vld [vmem:[%s12979_s15 + $0x68] sm:$0xff] }
  0x9d   : > { %1523 = vmatmul.mubr.bf16.gmra.mxu0 %v13191_v6 }
  0x9e   : > { %1619 = vmatpush1.bf16.msra.mxu0 %v11556_v4  ;;  %1596 = vmatmul.mubr.bf16.gmra.mxu1 %v13203_v15  ;;  %v515_v4 = vld [vmem:[%s12979_s15 + $0x20] sm:$0xff] }
  0x9f   : > { %1620 = vmatprep.subr.bf16.mxu0 %v11564_v12  ;;  %1692 = vmatpush1.bf16.msra.mxu1 %v11559_v16  ;;  %v543_v12 = vld [vmem:[%s12979_s15 + $0x100] sm:$0xff]  ;;  %v11626_v16 = vld [vmem:[%s16221_s1 + $0x434] ss:$8 sps:$4 sm:$0xff]  }
  0xa0   : > { %1693 = vmatprep.subr.bf16.mxu1 %v11567_v17  ;;  %1638 = vmatprep.mubr.bf16.mxu0 %v13237_v29  ;;  %v11616_v17 = vld [vmem:[#allocation2 + $0x78] sm:$0xff]  }
  0xa1   : > { %1711 = vmatprep.mubr.bf16.mxu1 %v13244_v33 }
  0xa2   : > { %1621 = vmatpush1.bf16.msra.mxu0 %v11562_v18  ;;  %v536_v18 = vld [vmem:[%s12979_s15 + $0xc8] sm:$0xff] }
  0xa3   : > { %1622 = vmatprep.subr.bf16.mxu0 %v11570_v19  ;;  %1694 = vmatpush1.bf16.msra.mxu1 %v11565_v20  ;;  %v13336_v19 = vpack.c.bf16 %v524_v5, %v515_v4  ;;  %v545_v20 = vld [vmem:[%s12979_s15 + $0x110] sm:$0xff]  ;;  %v11639_v4 = vld [vmem:[%s16221_s1 + $0x400] ss:$8 sps:$4 sm:$0xff]   ;;  %v11627_v5 = vld [vmem:[#allocation2 + $0x58] sm:$0xff]  }
  0xa4   : > { %1695 = vmatprep.subr.bf16.mxu1 %v11573_v21  ;;  %v11617_v21 = vld [vmem:[#allocation2 + $0x38] sm:$0xff]  }
  0xa6   : > { %1623 = vmatpush2.bf16.msra.mxu0 %v11568_v22  ;;  %v13339_v22 = vpack.c.bf16 %v543_v12, %v534_v7  ;;  %v11644_v7 = vld [vmem:[#allocation2 + $0xf8] sm:$0xff]  }
  0xa7   : > { %1624 = vmatprep.subr.bf16.mxu0 %v11576_v23  ;;  %1696 = vmatpush2.bf16.msra.mxu1 %v11571_v27  ;;  %v11624_v23 = vld [vmem:[%s16221_s1 + $0x430] ss:$8 sps:$4 sm:$0xff]   ;;  %v11631_v27 = vld [vmem:[%s16221_s1 + $0x424] ss:$8 sps:$4 sm:$0xff]  }
  0xa8   : > { %1697 = vmatprep.subr.bf16.mxu1 %v11579_v32  ;;  %v13351_v32 = vpack.c.bf16 %v545_v20, %v536_v18  ;;  %v11632_v18 = vld [vmem:[#allocation2 + $0x50] sm:$0xff]  }
  0xaa   : > { %1625 = vmatpush2.bf16.msra.mxu0 %v11574_v36  ;;  %v552_v36 = vld [vmem:[%s12979_s15 + $0x148] sm:$0xff] }
  0xab   : > { %1626 = vmatprep.subr.bf16.mxu0 %v11582_v37  ;;  %1698 = vmatpush2.bf16.msra.mxu1 %v11577_v38  ;;  %v561_v37 = vld [vmem:[%s12979_s15 + $0x190] sm:$0xff] }
  0xac   : > { %1699 = vmatprep.subr.bf16.mxu1 %v11585_v39  ;;  %v11619_v38 = vld [vmem:[#allocation2 + $0x30] sm:$0xff]   ;;  %v535_v39 = vld [vmem:[%s12979_s15 + $0xc0] sm:$0xff] }
  0xae   : > { %1627 = vmatpush2.bf16.msra.mxu0 %v11580_v40  ;;  %v544_v40 = vld [vmem:[%s12979_s15 + $0x108] sm:$0xff] }
  0xaf   : > { %1628 = vmatprep.subr.bf16.mxu0 %v11588_v41  ;;  %1700 = vmatpush2.bf16.msra.mxu1 %v11583_v42  ;;  %v11629_v41 = vld [vmem:[%s16221_s1 + $0x420] ss:$8 sps:$4 sm:$0xff]  }
  0xb0   : > { %1701 = vmatprep.subr.bf16.mxu1 %v11591_v43  ;;  %v11620_v42 = vld [vmem:[#allocation2 + $0x68] sm:$0xff]   ;;  %v11636_v43 = vld [vmem:[%s16221_s1 + $0x414] ss:$8 sps:$4 sm:$0xff]  }
  0xb2   : > { %1629 = vmatpush2.bf16.msra.mxu0 %v11586_v45  ;;  %v554_v45 = vld [vmem:[%s12979_s15 + $0x158] sm:$0xff] }
  0xb3   : > { %1630 = vmatprep.subr.bf16.mxu0 %v11594_v46  ;;  %1702 = vmatpush2.bf16.msra.mxu1 %v11589_v47  ;;  %v13368_v46 = vpack.c.bf16 %v542_v31, %v533_v30  ;;  %v563_v47 = vld [vmem:[%s12979_s15 + $0x1a0] sm:$0xff]  ;;  %v580_v30 = vld [vmem:[%s12979_s15 + $0x228] sm:$0xff] }
  0xb4   : > { %1703 = vmatprep.subr.bf16.mxu1 %v11597_v50  ;;  %v11621_v50 = vld [vmem:[#allocation2 + $0x28] sm:$0xff]  }
  0xb6   : > { %1631 = vmatpush2.bf16.msra.mxu0 %v11592_v51  ;;  %v13371_v51 = vpack.c.bf16 %v561_v37, %v552_v36  ;;  %v11637_v36 = vld [vmem:[#allocation2 + $0x48] sm:$0xff]  }
  0xb7   : > { %1632 = vmatprep.subr.bf16.mxu0 %v11600_v52  ;;  %1704 = vmatpush2.bf16.msra.mxu1 %v11595_v53  ;;  %v11634_v52 = vld [vmem:[%s16221_s1 + $0x410] ss:$8 sps:$4 sm:$0xff]   ;;  %v13376_v53 = vpack.c.bf16 %v544_v40, %v535_v39  ;;  %v11642_v39 = vld [vmem:[#allocation2 + $0x40] sm:$0xff]  }
  0xb8   : > { %1705 = vmatprep.subr.bf16.mxu1 %v11603_v54  ;;  %v11622_v54 = vld [vmem:[#allocation2 + $0x60] sm:$0xff]  }
  0xb9   : > { %v519_v40 = vld [vmem:[%s12979_s15 + $0x40] sm:$0xff] }
  0xba   : > { %1633 = vmatpush2.bf16.msra.mxu0 %v11598_v58  ;;  %v11641_v58 = vld [vmem:[%s16221_s1 + $0x404] ss:$8 sps:$4 sm:$0xff]  }
  0xbb   : > { %1634 = vmatprep.subr.bf16.mxu0 %v11606_v59  ;;  %1706 = vmatpush2.bf16.msra.mxu1 %v11601_v60  ;;  %v551_v59 = vld [vmem:[%s12979_s15 + $0x140] sm:$0xff]  ;;  %v560_v60 = vld [vmem:[%s12979_s15 + $0x188] sm:$0xff] }
  0xbc   : > { %1707 = vmatprep.subr.bf16.mxu1 %v11609_v61  ;;  %v13383_v61 = vpack.c.bf16 %v563_v47, %v554_v45  ;;  %v13397_v9 = vpack.c.bf16 %v560_v60, %v551_v59  ;;  %v11645_v45 = vld [vmem:[#allocation2 + $0xb8] sm:$0xff]   ;;  %v11650_v59 = vld [vmem:[#allocation2 + $0x170] sm:$0xff]  }
  0xbd   : > { %v537_v60 = vld [vmem:[%s12979_s15 + $0xd0] sm:$0xff] }
  0xbe   : > { %1635 = vmatpush2.bf16.msra.mxu0 %v11604_v62  ;;  %v570_v62 = vld [vmem:[%s12979_s15 + $0x1d8] sm:$0xff] }
  0xbf   : > { %1636 = vmatprep.subr.bf16.mxu0 %v11612_v0  ;;  %1708 = vmatpush2.bf16.msra.mxu1 %v11607_v63  ;;  %v579_v63 = vld [vmem:[%s12979_s15 + $0x220] sm:$0xff] }
  0xc0   : > { %1709 = vmatprep.subr.bf16.mxu1 %v11615_v3  ;;  %v11623_v0 = vld [vmem:[#allocation2 + $0x20] sm:$0xff]   ;;  %v562_v3 = vld [vmem:[%s12979_s15 + $0x198] sm:$0xff]  ;;  %v13400_v12 = vpack.c.bf16 %v579_v63, %v570_v62  ;;  %v11652_v63 = vld [vmem:[#allocation2 + $0xe8] sm:$0xff]  }
  0xc1   : > { %v546_v62 = vld [vmem:[%s12979_s15 + $0x118] sm:$0xff] }
  0xc2   : > { %1637 = vmatpush2.bf16.msra.mxu0 %v11610_v1  ;;  %v553_v1 = vld [vmem:[%s12979_s15 + $0x150] sm:$0xff] }
  0xc3   : > { %1760 = vmatprep.subr.bf16.mxu0 %v11626_v16  ;;  %1710 = vmatpush2.bf16.msra.mxu1 %v11613_v8  ;;  %v572_v8 = vld [vmem:[%s12979_s15 + $0x1e8] sm:$0xff]  ;;  %v13402_v16 = vpack.c.bf16 %v562_v3, %v553_v1  ;;  %v13433_v1 = vpack.c.bf16 %v546_v62, %v537_v60  ;;  %v11678_v60 = vld [vmem:[#allocation2 + $0x1f0] sm:$0xff]  }
  0xc4   : > { %10992 = vmatprep.subr.bf16.mxu1 %v11616_v17  ;;  %v11628_v17 = vld [vmem:[#allocation2 + $0x18] sm:$0xff]   ;;  %v13404_v20 = vpack.c.bf16 %v581_v10, %v572_v8  ;;  %v11654_v3 = vld [vmem:[#allocation2 + $0x168] sm:$0xff]   ;;  %v11658_v8 = vld [vmem:[#allocation2 + $0x160] sm:$0xff]  }
  0xc5   : > { %1639 = vmatmul.mubr.bf16.vlgmr.msra.gmra.mxu0 %v13336_v19  ;;  %v564_v10 = vld [vmem:[%s12979_s15 + $0x1a8] sm:$0xff]  ;;  %v11679_v62 = vld [vmem:[#allocation2 + $0x1b0] sm:$0xff]  }
  0xc6   : > { %1648 = vmatprep.mubr.bf16.mxu0 %v13339_v22  ;;  %1761 = vmatpush1.bf16.msra.mxu0 %v11624_v23  ;;  %v11633_v23 = vld [vmem:[#allocation2 + $0x10] sm:$0xff]  }
  0xc7   : > { %1712 = vmatmul.mubr.bf16.vlgmr.msra.gmra.mxu1 %v13344_v25  ;;  %1762 = vmatprep.subr.bf16.mxu0 %v11631_v27  ;;  %v571_v27 = vld [vmem:[%s12979_s15 + $0x1e0] sm:$0xff] }
  0xc8   : > { %10993 = vmatpush3.bf16.msra.mxu1 %v11617_v21  ;;  %1721 = vmatprep.mubr.bf16.mxu1 %v13351_v32  ;;  %v569_v21 = vld [vmem:[%s12979_s15 + $0x1d0] sm:$0xff]  ;;  %v13416_v37 = vpack.c.bf16 %v580_v30, %v571_v27 }
  0xc9   : > { %10994 = vmatprep.subr.bf16.mxu1 %v11618_v26  ;;  %v578_v26 = vld [vmem:[%s12979_s15 + $0x218] sm:$0xff]  ;;  %v11664_v27 = vld [vmem:[#allocation2 + $0xd0] sm:$0xff]  }
  0xca   : > { %1763 = vmatpush1.bf16.msra.mxu0 %v11629_v41  ;;  %v13414_v31 = vpack.c.bf16 %v578_v26, %v569_v21  ;;  %v16242_v41 = vmov 0   ;;  %v11663_v26 = vld [vmem:[#allocation2 + $0x118] sm:$0xff]   ;;  %v11665_v30 = vld [vmem:[#allocation2 + $0x90] sm:$0xff]  }
  0xcb   : > { %1764 = vmatprep.subr.bf16.mxu0 %v11636_v43  ;;  %v11643_v43 = vld [vmem:[#allocation2] sm:$0xff]  }
  0xcc   : > { %10995 = vmatpush3.bf16.msra.mxu1 %v11619_v38  ;;  %v11638_v38 = vld [vmem:[#allocation2 + $0x8] sm:$0xff]  }
  0xcd   : > { %1649 = vmatmul.mubr.bf16.gmra.mxu0 %v13368_v46  ;;  %10996 = vmatprep.subr.bf16.mxu1 %v11620_v42  ;;  %v528_v42 = vld [vmem:[%s12979_s15 + $0x88] sm:$0xff] }
  0xce   : > { %1658 = vmatprep.mubr.bf16.mxu0 %v13371_v51  ;;  %1765 = vmatpush1.bf16.msra.mxu0 %v11634_v52  ;;  %v13424_v47 = vpack.c.bf16 %v528_v42, %v519_v40  ;;  %v11647_v52 = vld [vmem:[#allocation2 + $0x138] sm:$0xff]   ;;  %v11669_v40 = vld [vmem:[#allocation2 + $0x88] sm:$0xff]  }
  0xcf   : > { %1722 = vmatmul.mubr.bf16.gmra.mxu1 %v13376_v53  ;;  %1766 = vmatprep.subr.bf16.mxu0 %v11641_v58  ;;  %v11649_v58 = vld [vmem:[#allocation2 + $0xb0] sm:$0xff]  }
  0xd0   : > { %10997 = vmatpush3.bf16.msra.mxu1 %v11621_v50  ;;  %1731 = vmatprep.mubr.bf16.mxu1 %v13383_v61  ;;  %v11646_v50 = vld [vmem:[#allocation2 + $0x178] sm:$0xff]  }
  0xd1   : > { %10998 = vmatprep.subr.bf16.mxu1 %v11622_v54  ;;  %v11648_v54 = vld [vmem:[#allocation2 + $0xf0] sm:$0xff]  }
  0xd2   : > { %1767 = vmatpush1.bf16.msra.mxu0 %v11639_v4  ;;  %v11655_v4 = vld [vmem:[#allocation2 + $0x128] sm:$0xff]  }
  0xd3   : > { %11032 = vmatprep.subr.bf16.mxu0 %v11644_v7  ;;  %v11657_v7 = vld [vmem:[#allocation2 + $0xa0] sm:$0xff]  }
  0xd4   : > { %10999 = vmatpush3.bf16.msra.mxu1 %v11623_v0  ;;  %v11653_v0 = vld [vmem:[#allocation2 + $0xa8] sm:$0xff]  }
  0xd5   : > { %1659 = vmatmul.mubr.bf16.gmra.mxu0 %v13397_v9  ;;  %11000 = vmatprep.subr.bf16.mxu1 %v11627_v5  ;;  %v11656_v5 = vld [vmem:[#allocation2 + $0xe0] sm:$0xff]  }
  0xd6   : > { %1668 = vmatprep.mubr.bf16.mxu0 %v13400_v12 }
  0xd7   : > { %1732 = vmatmul.mubr.bf16.gmra.mxu1 %v13402_v16 }
  0xd8   : > { %11001 = vmatpush3.bf16.msra.mxu1 %v11628_v17  ;;  %1741 = vmatprep.mubr.bf16.mxu1 %v13404_v20  ;;  %v11660_v17 = vld [vmem:[#allocation2 + $0xd8] sm:$0xff]  }
  0xd9   : > { %11002 = vmatprep.subr.bf16.mxu1 %v11632_v18  ;;  %v11661_v18 = vld [vmem:[#allocation2 + $0x98] sm:$0xff]  }
  0xdc   : > { %11003 = vmatpush3.bf16.msra.mxu1 %v11633_v23  ;;  %v11662_v23 = vld [vmem:[#allocation2 + $0x158] sm:$0xff]  }
  0xdd   : > { %1669 = vmatmul.mubr.bf16.gmra.mxu0 %v13414_v31  ;;  %11004 = vmatprep.subr.bf16.mxu1 %v11637_v36  ;;  %v11666_v36 = vld [vmem:[#allocation2 + $0x150] sm:$0xff]  }
  0xde   : > { %1784 = vmatprep.mubr.bf16.mxu0 %v16242_v41 }
  0xdf   : > { %1742 = vmatmul.mubr.bf16.gmra.mxu1 %v13416_v37 }
  0xe0   : > { %11005 = vmatpush3.bf16.msra.mxu1 %v11638_v38  ;;  %2424 = vmatprep.mubr.bf16.mxu1 %v12995_v49  ;;  %v11651_v49 = vld [vmem:[#allocation2 + $0x130] sm:$0xff]   ;;  %v582_v38 = vld [vmem:[%s12979_s15 + $0x238] sm:$0xff] }
  0xe1   : > { %11006 = vmatprep.subr.bf16.mxu1 %v11642_v39  ;;  %v11668_v39 = vld [vmem:[#allocation2 + $0xc8] sm:$0xff]  }
  0xe4   : > { %11007 = vmatpush3.bf16.msra.mxu1 %v11643_v43  ;;  %v11670_v43 = vld [vmem:[#allocation2 + $0x148] sm:$0xff]  }
  0xe5   : > { %9999 = vmatmul.mubr.msk.bf16.vlgmr.msra.gmra.mxu0 %vm1447_vm0, %v13424_v47  ;;  %11072 = vmatprep.subr.bf16.mxu1 %v11646_v50  ;;  %v11671_v50 = vld [vmem:[#allocation2 + $0x108] sm:$0xff]  }
  0xe6   : > { %11033 = vmatpush3.bf16.msra.mxu0 %v11645_v45  ;;  %1794 = vmatprep.mubr.bf16.mxu0 %v16242_v41  ;;  %v11672_v45 = vld [vmem:[#allocation2 + $0xc0] sm:$0xff]  }
  0xe7   : > { %2425 = vmatmul.mubr.bf16.vlgmr.msra.gmra.mxu1 %v13061_v11  ;;  %11034 = vmatprep.subr.bf16.mxu0 %v11648_v54  ;;  %v555_v11 = vld [vmem:[%s12979_s15 + $0x160] sm:$0xff] }
  0xe8   : > { %11073 = vmatpush3.bf16.msra.mxu1 %v11647_v52  ;;  %2432 = vmatprep.mubr.bf16.mxu1 %v13094_v24  ;;  %v11659_v24 = vld [vmem:[#allocation2 + $0x120] sm:$0xff]   ;;  %v13442_v21 = vpack.c.bf16 %v564_v10, %v555_v11 }
  0xe9   : > { %11074 = vmatprep.subr.bf16.mxu1 %v11650_v59  ;;  %v11674_v52 = vld [vmem:[#allocation2 + $0x140] sm:$0xff]   ;;  %v11677_v59 = vld [vmem:[#allocation2 + $0x1b8] sm:$0xff]  }
  0xea   : > { %11035 = vmatpush3.bf16.msra.mxu0 %v11649_v58  ;;  %v11673_v54 = vld [vmem:[#allocation2 + $0x80] sm:$0xff]   ;;  %v11687_v58 = vld [vmem:[#allocation2 + $0x218] sm:$0xff]  }
  0xeb   : > { %11036 = vmatprep.subr.bf16.mxu0 %v11652_v63  ;;  %v11680_v63 = vld [vmem:[#allocation2 + $0x1e8] sm:$0xff]  }
  0xec   : > { %11075 = vmatpush3.bf16.msra.mxu1 %v11651_v49  ;;  %v11690_v49 = vld [vmem:[#allocation2 + $0x210] sm:$0xff]  }
  0xed   : > { %10000 = vmatmul.mubr.msk.bf16.gmra.mxu0 %vm1447_vm0, %v13433_v1  ;;  %11076 = vmatprep.subr.bf16.mxu1 %v11654_v3  ;;  %v11683_v3 = vld [vmem:[#allocation2 + $0x1a0] sm:$0xff]  }
  0xee   : > { %11037 = vmatpush3.bf16.msra.mxu0 %v11653_v0  ;;  %1804 = vmatprep.mubr.bf16.mxu0 %v16242_v41  ;;  %v11695_v0 = vld [vmem:[#allocation2 + $0x200] sm:$0xff]  }
  0xef   : > { %2433 = vmatmul.mubr.bf16.gmra.mxu1 %v13103_v28  ;;  %11038 = vmatprep.subr.bf16.mxu0 %v11656_v5  ;;  %v573_v28 = vld [vmem:[%s12979_s15 + $0x1f0] sm:$0xff] }
  0xf0   : > { %11077 = vmatpush3.bf16.msra.mxu1 %v11655_v4  ;;  %2440 = vmatprep.mubr.bf16.mxu1 %v13138_v44  ;;  %v11667_v44 = vld [vmem:[#allocation2 + $0x110] sm:$0xff]   ;;  %v13451_v42 = vpack.c.bf16 %v582_v38, %v573_v28 }
  0xf1   : > { %11078 = vmatprep.subr.bf16.mxu1 %v11658_v8 }
  0xf2   : > { %11039 = vmatpush3.bf16.msra.mxu0 %v11657_v7 }
  0xf3   : > { %11040 = vmatprep.subr.bf16.mxu0 %v11660_v17 }
  0xf4   : > { %11079 = vmatpush3.bf16.msra.mxu1 %v11659_v24 }
  0xf5   : > { %10001 = vmatmul.mubr.msk.bf16.gmra.mxu0 %vm1447_vm0, %v13442_v21  ;;  %11080 = vmatprep.subr.bf16.mxu1 %v11662_v23 }
  0xf6   : > { %11041 = vmatpush3.bf16.msra.mxu0 %v11661_v18  ;;  %1814 = vmatprep.mubr.bf16.mxu0 %v16242_v41 }
  0xf7   : > { %2441 = vmatmul.mubr.bf16.gmra.mxu1 %v13147_v48  ;;  %11042 = vmatprep.subr.bf16.mxu0 %v11664_v27  ;;  %v11676_v48 = vld [vmem:[#allocation2 + $0x1f8] sm:$0xff]  }
  0xf8   : > { %11081 = vmatpush3.bf16.msra.mxu1 %v11663_v26  ;;  %2448 = vmatprep.mubr.bf16.mxu1 %v13182_v2  ;;  %v11675_v2 = vld [vmem:[#allocation2 + $0x100] sm:$0xff]  }
  0xf9   : > { %11082 = vmatprep.subr.bf16.mxu1 %v11666_v36 }
  0xfa   : > { %11043 = vmatpush3.bf16.msra.mxu0 %v11665_v30 }
  0xfb   : > { %11044 = vmatprep.subr.bf16.mxu0 %v11668_v39 }
  0xfc   : > { %11083 = vmatpush3.bf16.msra.mxu1 %v11667_v44 }
  0xfd   : > { %10002 = vmatmul.mubr.msk.bf16.gmra.mxu0 %vm1447_vm0, %v13451_v42  ;;  %11084 = vmatprep.subr.bf16.mxu1 %v11670_v43 }
  0xfe   : > { %11045 = vmatpush3.bf16.msra.mxu0 %v11669_v40  ;;  %2489 = vmatprep.mubr.bf16.mxu0 %v13009_v55  ;;  %v11693_v55 = vld [vmem:[#allocation2 + $0x208] sm:$0xff]  }
  0xff   : > { %2449 = vmatmul.mubr.bf16.gmra.mxu1 %v13191_v6  ;;  %11046 = vmatprep.subr.bf16.mxu0 %v11672_v45  ;;  %v11681_v6 = vld [vmem:[#allocation2 + $0x1a8] sm:$0xff]  }
 0x100   : > { %11085 = vmatpush3.bf16.msra.mxu1 %v11671_v50  ;;  %2554 = vmatprep.mubr.bf16.mxu1 %v13237_v29  ;;  %v11682_v29 = vld [vmem:[#allocation2 + $0x1e0] sm:$0xff]  }
 0x101   : > { %11086 = vmatprep.subr.bf16.mxu1 %v11674_v52 }
 0x102   : > { %11047 = vmatpush3.bf16.msra.mxu0 %v11673_v54 }
 0x103   : > { %11112 = vmatprep.subr.bf16.mxu0 %v11676_v48 }
 0x104   : > { %11087 = vmatpush3.bf16.msra.mxu1 %v11675_v2 }
 0x105   : > { %2490 = vmatmul.mubr.bf16.vlgmr.msra.gmra.mxu0 %v13069_v14  ;;  %11216 = vmatprep.subr.bf16.mxu1 %v11687_v58  ;;  %v11684_v14 = vld [vmem:[#allocation2 + $0x1d8] sm:$0xff]  }
 0x106   : > { %11113 = vmatpush3.bf16.msra.mxu0 %v11677_v59  ;;  %2497 = vmatprep.mubr.bf16.mxu0 %v13113_v34  ;;  %v11685_v34 = vld [vmem:[#allocation2 + $0x198] sm:$0xff]  }
 0x107   : > { %2555 = vmatmul.mubr.bf16.vlgmr.msra.gmra.mxu1 %v13336_v19  ;;  %11114 = vmatprep.subr.bf16.mxu0 %v11678_v60  ;;  %v11686_v19 = vld [vmem:[#allocation2 + $0x1d0] sm:$0xff]  }
 0x108   : > { %2562 = vmatprep.mubr.bf16.mxu1 %v13339_v22  ;;  %11217 = vmatpush3.bf16.msra.mxu1 %v11687_v58  ;;  %v11688_v22 = vld [vmem:[#allocation2 + $0x190] sm:$0xff]  }
 0x109   : > { %11218 = vmatprep.subr.bf16.mxu1 %v11690_v49 }
 0x10a   : > { %11115 = vmatpush3.bf16.msra.mxu0 %v11679_v62 }
 0x10b   : > { %11116 = vmatprep.subr.bf16.mxu0 %v11680_v63 }
 0x10c   : > { %11219 = vmatpush3.bf16.msra.mxu1 %v11690_v49 }
 0x10d   : > { %2498 = vmatmul.mubr.bf16.gmra.mxu0 %v13115_v35  ;;  %11220 = vmatprep.subr.bf16.mxu1 %v11693_v55  ;;  %v11689_v35 = vld [vmem:[#allocation2 + $0x1c8] sm:$0xff]  }
 0x10e   : > { %11117 = vmatpush3.bf16.msra.mxu0 %v11681_v6  ;;  %2505 = vmatprep.mubr.bf16.mxu0 %v13157_v56  ;;  %v11691_v56 = vld [vmem:[#allocation2 + $0x188] sm:$0xff]  }
 0x10f   : > { %2563 = vmatmul.mubr.bf16.gmra.mxu1 %v13368_v46  ;;  %11118 = vmatprep.subr.bf16.mxu0 %v11682_v29  ;;  %v11692_v46 = vld [vmem:[#allocation2 + $0x1c0] sm:$0xff]  }
 0x110   : > { %2570 = vmatprep.mubr.bf16.mxu1 %v13371_v51  ;;  %11221 = vmatpush3.bf16.msra.mxu1 %v11693_v55  ;;  %v11694_v51 = vld [vmem:[#allocation2 + $0x180] sm:$0xff]  }
 0x111   : > { %11222 = vmatprep.subr.bf16.mxu1 %v11695_v0 }
 0x112   : > { %11119 = vmatpush3.bf16.msra.mxu0 %v11683_v3 }
 0x113   : > { %11120 = vmatprep.subr.bf16.mxu0 %v11684_v14 }
 0x114   : > { %11223 = vmatpush3.bf16.msra.mxu1 %v11695_v0 }
 0x115   : > { %2506 = vmatmul.mubr.bf16.gmra.mxu0 %v13159_v57  ;;  %v757_v57 = vlaneseq }
 0x116   : > { %11121 = vmatpush3.bf16.msra.mxu0 %v11685_v34  ;;  %2513 = vmatprep.mubr.bf16.mxu0 %v13201_v13 }
 0x117   : > { %2571 = vmatmul.mubr.bf16.gmra.mxu1 %v13397_v9  ;;  %11122 = vmatprep.subr.bf16.mxu0 %v11686_v19  ;;  %v13487_v13 = vshrl.u32 %v757_v57, 7 }
 0x118   : > { %2578 = vmatprep.mubr.bf16.mxu1 %v13400_v12 }
 0x119   : > { %16270 = vst [vmem:[#allocation17_spill] sm:$0xff] %v13487_v13 }
 0x11a   : > { %11123 = vmatpush3.bf16.msra.mxu0 %v11688_v22 }
 0x11b   : > { %11124 = vmatprep.subr.bf16.mxu0 %v11689_v35 }
 0x11d   : > { %2514 = vmatmul.mubr.bf16.gmra.mxu0 %v13203_v15  ;;  %v755_v15 = vld [vmem:[%s16222_s2] sm:$0x3] }
 0x11e   : > { %11125 = vmatpush3.bf16.msra.mxu0 %v11691_v56  ;;  %2619 = vmatprep.mubr.bf16.mxu0 %v13244_v33  ;;  %v13494_v33 = vsub.s32 0, %v13487_v13 }
 0x11f   : > { %2579 = vmatmul.mubr.bf16.gmra.mxu1 %v13414_v31  ;;  %11126 = vmatprep.subr.bf16.mxu0 %v11692_v46 }
 0x120   : > { %11224 = vmatprep.mubr.msk.bf16.mxu1 %vm1447_vm0, %v13424_v47  ;;  %16271 = vst [vmem:[#allocation18_spill] sm:$0xff] %v13494_v33 }
 0x122   : > { %11127 = vmatpush3.bf16.msra.mxu0 %v11694_v51 }
 0x125   : > { %2620 = vmatmul.mubr.bf16.vlgmr.msra.gmra.mxu0 %v13344_v25  ;;  %v13498_v25 = vsub.s32 1, %v13487_v13 }
 0x126   : > { %2627 = vmatprep.mubr.bf16.mxu0 %v13351_v32  ;;  %v760_v32 = vrot.slane %v755_v15, %v13494_v33 }
 0x127   : > { %11225 = vmatmul.mubr.msk.bf16.vlgmr.msra.gmra.mxu1 %vm1447_vm0, %v13433_v1  ;;  %16272 = vst [vmem:[#allocation19_spill] sm:$0xff] %v13498_v25 }
 0x128   : > { %11228 = vmatprep.mubr.msk.bf16.mxu1 %vm1447_vm0, %v13442_v21 }
 0x12d   : > { %2628 = vmatmul.mubr.bf16.gmra.mxu0 %v13376_v53  ;;  %v13502_v53 = vrot.slane %v755_v15, %v13498_v25 }
 0x12e   : > { %2635 = vmatprep.mubr.bf16.mxu0 %v13383_v61 }
 0x12f   : > { %11229 = vmatmul.mubr.msk.bf16.gmra.mxu1 %vm1447_vm0, %v13451_v42  ;;  %16273 = vst [vmem:[#allocation20_spill] sm:$0xff] %v13502_v53 }
 0x135   : > { %2636 = vmatmul.mubr.bf16.gmra.mxu0 %v13402_v16 }
 0x136   : > { %2643 = vmatprep.mubr.bf16.mxu0 %v13404_v20 }
 0x13d   : > { %2644 = vmatmul.mubr.bf16.gmra.mxu0 %v13416_v37 }
 0x13e   : > { %3246 = vmatprep.mubr.bf16.mxu0 %v16242_v41 }
 0x145   : > { %v1494_v61 = vpop.f32.mrf.mxu0 }
 0x146   : > { %v1495_v9 = vadd.f32 %v1494_v61, %v760_v32  ;;  %v1567_v16 = vpop.f32.mrf.mxu1 }
 0x147   : > { %v1496_v12 = vpop.f32.mrf.mxu0 }
 0x148   : > { %v1497_v20 = vadd.f32 %v1496_v12, %v13502_v53  ;;  %v1568_v31 = vadd.f32 %v1567_v16, %v1495_v9  ;;  %v1569_v47 = vpop.f32.mrf.mxu1 }
 0x149   : > { %v1498_v37 = vpop.f32.mrf.mxu0 }
 0x14a   : > { %v1499_v1 = vadd.f32 %v1498_v37, %v760_v32  ;;  %v1570_v4 = vadd.f32 %v1569_v47, %v1497_v20  ;;  %v1571_v7 = vpop.f32.mrf.mxu1 }
 0x14b   : > { %v13505_v5 = vpop.f32.mrf.mxu0 }
 0x14c   : > { %16274 = vst [vmem:[#allocation21_spill] sm:$0xff] %v13505_v5  ;;  %v1572_v8 = vadd.f32 %v1571_v7, %v1499_v1  ;;  %v13507_v11 = vpop.f32.mrf.mxu1 }
 0x14d   : > { %16275 = vst [vmem:[#allocation22_spill] sm:$0xff] %v13507_v11  ;;  %v1504_v24 = vpop.f32.mrf.mxu0 }
 0x14e   : > { %v1505_v10 = vadd.f32 %v1504_v24, %v760_v32  ;;  %v1577_v18 = vpop.f32.mrf.mxu1 }
 0x14f   : > { %v1506_v17 = vpop.f32.mrf.mxu0 }
 0x150   : > { %v1507_v21 = vadd.f32 %v1506_v17, %v13502_v53  ;;  %v1578_v23 = vadd.f32 %v1577_v18, %v1505_v10  ;;  %v1579_v27 = vpop.f32.mrf.mxu1 }
 0x151   : > { %v1508_v26 = vpop.f32.mrf.mxu0 }
 0x152   : > { %v1509_v30 = vadd.f32 %v1508_v26, %v760_v32  ;;  %v1580_v36 = vadd.f32 %v1579_v27, %v1507_v21  ;;  %v1581_v44 = vpop.f32.mrf.mxu1 }
 0x153   : > { %v13510_v28 = vpop.f32.mrf.mxu0 }
 0x154   : > { %16276 = vst [vmem:[#allocation23_spill] sm:$0xff] %v13510_v28  ;;  %v1582_v38 = vadd.f32 %v1581_v44, %v1509_v30  ;;  %v13512_v40 = vpop.f32.mrf.mxu1 }
 0x155   : > { %v1514_v39 = vpop.f32.mrf.mxu0  ;;  %16277 = vst [vmem:[#allocation24_spill] sm:$0xff] %v13512_v40 }
 0x156   : > { %v1515_v42 = vadd.f32 %v1514_v39, %v760_v32  ;;  %v1587_v45 = vpop.f32.mrf.mxu1 }
 0x157   : > { %v1516_v43 = vpop.f32.mrf.mxu0 }
 0x158   : > { %v1517_v50 = vadd.f32 %v1516_v43, %v13502_v53  ;;  %v1588_v52 = vadd.f32 %v1587_v45, %v1515_v42  ;;  %v1589_v48 = vpop.f32.mrf.mxu1 }
 0x159   : > { %v1518_v54 = vpop.f32.mrf.mxu0 }
 0x15a   : > { %v1519_v2 = vadd.f32 %v1518_v54, %v760_v32  ;;  %v1590_v58 = vadd.f32 %v1589_v48, %v1517_v50  ;;  %v1591_v60 = vpop.f32.mrf.mxu1 }
 0x15b   : > { %v13515_v59 = vpop.f32.mrf.mxu0 }
 0x15c   : > { %16278 = vst [vmem:[#allocation25_spill] sm:$0xff] %v13515_v59  ;;  %v1592_v49 = vadd.f32 %v1591_v60, %v1519_v2  ;;  %v13517_v63 = vpop.f32.mrf.mxu1 }
 0x15d   : > { %v1524_v62 = vpop.f32.mrf.mxu0  ;;  %16279 = vst [vmem:[#allocation26_spill] sm:$0xff] %v13517_v63 }
 0x15e   : > { %v1525_v55 = vadd.f32 %v1524_v62, %v760_v32  ;;  %v1597_v29 = vpop.f32.mrf.mxu1 }
 0x15f   : > { %v1526_v6 = vpop.f32.mrf.mxu0 }
 0x160   : > { %v1527_v0 = vadd.f32 %v1526_v6, %v13502_v53  ;;  %v1598_v3 = vadd.f32 %v1597_v29, %v1525_v55  ;;  %v1599_v34 = vpop.f32.mrf.mxu1 }
 0x161   : > { %v1528_v14 = vpop.f32.mrf.mxu0 }
 0x162   : > { %v1529_v19 = vadd.f32 %v1528_v14, %v760_v32  ;;  %v1600_v22 = vadd.f32 %v1599_v34, %v1527_v0  ;;  %v1601_v35 = vpop.f32.mrf.mxu1  ;;  %v11696_v0 = vld [vmem:[%s16225_s5] sm:$0xff]  }
 0x163   : > { %v13520_v46 = vpop.f32.mrf.mxu0  ;;  %11240 = vmatprep.mubr.msk.bf16.mxu1 %vm1447_vm0, %v11696_v0 }
 0x164   : > { %v1602_v56 = vadd.f32 %v1601_v35, %v1529_v19  ;;  %16280 = vst [vmem:[#allocation27_spill] sm:$0xff] %v13520_v46  ;;  %v13522_v51 = vpop.f32.mrf.mxu1 }
 0x165   : > { %16281 = vst [vmem:[#allocation28_spill] sm:$0xff] %v13522_v51 }
 0x185   : > { %v1640_v57 = vpop.f32.mrf.mxu0 }
 0x186   : > { %v1641_v15 = vadd.f32 %v1640_v57, %v1568_v31 }
 0x187   : > { %v1642_v61 = vpop.f32.mrf.mxu0  ;;  %v1713_v9 = vpop.f32.mrf.mxu1 }
 0x188   : > { %v1643_v12 = vadd.f32 %v1642_v61, %v1570_v4  ;;  %v1714_v16 = vadd.f32 %v1713_v9, %v1641_v15 }
 0x189   : > { %v1644_v20 = vpop.f32.mrf.mxu0  ;;  %v1715_v37 = vpop.f32.mrf.mxu1 }
 0x18a   : > { %v1645_v47 = vadd.f32 %v1644_v20, %v1572_v8  ;;  %v1716_v1 = vadd.f32 %v1715_v37, %v1643_v12 }
 0x18b   : > { %v13524_v7 = vpop.f32.mrf.mxu0  ;;  %v1717_v32 = vpop.f32.mrf.mxu1 }
 0x18c   : > { %16282 = vst [vmem:[#allocation29_spill] sm:$0xff] %v13524_v7  ;;  %v1718_v24 = vadd.f32 %v1717_v32, %v1645_v47 }
 0x18d   : > { %v1650_v10 = vpop.f32.mrf.mxu0  ;;  %v13526_v17 = vpop.f32.mrf.mxu1 }
 0x18e   : > { %16283 = vst [vmem:[#allocation30_spill] sm:$0xff] %v13526_v17  ;;  %v1651_v18 = vadd.f32 %v1650_v10, %v1578_v23 }
 0x18f   : > { %v1652_v21 = vpop.f32.mrf.mxu0  ;;  %v1723_v26 = vpop.f32.mrf.mxu1 }
 0x190   : > { %v1653_v27 = vadd.f32 %v1652_v21, %v1580_v36  ;;  %v1724_v31 = vadd.f32 %v1723_v26, %v1651_v18 }
 0x191   : > { %v1654_v30 = vpop.f32.mrf.mxu0  ;;  %v1725_v44 = vpop.f32.mrf.mxu1 }
 0x192   : > { %v1655_v4 = vadd.f32 %v1654_v30, %v1582_v38  ;;  %v1726_v39 = vadd.f32 %v1725_v44, %v1653_v27 }
 0x193   : > { %v13528_v42 = vpop.f32.mrf.mxu0  ;;  %v1727_v8 = vpop.f32.mrf.mxu1 }
 0x194   : > { %16284 = vst [vmem:[#allocation31_spill] sm:$0xff] %v13528_v42  ;;  %v1728_v43 = vadd.f32 %v1727_v8, %v1655_v4 }
 0x195   : > { %v1660_v45 = vpop.f32.mrf.mxu0  ;;  %v13530_v50 = vpop.f32.mrf.mxu1 }
 0x196   : > { %16285 = vst [vmem:[#allocation32_spill] sm:$0xff] %v13530_v50  ;;  %v1661_v54 = vadd.f32 %v1660_v45, %v1588_v52 }
 0x197   : > { %v1662_v48 = vpop.f32.mrf.mxu0  ;;  %v1733_v2 = vpop.f32.mrf.mxu1 }
 0x198   : > { %v1663_v60 = vadd.f32 %v1662_v48, %v1590_v58  ;;  %v1734_v23 = vadd.f32 %v1733_v2, %v1661_v54 }
 0x199   : > { %v1664_v62 = vpop.f32.mrf.mxu0  ;;  %v1735_v55 = vpop.f32.mrf.mxu1 }
 0x19a   : > { %v1665_v36 = vadd.f32 %v1664_v62, %v1592_v49  ;;  %v1736_v6 = vadd.f32 %v1735_v55, %v1663_v60 }
 0x19b   : > { %v13532_v29 = vpop.f32.mrf.mxu0  ;;  %v1737_v38 = vpop.f32.mrf.mxu1 }
 0x19c   : > { %16286 = vst [vmem:[#allocation33_spill] sm:$0xff] %v13532_v29  ;;  %v1738_v14 = vadd.f32 %v1737_v38, %v1665_v36 }
 0x19d   : > { %v1670_v34 = vpop.f32.mrf.mxu0  ;;  %v13537_v19 = vpop.f32.mrf.mxu1 }
 0x19e   : > { %16287 = vst [vmem:[#allocation34_spill] sm:$0xff] %v13537_v19  ;;  %v1671_v52 = vadd.f32 %v1670_v34, %v1598_v3 }
 0x19f   : > { %v1672_v58 = vpop.f32.mrf.mxu0  ;;  %v1743_v35 = vpop.f32.mrf.mxu1 }
 0x1a0   : > { %v1673_v57 = vadd.f32 %v1672_v58, %v1600_v22  ;;  %v1744_v15 = vadd.f32 %v1743_v35, %v1671_v52 }
 0x1a1   : > { %v1674_v49 = vpop.f32.mrf.mxu0  ;;  %v1745_v61 = vpop.f32.mrf.mxu1 }
 0x1a2   : > { %v1675_v9 = vadd.f32 %v1674_v49, %v1602_v56  ;;  %v1746_v12 = vadd.f32 %v1745_v61, %v1673_v57 }
 0x1a3   : > { %v13540_v20 = vpop.f32.mrf.mxu0  ;;  %v1747_v37 = vpop.f32.mrf.mxu1 }
 0x1a4   : > { %16288 = vst [vmem:[#allocation35_spill] sm:$0xff] %v13540_v20  ;;  %v1748_v47 = vadd.f32 %v1747_v37, %v1675_v9 }
 0x1a5   : > { %v13542_v32 = vpop.f32.mrf.mxu1  ;;  %v1786_v10 = vpop.f32.mrf.mxu0 }
 0x1a6   : > { %16289 = vst [vmem:[#allocation36_spill] sm:$0xff] %v13542_v32  ;;  %v1787_v18 = vadd.f32 %v1786_v10, %v1714_v16 }
 0x1a7   : > { %v1788_v21 = vpop.f32.mrf.mxu0  ;;  %v11008_v26 = vpop.f32.mrf.mxu1 }
 0x1a8   : > { %v13544_v27 = vadd.f32 %v1788_v21, %v1716_v1  ;;  %v1825_v8 = vmax.f32 %v1787_v18, 0.0 }
 0x1a9   : > { %v1790_v3 = vpop.f32.mrf.mxu0  ;;  %v11009_v30 = vpop.f32.mrf.mxu1 }
 0x1aa   : > { %16290 = vst [vmem:[#allocation37_spill] sm:$0xff] %v13544_v27  ;;  %v1791_v22 = vadd.f32 %v1790_v3, %v1718_v24  ;;  %v11010_v44 = vadd.f32 %v11009_v30, %v11008_v26 }
 0x1ab   : > { %v13546_v4 = vpop.f32.mrf.mxu0  ;;  %v11011_v56 = vpop.f32.mrf.mxu1 }
 0x1ac   : > { %16291 = vst [vmem:[#allocation38_spill] sm:$0xff] %v13546_v4  ;;  %v1827_v45 = vmax.f32 %v1791_v22, 0.0 }
 0x1ad   : > { %v1796_v54 = vpop.f32.mrf.mxu0  ;;  %v11012_v48 = vpop.f32.mrf.mxu1 }
 0x1ae   : > { %v13548_v2 = vpack.c.bf16 %v1827_v45, %v1825_v8  ;;  %v1797_v60 = vadd.f32 %v1796_v54, %v1724_v31 }
 0x1af   : > { %v1798_v62 = vpop.f32.mrf.mxu0  ;;  %v13550_v16 = vpop.f32.mrf.mxu1 }
 0x1b0   : > { %16292 = vst [vmem:[#allocation39_spill] sm:$0xff] %v13548_v2  ;;  %v13552_v55 = vadd.f32 %v1798_v62, %v1726_v39  ;;  %v1829_v34 = vmax.f32 %v1797_v60, 0.0  ;;  %v13587_v62 = vld [vmem:[%s16224_s4] ss:$0 sm:$0xff] }
 0x1b1   : > { %v1800_v1 = vpop.f32.mrf.mxu0  ;;  %v13554_v36 = vpop.f32.mrf.mxu1 }
 0x1b2   : > { %16293 = vst [vmem:[#allocation40_spill] sm:$0xff] %v13552_v55  ;;  %v1801_v24 = vadd.f32 %v1800_v1, %v1728_v43 }
 0x1b3   : > { %v13556_v38 = vpop.f32.mrf.mxu0  ;;  %v13558_v0 = vpop.f32.mrf.mxu1 }
 0x1b4   : > { %16294 = vst [vmem:[#allocation41_spill] sm:$0xff] %v13556_v38  ;;  %v1831_v52 = vmax.f32 %v1801_v24, 0.0 }
 0x1b5   : > { %v1806_v58 = vpop.f32.mrf.mxu0  ;;  %v13560_v35 = vpop.f32.mrf.mxu1 }
 0x1b6   : > { %v13562_v57 = vpack.c.bf16 %v1831_v52, %v1829_v34  ;;  %v1807_v31 = vadd.f32 %v1806_v58, %v1734_v23 }
 0x1b7   : > { %v1808_v49 = vpop.f32.mrf.mxu0  ;;  %v13564_v61 = vpop.f32.mrf.mxu1 }
 0x1b8   : > { %16295 = vst [vmem:[#allocation42_spill] sm:$0xff] %v13562_v57  ;;  %v13566_v39 = vadd.f32 %v1808_v49, %v1736_v6  ;;  %v1833_v21 = vmax.f32 %v1807_v31, 0.0 }
 0x1b9   : > { %v1810_v9 = vpop.f32.mrf.mxu0  ;;  %v13568_v37 = vpop.f32.mrf.mxu1 }
 0x1ba   : > { %16296 = vst [vmem:[#allocation43_spill] sm:$0xff] %v13566_v39  ;;  %v1811_v43 = vadd.f32 %v1810_v9, %v1738_v14  ;;  %v11013_v9 = vadd.f32 %v11012_v48, %v11011_v56  ;;  %v11733_v56 = vld [vmem:[%s16226_s6 + $0x64] ss:$8 sps:$4 sm:$0xff]   ;;  %v11740_v39 = vld [vmem:[%s16226_s6 + $0x30] ss:$8 sps:$4 sm:$0xff]  }
 0x1bb   : > { %v13570_v10 = vpop.f32.mrf.mxu0  ;;  %v13572_v18 = vpop.f32.mrf.mxu1 }
 0x1bc   : > { %16297 = vst [vmem:[#allocation44_spill] sm:$0xff] %v13570_v10  ;;  %v1835_v26 = vmax.f32 %v1811_v43, 0.0  ;;  %v2430_v41 = vadd.f32 %v11013_v9, %v13587_v62  ;;  %v11736_v9 = vld [vmem:[%s16226_s6 + $0x54] ss:$8 sps:$4 sm:$0xff]   ;;  %v11743_v10 = vld [vmem:[%s16226_s6 + $0x20] ss:$8 sps:$4 sm:$0xff]  }
 0x1bd   : > { %v1816_v3 = vpop.f32.mrf.mxu0  ;;  %v13574_v30 = vpop.f32.mrf.mxu1 }
 0x1be   : > { %v13576_v22 = vpack.c.bf16 %v1835_v26, %v1833_v21  ;;  %v1817_v23 = vadd.f32 %v1816_v3, %v1744_v15 }
 0x1bf   : > { %v1818_v8 = vpop.f32.mrf.mxu0  ;;  %v13578_v45 = vpop.f32.mrf.mxu1 }
 0x1c0   : > { %16298 = vst [vmem:[#allocation45_spill] sm:$0xff] %v13576_v22  ;;  %v13580_v6 = vadd.f32 %v1818_v8, %v1746_v12  ;;  %v1837_v34 = vmax.f32 %v1817_v23, 0.0 }
 0x1c1   : > { %v1820_v54 = vpop.f32.mrf.mxu0  ;;  %v13582_v60 = vpop.f32.mrf.mxu1 }
 0x1c2   : > { %16299 = vst [vmem:[#allocation46_spill] sm:$0xff] %v13580_v6  ;;  %v1821_v14 = vadd.f32 %v1820_v54, %v1748_v47  ;;  %v2427_v47 = vadd.f32 %v11010_v44, %v13587_v62 }
 0x1c3   : > { %v13589_v1 = vpop.f32.mrf.mxu0  ;;  %v13591_v24 = vpop.f32.mrf.mxu1 }
 0x1c4   : > { %16300 = vst [vmem:[#allocation47_spill] sm:$0xff] %v13589_v1  ;;  %v1839_v15 = vmax.f32 %v1821_v14, 0.0  ;;  %v11728_v14 = vld [vmem:[%s16226_s6 + $0x70] ss:$8 sps:$4 sm:$0xff]  }
 0x1c5   : > { %v13593_v52 = vpop.f32.mrf.mxu1  ;;  %v11048_v58 = vpop.f32.mrf.mxu0 }
 0x1c6   : > { %v13595_v12 = vpack.c.bf16 %v1839_v15, %v1837_v34  ;;  %v11730_v34 = vld [vmem:[%s16226_s6 + $0x74] ss:$8 sps:$4 sm:$0xff]  }
 0x1c7   : > { %v11049_v31 = vpop.f32.mrf.mxu0  ;;  %v11088_v49 = vpop.f32.mrf.mxu1  ;;  %3214 = vmatprep.subr.bf16.mxu0 %v11730_v34 }
 0x1c8   : > { %16301 = vst [vmem:[#allocation48_spill] sm:$0xff] %v13595_v12  ;;  %v11050_v43 = vadd.f32 %v11049_v31, %v11048_v58  ;;  %3215 = vmatpush1.bf16.msra.mxu0 %v11728_v14  ;;  %v11739_v14 = vld [vmem:[%s16226_s6 + $0x44] ss:$8 sps:$4 sm:$0xff]  }
 0x1c9   : > { %v11051_v21 = vpop.f32.mrf.mxu0  ;;  %v11089_v26 = vpop.f32.mrf.mxu1  ;;  %3216 = vmatprep.subr.bf16.mxu0 %v11733_v56 }
 0x1ca   : > { %v2492_v3 = vadd.f32 %v11050_v43, %v2427_v47  ;;  %v11731_v47 = vld [vmem:[%s16226_s6 + $0x60] ss:$8 sps:$4 sm:$0xff]  }
 0x1cb   : > { %v11052_v8 = vpop.f32.mrf.mxu0  ;;  %v11091_v54 = vpop.f32.mrf.mxu1 }
 0x1cc   : > { %v11053_v23 = vadd.f32 %v11052_v8, %v11051_v21  ;;  %3217 = vmatpush1.bf16.msra.mxu0 %v11731_v47  ;;  %v11737_v47 = vld [vmem:[%s16226_s6 + $0x40] ss:$8 sps:$4 sm:$0xff]  }
 0x1cd   : > { %v13605_v15 = vpop.f32.mrf.mxu0  ;;  %v11092_v44 = vpop.f32.mrf.mxu1  ;;  %3218 = vmatprep.subr.bf16.mxu0 %v11736_v9  ;;  %v11742_v9 = vld [vmem:[%s16226_s6 + $0x34] ss:$8 sps:$4 sm:$0xff]  }
 0x1ce   : > { %v2495_v48 = vadd.f32 %v11053_v23, %v2430_v41  ;;  %v11734_v23 = vld [vmem:[%s16226_s6 + $0x50] ss:$8 sps:$4 sm:$0xff]  }
 0x1cf   : > { %v13610_v58 = vpop.f32.mrf.mxu0  ;;  %v13612_v31 = vpop.f32.mrf.mxu1 }
 0x1d0   : > { %3219 = vmatpush1.bf16.msra.mxu0 %v11734_v23  ;;  %v11745_v23 = vld [vmem:[%s16226_s6 + $0x24] ss:$8 sps:$4 sm:$0xff]  }
 0x1d1   : > { %v13620_v43 = vpop.f32.mrf.mxu0  ;;  %v13622_v21 = vpop.f32.mrf.mxu1  ;;  %3220 = vmatprep.subr.bf16.mxu0 %v11739_v14 }
 0x1d3   : > { %v13624_v41 = vpop.f32.mrf.mxu0  ;;  %v13626_v8 = vpop.f32.mrf.mxu1 }
 0x1d4   : > { %3221 = vmatpush1.bf16.msra.mxu0 %v11737_v47 }
 0x1d5   : > { %v13634_v34 = vpop.f32.mrf.mxu0  ;;  %v13636_v56 = vpop.f32.mrf.mxu1  ;;  %3222 = vmatprep.subr.bf16.mxu0 %v11742_v9  ;;  %v11090_v9 = vadd.f32 %v11089_v26, %v11088_v49 }
 0x1d7   : > { %v13638_v13 = vpop.f32.mrf.mxu0  ;;  %v13640_v12 = vpop.f32.mrf.mxu1  ;;  %v2557_v50 = vadd.f32 %v11090_v9, %v2492_v3 }
 0x1d8   : > { %3223 = vmatpush1.bf16.msra.mxu0 %v11740_v39  ;;  %v11093_v39 = vadd.f32 %v11092_v44, %v11091_v54 }
 0x1d9   : > { %v11063_v22 = vpop.f32.mrf.mxu0  ;;  %v13648_v6 = vpop.f32.mrf.mxu1  ;;  %3224 = vmatprep.subr.bf16.mxu0 %v11745_v23 }
 0x1da   : > { %v2560_v4 = vadd.f32 %v11093_v39, %v2495_v48 }
 0x1db   : > { %v11064_v57 = vpop.f32.mrf.mxu0  ;;  %v11103_v1 = vpop.f32.mrf.mxu1 }
 0x1dc   : > { %3225 = vmatpush1.bf16.msra.mxu0 %v11743_v10 }
 0x1dd   : > { %v11066_v14 = vpop.f32.mrf.mxu0  ;;  %v11104_v32 = vpop.f32.mrf.mxu1 }
 0x1df   : > { %v11067_v20 = vpop.f32.mrf.mxu0  ;;  %v11106_v2 = vpop.f32.mrf.mxu1 }
 0x1e0   : > { %v11068_v44 = vadd.f32 %v11067_v20, %v11066_v14  ;;  %v11059_v20 = vadd.f32 %v13624_v41, %v13620_v43 }
 0x1e1   : > { %v11069_v47 = vpop.f32.mrf.mxu0  ;;  %v11107_v51 = vpop.f32.mrf.mxu1 }
 0x1e3   : > { %v11070_v55 = vpop.f32.mrf.mxu0  ;;  %v13659_v19 = vpop.f32.mrf.mxu1 }
 0x1e5   : > { %v13661_v46 = vpop.f32.mrf.mxu1  ;;  %v11128_v29 = vpop.f32.mrf.mxu0 }
 0x1e7   : > { %v11129_v38 = vpop.f32.mrf.mxu0  ;;  %v13663_v63 = vpop.f32.mrf.mxu1 }
 0x1e8   : > { %v11130_v59 = vadd.f32 %v11129_v38, %v11128_v29  ;;  %v11065_v38 = vadd.f32 %v11064_v57, %v11063_v22  ;;  %v11031_v57 = vadd.f32 %v13593_v52, %v13591_v24  ;;  %v11056_v24 = vadd.f32 %v13610_v58, %v13605_v15 }
 0x1e9   : > { %v11131_v42 = vpop.f32.mrf.mxu0  ;;  %v2686_v40 = vpop.f32.mrf.mxu1  ;;  %v11111_v15 = vadd.f32 %v13661_v46, %v13659_v19 }
 0x1ea   : > { %v2622_v28 = vadd.f32 %v11130_v59, %v2557_v50  ;;  %v11025_v59 = vadd.f32 %v13574_v30, %v13572_v18  ;;  %v11028_v50 = vadd.f32 %v13582_v60, %v13578_v45  ;;  %v11105_v30 = vadd.f32 %v11104_v32, %v11103_v1 }
 0x1eb   : > { %v11132_v23 = vpop.f32.mrf.mxu0  ;;  %v13665_v27 = vpop.f32.mrf.mxu1  ;;  %v11071_v45 = vadd.f32 %v11070_v55, %v11069_v47  ;;  %v2454_v43 = vadd.f32 %v11031_v57, %v13587_v62  ;;  %v11102_v32 = vadd.f32 %v13648_v6, %v13640_v12  ;;  %v11099_v1 = vadd.f32 %v13636_v56, %v13626_v8 }
 0x1ec   : > { %v11133_v17 = vadd.f32 %v11132_v23, %v11131_v42  ;;  %v2687_v49 = vadd.f32 %v2686_v40, %v2622_v28  ;;  %v11022_v40 = vadd.f32 %v13568_v37, %v13564_v61  ;;  %v11062_v61 = vadd.f32 %v13638_v13, %v13634_v34 }
 0x1ed   : > { %v13667_v7 = vpop.f32.mrf.mxu0  ;;  %v2689_v10 = vpop.f32.mrf.mxu1  ;;  %v2519_v9 = vadd.f32 %v11071_v45, %v2454_v43  ;;  %v11096_v23 = vadd.f32 %v13622_v21, %v13612_v31  ;;  %v11710_v45 = vld [vmem:[%s16226_s6 + $0xd4] ss:$8 sps:$4 sm:$0xff]   ;;  %v16302_v43 = vmov 0  }
 0x1ee   : > { %v2625_v26 = vadd.f32 %v11133_v17, %v2560_v4  ;;  %v2717_v25 = vmax.f32 %v2687_v49, 0.0  ;;  %v2446_v17 = vadd.f32 %v11025_v59, %v13587_v62  ;;  %v2451_v4 = vadd.f32 %v11028_v50, %v13587_v62 }
 0x1ef   : > { %v11135_v11 = vpop.f32.mrf.mxu0  ;;  %v11230_v28 = vpop.f32.mrf.mxu1  ;;  %v2584_v59 = vadd.f32 %v11111_v15, %v2519_v9  ;;  %v11746_v9 = vld [vmem:[%s16226_s6 + $0x10] ss:$8 sps:$4 sm:$0xff]   ;;  %v11751_v15 = vld [vmem:[%s16226_s6 + $0x4] ss:$8 sps:$4 sm:$0xff]  }
 0x1f0   : > { %v2690_v5 = vadd.f32 %v2689_v10, %v2625_v26  ;;  %v2511_v37 = vadd.f32 %v11065_v38, %v2446_v17  ;;  %v11136_v50 = vadd.f32 %v11135_v11, %v13667_v7 }
 0x1f1   : > { %v11137_v53 = vpop.f32.mrf.mxu0 }
 0x1f2   : > { %v2718_v3 = vmax.f32 %v2690_v5, 0.0  ;;  %v11016_v5 = vadd.f32 %v13554_v36, %v13550_v16  ;;  %v2516_v16 = vadd.f32 %v11068_v44, %v2451_v4  ;;  %v11108_v36 = vadd.f32 %v11107_v51, %v11106_v2 }
 0x1f3   : > { %v11138_v54 = vpop.f32.mrf.mxu0  ;;  %v2576_v55 = vadd.f32 %v11105_v30, %v2511_v37  ;;  %v11700_v37 = vld [vmem:[%s16225_s5 + $0x20] sm:$0xff]   ;;  %v11704_v30 = vld [vmem:[%s16226_s6 + $0xf4] ss:$8 sps:$4 sm:$0xff]  }
 0x1f4   : > { %v13669_v29 = vpack.c.bf16 %v2718_v3, %v2717_v25  ;;  %v11019_v25 = vadd.f32 %v13560_v35, %v13558_v0  ;;  %v2702_v0 = vpop.f32.mrf.mxu1  ;;  %v2443_v35 = vadd.f32 %v11022_v40, %v13587_v62  ;;  %v2435_v60 = vadd.f32 %v11016_v5, %v13587_v62 }
 0x1f5   : > { %v11140_v42 = vpop.f32.mrf.mxu0  ;;  %v2581_v41 = vadd.f32 %v11108_v36, %v2516_v16  ;;  %v11139_v10 = vadd.f32 %v11138_v54, %v11137_v53  ;;  %v11701_v16 = vld [vmem:[%s16225_s5 + $0x28] sm:$0xff]   ;;  %v11702_v36 = vld [vmem:[%s16226_s6 + $0xf0] ss:$8 sps:$4 sm:$0xff]  }
 0x1f6   : > { %v2438_v14 = vadd.f32 %v11019_v25, %v13587_v62  ;;  %v2508_v13 = vadd.f32 %v11062_v61, %v2443_v35  ;;  %v11231_v34 = vpop.f32.mrf.mxu1  ;;  %v2500_v62 = vadd.f32 %v11056_v24, %v2435_v60  ;;  %v11699_v61 = vld [vmem:[%s16225_s5 + $0x18] sm:$0xff]   ;;  %v11705_v35 = vld [vmem:[%s16226_s6 + $0xe0] ss:$8 sps:$4 sm:$0xff]   ;;  %v11715_v24 = vld [vmem:[%s16226_s6 + $0xc4] ss:$8 sps:$4 sm:$0xff]  }
 0x1f7   : > { %v11141_v48 = vpop.f32.mrf.mxu0  ;;  %v11712_v60 = vld [vmem:[%s16225_s5 + $0x38] sm:$0xff]  }
 0x1f8   : > { %v2503_v2 = vadd.f32 %v11059_v20, %v2438_v14  ;;  %v11142_v58 = vadd.f32 %v11141_v48, %v11140_v42  ;;  %v2573_v12 = vadd.f32 %v11102_v32, %v2508_v13  ;;  %v2705_v56 = vpop.f32.mrf.mxu1  ;;  %v2565_v46 = vadd.f32 %v11096_v23, %v2500_v62  ;;  %v11708_v14 = vld [vmem:[%s16226_s6 + $0xd0] ss:$8 sps:$4 sm:$0xff]   ;;  %v11718_v13 = vld [vmem:[%s16226_s6 + $0xb4] ss:$8 sps:$4 sm:$0xff]  }
 0x1f9   : > { %v11143_v18 = vpop.f32.mrf.mxu0  ;;  %v11716_v32 = vld [vmem:[%s16226_s6 + $0xb0] ss:$8 sps:$4 sm:$0xff]  }
 0x1fa   : > { %v2568_v8 = vadd.f32 %v11099_v1, %v2503_v2  ;;  %v2638_v38 = vadd.f32 %v11142_v58, %v2573_v12  ;;  %v2630_v5 = vadd.f32 %v11136_v50, %v2565_v46  ;;  %v11719_v2 = vld [vmem:[%s16226_s6 + $0xa0] ss:$8 sps:$4 sm:$0xff]   ;;  %v11724_v1 = vld [vmem:[%s16226_s6 + $0x94] ss:$8 sps:$4 sm:$0xff]  }
 0x1fb   : > { %v11144_v22 = vpop.f32.mrf.mxu0  ;;  %v11749_v58 = vld [vmem:[%s16226_s6] ss:$8 sps:$4 sm:$0xff]  }
 0x1fc   : > { %v11145_v51 = vadd.f32 %v11144_v22, %v11143_v18  ;;  %v2633_v19 = vadd.f32 %v11139_v10, %v2568_v8  ;;  %v2703_v31 = vadd.f32 %v2702_v0, %v2638_v38  ;;  %v2695_v4 = vadd.f32 %v13663_v63, %v2630_v5  ;;  %v11697_v63 = vld [vmem:[%s16225_s5 + $0x8] sm:$0xff]   ;;  %v11711_v22 = vld [vmem:[%s16225_s5 + $0x30] sm:$0xff]  }
 0x1fd   : > { %v11146_v52 = vpop.f32.mrf.mxu0  ;;  %v11707_v0 = vld [vmem:[%s16226_s6 + $0xe4] ss:$8 sps:$4 sm:$0xff]  }
 0x1fe   : > { %v2641_v26 = vadd.f32 %v11145_v51, %v2576_v55  ;;  %v2698_v53 = vadd.f32 %v13665_v27, %v2633_v19  ;;  %v2721_v18 = vmax.f32 %v2703_v31, 0.0  ;;  %v11698_v27 = vld [vmem:[%s16225_s5 + $0x10] sm:$0xff]   ;;  %v11721_v51 = vld [vmem:[%s16226_s6 + $0xa4] ss:$8 sps:$4 sm:$0xff]  }
 0x1ff   : > { %v11147_v47 = vpop.f32.mrf.mxu0  ;;  %v11722_v55 = vld [vmem:[%s16226_s6 + $0x90] ss:$8 sps:$4 sm:$0xff]  }
 0x200   : > { %v11148_v39 = vadd.f32 %v11147_v47, %v11146_v52  ;;  %v2706_v48 = vadd.f32 %v2705_v56, %v2641_v26  ;;  %v2720_v11 = vmax.f32 %v2698_v53, 0.0  ;;  %v11713_v52 = vld [vmem:[%s16226_s6 + $0xc0] ss:$8 sps:$4 sm:$0xff]   ;;  %v11748_v47 = vld [vmem:[%s16226_s6 + $0x14] ss:$8 sps:$4 sm:$0xff]  }
 0x201   : > { %v11149_v6 = vpop.f32.mrf.mxu0  ;;  %3226 = vmatprep.subr.bf16.mxu0 %v11748_v47  ;;  %v11752_v53 = vld [vmem:[%s16225_s5 + $0x40] sm:$0xff]   ;;  %v11793_v47 = vld [vmem:[%s16226_s6 + $0x274] ss:$8 sps:$4 sm:$0xff]  }
 0x202   : > { %v2646_v49 = vadd.f32 %v11148_v39, %v2581_v41  ;;  %v2722_v25 = vmax.f32 %v2706_v48, 0.0  ;;  %v11727_v41 = vld [vmem:[%s16226_s6 + $0x84] ss:$8 sps:$4 sm:$0xff]   ;;  %3227 = vmatpush1.bf16.msra.mxu0 %v11746_v9  ;;  %v11797_v9 = vld [vmem:[%s16226_s6 + $0x260] ss:$8 sps:$4 sm:$0xff]  }
 0x203   : > { %v11150_v3 = vpop.f32.mrf.mxu0  ;;  %3228 = vmatprep.subr.bf16.mxu0 %v11751_v15  ;;  %v11799_v15 = vld [vmem:[%s16226_s6 + $0x264] ss:$8 sps:$4 sm:$0xff]  }
 0x204   : > { %v11151_v44 = vadd.f32 %v11150_v3, %v11149_v6  ;;  %v2711_v42 = vadd.f32 %v11230_v28, %v2646_v49  ;;  %v13708_v7 = vpack.c.bf16 %v2722_v25, %v2721_v18  ;;  %v2719_v28 = vmax.f32 %v2695_v4, 0.0  ;;  %v11753_v25 = vld [vmem:[%s16225_s5 + $0x48] sm:$0xff]   ;;  %v11755_v4 = vld [vmem:[%s16225_s5 + $0x58] sm:$0xff]   ;;  %v11756_v18 = vld [vmem:[%s16225_s5 + $0x60] sm:$0xff]  }
 0x206   : > { %v2649_v40 = vadd.f32 %v11151_v44, %v2584_v59  ;;  %v2723_v54 = vmax.f32 %v2711_v42, 0.0  ;;  %v13713_v20 = vpack.c.bf16 %v2720_v11, %v2719_v28  ;;  %3229 = vmatpush1.bf16.msra.mxu0 %v11749_v58  ;;  %v11757_v11 = vld [vmem:[%s16225_s5 + $0x68] sm:$0xff]   ;;  %v11758_v28 = vld [vmem:[%s16225_s5 + $0x70] sm:$0xff]  }
 0x207   : > { %v11803_v58 = vld [vmem:[%s16226_s6 + $0x250] ss:$8 sps:$4 sm:$0xff]  }
 0x208   : > { %v2714_v21 = vadd.f32 %v11231_v34, %v2649_v40  ;;  %v11725_v34 = vld [vmem:[%s16226_s6 + $0x80] ss:$8 sps:$4 sm:$0xff]  }
 0x20a   : > { %v2724_v17 = vmax.f32 %v2714_v21, 0.0 }
 0x20c   : > { %v13706_v57 = vpack.c.bf16 %v2724_v17, %v2723_v54  ;;  %v11754_v17 = vld [vmem:[%s16225_s5 + $0x50] sm:$0xff]  }
 0x20e   : > { %11232 = vmatprep.subr.bf16.mxu1 %v13706_v57 }
 0x20f   : > { %11233 = vmatpush3.bf16.msra.mxu1 %v13706_v57 }
 0x210   : > { %11234 = vmatprep.subr.bf16.mxu1 %v13708_v7 }
 0x213   : > { %11235 = vmatpush3.bf16.msra.mxu1 %v13708_v7 }
 0x214   : > { %11236 = vmatprep.subr.bf16.mxu1 %v13713_v20 }
 0x217   : > { %11237 = vmatpush3.bf16.msra.mxu1 %v13713_v20 }
 0x218   : > { %11238 = vmatprep.subr.bf16.mxu1 %v13669_v29 }
 0x21b   : > { %11239 = vmatpush3.bf16.msra.mxu1 %v13669_v29 }
 0x21c   : > { %11248 = vmatprep.subr.bf16.mxu1 %v13706_v57 }
 0x21e   : > { %11241 = vmatmul.mubr.msk.bf16.vlgmr.msra.gmra.mxu1 %vm1447_vm0, %v11697_v63  ;;  %v11759_v63 = vld [vmem:[%s16225_s5 + $0x78] sm:$0xff]  }
 0x21f   : > { %11249 = vmatpush3.bf16.msra.mxu1 %v13706_v57  ;;  %11244 = vmatprep.mubr.msk.bf16.mxu1 %vm1447_vm0, %v11698_v27  ;;  %v11760_v27 = vld [vmem:[%s16225_s5 + $0x80] sm:$0xff]  }
 0x220   : > { %11250 = vmatprep.subr.bf16.mxu1 %v13708_v7 }
 0x223   : > { %11251 = vmatpush3.bf16.msra.mxu1 %v13708_v7 }
 0x224   : > { %11252 = vmatprep.subr.bf16.mxu1 %v13713_v20 }
 0x226   : > { %11245 = vmatmul.mubr.msk.bf16.gmra.mxu1 %vm1447_vm0, %v11699_v61  ;;  %v11761_v61 = vld [vmem:[%s16225_s5 + $0x88] sm:$0xff]  }
 0x227   : > { %11253 = vmatpush3.bf16.msra.mxu1 %v13713_v20  ;;  %11256 = vmatprep.mubr.msk.bf16.mxu1 %vm1447_vm0, %v11700_v37  ;;  %v11762_v37 = vld [vmem:[%s16225_s5 + $0x90] sm:$0xff]  }
 0x228   : > { %11254 = vmatprep.subr.bf16.mxu1 %v13669_v29 }
 0x22b   : > { %11255 = vmatpush3.bf16.msra.mxu1 %v13669_v29 }
 0x22c   : > { %3061 = vmatprep.subr.bf16.mxu1 %v11704_v30  ;;  %v11763_v30 = vld [vmem:[%s16225_s5 + $0x98] sm:$0xff]  }
 0x22e   : > { %11257 = vmatmul.mubr.msk.bf16.vlgmr.msra.gmra.mxu1 %vm1447_vm0, %v11701_v16  ;;  %v11766_v16 = vld [vmem:[%s16226_s6 + $0x174] ss:$8 sps:$4 sm:$0xff]  }
 0x22f   : > { %3062 = vmatpush1.bf16.msra.mxu1 %v11702_v36  ;;  %11260 = vmatprep.mubr.msk.bf16.mxu1 %vm1447_vm0, %v11711_v22  ;;  %v11764_v36 = vld [vmem:[%s16226_s6 + $0x170] ss:$8 sps:$4 sm:$0xff]   ;;  %v11769_v22 = vld [vmem:[%s16226_s6 + $0x164] ss:$8 sps:$4 sm:$0xff]  }
 0x230   : > { %3063 = vmatprep.subr.bf16.mxu1 %v11707_v0  ;;  %3494 = vmatprep.subr.bf16.mxu0 %v11766_v16  ;;  %v11767_v0 = vld [vmem:[%s16226_s6 + $0x160] ss:$8 sps:$4 sm:$0xff]  }
 0x233   : > { %3064 = vmatpush1.bf16.msra.mxu1 %v11705_v35  ;;  %v11772_v35 = vld [vmem:[%s16226_s6 + $0x154] ss:$8 sps:$4 sm:$0xff]  }
 0x234   : > { %3065 = vmatprep.subr.bf16.mxu1 %v11710_v45  ;;  %v11770_v45 = vld [vmem:[%s16226_s6 + $0x150] ss:$8 sps:$4 sm:$0xff]  }
 0x236   : > { %11261 = vmatmul.mubr.msk.bf16.gmra.mxu1 %vm1447_vm0, %v11712_v60  ;;  %v11775_v60 = vld [vmem:[%s16226_s6 + $0x144] ss:$8 sps:$4 sm:$0xff]  }
 0x237   : > { %3066 = vmatpush1.bf16.msra.mxu1 %v11708_v14  ;;  %3093 = vmatprep.mubr.bf16.mxu1 %v16302_v43  ;;  %v11773_v14 = vld [vmem:[%s16226_s6 + $0x140] ss:$8 sps:$4 sm:$0xff]  }
 0x238   : > { %3067 = vmatprep.subr.bf16.mxu1 %v11715_v24  ;;  %v11778_v24 = vld [vmem:[%s16226_s6 + $0x134] ss:$8 sps:$4 sm:$0xff]  }
 0x23b   : > { %3068 = vmatpush1.bf16.msra.mxu1 %v11713_v52  ;;  %v11776_v52 = vld [vmem:[%s16226_s6 + $0x130] ss:$8 sps:$4 sm:$0xff]  }
 0x23c   : > { %3069 = vmatprep.subr.bf16.mxu1 %v11718_v13  ;;  %v11781_v13 = vld [vmem:[%s16226_s6 + $0x124] ss:$8 sps:$4 sm:$0xff]  }
 0x23f   : > { %3070 = vmatpush1.bf16.msra.mxu1 %v11716_v32  ;;  %v11779_v32 = vld [vmem:[%s16226_s6 + $0x120] ss:$8 sps:$4 sm:$0xff]  }
 0x240   : > { %3071 = vmatprep.subr.bf16.mxu1 %v11721_v51  ;;  %v11784_v51 = vld [vmem:[%s16226_s6 + $0x114] ss:$8 sps:$4 sm:$0xff]  }
 0x243   : > { %3072 = vmatpush1.bf16.msra.mxu1 %v11719_v2  ;;  %v11782_v2 = vld [vmem:[%s16226_s6 + $0x110] ss:$8 sps:$4 sm:$0xff]  }
 0x244   : > { %3073 = vmatprep.subr.bf16.mxu1 %v11724_v1  ;;  %v11787_v1 = vld [vmem:[%s16226_s6 + $0x104] ss:$8 sps:$4 sm:$0xff]  }
 0x247   : > { %3074 = vmatpush1.bf16.msra.mxu1 %v11722_v55  ;;  %v11785_v55 = vld [vmem:[%s16226_s6 + $0x100] ss:$8 sps:$4 sm:$0xff]  }
 0x248   : > { %3075 = vmatprep.subr.bf16.mxu1 %v11727_v41  ;;  %v11790_v41 = vld [vmem:[%s16226_s6 + $0x1f4] ss:$8 sps:$4 sm:$0xff]  }
 0x24b   : > { %3076 = vmatpush1.bf16.msra.mxu1 %v11725_v34  ;;  %v11791_v34 = vld [vmem:[%s16226_s6 + $0x270] ss:$8 sps:$4 sm:$0xff]  }
 0x24c   : > { %11264 = vmatprep.subr.bf16.mxu1 %v13706_v57 }
 0x2de   : > { %v11242_v39 = vpop.f32.mrf.mxu1 }
 0x2e0   : > { %v2803_v62 = vpop.f32.mrf.mxu1 }
 0x2e2   : > { %v11243_v23 = vpop.f32.mrf.mxu1 }
 0x2e3   : > { %v2835_v56 = vpack.c.bf16 %v11243_v23, %v11242_v39  ;;  %v11805_v39 = vld [vmem:[%s16226_s6 + $0x254] ss:$8 sps:$4 sm:$0xff]   ;;  %v11811_v23 = vld [vmem:[%s16226_s6 + $0x244] ss:$8 sps:$4 sm:$0xff]  }
 0x2e4   : > { %v2806_v6 = vpop.f32.mrf.mxu1 }
 0x2e5   : > { %v2834_v12 = vpack.c.bf16 %v2806_v6, %v2803_v62  ;;  %v11809_v62 = vld [vmem:[%s16226_s6 + $0x240] ss:$8 sps:$4 sm:$0xff]   ;;  %v11815_v6 = vld [vmem:[%s16226_s6 + $0x230] ss:$8 sps:$4 sm:$0xff]  }
 0x2e6   : > { %v11246_v10 = vpop.f32.mrf.mxu1 }
 0x2e7   : > { %3247 = vmatmul.mubr.bf16.vlgmr.msra.gmra.mxu0 %v2834_v12  ;;  %v11817_v12 = vld [vmem:[%s16226_s6 + $0x234] ss:$8 sps:$4 sm:$0xff]  }
 0x2e8   : > { %v2819_v49 = vpop.f32.mrf.mxu1  ;;  %3256 = vmatprep.mubr.bf16.mxu0 %v16302_v43  ;;  %3495 = vmatpush1.bf16.msra.mxu0 %v11764_v36 }
 0x2e9   : > { %3496 = vmatprep.subr.bf16.mxu0 %v11769_v22 }
 0x2ea   : > { %v11247_v26 = vpop.f32.mrf.mxu1 }
 0x2eb   : > { %v2837_v48 = vpack.c.bf16 %v11247_v26, %v11246_v10  ;;  %v11821_v10 = vld [vmem:[%s16226_s6 + $0x220] ss:$8 sps:$4 sm:$0xff]   ;;  %v11827_v26 = vld [vmem:[%s16226_s6 + $0x210] ss:$8 sps:$4 sm:$0xff]  }
 0x2ec   : > { %v2822_v8 = vpop.f32.mrf.mxu1  ;;  %3497 = vmatpush1.bf16.msra.mxu0 %v11767_v0 }
 0x2ed   : > { %v2836_v44 = vpack.c.bf16 %v2822_v8, %v2819_v49  ;;  %3498 = vmatprep.subr.bf16.mxu0 %v11772_v35  ;;  %v11823_v49 = vld [vmem:[%s16226_s6 + $0x224] ss:$8 sps:$4 sm:$0xff]   ;;  %v11829_v8 = vld [vmem:[%s16226_s6 + $0x214] ss:$8 sps:$4 sm:$0xff]  }
 0x2ee   : > { %v11258_v3 = vpop.f32.mrf.mxu1 }
 0x2ef   : > { %3257 = vmatmul.mubr.bf16.gmra.mxu0 %v2835_v56  ;;  %v11835_v56 = vld [vmem:[%s16226_s6 + $0x204] ss:$8 sps:$4 sm:$0xff]  }
 0x2f0   : > { %v2929_v59 = vpop.f32.mrf.mxu1  ;;  %3266 = vmatprep.mubr.bf16.mxu0 %v16302_v43  ;;  %3499 = vmatpush1.bf16.msra.mxu0 %v11770_v45 }
 0x2f1   : > { %3500 = vmatprep.subr.bf16.mxu0 %v11775_v60 }
 0x2f2   : > { %v11259_v50 = vpop.f32.mrf.mxu1 }
 0x2f3   : > { %v2961_v40 = vpack.c.bf16 %v11259_v50, %v11258_v3  ;;  %v11833_v3 = vld [vmem:[%s16226_s6 + $0x200] ss:$8 sps:$4 sm:$0xff]  }
 0x2f4   : > { %v2932_v38 = vpop.f32.mrf.mxu1  ;;  %3501 = vmatpush1.bf16.msra.mxu0 %v11773_v14 }
 0x2f5   : > { %v2960_v46 = vpack.c.bf16 %v2932_v38, %v2929_v59  ;;  %3502 = vmatprep.subr.bf16.mxu0 %v11778_v24 }
 0x2f6   : > { %v11262_v19 = vpop.f32.mrf.mxu1 }
 0x2f7   : > { %3094 = vmatmul.mubr.bf16.vlgmr.msra.gmra.mxu1 %v2960_v46  ;;  %3267 = vmatmul.mubr.bf16.gmra.mxu0 %v2836_v44 }
 0x2f8   : > { %11265 = vmatpush3.bf16.msra.mxu1 %v13706_v57  ;;  %3103 = vmatprep.mubr.bf16.mxu1 %v16302_v43  ;;  %v2945_v42 = vpop.f32.mrf.mxu1 }
 0x2f9   : > { %11266 = vmatprep.subr.bf16.mxu1 %v13708_v7  ;;  %3276 = vmatprep.mubr.bf16.mxu0 %v16302_v43 }
 0x2fa   : > { %v11263_v5 = vpop.f32.mrf.mxu1  ;;  %3503 = vmatpush1.bf16.msra.mxu0 %v11776_v52 }
 0x2fb   : > { %v2963_v54 = vpack.c.bf16 %v11263_v5, %v11262_v19  ;;  %3504 = vmatprep.subr.bf16.mxu0 %v11781_v13 }
 0x2fc   : > { %11267 = vmatpush3.bf16.msra.mxu1 %v13708_v7  ;;  %v2948_v31 = vpop.f32.mrf.mxu1 }
 0x2fd   : > { %11268 = vmatprep.subr.bf16.mxu1 %v13713_v20  ;;  %v2962_v21 = vpack.c.bf16 %v2948_v31, %v2945_v42 }
 0x2fe   : > { %3505 = vmatpush1.bf16.msra.mxu0 %v11779_v32 }
 0x2ff   : > { %3104 = vmatmul.mubr.bf16.gmra.mxu1 %v2961_v40  ;;  %3277 = vmatmul.mubr.bf16.gmra.mxu0 %v2837_v48 }
 0x300   : > { %11269 = vmatpush3.bf16.msra.mxu1 %v13713_v20  ;;  %3113 = vmatprep.mubr.bf16.mxu1 %v16302_v43 }
 0x301   : > { %11270 = vmatprep.subr.bf16.mxu1 %v13669_v29  ;;  %3526 = vmatprep.mubr.bf16.mxu0 %v16302_v43 }
 0x302   : > { %3506 = vmatprep.subr.bf16.mxu0 %v11784_v51 }
 0x303   : > { %3507 = vmatpush1.bf16.msra.mxu0 %v11782_v2 }
 0x304   : > { %11271 = vmatpush3.bf16.msra.mxu1 %v13669_v29  ;;  %3508 = vmatprep.subr.bf16.mxu0 %v11787_v1 }
 0x305   : > { %11280 = vmatprep.subr.bf16.mxu1 %v13706_v57 }
 0x307   : > { %3114 = vmatmul.mubr.bf16.gmra.mxu1 %v2962_v21  ;;  %3509 = vmatpush1.bf16.msra.mxu0 %v11785_v55 }
 0x308   : > { %3123 = vmatprep.mubr.bf16.mxu1 %v16302_v43  ;;  %3790 = vmatprep.subr.bf16.mxu0 %v11790_v41 }
 0x30f   : > { %3124 = vmatmul.mubr.bf16.gmra.mxu1 %v2963_v54 }
 0x310   : > { %11272 = vmatprep.mubr.msk.bf16.mxu1 %vm1447_vm0, %v11752_v53 }
 0x317   : > { %11273 = vmatmul.mubr.msk.bf16.vlgmr.msra.gmra.mxu1 %vm1447_vm0, %v11753_v25 }
 0x318   : > { %11281 = vmatpush3.bf16.msra.mxu1 %v13706_v57  ;;  %11276 = vmatprep.mubr.msk.bf16.mxu1 %vm1447_vm0, %v11754_v17 }
 0x319   : > { %11282 = vmatprep.subr.bf16.mxu1 %v13708_v7 }
 0x31c   : > { %11283 = vmatpush3.bf16.msra.mxu1 %v13708_v7 }
 0x31d   : > { %11284 = vmatprep.subr.bf16.mxu1 %v13713_v20 }
 0x31f   : > { %11277 = vmatmul.mubr.msk.bf16.gmra.mxu1 %vm1447_vm0, %v11755_v4 }
 0x320   : > { %11285 = vmatpush3.bf16.msra.mxu1 %v13713_v20  ;;  %11288 = vmatprep.mubr.msk.bf16.mxu1 %vm1447_vm0, %v11756_v18 }
 0x321   : > { %11286 = vmatprep.subr.bf16.mxu1 %v13669_v29 }
 0x324   : > { %11287 = vmatpush3.bf16.msra.mxu1 %v13669_v29 }
 0x325   : > { %11296 = vmatprep.subr.bf16.mxu1 %v13706_v57 }
 0x327   : > { %11289 = vmatmul.mubr.msk.bf16.vlgmr.msra.gmra.mxu1 %vm1447_vm0, %v11757_v11 }
 0x328   : > { %11297 = vmatpush3.bf16.msra.mxu1 %v13706_v57  ;;  %11292 = vmatprep.mubr.msk.bf16.mxu1 %vm1447_vm0, %v11758_v28 }
 0x329   : > { %11298 = vmatprep.subr.bf16.mxu1 %v13708_v7 }
 0x32c   : > { %11299 = vmatpush3.bf16.msra.mxu1 %v13708_v7 }
 0x32d   : > { %11300 = vmatprep.subr.bf16.mxu1 %v13713_v20 }
 0x32f   : > { %11293 = vmatmul.mubr.msk.bf16.gmra.mxu1 %vm1447_vm0, %v11759_v63 }
 0x330   : > { %11301 = vmatpush3.bf16.msra.mxu1 %v13713_v20  ;;  %11304 = vmatprep.mubr.msk.bf16.mxu1 %vm1447_vm0, %v11760_v27 }
 0x331   : > { %11302 = vmatprep.subr.bf16.mxu1 %v13669_v29 }
 0x334   : > { %11303 = vmatpush3.bf16.msra.mxu1 %v13669_v29 }
 0x335   : > { %4086 = vmatprep.subr.bf16.mxu1 %v11793_v47 }
 0x337   : > { %11305 = vmatmul.mubr.msk.bf16.vlgmr.msra.gmra.mxu1 %vm1447_vm0, %v11761_v61 }
 0x338   : > { %11308 = vmatprep.mubr.msk.bf16.mxu1 %vm1447_vm0, %v11762_v37  ;;  %4087 = vmatpush1.bf16.msra.mxu1 %v11791_v34 }
 0x339   : > { %4088 = vmatprep.subr.bf16.mxu1 %v11799_v15 }
 0x33c   : > { %4089 = vmatpush1.bf16.msra.mxu1 %v11797_v9 }
 0x33d   : > { %4090 = vmatprep.subr.bf16.mxu1 %v11805_v39  ;;  %v11788_v39 = vld [vmem:[%s16226_s6 + $0x1f0] ss:$8 sps:$4 sm:$0xff]  }
 0x33f   : > { %11309 = vmatmul.mubr.msk.bf16.gmra.mxu1 %vm1447_vm0, %v11763_v30 }
 0x340   : > { %4118 = vmatprep.mubr.bf16.mxu1 %v16302_v43  ;;  %4091 = vmatpush1.bf16.msra.mxu1 %v11803_v58 }
 0x341   : > { %4092 = vmatprep.subr.bf16.mxu1 %v11811_v23  ;;  %v11796_v23 = vld [vmem:[%s16226_s6 + $0x1e4] ss:$8 sps:$4 sm:$0xff]  }
 0x344   : > { %4093 = vmatpush1.bf16.msra.mxu1 %v11809_v62 }
 0x345   : > { %4094 = vmatprep.subr.bf16.mxu1 %v11817_v12 }
 0x348   : > { %4095 = vmatpush1.bf16.msra.mxu1 %v11815_v6 }
 0x349   : > { %4096 = vmatprep.subr.bf16.mxu1 %v11823_v49  ;;  %v11802_v49 = vld [vmem:[%s16226_s6 + $0x1d4] ss:$8 sps:$4 sm:$0xff]  }
 0x34c   : > { %4097 = vmatpush1.bf16.msra.mxu1 %v11821_v10  ;;  %v11794_v10 = vld [vmem:[%s16226_s6 + $0x1e0] ss:$8 sps:$4 sm:$0xff]  }
 0x34d   : > { %4098 = vmatprep.subr.bf16.mxu1 %v11829_v8 }
 0x350   : > { %4099 = vmatpush1.bf16.msra.mxu1 %v11827_v26 }
 0x351   : > { %4100 = vmatprep.subr.bf16.mxu1 %v11835_v56  ;;  %v11800_v56 = vld [vmem:[%s16226_s6 + $0x1d0] ss:$8 sps:$4 sm:$0xff]  }
 0x354   : > { %4101 = vmatpush1.bf16.msra.mxu1 %v11833_v3 }
 0x3a7   : > { %v3248_v59 = vpop.f32.mrf.mxu0 }
 0x3a9   : > { %v3250_v50 = vpop.f32.mrf.mxu0 }
 0x3ab   : > { %v3252_v38 = vpop.f32.mrf.mxu0 }
 0x3ad   : > { %v13996_v44 = vpop.f32.mrf.mxu0 }
 0x3af   : > { %v3258_v46 = vpop.f32.mrf.mxu0 }
 0x3b1   : > { %v3260_v19 = vpop.f32.mrf.mxu0 }
 0x3b3   : > { %v3262_v42 = vpop.f32.mrf.mxu0 }
 0x3b5   : > { %v13998_v48 = vpop.f32.mrf.mxu0 }
 0x3b7   : > { %v3095_v40 = vpop.f32.mrf.mxu1  ;;  %v3268_v53 = vpop.f32.mrf.mxu0 }
 0x3b8   : > { %v14000_v5 = vadd.f32 %v3248_v59, %v3095_v40  ;;  %v11808_v59 = vld [vmem:[%s16226_s6 + $0x1c4] ss:$8 sps:$4 sm:$0xff]  }
 0x3b9   : > { %v3097_v31 = vpop.f32.mrf.mxu1  ;;  %v3270_v4 = vpop.f32.mrf.mxu0 }
 0x3ba   : > { %v14002_v21 = vadd.f32 %v3250_v50, %v3097_v31  ;;  %v11812_v31 = vld [vmem:[%s16226_s6 + $0x1b0] ss:$8 sps:$4 sm:$0xff]  }
 0x3bb   : > { %v3099_v54 = vpop.f32.mrf.mxu1  ;;  %v3272_v27 = vpop.f32.mrf.mxu0 }
 0x3bc   : > { %v14004_v25 = vadd.f32 %v3252_v38, %v3099_v54  ;;  %v11820_v54 = vld [vmem:[%s16226_s6 + $0x1a4] ss:$8 sps:$4 sm:$0xff]  }
 0x3bd   : > { %v14006_v17 = vpop.f32.mrf.mxu1  ;;  %v14016_v16 = vpop.f32.mrf.mxu0 }
 0x3bf   : > { %v3105_v18 = vpop.f32.mrf.mxu1  ;;  %v3278_v45 = vpop.f32.mrf.mxu0 }
 0x3c0   : > { %v14008_v11 = vadd.f32 %v3258_v46, %v3105_v18  ;;  %v11806_v46 = vld [vmem:[%s16226_s6 + $0x1c0] ss:$8 sps:$4 sm:$0xff]  }
 0x3c1   : > { %v3107_v28 = vpop.f32.mrf.mxu1  ;;  %v3280_v52 = vpop.f32.mrf.mxu0 }
 0x3c2   : > { %v14010_v63 = vadd.f32 %v3260_v19, %v3107_v28  ;;  %v11814_v19 = vld [vmem:[%s16226_s6 + $0x1b4] ss:$8 sps:$4 sm:$0xff]   ;;  %v11818_v28 = vld [vmem:[%s16226_s6 + $0x1a0] ss:$8 sps:$4 sm:$0xff]  }
 0x3c3   : > { %v3109_v61 = vpop.f32.mrf.mxu1  ;;  %v3282_v1 = vpop.f32.mrf.mxu0 }
 0x3c4   : > { %v14012_v37 = vadd.f32 %v3262_v42, %v3109_v61 }
 0x3c5   : > { %v14014_v30 = vpop.f32.mrf.mxu1 }
 0x3c7   : > { %v3115_v36 = vpop.f32.mrf.mxu1 }
 0x3c8   : > { %v14018_v22 = vadd.f32 %v3268_v53, %v3115_v36 }
 0x3c9   : > { %v3117_v0 = vpop.f32.mrf.mxu1 }
 0x3ca   : > { %v14020_v35 = vadd.f32 %v3270_v4, %v3117_v0  ;;  %v11824_v0 = vld [vmem:[%s16226_s6 + $0x190] ss:$8 sps:$4 sm:$0xff]  }
 0x3cb   : > { %v3119_v60 = vpop.f32.mrf.mxu1 }
 0x3cc   : > { %v14022_v14 = vadd.f32 %v3272_v27, %v3119_v60  ;;  %v11826_v27 = vld [vmem:[%s16226_s6 + $0x194] ss:$8 sps:$4 sm:$0xff]   ;;  %v11832_v60 = vld [vmem:[%s16226_s6 + $0x184] ss:$8 sps:$4 sm:$0xff]  }
 0x3cd   : > { %v14024_v24 = vpop.f32.mrf.mxu1 }
 0x3cf   : > { %v3125_v13 = vpop.f32.mrf.mxu1 }
 0x3d0   : > { %v14026_v32 = vadd.f32 %v3278_v45, %v3125_v13  ;;  %v11830_v13 = vld [vmem:[%s16226_s6 + $0x180] ss:$8 sps:$4 sm:$0xff]  }
 0x3d1   : > { %v3127_v51 = vpop.f32.mrf.mxu1 }
 0x3d2   : > { %v14028_v2 = vadd.f32 %v3280_v52, %v3127_v51 }
 0x3d3   : > { %v3129_v55 = vpop.f32.mrf.mxu1 }
 0x3d4   : > { %v14030_v41 = vadd.f32 %v3282_v1, %v3129_v55 }
 0x3d5   : > { %v14032_v34 = vpop.f32.mrf.mxu1 }
 0x3d7   : > { %v11274_v47 = vpop.f32.mrf.mxu1 }
 0x3d9   : > { %v3362_v9 = vpop.f32.mrf.mxu1 }
 0x3db   : > { %v11275_v15 = vpop.f32.mrf.mxu1 }
 0x3dc   : > { %v3394_v3 = vpack.c.bf16 %v11275_v15, %v11274_v47 }
 0x3dd   : > { %v3365_v58 = vpop.f32.mrf.mxu1 }
 0x3de   : > { %v3393_v62 = vpack.c.bf16 %v3365_v58, %v3362_v9 }
 0x3df   : > { %v11278_v6 = vpop.f32.mrf.mxu1 }
 0x3e0   : > { %3527 = vmatmul.mubr.bf16.vlgmr.msra.gmra.mxu0 %v3393_v62 }
 0x3e1   : > { %3791 = vmatpush1.bf16.msra.mxu0 %v11788_v39  ;;  %v3378_v12 = vpop.f32.mrf.mxu1  ;;  %3536 = vmatprep.mubr.bf16.mxu0 %v16302_v43 }
 0x3e2   : > { %3792 = vmatprep.subr.bf16.mxu0 %v11796_v23 }
 0x3e3   : > { %v11279_v26 = vpop.f32.mrf.mxu1 }
 0x3e4   : > { %v3396_v45 = vpack.c.bf16 %v11279_v26, %v11278_v6  ;;  %v11836_v26 = vld [vmem:[%s16225_s5 + $0xa0] sm:$0xff]  }
 0x3e5   : > { %3793 = vmatpush1.bf16.msra.mxu0 %v11794_v10  ;;  %v3381_v8 = vpop.f32.mrf.mxu1 }
 0x3e6   : > { %3794 = vmatprep.subr.bf16.mxu0 %v11802_v49  ;;  %v3395_v53 = vpack.c.bf16 %v3381_v8, %v3378_v12 }
 0x3e7   : > { %v11290_v50 = vpop.f32.mrf.mxu1 }
 0x3e8   : > { %3537 = vmatmul.mubr.bf16.gmra.mxu0 %v3394_v3  ;;  %v11838_v3 = vld [vmem:[%s16225_s5 + $0xb0] sm:$0xff]  }
 0x3e9   : > { %3795 = vmatpush1.bf16.msra.mxu0 %v11800_v56  ;;  %v3658_v38 = vpop.f32.mrf.mxu1  ;;  %3546 = vmatprep.mubr.bf16.mxu0 %v16302_v43  ;;  %v11837_v56 = vld [vmem:[%s16225_s5 + $0xa8] sm:$0xff]  }
 0x3ea   : > { %3796 = vmatprep.subr.bf16.mxu0 %v11808_v59  ;;  %v11839_v59 = vld [vmem:[%s16225_s5 + $0xb8] sm:$0xff]  }
 0x3eb   : > { %v11291_v42 = vpop.f32.mrf.mxu1 }
 0x3ec   : > { %v3690_v23 = vpack.c.bf16 %v11291_v42, %v11290_v50  ;;  %v11840_v50 = vld [vmem:[%s16225_s5 + $0xc0] sm:$0xff]   ;;  %v11852_v42 = vld [vmem:[%s16226_s6 + $0x2d4] ss:$8 sps:$4 sm:$0xff]  }
 0x3ed   : > { %3797 = vmatpush1.bf16.msra.mxu0 %v11806_v46  ;;  %v3661_v40 = vpop.f32.mrf.mxu1  ;;  %v11849_v46 = vld [vmem:[%s16226_s6 + $0x2e4] ss:$8 sps:$4 sm:$0xff]  }
 0x3ee   : > { %3798 = vmatprep.subr.bf16.mxu0 %v11814_v19  ;;  %v3689_v47 = vpack.c.bf16 %v3661_v40, %v3658_v38  ;;  %v11844_v38 = vld [vmem:[%s16226_s6 + $0x2f0] ss:$8 sps:$4 sm:$0xff]   ;;  %v11847_v19 = vld [vmem:[%s16226_s6 + $0x2e0] ss:$8 sps:$4 sm:$0xff]  }
 0x3ef   : > { %v11294_v4 = vpop.f32.mrf.mxu1  ;;  %v11850_v40 = vld [vmem:[%s16226_s6 + $0x2d0] ss:$8 sps:$4 sm:$0xff]  }
 0x3f0   : > { %3547 = vmatmul.mubr.bf16.gmra.mxu0 %v3395_v53  ;;  %v11853_v53 = vld [vmem:[%s16226_s6 + $0x2c0] ss:$8 sps:$4 sm:$0xff]  }
 0x3f1   : > { %3799 = vmatpush1.bf16.msra.mxu0 %v11812_v31  ;;  %v3674_v18 = vpop.f32.mrf.mxu1  ;;  %3556 = vmatprep.mubr.bf16.mxu0 %v16302_v43  ;;  %v11855_v31 = vld [vmem:[%s16226_s6 + $0x2c4] ss:$8 sps:$4 sm:$0xff]  }
 0x3f2   : > { %3800 = vmatprep.subr.bf16.mxu0 %v11820_v54  ;;  %v11858_v54 = vld [vmem:[%s16226_s6 + $0x2b4] ss:$8 sps:$4 sm:$0xff]  }
 0x3f3   : > { %v11295_v61 = vpop.f32.mrf.mxu1 }
 0x3f4   : > { %v3692_v8 = vpack.c.bf16 %v11295_v61, %v11294_v4  ;;  %v11861_v4 = vld [vmem:[%s16226_s6 + $0x374] ss:$8 sps:$4 sm:$0xff]   ;;  %v11867_v61 = vld [vmem:[%s16226_s6 + $0x364] ss:$8 sps:$4 sm:$0xff]  }
 0x3f5   : > { %3801 = vmatpush1.bf16.msra.mxu0 %v11818_v28  ;;  %v3677_v36 = vpop.f32.mrf.mxu1  ;;  %v11859_v28 = vld [vmem:[%s16226_s6 + $0x370] ss:$8 sps:$4 sm:$0xff]  }
 0x3f6   : > { %3802 = vmatprep.subr.bf16.mxu0 %v11826_v27  ;;  %v3691_v10 = vpack.c.bf16 %v3677_v36, %v3674_v18  ;;  %v11856_v18 = vld [vmem:[%s16226_s6 + $0x2b0] ss:$8 sps:$4 sm:$0xff]   ;;  %v11864_v27 = vld [vmem:[%s16226_s6 + $0x2a4] ss:$8 sps:$4 sm:$0xff]   ;;  %v11862_v36 = vld [vmem:[%s16226_s6 + $0x2a0] ss:$8 sps:$4 sm:$0xff]  }
 0x3f7   : > { %v11306_v52 = vpop.f32.mrf.mxu1 }
 0x3f8   : > { %3557 = vmatmul.mubr.bf16.gmra.mxu0 %v3396_v45  ;;  %v11870_v45 = vld [vmem:[%s16226_s6 + $0x294] ss:$8 sps:$4 sm:$0xff]  }
 0x3f9   : > { %3803 = vmatpush1.bf16.msra.mxu0 %v11824_v0  ;;  %v3954_v51 = vpop.f32.mrf.mxu1  ;;  %3822 = vmatprep.mubr.bf16.mxu0 %v16302_v43  ;;  %v11865_v0 = vld [vmem:[%s16226_s6 + $0x360] ss:$8 sps:$4 sm:$0xff]  }
 0x3fa   : > { %3804 = vmatprep.subr.bf16.mxu0 %v11832_v60  ;;  %v11873_v60 = vld [vmem:[%s16226_s6 + $0x354] ss:$8 sps:$4 sm:$0xff]  }
 0x3fb   : > { %v11307_v1 = vpop.f32.mrf.mxu1 }
 0x3fc   : > { %v3986_v39 = vpack.c.bf16 %v11307_v1, %v11306_v52  ;;  %v11868_v52 = vld [vmem:[%s16226_s6 + $0x290] ss:$8 sps:$4 sm:$0xff]   ;;  %v11879_v1 = vld [vmem:[%s16226_s6 + $0x344] ss:$8 sps:$4 sm:$0xff]  }
 0x3fd   : > { %3805 = vmatpush1.bf16.msra.mxu0 %v11830_v13  ;;  %v3957_v55 = vpop.f32.mrf.mxu1  ;;  %v11871_v13 = vld [vmem:[%s16226_s6 + $0x350] ss:$8 sps:$4 sm:$0xff]  }
 0x3fe   : > { %11312 = vmatprep.subr.bf16.mxu0 %v13706_v57  ;;  %v3985_v9 = vpack.c.bf16 %v3957_v55, %v3954_v51  ;;  %v11876_v51 = vld [vmem:[%s16226_s6 + $0x284] ss:$8 sps:$4 sm:$0xff]   ;;  %v11874_v55 = vld [vmem:[%s16226_s6 + $0x280] ss:$8 sps:$4 sm:$0xff]  }
 0x3ff   : > { %v11310_v15 = vpop.f32.mrf.mxu1 }
 0x400   : > { %3823 = vmatmul.mubr.bf16.vlgmr.msra.gmra.mxu0 %v3689_v47  ;;  %4119 = vmatmul.mubr.bf16.vlgmr.msra.gmra.mxu1 %v3985_v9  ;;  %v11877_v47 = vld [vmem:[%s16226_s6 + $0x340] ss:$8 sps:$4 sm:$0xff]   ;;  %v11882_v9 = vld [vmem:[%s16226_s6 + $0x334] ss:$8 sps:$4 sm:$0xff]  }
 0x401   : > { %11313 = vmatpush3.bf16.msra.mxu0 %v13706_v57  ;;  %3832 = vmatprep.mubr.bf16.mxu0 %v16302_v43  ;;  %v3970_v58 = vpop.f32.mrf.mxu1 }
 0x402   : > { %11314 = vmatprep.subr.bf16.mxu0 %v13708_v7  ;;  %4128 = vmatprep.mubr.bf16.mxu1 %v16302_v43 }
 0x403   : > { %v11311_v62 = vpop.f32.mrf.mxu1 }
 0x404   : > { %v3988_v49 = vpack.c.bf16 %v11311_v62, %v11310_v15  ;;  %v11880_v15 = vld [vmem:[%s16226_s6 + $0x330] ss:$8 sps:$4 sm:$0xff]   ;;  %v11888_v62 = vld [vmem:[%s16226_s6 + $0x314] ss:$8 sps:$4 sm:$0xff]  }
 0x405   : > { %11315 = vmatpush3.bf16.msra.mxu0 %v13708_v7  ;;  %v3973_v6 = vpop.f32.mrf.mxu1 }
 0x406   : > { %11316 = vmatprep.subr.bf16.mxu0 %v13713_v20  ;;  %v3987_v12 = vpack.c.bf16 %v3973_v6, %v3970_v58  ;;  %v11885_v58 = vld [vmem:[%s16226_s6 + $0x324] ss:$8 sps:$4 sm:$0xff]  }
 0x407   : > { %v11891_v6 = vld [vmem:[%s16226_s6 + $0x304] ss:$8 sps:$4 sm:$0xff]  }
 0x408   : > { %3833 = vmatmul.mubr.bf16.gmra.mxu0 %v3690_v23  ;;  %4129 = vmatmul.mubr.bf16.gmra.mxu1 %v3986_v39  ;;  %v11883_v39 = vld [vmem:[%s16226_s6 + $0x320] ss:$8 sps:$4 sm:$0xff]   ;;  %v11886_v23 = vld [vmem:[%s16226_s6 + $0x310] ss:$8 sps:$4 sm:$0xff]  }
 0x409   : > { %11317 = vmatpush3.bf16.msra.mxu0 %v13713_v20  ;;  %3842 = vmatprep.mubr.bf16.mxu0 %v16302_v43 }
 0x40a   : > { %11318 = vmatprep.subr.bf16.mxu0 %v13669_v29  ;;  %4138 = vmatprep.mubr.bf16.mxu1 %v16302_v43 }
 0x40d   : > { %11319 = vmatpush3.bf16.msra.mxu0 %v13669_v29 }
 0x40e   : > { %11328 = vmatprep.subr.bf16.mxu0 %v13706_v57 }
 0x410   : > { %3843 = vmatmul.mubr.bf16.gmra.mxu0 %v3691_v10  ;;  %4139 = vmatmul.mubr.bf16.gmra.mxu1 %v3987_v12  ;;  %v11889_v12 = vld [vmem:[%s16226_s6 + $0x300] ss:$8 sps:$4 sm:$0xff]   ;;  %v14235_v10 = vpop.f32.mrf.mxu0 }
 0x411   : > { %3852 = vmatprep.mubr.bf16.mxu0 %v16302_v43  ;;  %4148 = vmatprep.mubr.bf16.mxu1 %v16302_v43 }
 0x418   : > { %3853 = vmatmul.mubr.bf16.gmra.mxu0 %v3692_v8  ;;  %4149 = vmatmul.mubr.bf16.gmra.mxu1 %v3988_v49 }
 0x419   : > { %11320 = vmatprep.mubr.msk.bf16.mxu0 %vm1447_vm0, %v11836_v26  ;;  %4414 = vmatprep.mubr.bf16.mxu1 %v16302_v43 }
 0x420   : > { %11321 = vmatmul.mubr.msk.bf16.vlgmr.msra.gmra.mxu0 %vm1447_vm0, %v11837_v56 }
 0x421   : > { %11329 = vmatpush3.bf16.msra.mxu0 %v13706_v57  ;;  %11324 = vmatprep.mubr.msk.bf16.mxu0 %vm1447_vm0, %v11838_v3  ;;  %v11841_v57 = vld [vmem:[%s16225_s5 + $0xc8] sm:$0xff]  }
 0x422   : > { %11330 = vmatprep.subr.bf16.mxu0 %v13708_v7 }
 0x425   : > { %11331 = vmatpush3.bf16.msra.mxu0 %v13708_v7  ;;  %v11842_v7 = vld [vmem:[%s16225_s5 + $0xd0] sm:$0xff]  }
 0x426   : > { %11332 = vmatprep.subr.bf16.mxu0 %v13713_v20 }
 0x428   : > { %11325 = vmatmul.mubr.msk.bf16.gmra.mxu0 %vm1447_vm0, %v11839_v59 }
 0x429   : > { %11333 = vmatpush3.bf16.msra.mxu0 %v13713_v20  ;;  %11336 = vmatprep.mubr.msk.bf16.mxu0 %vm1447_vm0, %v11840_v50  ;;  %v11843_v20 = vld [vmem:[%s16225_s5 + $0xd8] sm:$0xff]  }
 0x42a   : > { %11334 = vmatprep.subr.bf16.mxu0 %v13669_v29 }
 0x42d   : > { %11335 = vmatpush3.bf16.msra.mxu0 %v13669_v29  ;;  %v11846_v29 = vld [vmem:[%s16226_s6 + $0x2f4] ss:$8 sps:$4 sm:$0xff]  }
 0x42e   : > { %4382 = vmatprep.subr.bf16.mxu1 %v11846_v29  ;;  %4678 = vmatprep.subr.bf16.mxu0 %v11861_v4 }
 0x42f   : > { %4383 = vmatpush1.bf16.msra.mxu1 %v11844_v38 }
 0x430   : > { %11337 = vmatmul.mubr.msk.bf16.vlgmr.msra.gmra.mxu0 %vm1447_vm0, %v11841_v57  ;;  %4384 = vmatprep.subr.bf16.mxu1 %v11849_v46 }
 0x431   : > { %11340 = vmatprep.mubr.msk.bf16.mxu0 %vm1447_vm0, %v11842_v7  ;;  %4679 = vmatpush1.bf16.msra.mxu0 %v11859_v28 }
 0x432   : > { %4680 = vmatprep.subr.bf16.mxu0 %v11867_v61 }
 0x433   : > { %4385 = vmatpush1.bf16.msra.mxu1 %v11847_v19 }
 0x434   : > { %4386 = vmatprep.subr.bf16.mxu1 %v11852_v42 }
 0x435   : > { %4681 = vmatpush1.bf16.msra.mxu0 %v11865_v0 }
 0x436   : > { %4682 = vmatprep.subr.bf16.mxu0 %v11873_v60 }
 0x437   : > { %4387 = vmatpush1.bf16.msra.mxu1 %v11850_v40 }
 0x438   : > { %11341 = vmatmul.mubr.msk.bf16.gmra.mxu0 %vm1447_vm0, %v11843_v20  ;;  %4388 = vmatprep.subr.bf16.mxu1 %v11855_v31 }
 0x439   : > { %4710 = vmatprep.mubr.bf16.mxu0 %v16302_v43  ;;  %4683 = vmatpush1.bf16.msra.mxu0 %v11871_v13 }
 0x43a   : > { %4684 = vmatprep.subr.bf16.mxu0 %v11879_v1 }
 0x43b   : > { %4389 = vmatpush1.bf16.msra.mxu1 %v11853_v53 }
 0x43c   : > { %4390 = vmatprep.subr.bf16.mxu1 %v11858_v54 }
 0x43d   : > { %4685 = vmatpush1.bf16.msra.mxu0 %v11877_v47 }
 0x43e   : > { %4686 = vmatprep.subr.bf16.mxu0 %v11882_v9 }
 0x43f   : > { %4391 = vmatpush1.bf16.msra.mxu1 %v11856_v18 }
 0x440   : > { %4392 = vmatprep.subr.bf16.mxu1 %v11864_v27 }
 0x441   : > { %4687 = vmatpush1.bf16.msra.mxu0 %v11880_v15 }
 0x442   : > { %4688 = vmatprep.subr.bf16.mxu0 %v11885_v58 }
 0x443   : > { %4393 = vmatpush1.bf16.msra.mxu1 %v11862_v36 }
 0x444   : > { %4394 = vmatprep.subr.bf16.mxu1 %v11870_v45 }
 0x445   : > { %4689 = vmatpush1.bf16.msra.mxu0 %v11883_v39 }
 0x446   : > { %4690 = vmatprep.subr.bf16.mxu0 %v11888_v62 }
 0x447   : > { %4395 = vmatpush1.bf16.msra.mxu1 %v11868_v52 }
 0x448   : > { %4396 = vmatprep.subr.bf16.mxu1 %v11876_v51 }
 0x449   : > { %4691 = vmatpush1.bf16.msra.mxu0 %v11886_v23 }
 0x44a   : > { %4692 = vmatprep.subr.bf16.mxu0 %v11891_v6 }
 0x44b   : > { %4397 = vmatpush1.bf16.msra.mxu1 %v11874_v55 }
 0x44d   : > { %4693 = vmatpush1.bf16.msra.mxu0 %v11889_v12 }
 0x4a0   : > { %v3528_v49 = vpop.f32.mrf.mxu0 }
 0x4a1   : > { %v3567_v26 = vadd.f32 %v3528_v49, %v14000_v5 }
 0x4a2   : > { %v3530_v8 = vpop.f32.mrf.mxu0 }
 0x4a3   : > { %v3568_v56 = vadd.f32 %v3530_v8, %v14002_v21 }
 0x4a4   : > { %v3532_v3 = vpop.f32.mrf.mxu0 }
 0x4a5   : > { %v3569_v59 = vadd.f32 %v3532_v3, %v14004_v25 }
 0x4a6   : > { %v14240_v50 = vpop.f32.mrf.mxu0 }
 0x4a8   : > { %v3538_v57 = vpop.f32.mrf.mxu0 }
 0x4a9   : > { %v3571_v7 = vadd.f32 %v3538_v57, %v14008_v11 }
 0x4aa   : > { %v3540_v20 = vpop.f32.mrf.mxu0 }
 0x4ab   : > { %v3572_v29 = vadd.f32 %v3540_v20, %v14010_v63 }
 0x4ac   : > { %v3542_v38 = vpop.f32.mrf.mxu0 }
 0x4ad   : > { %v3573_v46 = vadd.f32 %v3542_v38, %v14012_v37 }
 0x4ae   : > { %v14245_v19 = vpop.f32.mrf.mxu0 }
 0x4b0   : > { %v3548_v5 = vpop.f32.mrf.mxu0 }
 0x4b1   : > { %v3575_v42 = vadd.f32 %v3548_v5, %v14018_v22 }
 0x4b2   : > { %v3550_v21 = vpop.f32.mrf.mxu0 }
 0x4b3   : > { %v3576_v40 = vadd.f32 %v3550_v21, %v14020_v35 }
 0x4b4   : > { %v3552_v25 = vpop.f32.mrf.mxu0 }
 0x4b5   : > { %v3577_v31 = vadd.f32 %v3552_v25, %v14022_v14 }
 0x4b6   : > { %v14250_v53 = vpop.f32.mrf.mxu0 }
 0x4b8   : > { %v3558_v11 = vpop.f32.mrf.mxu0 }
 0x4b9   : > { %v3579_v54 = vadd.f32 %v3558_v11, %v14026_v32 }
 0x4ba   : > { %v3560_v63 = vpop.f32.mrf.mxu0 }
 0x4bb   : > { %v3580_v4 = vadd.f32 %v3560_v63, %v14028_v2 }
 0x4bc   : > { %v3562_v37 = vpop.f32.mrf.mxu0 }
 0x4bd   : > { %v3581_v18 = vadd.f32 %v3562_v37, %v14030_v41 }
 0x4be   : > { %v14255_v28 = vpop.f32.mrf.mxu0 }
 0x4c0   : > { %v3824_v22 = vpop.f32.mrf.mxu0  ;;  %v4120_v27 = vpop.f32.mrf.mxu1 }
 0x4c1   : > { %v3863_v61 = vadd.f32 %v3824_v22, %v3567_v26 }
 0x4c2   : > { %v3826_v35 = vpop.f32.mrf.mxu0  ;;  %v4122_v36 = vpop.f32.mrf.mxu1 }
 0x4c3   : > { %v3864_v0 = vadd.f32 %v3826_v35, %v3568_v56  ;;  %v14257_v14 = vadd.f32 %v4120_v27, %v3863_v61 }
 0x4c4   : > { %v3828_v45 = vpop.f32.mrf.mxu0  ;;  %v4124_v60 = vpop.f32.mrf.mxu1 }
 0x4c5   : > { %v3865_v52 = vadd.f32 %v3828_v45, %v3569_v59  ;;  %v14259_v32 = vadd.f32 %v4122_v36, %v3864_v0 }
 0x4c6   : > { %v14261_v13 = vpop.f32.mrf.mxu0 }
 0x4c7   : > { %16303 = vst [vmem:[#allocation49_spill] sm:$0xff] %v14259_v32  ;;  %v14263_v2 = vadd.f32 %v4124_v60, %v3865_v52  ;;  %v14297_v52 = vpop.f32.mrf.mxu1 }
 0x4c8   : > { %v3834_v41 = vpop.f32.mrf.mxu0 }
 0x4c9   : > { %v14265_v51 = vadd.f32 %v3834_v41, %v3571_v7  ;;  %v4130_v41 = vpop.f32.mrf.mxu1 }
 0x4ca   : > { %v3836_v1 = vpop.f32.mrf.mxu0 }
 0x4cb   : > { %v14267_v55 = vadd.f32 %v3836_v1, %v3572_v29  ;;  %v14299_v1 = vpop.f32.mrf.mxu1 }
 0x4cc   : > { %v3838_v47 = vpop.f32.mrf.mxu0 }
 0x4cd   : > { %v14269_v9 = vadd.f32 %v3838_v47, %v3573_v46  ;;  %v4134_v47 = vpop.f32.mrf.mxu1 }
 0x4ce   : > { %v14271_v15 = vpop.f32.mrf.mxu0 }
 0x4d0   : > { %v3844_v58 = vpop.f32.mrf.mxu0 }
 0x4d1   : > { %v14273_v39 = vadd.f32 %v3844_v58, %v3575_v42  ;;  %v14301_v58 = vpop.f32.mrf.mxu1 }
 0x4d2   : > { %v3846_v62 = vpop.f32.mrf.mxu0 }
 0x4d3   : > { %v14275_v23 = vadd.f32 %v3846_v62, %v3576_v40  ;;  %v4140_v62 = vpop.f32.mrf.mxu1 }
 0x4d4   : > { %v3848_v6 = vpop.f32.mrf.mxu0 }
 0x4d5   : > { %v14277_v12 = vadd.f32 %v3848_v6, %v3577_v31  ;;  %v14303_v6 = vpop.f32.mrf.mxu1 }
 0x4d6   : > { %v14279_v49 = vpop.f32.mrf.mxu0 }
 0x4d8   : > { %v3854_v26 = vpop.f32.mrf.mxu0 }
 0x4d9   : > { %v14281_v8 = vadd.f32 %v3854_v26, %v3579_v54  ;;  %v4144_v26 = vpop.f32.mrf.mxu1 }
 0x4da   : > { %v3856_v56 = vpop.f32.mrf.mxu0 }
 0x4db   : > { %v14283_v3 = vadd.f32 %v3856_v56, %v3580_v4  ;;  %v14305_v56 = vpop.f32.mrf.mxu1 }
 0x4dc   : > { %v3858_v59 = vpop.f32.mrf.mxu0 }
 0x4dd   : > { %v14285_v57 = vadd.f32 %v3858_v59, %v3581_v18  ;;  %v14307_v59 = vpop.f32.mrf.mxu1 }
 0x4de   : > { %v14287_v7 = vpop.f32.mrf.mxu0 }
 0x4e0   : > { %v11322_v20 = vpop.f32.mrf.mxu0 }
 0x4e2   : > { %v4250_v29 = vpop.f32.mrf.mxu0 }
 0x4e4   : > { %v11323_v38 = vpop.f32.mrf.mxu0 }
 0x4e5   : > { %v4282_v31 = vpack.c.bf16 %v11323_v38, %v11322_v20  ;;  %v14309_v20 = vpop.f32.mrf.mxu1 }
 0x4e6   : > { %v4253_v46 = vpop.f32.mrf.mxu0 }
 0x4e7   : > { %v4281_v5 = vpack.c.bf16 %v4253_v46, %v4250_v29  ;;  %v14311_v29 = vpop.f32.mrf.mxu1 }
 0x4e8   : > { %v11326_v42 = vpop.f32.mrf.mxu0 }
 0x4e9   : > { %4415 = vmatmul.mubr.bf16.vlgmr.msra.gmra.mxu1 %v4281_v5  ;;  %v14313_v38 = vpop.f32.mrf.mxu1 }
 0x4ea   : > { %v4266_v21 = vpop.f32.mrf.mxu0  ;;  %4424 = vmatprep.mubr.bf16.mxu1 %v16302_v43 }
 0x4ec   : > { %v11327_v40 = vpop.f32.mrf.mxu0 }
 0x4ed   : > { %v4284_v61 = vpack.c.bf16 %v11327_v40, %v11326_v42 }
 0x4ee   : > { %v4269_v25 = vpop.f32.mrf.mxu0 }
 0x4ef   : > { %v4283_v37 = vpack.c.bf16 %v4269_v25, %v4266_v21 }
 0x4f0   : > { %v11338_v11 = vpop.f32.mrf.mxu0 }
 0x4f1   : > { %4425 = vmatmul.mubr.bf16.gmra.mxu1 %v4282_v31 }
 0x4f2   : > { %v4546_v54 = vpop.f32.mrf.mxu0  ;;  %4434 = vmatprep.mubr.bf16.mxu1 %v16302_v43 }
 0x4f4   : > { %v11339_v63 = vpop.f32.mrf.mxu0 }
 0x4f5   : > { %v4578_v35 = vpack.c.bf16 %v11339_v63, %v11338_v11 }
 0x4f6   : > { %v4549_v4 = vpop.f32.mrf.mxu0 }
 0x4f7   : > { %v4577_v18 = vpack.c.bf16 %v4549_v4, %v4546_v54  ;;  %v14326_v54 = vld [vmem:[%s16227_s7] sm:$0x3] }
 0x4f8   : > { %v11342_v22 = vpop.f32.mrf.mxu0 }
 0x4f9   : > { %4435 = vmatmul.mubr.bf16.gmra.mxu1 %v4283_v37  ;;  %4711 = vmatmul.mubr.bf16.vlgmr.msra.gmra.mxu0 %v4577_v18 }
 0x4fa   : > { %4444 = vmatprep.mubr.bf16.mxu1 %v16302_v43  ;;  %4720 = vmatprep.mubr.bf16.mxu0 %v16302_v43  ;;  %v4562_v27 = vpop.f32.mrf.mxu0 }
 0x4fc   : > { %v11343_v36 = vpop.f32.mrf.mxu0 }
 0x4fd   : > { %v4580_v60 = vpack.c.bf16 %v11343_v36, %v11342_v22  ;;  %v14331_v22 = vrot.slane %v14326_v54, %v13494_v33 }
 0x4fe   : > { %v4565_v0 = vpop.f32.mrf.mxu0 }
 0x4ff   : > { %v4579_v45 = vpack.c.bf16 %v4565_v0, %v4562_v27  ;;  %v4163_v0 = vadd.f32 %v4130_v41, %v14265_v51 }
 0x501   : > { %4445 = vmatmul.mubr.bf16.gmra.mxu1 %v4284_v61  ;;  %4721 = vmatmul.mubr.bf16.gmra.mxu0 %v4578_v35 }
 0x502   : > { %4730 = vmatprep.mubr.bf16.mxu0 %v16302_v43  ;;  %4891 = vmatprep.mubr.bf16.mxu1 %v16302_v43 }
 0x509   : > { %4731 = vmatmul.mubr.bf16.gmra.mxu0 %v4579_v45 }
 0x50a   : > { %4740 = vmatprep.mubr.bf16.mxu0 %v16302_v43 }
 0x511   : > { %4741 = vmatmul.mubr.bf16.gmra.mxu0 %v4580_v60 }
 0x512   : > { %5033 = vmatprep.mubr.bf16.mxu0 %v16302_v43  ;;  %v4165_v43 = vadd.f32 %v4134_v47, %v14269_v9 }
 0x5a9   : > { %v4416_v46 = vpop.f32.mrf.mxu1 }
 0x5aa   : > { %v4455_v63 = vadd.f32 %v4416_v46, %v14257_v14 }
 0x5ab   : > { %v14315_v5 = vpop.f32.mrf.mxu1 }
 0x5ac   : > { %16304 = vst [vmem:[#allocation50_spill] sm:$0xff] %v14315_v5 }
 0x5ad   : > { %v4420_v42 = vpop.f32.mrf.mxu1 }
 0x5ae   : > { %v4457_v35 = vadd.f32 %v4420_v42, %v14263_v2 }
 0x5af   : > { %v14317_v21 = vpop.f32.mrf.mxu1 }
 0x5b0   : > { %16305 = vst [vmem:[#allocation51_spill] sm:$0xff] %v14317_v21 }
 0x5b1   : > { %v4426_v40 = vpop.f32.mrf.mxu1 }
 0x5b3   : > { %v14319_v25 = vpop.f32.mrf.mxu1 }
 0x5b5   : > { %v4430_v31 = vpop.f32.mrf.mxu1 }
 0x5b6   : > { %v4461_v42 = vadd.f32 %v4430_v31, %v4165_v43  ;;  %v4169_v43 = vadd.f32 %v4144_v26, %v14277_v12 }
 0x5b7   : > { %v14321_v11 = vpop.f32.mrf.mxu1 }
 0x5b9   : > { %v4436_v4 = vpop.f32.mrf.mxu1  ;;  %v4712_v37 = vpop.f32.mrf.mxu0 }
 0x5ba   : > { %v4751_v18 = vadd.f32 %v4712_v37, %v4455_v63  ;;  %v4459_v63 = vadd.f32 %v4426_v40, %v4163_v0 }
 0x5bb   : > { %v14333_v27 = vpop.f32.mrf.mxu1  ;;  %v14335_v61 = vpop.f32.mrf.mxu0 }
 0x5bc   : > { %16306 = vst [vmem:[#allocation52_spill] sm:$0xff] %v14335_v61  ;;  %v4779_v45 = vadd.f32 %v14331_v22, %v4751_v18  ;;  %v4167_v18 = vadd.f32 %v4140_v62, %v14273_v39  ;;  %v3265_v39 = vadd.f32 %v13998_v48, %v14014_v30  ;;  %v3285_v62 = vadd.f32 %v14235_v10, %v14032_v34 }
 0x5bd   : > { %v4716_v36 = vpop.f32.mrf.mxu0  ;;  %v4440_v14 = vpop.f32.mrf.mxu1  ;;  %v3255_v34 = vadd.f32 %v13996_v44, %v14006_v17  ;;  %v4173_v44 = vadd.f32 %v14311_v29, %v14285_v57 }
 0x5be   : > { %v4753_v60 = vadd.f32 %v4716_v36, %v4457_v35  ;;  %v4795_v5 = vmax.f32 %v4779_v45, 0.0  ;;  %v3275_v36 = vadd.f32 %v14016_v16, %v14024_v24  ;;  %v4463_v47 = vadd.f32 %v4436_v4, %v4167_v18 }
 0x5bf   : > { %v14340_v46 = vpop.f32.mrf.mxu0  ;;  %v4442_v21 = vpop.f32.mrf.mxu1  ;;  %v3582_v12 = vadd.f32 %v14255_v28, %v3285_v62  ;;  %v4172_v28 = vadd.f32 %v14309_v20, %v14283_v3  ;;  %v4168_v18 = vadd.f32 %v14303_v6, %v14275_v23 }
 0x5c0   : > { %v4781_v37 = vadd.f32 %v14331_v22, %v4753_v60  ;;  %v3578_v45 = vadd.f32 %v14250_v53, %v3275_v36  ;;  %v3574_v53 = vadd.f32 %v14245_v19, %v3265_v39 }
 0x5c1   : > { %v4722_v33 = vpop.f32.mrf.mxu0  ;;  %v4446_v0 = vpop.f32.mrf.mxu1 }
 0x5c2   : > { %v4797_v32 = vmax.f32 %v4781_v37, 0.0  ;;  %v4755_v61 = vadd.f32 %v4722_v33, %v4459_v63  ;;  %v3874_v16 = vadd.f32 %v14279_v49, %v3578_v45  ;;  %v4171_v37 = vadd.f32 %v14307_v59, %v14281_v8  ;;  %v16307_v45 = vld [vmem:[#allocation19_spill] sm:$0xff] }
 0x5c3   : > { %v14344_v2 = vpop.f32.mrf.mxu0  ;;  %v4448_v24 = vpop.f32.mrf.mxu1  ;;  %v3870_v10 = vadd.f32 %v14271_v15, %v3574_v53  ;;  %v3570_v59 = vadd.f32 %v14240_v50, %v3255_v34  ;;  %v4464_v50 = vadd.f32 %v14333_v27, %v4168_v18 }
 0x5c4   : > { %v14346_v51 = vpack.c.bf16 %v4797_v32, %v4795_v5  ;;  %v4783_v35 = vadd.f32 %v14331_v22, %v4755_v61  ;;  %v4465_v61 = vadd.f32 %v4440_v14, %v4169_v43  ;;  %v4170_v49 = vadd.f32 %v14305_v56, %v3874_v16 }
 0x5c5   : > { %v4726_v41 = vpop.f32.mrf.mxu0  ;;  %v3878_v14 = vadd.f32 %v14287_v7, %v3582_v12  ;;  %v4468_v56 = vadd.f32 %v4448_v24, %v4172_v28  ;;  %v3866_v36 = vadd.f32 %v14261_v13, %v3570_v59  ;;  %v4166_v3 = vadd.f32 %v14301_v58, %v3870_v10  ;;  %v16311_v10 = vld [vmem:[#allocation52_spill] sm:$0xff] }
 0x5c6   : > { %v4757_v40 = vadd.f32 %v4726_v41, %v4461_v42  ;;  %v4799_v32 = vmax.f32 %v4783_v35, 0.0  ;;  %v4450_v42 = vpop.f32.mrf.mxu1  ;;  %v4467_v41 = vadd.f32 %v4446_v0, %v4171_v37  ;;  %v4466_v17 = vadd.f32 %v4442_v21, %v4170_v49  ;;  %v16310_v37 = vld [vmem:[#allocation50_spill] sm:$0xff] }
 0x5c7   : > { %v4728_v9 = vpop.f32.mrf.mxu0  ;;  %v4174_v20 = vadd.f32 %v14313_v38, %v3878_v14  ;;  %v4469_v23 = vadd.f32 %v4450_v42, %v4173_v44  ;;  %v4164_v21 = vadd.f32 %v14299_v1, %v14267_v55  ;;  %v4776_v13 = vrot.slane %v14326_v54, %v16307_v45 }
 0x5c8   : > { %v4785_v33 = vadd.f32 %v14331_v22, %v4757_v40  ;;  %v4452_v0 = vpop.f32.mrf.mxu1 }
 0x5c9   : > { %v4732_v60 = vpop.f32.mrf.mxu0 }
 0x5ca   : > { %v4801_v5 = vmax.f32 %v4785_v33, 0.0  ;;  %v4759_v31 = vadd.f32 %v4732_v60, %v4463_v47  ;;  %v4462_v33 = vadd.f32 %v14321_v11, %v4166_v3  ;;  %v4470_v60 = vadd.f32 %v4452_v0, %v4174_v20  ;;  %v16308_v11 = vld [vmem:[#allocation51_spill] sm:$0xff]  ;;  %v11935_v20 = vld [vmem:[%s16229_s9 + $0x64] ss:$8 sps:$4 sm:$0xff]  }
 0x5cb   : > { %v4734_v4 = vpop.f32.mrf.mxu0  ;;  %v11930_v3 = vld [vmem:[%s16229_s9 + $0x70] ss:$8 sps:$4 sm:$0xff]   ;;  %v16312_v0 = vmov 0  }
 0x5cc   : > { %v14360_v63 = vpack.c.bf16 %v4801_v5, %v4799_v32  ;;  %v4787_v48 = vadd.f32 %v14331_v22, %v4759_v31  ;;  %v4760_v38 = vadd.f32 %v4734_v4, %v4464_v50  ;;  %v4162_v32 = vadd.f32 %v14297_v52, %v3866_v36  ;;  %v11899_v36 = vld [vmem:[%s16229_s9 + $0x104] ss:$8 sps:$4 sm:$0xff]   ;;  %v11897_v50 = vld [vmem:[%s16229_s9 + $0x100] ss:$8 sps:$4 sm:$0xff]  }
 0x5cd   : > { %v4736_v26 = vpop.f32.mrf.mxu0  ;;  %v4460_v5 = vadd.f32 %v14319_v25, %v4164_v21  ;;  %v4758_v31 = vadd.f32 %v4728_v9, %v4462_v33  ;;  %v11901_v21 = vld [vmem:[%s16229_s9 + $0xf0] ss:$8 sps:$4 sm:$0xff]   ;;  %v11907_v33 = vld [vmem:[%s16229_s9 + $0xe4] ss:$8 sps:$4 sm:$0xff]  }
 0x5ce   : > { %v4761_v30 = vadd.f32 %v4736_v26, %v4465_v61  ;;  %v4803_v7 = vmax.f32 %v4787_v48, 0.0  ;;  %v4458_v24 = vadd.f32 %v16308_v11, %v4162_v32  ;;  %v4788_v61 = vadd.f32 %v4776_v13, %v4760_v38  ;;  %v16309_v26 = vld [vmem:[#allocation49_spill] sm:$0xff]  ;;  %v11912_v32 = vld [vmem:[#allocation5 + $0x10] sm:$0xff]   ;;  %v11916_v11 = vld [vmem:[#allocation5 + $0x38] sm:$0xff]  }
 0x5cf   : > { %v4738_v19 = vpop.f32.mrf.mxu0  ;;  %v4756_v54 = vadd.f32 %v14344_v2, %v4460_v5  ;;  %v4456_v52 = vadd.f32 %v16310_v37, %v16309_v26  ;;  %v4786_v9 = vadd.f32 %v4776_v13, %v4758_v31  ;;  %v11941_v38 = vld [vmem:[%s16229_s9 + $0x44] ss:$8 sps:$4 sm:$0xff]   ;;  %v11909_v5 = vld [vmem:[%s16229_s9 + $0xd0] ss:$8 sps:$4 sm:$0xff]   ;;  %v11921_v26 = vld [vmem:[%s16229_s9 + $0xa0] ss:$8 sps:$4 sm:$0xff]  }
 0x5d0   : > { %v4789_v8 = vadd.f32 %v14331_v22, %v4761_v30  ;;  %v4762_v57 = vadd.f32 %v4738_v19, %v4466_v17  ;;  %v4754_v25 = vadd.f32 %v14340_v46, %v4458_v24  ;;  %v4804_v42 = vmax.f32 %v4788_v61, 0.0  ;;  %v11915_v31 = vld [vmem:[%s16229_s9 + $0xc4] ss:$8 sps:$4 sm:$0xff]   ;;  %v11920_v24 = vld [vmem:[#allocation5 + $0x18] sm:$0xff]  }
 0x5d1   : > { %v4742_v15 = vpop.f32.mrf.mxu0  ;;  %v4752_v49 = vadd.f32 %v16311_v10, %v4456_v52  ;;  %v4784_v14 = vadd.f32 %v4776_v13, %v4756_v54  ;;  %v4802_v28 = vmax.f32 %v4786_v9, 0.0  ;;  %v11917_v54 = vld [vmem:[%s16229_s9 + $0xb0] ss:$8 sps:$4 sm:$0xff]   ;;  %v11947_v61 = vld [vmem:[%s16229_s9 + $0x24] ss:$8 sps:$4 sm:$0xff]  }
 0x5d2   : > { %v4805_v35 = vmax.f32 %v4789_v8, 0.0  ;;  %v4763_v40 = vadd.f32 %v4742_v15, %v4467_v41  ;;  %v4790_v62 = vadd.f32 %v4776_v13, %v4762_v57  ;;  %v4782_v19 = vadd.f32 %v4776_v13, %v4754_v25  ;;  %v11896_v15 = vld [vmem:[%s16229_s9 + $0x114] ss:$8 sps:$4 sm:$0xff]   ;;  %v11900_v57 = vld [vmem:[#allocation5 + $0x28] sm:$0xff]   ;;  %v11948_v52 = vld [vmem:[%s16229_s9 + $0x10] ss:$8 sps:$4 sm:$0xff]  }
 0x5d3   : > { %v4744_v47 = vpop.f32.mrf.mxu0  ;;  %v4780_v46 = vadd.f32 %v4776_v13, %v4752_v49  ;;  %v4800_v8 = vmax.f32 %v4784_v14, 0.0  ;;  %v11926_v37 = vld [vmem:[%s16229_s9 + $0x134] ss:$8 sps:$4 sm:$0xff]   ;;  %v11953_v25 = vld [vmem:[%s16229_s9 + $0x4] ss:$8 sps:$4 sm:$0xff]  }
 0x5d4   : > { %v14384_v6 = vpack.c.bf16 %v4805_v35, %v4803_v7  ;;  %v4764_v29 = vadd.f32 %v4744_v47, %v4468_v56  ;;  %v4791_v27 = vadd.f32 %v14331_v22, %v4763_v40  ;;  %v4806_v48 = vmax.f32 %v4790_v62, 0.0  ;;  %v11932_v56 = vld [vmem:[%s16229_s9 + $0x74] ss:$8 sps:$4 sm:$0xff]   ;;  %v11892_v7 = vld [vmem:[#allocation5] sm:$0xff]   ;;  %v11894_v40 = vld [vmem:[%s16229_s9 + $0x110] ss:$8 sps:$4 sm:$0xff]  }
 0x5d5   : > { %v4746_v58 = vpop.f32.mrf.mxu0  ;;  %v4798_v59 = vmax.f32 %v4782_v19, 0.0  ;;  %v14413_v18 = vpack.c.bf16 %v4802_v28, %v4800_v8  ;;  %v4796_v44 = vmax.f32 %v4780_v46, 0.0  ;;  %v11893_v35 = vld [vmem:[#allocation5 + $0x20] sm:$0xff]   ;;  %v11903_v47 = vld [vmem:[%s16229_s9 + $0xf4] ss:$8 sps:$4 sm:$0xff]  }
 0x5d6   : > { %v4765_v43 = vadd.f32 %v4746_v58, %v4469_v23  ;;  %v4792_v16 = vadd.f32 %v4776_v13, %v4764_v29  ;;  %v4807_v4 = vmax.f32 %v4791_v27, 0.0  ;;  %v14405_v41 = vpack.c.bf16 %v4806_v48, %v4804_v42  ;;  %v11933_v23 = vld [vmem:[%s16229_s9 + $0x60] ss:$8 sps:$4 sm:$0xff]   ;;  %v11936_v58 = vld [vmem:[%s16229_s9 + $0x50] ss:$8 sps:$4 sm:$0xff]  }
 0x5d7   : > { %v4748_v39 = vpop.f32.mrf.mxu0  ;;  %v14419_v17 = vpack.c.bf16 %v4798_v59, %v4796_v44  ;;  %v11904_v29 = vld [vmem:[#allocation5 + $0x8] sm:$0xff]   ;;  %v11911_v27 = vld [vmem:[%s16229_s9 + $0xd4] ss:$8 sps:$4 sm:$0xff]   ;;  %v11924_v9 = vld [vmem:[%s16229_s9 + $0x130] ss:$8 sps:$4 sm:$0xff]  }
 0x5d8   : > { %v4793_v55 = vadd.f32 %v14331_v22, %v4765_v43  ;;  %v4766_v1 = vadd.f32 %v4748_v39, %v4470_v60  ;;  %v4808_v30 = vmax.f32 %v4792_v16, 0.0  ;;  %v11905_v60 = vld [vmem:[%s16229_s9 + $0xe0] ss:$8 sps:$4 sm:$0xff]   ;;  %v11908_v43 = vld [vmem:[#allocation5 + $0x30] sm:$0xff]   ;;  %v11929_v48 = vld [vmem:[%s16229_s9 + $0x124] ss:$8 sps:$4 sm:$0xff]  }
 0x5d9   : > { %v11939_v39 = vld [vmem:[%s16229_s9 + $0x40] ss:$8 sps:$4 sm:$0xff]   ;;  %v11944_v62 = vld [vmem:[%s16229_s9 + $0x34] ss:$8 sps:$4 sm:$0xff]   ;;  %v11954_v10 = vld [vmem:[%s16229_s9 + $0x90] ss:$8 sps:$4 sm:$0xff]  }
 0x5da   : > { %v4809_v53 = vmax.f32 %v4793_v55, 0.0  ;;  %v4794_v12 = vadd.f32 %v4776_v13, %v4766_v1  ;;  %v11938_v13 = vld [vmem:[%s16229_s9 + $0x54] ss:$8 sps:$4 sm:$0xff]   ;;  %v11913_v16 = vld [vmem:[%s16229_s9 + $0xc0] ss:$8 sps:$4 sm:$0xff]  }
 0x5db   : > { %v11919_v55 = vld [vmem:[%s16229_s9 + $0xb4] ss:$8 sps:$4 sm:$0xff]   ;;  %v11942_v1 = vld [vmem:[%s16229_s9 + $0x30] ss:$8 sps:$4 sm:$0xff]   ;;  %v11959_v14 = vld [vmem:[%s16229_s9 + $0x84] ss:$8 sps:$4 sm:$0xff]  }
 0x5dc   : > { %v14400_v34 = vpack.c.bf16 %v4809_v53, %v4807_v4  ;;  %v4810_v22 = vmax.f32 %v4794_v12, 0.0  ;;  %v11923_v4 = vld [vmem:[%s16229_s9 + $0xa4] ss:$8 sps:$4 sm:$0xff]   ;;  %v11945_v53 = vld [vmem:[%s16229_s9 + $0x20] ss:$8 sps:$4 sm:$0xff]  }
 0x5dd   : > { %v11950_v12 = vld [vmem:[%s16229_s9 + $0x14] ss:$8 sps:$4 sm:$0xff]   ;;  %v11957_v42 = vld [vmem:[%s16229_s9 + $0x80] ss:$8 sps:$4 sm:$0xff]  }
 0x5de   : > { %v14403_v2 = vpack.c.bf16 %v4810_v22, %v4808_v30  ;;  %v11951_v30 = vld [vmem:[%s16229_s9] ss:$8 sps:$4 sm:$0xff]   ;;  %v11956_v49 = vld [vmem:[%s16229_s9 + $0x94] ss:$8 sps:$4 sm:$0xff]  }
 0x5df   : > { %v11927_v22 = vld [vmem:[%s16229_s9 + $0x120] ss:$8 sps:$4 sm:$0xff]   ;;  %v11962_v19 = vld [vmem:[%s16229_s9 + $0x1b4] ss:$8 sps:$4 sm:$0xff]  }
 0x5e0   : > { %4867 = vmatprep.subr.bf16.mxu1 %v14403_v2  ;;  %5009 = vmatprep.subr.bf16.mxu0 %v14403_v2 }
 0x5e1   : > { %4868 = vmatpush1.bf16.msra.mxu1 %v14400_v34  ;;  %5010 = vmatpush1.bf16.msra.mxu0 %v14400_v34 }
 0x5e2   : > { %4869 = vmatprep.subr.bf16.mxu1 %v14405_v41  ;;  %5011 = vmatprep.subr.bf16.mxu0 %v14405_v41 }
 0x5e5   : > { %4870 = vmatpush1.bf16.msra.mxu1 %v14384_v6  ;;  %5012 = vmatpush1.bf16.msra.mxu0 %v14384_v6 }
 0x5e6   : > { %4871 = vmatprep.subr.bf16.mxu1 %v14413_v18  ;;  %5013 = vmatprep.subr.bf16.mxu0 %v14413_v18 }
 0x5e9   : > { %4872 = vmatpush1.bf16.msra.mxu1 %v14360_v63  ;;  %5014 = vmatpush1.bf16.msra.mxu0 %v14360_v63 }
 0x5ea   : > { %4873 = vmatprep.subr.bf16.mxu1 %v14419_v17  ;;  %5015 = vmatprep.subr.bf16.mxu0 %v14419_v17 }
 0x5ed   : > { %4874 = vmatpush1.bf16.msra.mxu1 %v14346_v51  ;;  %5016 = vmatpush1.bf16.msra.mxu0 %v14346_v51 }
 0x5ee   : > { %5216 = vmatprep.subr.bf16.mxu1 %v11896_v15  ;;  %5401 = vmatprep.subr.bf16.mxu0 %v11932_v56 }
 0x5f0   : > { %10392 = vmatmul.mubr.msk.bf16.vlgmr.msra.gmra.mxu1 %vm1447_vm0, %v11892_v7  ;;  %10400 = vmatmul.mubr.msk.bf16.vlgmr.msra.gmra.mxu0 %vm1447_vm0, %v11893_v35 }
 0x5f1   : > { %5217 = vmatpush1.bf16.msra.mxu1 %v11894_v40  ;;  %5043 = vmatprep.mubr.bf16.mxu0 %v16312_v0 }
 0x5f2   : > { %5218 = vmatprep.subr.bf16.mxu1 %v11899_v36  ;;  %4901 = vmatprep.mubr.bf16.mxu1 %v16312_v0 }
 0x5f3   : > { %5402 = vmatpush1.bf16.msra.mxu0 %v11930_v3  ;;  %v11960_v3 = vld [vmem:[%s16229_s9 + $0x1b0] ss:$8 sps:$4 sm:$0xff]  }
 0x5f4   : > { %5403 = vmatprep.subr.bf16.mxu0 %v11935_v20 }
 0x5f5   : > { %5219 = vmatpush1.bf16.msra.mxu1 %v11897_v50 }
 0x5f6   : > { %5220 = vmatprep.subr.bf16.mxu1 %v11903_v47 }
 0x5f7   : > { %5404 = vmatpush1.bf16.msra.mxu0 %v11933_v23  ;;  %v11965_v23 = vld [vmem:[%s16229_s9 + $0x1a4] ss:$8 sps:$4 sm:$0xff]  }
 0x5f8   : > { %10401 = vmatmul.mubr.msk.bf16.gmra.mxu0 %vm1447_vm0, %v11900_v57  ;;  %10393 = vmatmul.mubr.msk.bf16.gmra.mxu1 %vm1447_vm0, %v11904_v29 }
 0x5f9   : > { %5221 = vmatpush1.bf16.msra.mxu1 %v11901_v21  ;;  %5053 = vmatprep.mubr.bf16.mxu0 %v16312_v0  ;;  %v11963_v21 = vld [vmem:[%s16229_s9 + $0x1a0] ss:$8 sps:$4 sm:$0xff]  }
 0x5fa   : > { %5222 = vmatprep.subr.bf16.mxu1 %v11907_v33  ;;  %4911 = vmatprep.mubr.bf16.mxu1 %v16312_v0 }
 0x5fb   : > { %5405 = vmatprep.subr.bf16.mxu0 %v11938_v13 }
 0x5fc   : > { %5406 = vmatpush1.bf16.msra.mxu0 %v11936_v58  ;;  %v11968_v58 = vld [vmem:[%s16229_s9 + $0x194] ss:$8 sps:$4 sm:$0xff]  }
 0x5fd   : > { %5223 = vmatpush1.bf16.msra.mxu1 %v11905_v60  ;;  %5407 = vmatprep.subr.bf16.mxu0 %v11941_v38 }
 0x5fe   : > { %5224 = vmatprep.subr.bf16.mxu1 %v11911_v27 }
 0x600   : > { %10402 = vmatmul.mubr.msk.bf16.gmra.mxu0 %vm1447_vm0, %v11908_v43  ;;  %10394 = vmatmul.mubr.msk.bf16.gmra.mxu1 %vm1447_vm0, %v11912_v32  ;;  %v11966_v32 = vld [vmem:[%s16229_s9 + $0x190] ss:$8 sps:$4 sm:$0xff]  }
 0x601   : > { %5225 = vmatpush1.bf16.msra.mxu1 %v11909_v5  ;;  %5063 = vmatprep.mubr.bf16.mxu0 %v16312_v0 }
 0x602   : > { %5226 = vmatprep.subr.bf16.mxu1 %v11915_v31  ;;  %4921 = vmatprep.mubr.bf16.mxu1 %v16312_v0 }
 0x603   : > { %5408 = vmatpush1.bf16.msra.mxu0 %v11939_v39 }
 0x604   : > { %5409 = vmatprep.subr.bf16.mxu0 %v11944_v62 }
 0x605   : > { %5227 = vmatpush1.bf16.msra.mxu1 %v11913_v16  ;;  %v11971_v16 = vld [vmem:[%s16229_s9 + $0x184] ss:$8 sps:$4 sm:$0xff]  }
 0x606   : > { %5228 = vmatprep.subr.bf16.mxu1 %v11919_v55 }
 0x607   : > { %5410 = vmatpush1.bf16.msra.mxu0 %v11942_v1 }
 0x608   : > { %10403 = vmatmul.mubr.msk.bf16.gmra.mxu0 %vm1447_vm0, %v11916_v11  ;;  %10395 = vmatmul.mubr.msk.bf16.gmra.mxu1 %vm1447_vm0, %v11920_v24  ;;  %v11969_v11 = vld [vmem:[%s16229_s9 + $0x180] ss:$8 sps:$4 sm:$0xff]  }
 0x609   : > { %5229 = vmatpush1.bf16.msra.mxu1 %v11917_v54  ;;  %5411 = vmatprep.subr.bf16.mxu0 %v11947_v61  ;;  %v11974_v61 = vld [vmem:[%s16229_s9 + $0x174] ss:$8 sps:$4 sm:$0xff]  }
 0x60a   : > { %5230 = vmatprep.subr.bf16.mxu1 %v11923_v4 }
 0x60b   : > { %5412 = vmatpush1.bf16.msra.mxu0 %v11945_v53 }
 0x60c   : > { %5413 = vmatprep.subr.bf16.mxu0 %v11950_v12 }
 0x60d   : > { %5231 = vmatpush1.bf16.msra.mxu1 %v11921_v26 }
 0x60e   : > { %5244 = vmatprep.subr.bf16.mxu1 %v11926_v37  ;;  %v11972_v37 = vld [vmem:[%s16229_s9 + $0x170] ss:$8 sps:$4 sm:$0xff]  }
 0x60f   : > { %5414 = vmatpush1.bf16.msra.mxu0 %v11948_v52 }
 0x610   : > { %5415 = vmatprep.subr.bf16.mxu0 %v11953_v25 }
 0x611   : > { %5245 = vmatpush2.bf16.msra.mxu1 %v11924_v9 }
 0x612   : > { %5246 = vmatprep.subr.bf16.mxu1 %v11929_v48 }
 0x613   : > { %5416 = vmatpush1.bf16.msra.mxu0 %v11951_v30  ;;  %v11977_v30 = vld [vmem:[%s16229_s9 + $0x164] ss:$8 sps:$4 sm:$0xff]  }
 0x614   : > { %5429 = vmatprep.subr.bf16.mxu0 %v11956_v49  ;;  %v11975_v49 = vld [vmem:[%s16229_s9 + $0x160] ss:$8 sps:$4 sm:$0xff]  }
 0x615   : > { %5247 = vmatpush2.bf16.msra.mxu1 %v11927_v22 }
 0x616   : > { %5523 = vmatprep.subr.bf16.mxu1 %v14403_v2 }
 0x617   : > { %5430 = vmatpush2.bf16.msra.mxu0 %v11954_v10 }
 0x618   : > { %5431 = vmatprep.subr.bf16.mxu0 %v11959_v14 }
 0x61b   : > { %5432 = vmatpush2.bf16.msra.mxu0 %v11957_v42 }
 0x61c   : > { %5729 = vmatprep.subr.bf16.mxu0 %v11962_v19  ;;  %v11980_v19 = vld [vmem:[%s16229_s9 + $0x154] ss:$8 sps:$4 sm:$0xff]  }
 0x6b0   : > { %v4893_v28 = vpop.f32.mrf.mxu1  ;;  %v5035_v46 = vpop.f32.mrf.mxu0 }
 0x6b2   : > { %v4895_v8 = vpop.f32.mrf.mxu1  ;;  %v5037_v59 = vpop.f32.mrf.mxu0 }
 0x6b4   : > { %v4897_v44 = vpop.f32.mrf.mxu1  ;;  %v5039_v15 = vpop.f32.mrf.mxu0 }
 0x6b5   : > { %v4932_v56 = vpack.c.bf16 %v4897_v44, %v4893_v28  ;;  %v5074_v20 = vpack.c.bf16 %v5039_v15, %v5035_v46  ;;  %v11978_v44 = vld [vmem:[%s16229_s9 + $0x150] ss:$8 sps:$4 sm:$0xff]  }
 0x6b6   : > { %v4899_v7 = vpop.f32.mrf.mxu1  ;;  %v5041_v35 = vpop.f32.mrf.mxu0 }
 0x6b7   : > { %v4933_v40 = vpack.c.bf16 %v4899_v7, %v4895_v8  ;;  %v5075_v36 = vpack.c.bf16 %v5041_v35, %v5037_v59  ;;  %v11983_v7 = vld [vmem:[%s16229_s9 + $0x144] ss:$8 sps:$4 sm:$0xff]   ;;  %v11981_v35 = vld [vmem:[%s16229_s9 + $0x140] ss:$8 sps:$4 sm:$0xff]  }
 0x6b8   : > { %v5045_v50 = vpop.f32.mrf.mxu0  ;;  %v4903_v47 = vpop.f32.mrf.mxu1 }
 0x6b9   : > { %10444 = vmatprep.mubr.msk.bf16.mxu1 %vm5203_vm1, %v5075_v36  ;;  %10468 = vmatprep.mubr.msk.bf16.mxu0 %vm5203_vm1, %v4933_v40  ;;  %v11986_v40 = vld [vmem:[%s16229_s9 + $0x1d4] ss:$8 sps:$4 sm:$0xff]   ;;  %v11987_v36 = vld [vmem:[#allocation5 + $0x40] sm:$0xff]  }
 0x6ba   : > { %v5047_v57 = vpop.f32.mrf.mxu0  ;;  %5249 = vmatmul.mubr.bf16.vlgmr.msra.gmra.mxu1 %v5074_v20  ;;  %5434 = vmatmul.mubr.bf16.vlgmr.msra.gmra.mxu0 %v4932_v56  ;;  %v4905_v29 = vpop.f32.mrf.mxu1  ;;  %v11990_v20 = vld [vmem:[%s16229_s9 + $0x1c4] ss:$8 sps:$4 sm:$0xff]  }
 0x6bb   : > { %5524 = vmatpush1.bf16.msra.mxu1 %v14400_v34  ;;  %5730 = vmatpush1.bf16.msra.mxu0 %v11960_v3  ;;  %v11984_v3 = vld [vmem:[%s16229_s9 + $0x1d0] ss:$8 sps:$4 sm:$0xff]  }
 0x6bc   : > { %5525 = vmatprep.subr.bf16.mxu1 %v14405_v41  ;;  %v5049_v33 = vpop.f32.mrf.mxu0  ;;  %5731 = vmatprep.subr.bf16.mxu0 %v11965_v23  ;;  %v4907_v13 = vpop.f32.mrf.mxu1  ;;  %v11996_v23 = vld [vmem:[%s16229_s9 + $0x254] ss:$8 sps:$4 sm:$0xff]  }
 0x6bd   : > { %v4934_v38 = vpack.c.bf16 %v4907_v13, %v4903_v47  ;;  %v5076_v31 = vpack.c.bf16 %v5049_v33, %v5045_v50  ;;  %v11988_v50 = vld [vmem:[%s16229_s9 + $0x1c0] ss:$8 sps:$4 sm:$0xff]   ;;  %v11994_v33 = vld [vmem:[%s16229_s9 + $0x250] ss:$8 sps:$4 sm:$0xff]   ;;  %v12000_v13 = vld [vmem:[%s16229_s9 + $0x244] ss:$8 sps:$4 sm:$0xff]  }
 0x6be   : > { %v5051_v60 = vpop.f32.mrf.mxu0  ;;  %v4909_v27 = vpop.f32.mrf.mxu1  ;;  %v11991_v47 = vld [vmem:[#allocation5 + $0x48] sm:$0xff]  }
 0x6bf   : > { %v5077_v43 = vpack.c.bf16 %v5051_v60, %v5047_v57  ;;  %5526 = vmatpush1.bf16.msra.mxu1 %v14384_v6  ;;  %5732 = vmatpush1.bf16.msra.mxu0 %v11963_v21  ;;  %v4935_v5 = vpack.c.bf16 %v4909_v27, %v4905_v29  ;;  %v11992_v57 = vld [vmem:[#allocation5 + $0x50] sm:$0xff]   ;;  %v11993_v29 = vld [vmem:[#allocation5 + $0x58] sm:$0xff]   ;;  %v11997_v21 = vld [vmem:[#allocation5 + $0x60] sm:$0xff]  }
 0x6c0   : > { %5527 = vmatprep.subr.bf16.mxu1 %v14413_v18  ;;  %v5055_v39 = vpop.f32.mrf.mxu0  ;;  %5733 = vmatprep.subr.bf16.mxu0 %v11968_v58  ;;  %v4913_v62 = vpop.f32.mrf.mxu1  ;;  %v11998_v58 = vld [vmem:[%s16229_s9 + $0x240] ss:$8 sps:$4 sm:$0xff]   ;;  %v12003_v60 = vld [vmem:[%s16229_s9 + $0x234] ss:$8 sps:$4 sm:$0xff]   ;;  %v12001_v27 = vld [vmem:[%s16229_s9 + $0x230] ss:$8 sps:$4 sm:$0xff]  }
 0x6c1   : > { %10445 = vmatprep.mubr.msk.bf16.mxu1 %vm5203_vm1, %v5077_v43  ;;  %10469 = vmatprep.mubr.msk.bf16.mxu0 %vm5203_vm1, %v4935_v5  ;;  %v12007_v43 = vld [vmem:[%s16229_s9 + $0x224] ss:$8 sps:$4 sm:$0xff]   ;;  %v12010_v5 = vld [vmem:[%s16229_s9 + $0x214] ss:$8 sps:$4 sm:$0xff]  }
 0x6c2   : > { %v5057_v55 = vpop.f32.mrf.mxu0  ;;  %5259 = vmatmul.mubr.bf16.gmra.mxu1 %v5076_v31  ;;  %v4915_v1 = vpop.f32.mrf.mxu1  ;;  %5444 = vmatmul.mubr.bf16.gmra.mxu0 %v4934_v38  ;;  %v12004_v38 = vld [vmem:[#allocation5 + $0x68] sm:$0xff]   ;;  %v12011_v31 = vld [vmem:[#allocation5 + $0x70] sm:$0xff]  }
 0x6c3   : > { %5528 = vmatpush1.bf16.msra.mxu1 %v14360_v63  ;;  %5734 = vmatpush1.bf16.msra.mxu0 %v11966_v32  ;;  %v12005_v32 = vld [vmem:[%s16229_s9 + $0x220] ss:$8 sps:$4 sm:$0xff]  }
 0x6c4   : > { %5529 = vmatprep.subr.bf16.mxu1 %v14419_v17  ;;  %v5059_v24 = vpop.f32.mrf.mxu0  ;;  %5735 = vmatprep.subr.bf16.mxu0 %v11971_v16  ;;  %v4917_v54 = vpop.f32.mrf.mxu1  ;;  %v12012_v16 = vld [vmem:[%s16229_s9 + $0x200] ss:$8 sps:$4 sm:$0xff]  }
 0x6c5   : > { %v4936_v53 = vpack.c.bf16 %v4917_v54, %v4913_v62  ;;  %v5078_v25 = vpack.c.bf16 %v5059_v24, %v5055_v39  ;;  %v12008_v39 = vld [vmem:[%s16229_s9 + $0x210] ss:$8 sps:$4 sm:$0xff]   ;;  %v12014_v62 = vld [vmem:[%s16229_s9 + $0x204] ss:$8 sps:$4 sm:$0xff]   ;;  %v12019_v54 = vld [vmem:[%s16229_s9 + $0x1e0] ss:$8 sps:$4 sm:$0xff]  }
 0x6c6   : > { %v5061_v4 = vpop.f32.mrf.mxu0  ;;  %v4919_v12 = vpop.f32.mrf.mxu1  ;;  %v12021_v24 = vld [vmem:[%s16229_s9 + $0x1e4] ss:$8 sps:$4 sm:$0xff]  }
 0x6c7   : > { %v5079_v26 = vpack.c.bf16 %v5061_v4, %v5057_v55  ;;  %5530 = vmatpush1.bf16.msra.mxu1 %v14346_v51  ;;  %5736 = vmatpush1.bf16.msra.mxu0 %v11969_v11  ;;  %v4937_v52 = vpack.c.bf16 %v4919_v12, %v4915_v1  ;;  %v12017_v55 = vld [vmem:[%s16229_s9 + $0x1f4] ss:$8 sps:$4 sm:$0xff]   ;;  %v12015_v11 = vld [vmem:[%s16229_s9 + $0x1f0] ss:$8 sps:$4 sm:$0xff]   ;;  %v12025_v12 = vld [vmem:[%s16229_s9 + $0x260] ss:$8 sps:$4 sm:$0xff]  }
 0x6c8   : > { %5867 = vmatprep.subr.bf16.mxu1 %v14403_v2  ;;  %v5065_v9 = vpop.f32.mrf.mxu0  ;;  %5737 = vmatprep.subr.bf16.mxu0 %v11974_v61  ;;  %v4923_v48 = vpop.f32.mrf.mxu1  ;;  %v12018_v1 = vld [vmem:[#allocation5 + $0x78] sm:$0xff]  }
 0x6c9   : > { %10446 = vmatprep.mubr.msk.bf16.mxu1 %vm5203_vm1, %v5079_v26  ;;  %10470 = vmatprep.mubr.msk.bf16.mxu0 %vm5203_vm1, %v4937_v52  ;;  %v12024_v61 = vld [vmem:[%s16229_s9 + $0x274] ss:$8 sps:$4 sm:$0xff]   ;;  %v12022_v4 = vld [vmem:[%s16229_s9 + $0x270] ss:$8 sps:$4 sm:$0xff]  }
 0x6ca   : > { %v5067_v22 = vpop.f32.mrf.mxu0  ;;  %5269 = vmatmul.mubr.bf16.gmra.mxu1 %v5078_v25  ;;  %v4925_v10 = vpop.f32.mrf.mxu1  ;;  %5454 = vmatmul.mubr.bf16.gmra.mxu0 %v4936_v53  ;;  %v12027_v53 = vld [vmem:[%s16229_s9 + $0x264] ss:$8 sps:$4 sm:$0xff]  }
 0x6cb   : > { %5738 = vmatpush1.bf16.msra.mxu0 %v11972_v37 }
 0x6cc   : > { %v5069_v14 = vpop.f32.mrf.mxu0  ;;  %5739 = vmatprep.subr.bf16.mxu0 %v11977_v30  ;;  %v4927_v42 = vpop.f32.mrf.mxu1 }
 0x6cd   : > { %v4938_v46 = vpack.c.bf16 %v4927_v42, %v4923_v48  ;;  %v5080_v56 = vpack.c.bf16 %v5069_v14, %v5065_v9 }
 0x6ce   : > { %v5071_v28 = vpop.f32.mrf.mxu0  ;;  %v4929_v8 = vpop.f32.mrf.mxu1 }
 0x6cf   : > { %v5081_v59 = vpack.c.bf16 %v5071_v28, %v5067_v22  ;;  %5740 = vmatpush1.bf16.msra.mxu0 %v11975_v49  ;;  %v4939_v15 = vpack.c.bf16 %v4929_v8, %v4925_v10 }
 0x6d0   : > { %5741 = vmatprep.subr.bf16.mxu0 %v11980_v19 }
 0x6d1   : > { %10447 = vmatprep.mubr.msk.bf16.mxu1 %vm5203_vm1, %v5081_v59  ;;  %10471 = vmatprep.mubr.msk.bf16.mxu0 %vm5203_vm1, %v4939_v15 }
 0x6d2   : > { %5279 = vmatmul.mubr.bf16.gmra.mxu1 %v5080_v56  ;;  %5464 = vmatmul.mubr.bf16.gmra.mxu0 %v4938_v46 }
 0x6d3   : > { %5742 = vmatpush1.bf16.msra.mxu0 %v11978_v44  ;;  %5547 = vmatprep.mubr.bf16.mxu1 %v16312_v0 }
 0x6d4   : > { %5743 = vmatprep.subr.bf16.mxu0 %v11983_v7 }
 0x6d7   : > { %5744 = vmatpush1.bf16.msra.mxu0 %v11981_v35 }
 0x6d8   : > { %5757 = vmatprep.subr.bf16.mxu0 %v11986_v40 }
 0x6da   : > { %10476 = vmatmul.mubr.msk.bf16.vlgmr.msra.gmra.mxu1 %vm1447_vm0, %v11987_v36 }
 0x6db   : > { %5758 = vmatpush2.bf16.msra.mxu0 %v11984_v3  ;;  %5868 = vmatpush1.bf16.msra.mxu1 %v14400_v34 }
 0x6dc   : > { %5869 = vmatprep.subr.bf16.mxu1 %v14405_v41  ;;  %5759 = vmatprep.subr.bf16.mxu0 %v11990_v20 }
 0x6dd   : > { %5557 = vmatprep.mubr.bf16.mxu1 %v16312_v0 }
 0x6df   : > { %5760 = vmatpush2.bf16.msra.mxu0 %v11988_v50  ;;  %5870 = vmatpush1.bf16.msra.mxu1 %v14384_v6 }
 0x6e0   : > { %5871 = vmatprep.subr.bf16.mxu1 %v14413_v18  ;;  %6211 = vmatprep.subr.bf16.mxu0 %v14403_v2 }
 0x6e2   : > { %10477 = vmatmul.mubr.msk.bf16.gmra.mxu1 %vm1447_vm0, %v11991_v47 }
 0x6e3   : > { %5872 = vmatpush1.bf16.msra.mxu1 %v14360_v63  ;;  %5567 = vmatprep.mubr.bf16.mxu1 %v16312_v0 }
 0x6e4   : > { %5873 = vmatprep.subr.bf16.mxu1 %v14419_v17 }
 0x6e7   : > { %5874 = vmatpush1.bf16.msra.mxu1 %v14346_v51 }
 0x6e8   : > { %6073 = vmatprep.subr.bf16.mxu1 %v11996_v23 }
 0x6ea   : > { %10478 = vmatmul.mubr.msk.bf16.gmra.mxu1 %vm1447_vm0, %v11992_v57 }
 0x6eb   : > { %5577 = vmatprep.mubr.bf16.mxu1 %v16312_v0 }
 0x6f2   : > { %10479 = vmatmul.mubr.msk.bf16.gmra.mxu1 %vm1447_vm0, %v11993_v29 }
 0x6f3   : > { %5891 = vmatprep.mubr.bf16.mxu1 %v16312_v0 }
 0x6fa   : > { %10528 = vmatmul.mubr.msk.bf16.vlgmr.msra.gmra.mxu1 %vm1447_vm0, %v11997_v21 }
 0x6fb   : > { %6074 = vmatpush1.bf16.msra.mxu1 %v11994_v33  ;;  %5901 = vmatprep.mubr.bf16.mxu1 %v16312_v0 }
 0x6fc   : > { %6075 = vmatprep.subr.bf16.mxu1 %v12000_v13 }
 0x6ff   : > { %6076 = vmatpush1.bf16.msra.mxu1 %v11998_v58 }
 0x700   : > { %6077 = vmatprep.subr.bf16.mxu1 %v12003_v60 }
 0x702   : > { %10529 = vmatmul.mubr.msk.bf16.gmra.mxu1 %vm1447_vm0, %v12004_v38 }
 0x703   : > { %6078 = vmatpush1.bf16.msra.mxu1 %v12001_v27  ;;  %5911 = vmatprep.mubr.bf16.mxu1 %v16312_v0 }
 0x704   : > { %6079 = vmatprep.subr.bf16.mxu1 %v12007_v43 }
 0x707   : > { %6080 = vmatpush1.bf16.msra.mxu1 %v12005_v32 }
 0x708   : > { %6081 = vmatprep.subr.bf16.mxu1 %v12010_v5 }
 0x70a   : > { %10530 = vmatmul.mubr.msk.bf16.gmra.mxu1 %vm1447_vm0, %v12011_v31 }
 0x70b   : > { %6082 = vmatpush1.bf16.msra.mxu1 %v12008_v39  ;;  %5921 = vmatprep.mubr.bf16.mxu1 %v16312_v0 }
 0x70c   : > { %6083 = vmatprep.subr.bf16.mxu1 %v12014_v62 }
 0x70f   : > { %6084 = vmatpush1.bf16.msra.mxu1 %v12012_v16 }
 0x710   : > { %6085 = vmatprep.subr.bf16.mxu1 %v12017_v55 }
 0x712   : > { %10531 = vmatmul.mubr.msk.bf16.gmra.mxu1 %vm1447_vm0, %v12018_v1 }
 0x713   : > { %6086 = vmatpush1.bf16.msra.mxu1 %v12015_v11 }
 0x714   : > { %6087 = vmatprep.subr.bf16.mxu1 %v12021_v24 }
 0x717   : > { %6088 = vmatpush1.bf16.msra.mxu1 %v12019_v54 }
 0x718   : > { %6101 = vmatprep.subr.bf16.mxu1 %v12024_v61 }
 0x71b   : > { %6102 = vmatpush2.bf16.msra.mxu1 %v12022_v4 }
 0x71c   : > { %6103 = vmatprep.subr.bf16.mxu1 %v12027_v53 }
 0x71f   : > { %6104 = vmatpush2.bf16.msra.mxu1 %v12025_v12 }
 0x720   : > { %6555 = vmatprep.subr.bf16.mxu1 %v14403_v2 }
 0x77a   : > { %v5250_v26 = vpop.f32.mrf.mxu1  ;;  %v5435_v37 = vpop.f32.mrf.mxu0 }
 0x77b   : > { %v14723_v52 = vadd.f32 %v5435_v37, %v5250_v26 }
 0x77c   : > { %v5252_v25 = vpop.f32.mrf.mxu1  ;;  %v5437_v9 = vpop.f32.mrf.mxu0 }
 0x77d   : > { %v14725_v48 = vadd.f32 %v5437_v9, %v5252_v25 }
 0x77e   : > { %v5254_v30 = vpop.f32.mrf.mxu1  ;;  %v5439_v22 = vpop.f32.mrf.mxu0 }
 0x77f   : > { %v14727_v10 = vadd.f32 %v5439_v22, %v5254_v30  ;;  %v12030_v30 = vld [vmem:[%s16229_s9 + $0x2f4] ss:$8 sps:$4 sm:$0xff]  }
 0x780   : > { %v14729_v49 = vpop.f32.mrf.mxu1  ;;  %v14731_v14 = vpop.f32.mrf.mxu0 }
 0x782   : > { %v5260_v42 = vpop.f32.mrf.mxu1  ;;  %v5445_v19 = vpop.f32.mrf.mxu0 }
 0x783   : > { %v14733_v28 = vadd.f32 %v5445_v19, %v5260_v42 }
 0x784   : > { %v5262_v46 = vpop.f32.mrf.mxu1  ;;  %v5447_v8 = vpop.f32.mrf.mxu0 }
 0x785   : > { %v14735_v59 = vadd.f32 %v5447_v8, %v5262_v46 }
 0x786   : > { %v5264_v44 = vpop.f32.mrf.mxu1  ;;  %v5449_v15 = vpop.f32.mrf.mxu0 }
 0x787   : > { %v14737_v56 = vadd.f32 %v5449_v15, %v5264_v44 }
 0x788   : > { %v14739_v7 = vpop.f32.mrf.mxu1  ;;  %v14741_v35 = vpop.f32.mrf.mxu0 }
 0x78a   : > { %v5270_v40 = vpop.f32.mrf.mxu1  ;;  %v5455_v36 = vpop.f32.mrf.mxu0 }
 0x78b   : > { %v14743_v3 = vadd.f32 %v5455_v36, %v5270_v40 }
 0x78c   : > { %v5272_v20 = vpop.f32.mrf.mxu1  ;;  %v5457_v50 = vpop.f32.mrf.mxu0 }
 0x78d   : > { %v14745_v47 = vadd.f32 %v5457_v50, %v5272_v20 }
 0x78e   : > { %v5274_v23 = vpop.f32.mrf.mxu1  ;;  %v5459_v57 = vpop.f32.mrf.mxu0 }
 0x78f   : > { %v14747_v29 = vadd.f32 %v5459_v57, %v5274_v23 }
 0x790   : > { %v14749_v21 = vpop.f32.mrf.mxu1  ;;  %v14751_v33 = vpop.f32.mrf.mxu0 }
 0x792   : > { %v5280_v13 = vpop.f32.mrf.mxu1  ;;  %v5465_v58 = vpop.f32.mrf.mxu0 }
 0x793   : > { %v14753_v60 = vadd.f32 %v5465_v58, %v5280_v13  ;;  %v12031_v58 = vld [vmem:[#allocation5 + $0x80] sm:$0xff]  }
 0x794   : > { %v5282_v38 = vpop.f32.mrf.mxu1  ;;  %v5467_v27 = vpop.f32.mrf.mxu0 }
 0x795   : > { %v14755_v43 = vadd.f32 %v5467_v27, %v5282_v38  ;;  %v12028_v27 = vld [vmem:[%s16229_s9 + $0x2f0] ss:$8 sps:$4 sm:$0xff]  }
 0x796   : > { %v5284_v32 = vpop.f32.mrf.mxu1  ;;  %v5469_v5 = vpop.f32.mrf.mxu0 }
 0x797   : > { %v14757_v31 = vadd.f32 %v5469_v5, %v5284_v32  ;;  %v12034_v5 = vld [vmem:[%s16229_s9 + $0x2e4] ss:$8 sps:$4 sm:$0xff]  }
 0x798   : > { %v14759_v39 = vpop.f32.mrf.mxu1 }
 0x79a   : > { %v5549_v62 = vpop.f32.mrf.mxu1 }
 0x79c   : > { %v5551_v16 = vpop.f32.mrf.mxu1 }
 0x79e   : > { %v5553_v55 = vpop.f32.mrf.mxu1 }
 0x79f   : > { %v5588_v24 = vpack.c.bf16 %v5553_v55, %v5549_v62 }
 0x7a0   : > { %v5555_v1 = vpop.f32.mrf.mxu1 }
 0x7a1   : > { %v5589_v11 = vpack.c.bf16 %v5555_v1, %v5551_v16  ;;  %v12032_v16 = vld [vmem:[%s16229_s9 + $0x2e0] ss:$8 sps:$4 sm:$0xff]   ;;  %v12037_v1 = vld [vmem:[%s16229_s9 + $0x2d4] ss:$8 sps:$4 sm:$0xff]  }
 0x7a2   : > { %v5559_v54 = vpop.f32.mrf.mxu1 }
 0x7a3   : > { %10520 = vmatprep.mubr.msk.bf16.mxu0 %vm5203_vm1, %v5589_v11 }
 0x7a4   : > { %v5561_v61 = vpop.f32.mrf.mxu1  ;;  %5762 = vmatmul.mubr.bf16.vlgmr.msra.gmra.mxu0 %v5588_v24 }
 0x7a5   : > { %6212 = vmatpush1.bf16.msra.mxu0 %v14400_v34 }
 0x7a6   : > { %6213 = vmatprep.subr.bf16.mxu0 %v14405_v41  ;;  %v5563_v4 = vpop.f32.mrf.mxu1 }
 0x7a7   : > { %v5590_v26 = vpack.c.bf16 %v5563_v4, %v5559_v54  ;;  %v12038_v54 = vld [vmem:[#allocation5 + $0x88] sm:$0xff]   ;;  %v12035_v4 = vld [vmem:[%s16229_s9 + $0x2d0] ss:$8 sps:$4 sm:$0xff]  }
 0x7a8   : > { %v5565_v53 = vpop.f32.mrf.mxu1 }
 0x7a9   : > { %v5591_v12 = vpack.c.bf16 %v5565_v53, %v5561_v61  ;;  %6214 = vmatpush1.bf16.msra.mxu0 %v14384_v6 }
 0x7aa   : > { %6215 = vmatprep.subr.bf16.mxu0 %v14413_v18  ;;  %v5569_v37 = vpop.f32.mrf.mxu1 }
 0x7ab   : > { %10521 = vmatprep.mubr.msk.bf16.mxu0 %vm5203_vm1, %v5591_v12  ;;  %v12041_v12 = vld [vmem:[%s16229_s9 + $0x2c4] ss:$8 sps:$4 sm:$0xff]  }
 0x7ac   : > { %v5571_v25 = vpop.f32.mrf.mxu1  ;;  %5772 = vmatmul.mubr.bf16.gmra.mxu0 %v5590_v26 }
 0x7ad   : > { %6216 = vmatpush1.bf16.msra.mxu0 %v14360_v63 }
 0x7ae   : > { %6217 = vmatprep.subr.bf16.mxu0 %v14419_v17  ;;  %v5573_v9 = vpop.f32.mrf.mxu1 }
 0x7af   : > { %v5592_v19 = vpack.c.bf16 %v5573_v9, %v5569_v37  ;;  %v12039_v37 = vld [vmem:[%s16229_s9 + $0x2c0] ss:$8 sps:$4 sm:$0xff]   ;;  %v12044_v9 = vld [vmem:[%s16229_s9 + $0x2b4] ss:$8 sps:$4 sm:$0xff]  }
 0x7b0   : > { %v5575_v22 = vpop.f32.mrf.mxu1 }
 0x7b1   : > { %v5593_v42 = vpack.c.bf16 %v5575_v22, %v5571_v25  ;;  %6218 = vmatpush1.bf16.msra.mxu0 %v14346_v51 }
 0x7b2   : > { %v5579_v46 = vpop.f32.mrf.mxu1  ;;  %6417 = vmatprep.subr.bf16.mxu0 %v12030_v30 }
 0x7b3   : > { %10522 = vmatprep.mubr.msk.bf16.mxu0 %vm5203_vm1, %v5593_v42  ;;  %v12045_v42 = vld [vmem:[#allocation5 + $0x90] sm:$0xff]  }
 0x7b4   : > { %v5581_v8 = vpop.f32.mrf.mxu1  ;;  %5782 = vmatmul.mubr.bf16.gmra.mxu0 %v5592_v19 }
 0x7b6   : > { %v5583_v44 = vpop.f32.mrf.mxu1 }
 0x7b7   : > { %v5594_v36 = vpack.c.bf16 %v5583_v44, %v5579_v46  ;;  %v12042_v46 = vld [vmem:[%s16229_s9 + $0x2b0] ss:$8 sps:$4 sm:$0xff]   ;;  %v12048_v44 = vld [vmem:[%s16229_s9 + $0x2a4] ss:$8 sps:$4 sm:$0xff]  }
 0x7b8   : > { %v5585_v15 = vpop.f32.mrf.mxu1 }
 0x7b9   : > { %v5595_v40 = vpack.c.bf16 %v5585_v15, %v5581_v8 }
 0x7ba   : > { %v5893_v20 = vpop.f32.mrf.mxu1 }
 0x7bb   : > { %10523 = vmatprep.mubr.msk.bf16.mxu0 %vm5203_vm1, %v5595_v40  ;;  %v12046_v40 = vld [vmem:[%s16229_s9 + $0x2a0] ss:$8 sps:$4 sm:$0xff]  }
 0x7bc   : > { %5792 = vmatmul.mubr.bf16.gmra.mxu0 %v5594_v36  ;;  %v5895_v50 = vpop.f32.mrf.mxu1 }
 0x7bd   : > { %6235 = vmatprep.mubr.bf16.mxu0 %v16312_v0 }
 0x7be   : > { %v5897_v23 = vpop.f32.mrf.mxu1 }
 0x7bf   : > { %v5932_v57 = vpack.c.bf16 %v5897_v23, %v5893_v20  ;;  %v12051_v20 = vld [vmem:[%s16229_s9 + $0x294] ss:$8 sps:$4 sm:$0xff]  }
 0x7c0   : > { %v5899_v13 = vpop.f32.mrf.mxu1 }
 0x7c1   : > { %v5933_v38 = vpack.c.bf16 %v5899_v13, %v5895_v50 }
 0x7c2   : > { %v5903_v32 = vpop.f32.mrf.mxu1 }
 0x7c3   : > { %10572 = vmatprep.mubr.msk.bf16.mxu1 %vm5203_vm1, %v5933_v38  ;;  %v12055_v38 = vld [vmem:[%s16229_s9 + $0x284] ss:$8 sps:$4 sm:$0xff]  }
 0x7c4   : > { %v5905_v62 = vpop.f32.mrf.mxu1  ;;  %6106 = vmatmul.mubr.bf16.vlgmr.msra.gmra.mxu1 %v5932_v57  ;;  %10580 = vmatmul.mubr.msk.bf16.vlgmr.msra.gmra.mxu0 %vm1447_vm0, %v12031_v58  ;;  %v12052_v57 = vld [vmem:[#allocation5 + $0x98] sm:$0xff]  }
 0x7c5   : > { %6418 = vmatpush1.bf16.msra.mxu0 %v12028_v27  ;;  %6556 = vmatpush1.bf16.msra.mxu1 %v14400_v34  ;;  %v12049_v58 = vld [vmem:[%s16229_s9 + $0x290] ss:$8 sps:$4 sm:$0xff]   ;;  %v12053_v27 = vld [vmem:[%s16229_s9 + $0x280] ss:$8 sps:$4 sm:$0xff]  }
 0x7c6   : > { %6557 = vmatprep.subr.bf16.mxu1 %v14405_v41  ;;  %v5907_v55 = vpop.f32.mrf.mxu1  ;;  %6419 = vmatprep.subr.bf16.mxu0 %v12034_v5  ;;  %v12059_v5 = vld [vmem:[#allocation5 + $0xa0] sm:$0xff]  }
 0x7c7   : > { %6245 = vmatprep.mubr.bf16.mxu0 %v16312_v0  ;;  %v5934_v11 = vpack.c.bf16 %v5907_v55, %v5903_v32  ;;  %v12058_v32 = vld [vmem:[%s16229_s9 + $0x314] ss:$8 sps:$4 sm:$0xff]   ;;  %v12060_v55 = vld [vmem:[%s16229_s9 + $0x300] ss:$8 sps:$4 sm:$0xff]  }
 0x7c8   : > { %v5909_v24 = vpop.f32.mrf.mxu1 }
 0x7c9   : > { %v5935_v61 = vpack.c.bf16 %v5909_v24, %v5905_v62  ;;  %6420 = vmatpush1.bf16.msra.mxu0 %v12032_v16  ;;  %6558 = vmatpush1.bf16.msra.mxu1 %v14384_v6  ;;  %v12056_v62 = vld [vmem:[%s16229_s9 + $0x310] ss:$8 sps:$4 sm:$0xff]   ;;  %v12062_v16 = vld [vmem:[%s16229_s9 + $0x304] ss:$8 sps:$4 sm:$0xff]  }
 0x7ca   : > { %6559 = vmatprep.subr.bf16.mxu1 %v14413_v18  ;;  %v5913_v53 = vpop.f32.mrf.mxu1  ;;  %6421 = vmatprep.subr.bf16.mxu0 %v12037_v1  ;;  %v12063_v1 = vld [vmem:[#allocation5 + $0xa8] sm:$0xff]   ;;  %v12065_v24 = vld [vmem:[#allocation5 + $0xb8] sm:$0xff]  }
 0x7cb   : > { %10573 = vmatprep.mubr.msk.bf16.mxu1 %vm5203_vm1, %v5935_v61  ;;  %v12071_v61 = vld [vmem:[%s16229_s9 + $0x384] ss:$8 sps:$4 sm:$0xff]  }
 0x7cc   : > { %v5915_v26 = vpop.f32.mrf.mxu1  ;;  %6116 = vmatmul.mubr.bf16.gmra.mxu1 %v5934_v11  ;;  %10581 = vmatmul.mubr.msk.bf16.gmra.mxu0 %vm1447_vm0, %v12038_v54  ;;  %v12064_v11 = vld [vmem:[#allocation5 + $0xb0] sm:$0xff]  }
 0x7cd   : > { %6422 = vmatpush1.bf16.msra.mxu0 %v12035_v4  ;;  %6560 = vmatpush1.bf16.msra.mxu1 %v14360_v63  ;;  %v12068_v54 = vld [vmem:[%s16229_s9 + $0x394] ss:$8 sps:$4 sm:$0xff]   ;;  %v12069_v4 = vld [vmem:[%s16229_s9 + $0x380] ss:$8 sps:$4 sm:$0xff]  }
 0x7ce   : > { %6561 = vmatprep.subr.bf16.mxu1 %v14419_v17  ;;  %v5917_v25 = vpop.f32.mrf.mxu1  ;;  %6423 = vmatprep.subr.bf16.mxu0 %v12041_v12  ;;  %v12072_v12 = vld [vmem:[%s16229_s9 + $0x370] ss:$8 sps:$4 sm:$0xff]  }
 0x7cf   : > { %6255 = vmatprep.mubr.bf16.mxu0 %v16312_v0  ;;  %v5936_v30 = vpack.c.bf16 %v5917_v25, %v5913_v53  ;;  %v12074_v53 = vld [vmem:[%s16229_s9 + $0x374] ss:$8 sps:$4 sm:$0xff]  }
 0x7d0   : > { %v5919_v22 = vpop.f32.mrf.mxu1  ;;  %v12080_v25 = vld [vmem:[%s16229_s9 + $0x354] ss:$8 sps:$4 sm:$0xff]  }
 0x7d1   : > { %v5937_v19 = vpack.c.bf16 %v5919_v22, %v5915_v26  ;;  %6424 = vmatpush1.bf16.msra.mxu0 %v12039_v37  ;;  %6562 = vmatpush1.bf16.msra.mxu1 %v14346_v51  ;;  %v12077_v26 = vld [vmem:[%s16229_s9 + $0x364] ss:$8 sps:$4 sm:$0xff]   ;;  %v12075_v37 = vld [vmem:[%s16229_s9 + $0x360] ss:$8 sps:$4 sm:$0xff]  }
 0x7d2   : > { %v5923_v8 = vpop.f32.mrf.mxu1  ;;  %6425 = vmatprep.subr.bf16.mxu0 %v12044_v9  ;;  %6761 = vmatprep.subr.bf16.mxu1 %v12068_v54  ;;  %v12078_v9 = vld [vmem:[%s16229_s9 + $0x350] ss:$8 sps:$4 sm:$0xff]   ;;  %v12081_v22 = vld [vmem:[%s16229_s9 + $0x340] ss:$8 sps:$4 sm:$0xff]  }
 0x7d3   : > { %10574 = vmatprep.mubr.msk.bf16.mxu1 %vm5203_vm1, %v5937_v19  ;;  %v12084_v19 = vld [vmem:[%s16229_s9 + $0x330] ss:$8 sps:$4 sm:$0xff]  }
 0x7d4   : > { %v5925_v15 = vpop.f32.mrf.mxu1  ;;  %6126 = vmatmul.mubr.bf16.gmra.mxu1 %v5936_v30  ;;  %10582 = vmatmul.mubr.msk.bf16.gmra.mxu0 %vm1447_vm0, %v12045_v42  ;;  %v12083_v30 = vld [vmem:[%s16229_s9 + $0x344] ss:$8 sps:$4 sm:$0xff]   ;;  %v12086_v42 = vld [vmem:[%s16229_s9 + $0x334] ss:$8 sps:$4 sm:$0xff]  }
 0x7d5   : > { %6426 = vmatpush1.bf16.msra.mxu0 %v12042_v46  ;;  %6265 = vmatprep.mubr.bf16.mxu0 %v16312_v0  ;;  %v12089_v46 = vld [vmem:[%s16229_s9 + $0x324] ss:$8 sps:$4 sm:$0xff]  }
 0x7d6   : > { %v5927_v36 = vpop.f32.mrf.mxu1  ;;  %6427 = vmatprep.subr.bf16.mxu0 %v12048_v44  ;;  %v12092_v44 = vld [vmem:[%s16229_s9 + $0x3b4] ss:$8 sps:$4 sm:$0xff]  }
 0x7d7   : > { %v5938_v50 = vpack.c.bf16 %v5927_v36, %v5923_v8  ;;  %v12087_v8 = vld [vmem:[%s16229_s9 + $0x320] ss:$8 sps:$4 sm:$0xff]  }
 0x7d8   : > { %v5929_v23 = vpop.f32.mrf.mxu1  ;;  %v12093_v36 = vld [vmem:[%s16229_s9 + $0x3a0] ss:$8 sps:$4 sm:$0xff]  }
 0x7d9   : > { %v5939_v13 = vpack.c.bf16 %v5929_v23, %v5925_v15  ;;  %6428 = vmatpush1.bf16.msra.mxu0 %v12046_v40  ;;  %v12090_v15 = vld [vmem:[%s16229_s9 + $0x3b0] ss:$8 sps:$4 sm:$0xff]   ;;  %v12095_v40 = vld [vmem:[%s16229_s9 + $0x3a4] ss:$8 sps:$4 sm:$0xff]  }
 0x7da   : > { %6429 = vmatprep.subr.bf16.mxu0 %v12051_v20  ;;  %v14920_v20 = vpop.f32.mrf.mxu0 }
 0x7db   : > { %10575 = vmatprep.mubr.msk.bf16.mxu1 %vm5203_vm1, %v5939_v13 }
 0x7dc   : > { %6136 = vmatmul.mubr.bf16.gmra.mxu1 %v5938_v50  ;;  %10583 = vmatmul.mubr.msk.bf16.gmra.mxu0 %vm1447_vm0, %v12052_v57 }
 0x7dd   : > { %6430 = vmatpush1.bf16.msra.mxu0 %v12049_v58  ;;  %6579 = vmatprep.mubr.bf16.mxu1 %v16312_v0 }
 0x7de   : > { %6431 = vmatprep.subr.bf16.mxu0 %v12055_v38 }
 0x7e1   : > { %6432 = vmatpush1.bf16.msra.mxu0 %v12053_v27 }
 0x7e2   : > { %6445 = vmatprep.subr.bf16.mxu0 %v12058_v32 }
 0x7e4   : > { %10632 = vmatmul.mubr.msk.bf16.vlgmr.msra.gmra.mxu1 %vm1447_vm0, %v12059_v5 }
 0x7e5   : > { %6446 = vmatpush2.bf16.msra.mxu0 %v12056_v62  ;;  %6589 = vmatprep.mubr.bf16.mxu1 %v16312_v0 }
 0x7e6   : > { %6447 = vmatprep.subr.bf16.mxu0 %v12062_v16 }
 0x7e9   : > { %6448 = vmatpush2.bf16.msra.mxu0 %v12060_v55 }
 0x7ea   : > { %6899 = vmatprep.subr.bf16.mxu0 %v14403_v2  ;;  %v12066_v2 = vld [vmem:[%s16229_s9 + $0x390] ss:$8 sps:$4 sm:$0xff]  }
 0x7eb   : > { %6762 = vmatpush1.bf16.msra.mxu1 %v12066_v2 }
 0x7ec   : > { %10633 = vmatmul.mubr.msk.bf16.gmra.mxu1 %vm1447_vm0, %v12063_v1  ;;  %6763 = vmatprep.subr.bf16.mxu1 %v12071_v61 }
 0x7ed   : > { %6599 = vmatprep.mubr.bf16.mxu1 %v16312_v0 }
 0x7ef   : > { %6764 = vmatpush1.bf16.msra.mxu1 %v12069_v4 }
 0x7f0   : > { %6765 = vmatprep.subr.bf16.mxu1 %v12074_v53 }
 0x7f3   : > { %6766 = vmatpush1.bf16.msra.mxu1 %v12072_v12 }
 0x7f4   : > { %10634 = vmatmul.mubr.msk.bf16.gmra.mxu1 %vm1447_vm0, %v12064_v11  ;;  %6767 = vmatprep.subr.bf16.mxu1 %v12077_v26 }
 0x7f5   : > { %6609 = vmatprep.mubr.bf16.mxu1 %v16312_v0 }
 0x7f7   : > { %6768 = vmatpush1.bf16.msra.mxu1 %v12075_v37 }
 0x7f8   : > { %6769 = vmatprep.subr.bf16.mxu1 %v12080_v25 }
 0x7fb   : > { %6770 = vmatpush1.bf16.msra.mxu1 %v12078_v9 }
 0x7fc   : > { %10635 = vmatmul.mubr.msk.bf16.gmra.mxu1 %vm1447_vm0, %v12065_v24  ;;  %6771 = vmatprep.subr.bf16.mxu1 %v12083_v30 }
 0x7ff   : > { %6772 = vmatpush1.bf16.msra.mxu1 %v12081_v22 }
 0x800   : > { %6773 = vmatprep.subr.bf16.mxu1 %v12086_v42 }
 0x803   : > { %6774 = vmatpush1.bf16.msra.mxu1 %v12084_v19 }
 0x804   : > { %6775 = vmatprep.subr.bf16.mxu1 %v12089_v46 }
 0x807   : > { %6776 = vmatpush1.bf16.msra.mxu1 %v12087_v8 }
 0x808   : > { %6789 = vmatprep.subr.bf16.mxu1 %v12092_v44 }
 0x80b   : > { %6790 = vmatpush2.bf16.msra.mxu1 %v12090_v15 }
 0x80c   : > { %6791 = vmatprep.subr.bf16.mxu1 %v12095_v40 }
 0x80f   : > { %6792 = vmatpush2.bf16.msra.mxu1 %v12093_v36 }
 0x864   : > { %v5763_v50 = vpop.f32.mrf.mxu0 }
 0x865   : > { %v5802_v23 = vadd.f32 %v5763_v50, %v14723_v52 }
 0x866   : > { %v5765_v57 = vpop.f32.mrf.mxu0 }
 0x867   : > { %v5803_v13 = vadd.f32 %v5765_v57, %v14725_v48 }
 0x868   : > { %v5767_v58 = vpop.f32.mrf.mxu0 }
 0x869   : > { %v5804_v38 = vadd.f32 %v5767_v58, %v14727_v10 }
 0x86a   : > { %v14925_v27 = vpop.f32.mrf.mxu0 }
 0x86c   : > { %v5773_v32 = vpop.f32.mrf.mxu0 }
 0x86d   : > { %v5806_v5 = vadd.f32 %v5773_v32, %v14733_v28 }
 0x86e   : > { %v5775_v62 = vpop.f32.mrf.mxu0 }
 0x86f   : > { %v5807_v16 = vadd.f32 %v5775_v62, %v14735_v59 }
 0x870   : > { %v5777_v55 = vpop.f32.mrf.mxu0 }
 0x871   : > { %v5808_v1 = vadd.f32 %v5777_v55, %v14737_v56 }
 0x872   : > { %v14930_v11 = vpop.f32.mrf.mxu0 }
 0x874   : > { %v5783_v52 = vpop.f32.mrf.mxu0 }
 0x875   : > { %v5810_v24 = vadd.f32 %v5783_v52, %v14743_v3 }
 0x876   : > { %v5785_v48 = vpop.f32.mrf.mxu0 }
 0x877   : > { %v5811_v54 = vadd.f32 %v5785_v48, %v14745_v47 }
 0x878   : > { %v5787_v10 = vpop.f32.mrf.mxu0 }
 0x879   : > { %v5812_v2 = vadd.f32 %v5787_v10, %v14747_v29 }
 0x87a   : > { %v14935_v61 = vpop.f32.mrf.mxu0 }
 0x87c   : > { %v5793_v28 = vpop.f32.mrf.mxu0 }
 0x87d   : > { %v5814_v4 = vadd.f32 %v5793_v28, %v14753_v60 }
 0x87e   : > { %v5795_v59 = vpop.f32.mrf.mxu0 }
 0x87f   : > { %v5815_v53 = vadd.f32 %v5795_v59, %v14755_v43 }
 0x880   : > { %v5797_v56 = vpop.f32.mrf.mxu0 }
 0x881   : > { %v5816_v12 = vadd.f32 %v5797_v56, %v14757_v31 }
 0x882   : > { %v14940_v26 = vpop.f32.mrf.mxu0 }
 0x884   : > { %v6107_v3 = vpop.f32.mrf.mxu1  ;;  %v6237_v37 = vpop.f32.mrf.mxu0 }
 0x885   : > { %v14942_v25 = vadd.f32 %v6107_v3, %v5802_v23 }
 0x886   : > { %v6109_v47 = vpop.f32.mrf.mxu1  ;;  %v6239_v9 = vpop.f32.mrf.mxu0 }
 0x887   : > { %v14944_v29 = vadd.f32 %v6109_v47, %v5803_v13 }
 0x888   : > { %v6111_v30 = vpop.f32.mrf.mxu1  ;;  %v6241_v22 = vpop.f32.mrf.mxu0 }
 0x889   : > { %v14946_v42 = vadd.f32 %v6111_v30, %v5804_v38  ;;  %v6276_v46 = vpack.c.bf16 %v6241_v22, %v6237_v37 }
 0x88a   : > { %v14948_v60 = vpop.f32.mrf.mxu1  ;;  %v6243_v43 = vpop.f32.mrf.mxu0 }
 0x88b   : > { %v6277_v19 = vpack.c.bf16 %v6243_v43, %v6239_v9 }
 0x88c   : > { %v6117_v31 = vpop.f32.mrf.mxu1  ;;  %v6247_v8 = vpop.f32.mrf.mxu0 }
 0x88d   : > { %v14950_v44 = vadd.f32 %v6117_v31, %v5806_v5  ;;  %10624 = vmatprep.mubr.msk.bf16.mxu0 %vm5203_vm1, %v6277_v19 }
 0x88e   : > { %v6119_v15 = vpop.f32.mrf.mxu1  ;;  %v6249_v40 = vpop.f32.mrf.mxu0  ;;  %6450 = vmatmul.mubr.bf16.vlgmr.msra.gmra.mxu0 %v6276_v46  ;;  %v12096_v46 = vld [vmem:[#allocation5 + $0xc0] sm:$0xff]  }
 0x88f   : > { %v14953_v36 = vadd.f32 %v6119_v15, %v5807_v16  ;;  %6900 = vmatpush1.bf16.msra.mxu0 %v14400_v34 }
 0x890   : > { %6901 = vmatprep.subr.bf16.mxu0 %v14405_v41  ;;  %v6121_v50 = vpop.f32.mrf.mxu1  ;;  %v6251_v23 = vpop.f32.mrf.mxu0 }
 0x891   : > { %v14957_v57 = vadd.f32 %v6121_v50, %v5808_v1  ;;  %v6278_v32 = vpack.c.bf16 %v6251_v23, %v6247_v8  ;;  %v12097_v23 = vld [vmem:[#allocation5 + $0xc8] sm:$0xff]  }
 0x892   : > { %v14959_v13 = vpop.f32.mrf.mxu1  ;;  %v6253_v58 = vpop.f32.mrf.mxu0 }
 0x893   : > { %v6279_v38 = vpack.c.bf16 %v6253_v58, %v6249_v40  ;;  %6902 = vmatpush1.bf16.msra.mxu0 %v14384_v6 }
 0x894   : > { %6903 = vmatprep.subr.bf16.mxu0 %v14413_v18  ;;  %v6127_v5 = vpop.f32.mrf.mxu1  ;;  %v6257_v62 = vpop.f32.mrf.mxu0 }
 0x895   : > { %v14963_v16 = vadd.f32 %v6127_v5, %v5810_v24  ;;  %10625 = vmatprep.mubr.msk.bf16.mxu0 %vm5203_vm1, %v6279_v38 }
 0x896   : > { %v6129_v34 = vpop.f32.mrf.mxu1  ;;  %v6259_v41 = vpop.f32.mrf.mxu0  ;;  %6460 = vmatmul.mubr.bf16.gmra.mxu0 %v6278_v32 }
 0x897   : > { %v14966_v55 = vadd.f32 %v6129_v34, %v5811_v54  ;;  %6904 = vmatpush1.bf16.msra.mxu0 %v14360_v63 }
 0x898   : > { %6905 = vmatprep.subr.bf16.mxu0 %v14419_v17  ;;  %v6131_v1 = vpop.f32.mrf.mxu1  ;;  %v6261_v6 = vpop.f32.mrf.mxu0 }
 0x899   : > { %v14970_v52 = vadd.f32 %v6131_v1, %v5812_v2  ;;  %v6280_v10 = vpack.c.bf16 %v6261_v6, %v6257_v62 }
 0x89a   : > { %v14972_v18 = vpop.f32.mrf.mxu1  ;;  %v6263_v48 = vpop.f32.mrf.mxu0 }
 0x89b   : > { %v6281_v24 = vpack.c.bf16 %v6263_v48, %v6259_v41  ;;  %6906 = vmatpush1.bf16.msra.mxu0 %v14346_v51  ;;  %v12098_v41 = vld [vmem:[#allocation5 + $0xd0] sm:$0xff]  }
 0x89c   : > { %v6137_v28 = vpop.f32.mrf.mxu1  ;;  %v6267_v59 = vpop.f32.mrf.mxu0 }
 0x89d   : > { %v14975_v56 = vadd.f32 %v6137_v28, %v5814_v4  ;;  %10626 = vmatprep.mubr.msk.bf16.mxu0 %vm5203_vm1, %v6281_v24 }
 0x89e   : > { %v6139_v63 = vpop.f32.mrf.mxu1  ;;  %v6269_v54 = vpop.f32.mrf.mxu0  ;;  %6470 = vmatmul.mubr.bf16.gmra.mxu0 %v6280_v10 }
 0x89f   : > { %v14978_v17 = vadd.f32 %v6139_v63, %v5815_v53 }
 0x8a0   : > { %v6141_v2 = vpop.f32.mrf.mxu1  ;;  %v6271_v3 = vpop.f32.mrf.mxu0 }
 0x8a1   : > { %v14980_v37 = vadd.f32 %v6141_v2, %v5816_v12  ;;  %v6282_v30 = vpack.c.bf16 %v6271_v3, %v6267_v59  ;;  %v12099_v59 = vld [vmem:[#allocation5 + $0xd8] sm:$0xff]   ;;  %v12105_v3 = vld [vmem:[%s16229_s9 + $0x424] ss:$8 sps:$4 sm:$0xff]  }
 0x8a2   : > { %v14982_v47 = vpop.f32.mrf.mxu1  ;;  %v6273_v9 = vpop.f32.mrf.mxu0  ;;  %v12100_v2 = vld [vmem:[%s16229_s9 + $0x430] ss:$8 sps:$4 sm:$0xff]  }
 0x8a3   : > { %v6283_v51 = vpack.c.bf16 %v6273_v9, %v6269_v54  ;;  %v12102_v54 = vld [vmem:[%s16229_s9 + $0x434] ss:$8 sps:$4 sm:$0xff]   ;;  %v12103_v9 = vld [vmem:[%s16229_s9 + $0x420] ss:$8 sps:$4 sm:$0xff]  }
 0x8a4   : > { %v6581_v22 = vpop.f32.mrf.mxu1  ;;  %7105 = vmatprep.subr.bf16.mxu0 %v12102_v54  ;;  %v12166_v54 = vld [vmem:[#allocation7 + $0x48] ss:$36 sps:$4 sm:$0xff]  }
 0x8a5   : > { %10627 = vmatprep.mubr.msk.bf16.mxu0 %vm5203_vm1, %v6283_v51  ;;  %v12108_v51 = vld [vmem:[%s16229_s9 + $0x414] ss:$8 sps:$4 sm:$0xff]  }
 0x8a6   : > { %6480 = vmatmul.mubr.bf16.gmra.mxu0 %v6282_v30  ;;  %v6583_v4 = vpop.f32.mrf.mxu1  ;;  %v12106_v30 = vld [vmem:[%s16229_s9 + $0x410] ss:$8 sps:$4 sm:$0xff]  }
 0x8a7   : > { %6923 = vmatprep.mubr.bf16.mxu0 %v16312_v0 }
 0x8a8   : > { %v6585_v43 = vpop.f32.mrf.mxu1 }
 0x8a9   : > { %v6620_v19 = vpack.c.bf16 %v6585_v43, %v6581_v22  ;;  %v12111_v22 = vld [vmem:[%s16229_s9 + $0x404] ss:$8 sps:$4 sm:$0xff]   ;;  %v12114_v43 = vld [vmem:[%s16229_s9 + $0x3f4] ss:$8 sps:$4 sm:$0xff]  }
 0x8aa   : > { %v6587_v53 = vpop.f32.mrf.mxu1 }
 0x8ab   : > { %v6621_v31 = vpack.c.bf16 %v6587_v53, %v6583_v4  ;;  %v12109_v4 = vld [vmem:[%s16229_s9 + $0x400] ss:$8 sps:$4 sm:$0xff]   ;;  %v12117_v53 = vld [vmem:[%s16229_s9 + $0x3e4] ss:$8 sps:$4 sm:$0xff]  }
 0x8ac   : > { %v6591_v8 = vpop.f32.mrf.mxu1 }
 0x8ad   : > { %10676 = vmatprep.mubr.msk.bf16.mxu1 %vm5203_vm1, %v6621_v31  ;;  %v12120_v31 = vld [vmem:[%s16229_s9 + $0x3d4] ss:$8 sps:$4 sm:$0xff]  }
 0x8ae   : > { %v6593_v12 = vpop.f32.mrf.mxu1  ;;  %6794 = vmatmul.mubr.bf16.vlgmr.msra.gmra.mxu1 %v6620_v19  ;;  %10684 = vmatmul.mubr.msk.bf16.vlgmr.msra.gmra.mxu0 %vm1447_vm0, %v12096_v46  ;;  %v12112_v19 = vld [vmem:[%s16229_s9 + $0x3f0] ss:$8 sps:$4 sm:$0xff]   ;;  %v12115_v46 = vld [vmem:[%s16229_s9 + $0x3e0] ss:$8 sps:$4 sm:$0xff]  }
 0x8af   : > { %6933 = vmatprep.mubr.bf16.mxu0 %v16312_v0  ;;  %7106 = vmatpush1.bf16.msra.mxu0 %v12100_v2  ;;  %v12174_v2 = vld [vmem:[#allocation7 + $0x4] ss:$36 sps:$4 sm:$0xff]  }
 0x8b0   : > { %v6595_v15 = vpop.f32.mrf.mxu1  ;;  %7107 = vmatprep.subr.bf16.mxu0 %v12105_v3  ;;  %v12172_v3 = vld [vmem:[#allocation7] ss:$36 sps:$4 sm:$0xff]  }
 0x8b1   : > { %v6622_v40 = vpack.c.bf16 %v6595_v15, %v6591_v8  ;;  %v12118_v8 = vld [vmem:[%s16229_s9 + $0x3d0] ss:$8 sps:$4 sm:$0xff]   ;;  %v12121_v15 = vld [vmem:[%s16229_s9 + $0x3c0] ss:$8 sps:$4 sm:$0xff]  }
 0x8b2   : > { %v6597_v50 = vpop.f32.mrf.mxu1 }
 0x8b3   : > { %v6623_v58 = vpack.c.bf16 %v6597_v50, %v6593_v12  ;;  %7108 = vmatpush1.bf16.msra.mxu0 %v12103_v9  ;;  %v12123_v12 = vld [vmem:[%s16229_s9 + $0x3c4] ss:$8 sps:$4 sm:$0xff]   ;;  %v12124_v50 = vld [vmem:[%s16229_s9 + $0x450] ss:$8 sps:$4 sm:$0xff]   ;;  %v12180_v9 = vld [vmem:[#allocation7 + $0x31c] ss:$36 sps:$4 sm:$0xff]  }
 0x8b4   : > { %v6601_v38 = vpop.f32.mrf.mxu1  ;;  %7109 = vmatprep.subr.bf16.mxu0 %v12108_v51  ;;  %v12178_v51 = vld [vmem:[#allocation7 + $0x318] ss:$36 sps:$4 sm:$0xff]  }
 0x8b5   : > { %10677 = vmatprep.mubr.msk.bf16.mxu1 %vm5203_vm1, %v6623_v58  ;;  %v12127_v58 = vld [vmem:[%s16229_s9 + $0x440] ss:$8 sps:$4 sm:$0xff]  }
 0x8b6   : > { %v6603_v32 = vpop.f32.mrf.mxu1  ;;  %6804 = vmatmul.mubr.bf16.gmra.mxu1 %v6622_v40  ;;  %10685 = vmatmul.mubr.msk.bf16.gmra.mxu0 %vm1447_vm0, %v12097_v23  ;;  %v12126_v40 = vld [vmem:[%s16229_s9 + $0x454] ss:$8 sps:$4 sm:$0xff]   ;;  %v12129_v23 = vld [vmem:[%s16229_s9 + $0x444] ss:$8 sps:$4 sm:$0xff]  }
 0x8b7   : > { %6943 = vmatprep.mubr.bf16.mxu0 %v16312_v0  ;;  %7110 = vmatpush1.bf16.msra.mxu0 %v12106_v30 }
 0x8b8   : > { %v6605_v5 = vpop.f32.mrf.mxu1  ;;  %7111 = vmatprep.subr.bf16.mxu0 %v12111_v22 }
 0x8b9   : > { %v6624_v62 = vpack.c.bf16 %v6605_v5, %v6601_v38  ;;  %v12130_v38 = vld [vmem:[#allocation7 + $0x1f8] ss:$36 sps:$4 sm:$0xff]   ;;  %v12135_v5 = vld [vmem:[#allocation7 + $0x204] ss:$36 sps:$4 sm:$0xff]  }
 0x8ba   : > { %v6607_v34 = vpop.f32.mrf.mxu1 }
 0x8bb   : > { %v6625_v1 = vpack.c.bf16 %v6607_v34, %v6603_v32  ;;  %7112 = vmatpush1.bf16.msra.mxu0 %v12109_v4  ;;  %v12132_v32 = vld [vmem:[#allocation7 + $0x1fc] ss:$36 sps:$4 sm:$0xff]   ;;  %v12136_v34 = vld [vmem:[#allocation7 + $0x1b0] ss:$36 sps:$4 sm:$0xff]  }
 0x8bc   : > { %v6611_v6 = vpop.f32.mrf.mxu1  ;;  %7113 = vmatprep.subr.bf16.mxu0 %v12114_v43  ;;  %8058 = vmatprep.subr.bf16.mxu1 %v12132_v32 }
 0x8bd   : > { %10678 = vmatprep.mubr.msk.bf16.mxu1 %vm5203_vm1, %v6625_v1  ;;  %8059 = vmatpush1.bf16.msra.mxu1 %v12130_v38  ;;  %v12142_v1 = vld [vmem:[#allocation7 + $0x168] ss:$36 sps:$4 sm:$0xff]  }
 0x8be   : > { %v6613_v48 = vpop.f32.mrf.mxu1  ;;  %6814 = vmatmul.mubr.bf16.gmra.mxu1 %v6624_v62  ;;  %10686 = vmatmul.mubr.msk.bf16.gmra.mxu0 %vm1447_vm0, %v12098_v41  ;;  %v12138_v62 = vld [vmem:[#allocation7 + $0x1b4] ss:$36 sps:$4 sm:$0xff]   ;;  %v12144_v41 = vld [vmem:[#allocation7 + $0x16c] ss:$36 sps:$4 sm:$0xff]  }
 0x8bf   : > { %6953 = vmatprep.mubr.bf16.mxu0 %v16312_v0  ;;  %7114 = vmatpush1.bf16.msra.mxu0 %v12112_v19 }
 0x8c0   : > { %v6615_v24 = vpop.f32.mrf.mxu1  ;;  %7115 = vmatprep.subr.bf16.mxu0 %v12117_v53  ;;  %8060 = vmatprep.subr.bf16.mxu1 %v12138_v62 }
 0x8c1   : > { %v6626_v10 = vpack.c.bf16 %v6615_v24, %v6611_v6  ;;  %8061 = vmatpush1.bf16.msra.mxu1 %v12136_v34  ;;  %v12150_v6 = vld [vmem:[#allocation7 + $0x124] ss:$36 sps:$4 sm:$0xff]   ;;  %v12156_v24 = vld [vmem:[#allocation7 + $0xdc] ss:$36 sps:$4 sm:$0xff]  }
 0x8c2   : > { %v6617_v28 = vpop.f32.mrf.mxu1  ;;  %8062 = vmatprep.subr.bf16.mxu1 %v12144_v41 }
 0x8c3   : > { %v6627_v63 = vpack.c.bf16 %v6617_v28, %v6613_v48  ;;  %7116 = vmatpush1.bf16.msra.mxu0 %v12115_v46  ;;  %v12148_v48 = vld [vmem:[#allocation7 + $0x120] ss:$36 sps:$4 sm:$0xff]   ;;  %v12162_v28 = vld [vmem:[#allocation7 + $0x94] ss:$36 sps:$4 sm:$0xff]  }
 0x8c4   : > { %7117 = vmatprep.subr.bf16.mxu0 %v12120_v31 }
 0x8c5   : > { %10679 = vmatprep.mubr.msk.bf16.mxu1 %vm5203_vm1, %v6627_v63  ;;  %8063 = vmatpush1.bf16.msra.mxu1 %v12142_v1  ;;  %v12168_v63 = vld [vmem:[#allocation7 + $0x4c] ss:$36 sps:$4 sm:$0xff]  }
 0x8c6   : > { %6824 = vmatmul.mubr.bf16.gmra.mxu1 %v6626_v10  ;;  %10687 = vmatmul.mubr.msk.bf16.gmra.mxu0 %vm1447_vm0, %v12099_v59  ;;  %v12154_v10 = vld [vmem:[#allocation7 + $0xd8] ss:$36 sps:$4 sm:$0xff]   ;;  %v12160_v59 = vld [vmem:[#allocation7 + $0x90] ss:$36 sps:$4 sm:$0xff]  }
 0x8c7   : > { %7118 = vmatpush1.bf16.msra.mxu0 %v12118_v8  ;;  %8064 = vmatprep.subr.bf16.mxu1 %v12150_v6 }
 0x8c8   : > { %7119 = vmatprep.subr.bf16.mxu0 %v12123_v12 }
 0x8c9   : > { %8065 = vmatpush1.bf16.msra.mxu1 %v12148_v48 }
 0x8ca   : > { %8066 = vmatprep.subr.bf16.mxu1 %v12156_v24  ;;  %v12133_v24 = vld [vmem:[#allocation7 + $0x200] ss:$36 sps:$4 sm:$0xff]  }
 0x8cb   : > { %7120 = vmatpush1.bf16.msra.mxu0 %v12121_v15 }
 0x8cc   : > { %7133 = vmatprep.subr.bf16.mxu0 %v12126_v40 }
 0x8cd   : > { %8067 = vmatpush1.bf16.msra.mxu1 %v12154_v10 }
 0x8ce   : > { %8068 = vmatprep.subr.bf16.mxu1 %v12162_v28 }
 0x8cf   : > { %7134 = vmatpush2.bf16.msra.mxu0 %v12124_v50 }
 0x8d0   : > { %7135 = vmatprep.subr.bf16.mxu0 %v12129_v23 }
 0x8d1   : > { %8069 = vmatpush1.bf16.msra.mxu1 %v12160_v59 }
 0x8d2   : > { %8070 = vmatprep.subr.bf16.mxu1 %v12168_v63 }
 0x8d3   : > { %7136 = vmatpush2.bf16.msra.mxu0 %v12127_v58 }
 0x8d4   : > { %8131 = vmatprep.subr.bf16.mxu0 %v12135_v5 }
 0x8d5   : > { %8071 = vmatpush1.bf16.msra.mxu1 %v12166_v54 }
 0x8d6   : > { %8072 = vmatprep.subr.bf16.mxu1 %v12174_v2 }
 0x8d9   : > { %8073 = vmatpush1.bf16.msra.mxu1 %v12172_v3 }
 0x8da   : > { %8082 = vmatprep.subr.bf16.mxu1 %v12180_v9  ;;  %v12145_v9 = vld [vmem:[#allocation7 + $0x170] ss:$36 sps:$4 sm:$0xff]  }
 0x8dd   : > { %8083 = vmatpush2.bf16.msra.mxu1 %v12178_v51 }
 0x94e   : > { %v6451_v30 = vpop.f32.mrf.mxu0 }
 0x94f   : > { %v15058_v22 = vadd.f32 %v6451_v30, %v14942_v25  ;;  %v12153_v30 = vld [vmem:[#allocation7 + $0x12c] ss:$36 sps:$4 sm:$0xff]  }
 0x950   : > { %v6453_v4 = vpop.f32.mrf.mxu0 }
 0x951   : > { %v15061_v43 = vadd.f32 %v6453_v4, %v14944_v29 }
 0x952   : > { %v6455_v19 = vpop.f32.mrf.mxu0 }
 0x953   : > { %v15064_v53 = vadd.f32 %v6455_v19, %v14946_v42  ;;  %v12151_v19 = vld [vmem:[#allocation7 + $0x128] ss:$36 sps:$4 sm:$0xff]  }
 0x954   : > { %v15066_v46 = vpop.f32.mrf.mxu0 }
 0x956   : > { %v6461_v31 = vpop.f32.mrf.mxu0 }
 0x957   : > { %v15069_v8 = vadd.f32 %v6461_v31, %v14950_v44 }
 0x958   : > { %v6463_v12 = vpop.f32.mrf.mxu0 }
 0x959   : > { %v15072_v15 = vadd.f32 %v6463_v12, %v14953_v36  ;;  %v12159_v12 = vld [vmem:[#allocation7 + $0xe4] ss:$36 sps:$4 sm:$0xff]  }
 0x95a   : > { %v6465_v25 = vpop.f32.mrf.mxu0 }
 0x95b   : > { %v15075_v40 = vadd.f32 %v6465_v25, %v14957_v57 }
 0x95c   : > { %v15077_v29 = vpop.f32.mrf.mxu0 }
 0x95e   : > { %v6471_v50 = vpop.f32.mrf.mxu0 }
 0x95f   : > { %v15080_v42 = vadd.f32 %v6471_v50, %v14963_v16 }
 0x960   : > { %v6473_v23 = vpop.f32.mrf.mxu0 }
 0x961   : > { %v15083_v58 = vadd.f32 %v6473_v23, %v14966_v55 }
 0x962   : > { %v6475_v44 = vpop.f32.mrf.mxu0 }
 0x963   : > { %v15086_v38 = vadd.f32 %v6475_v44, %v14970_v52  ;;  %v12157_v44 = vld [vmem:[#allocation7 + $0xe0] ss:$36 sps:$4 sm:$0xff]  }
 0x964   : > { %v15088_v36 = vpop.f32.mrf.mxu0 }
 0x966   : > { %v6481_v32 = vpop.f32.mrf.mxu0 }
 0x967   : > { %v15091_v57 = vadd.f32 %v6481_v32, %v14975_v56  ;;  %v12141_v56 = vld [vmem:[#allocation7 + $0x1bc] ss:$36 sps:$4 sm:$0xff]  }
 0x968   : > { %v6483_v5 = vpop.f32.mrf.mxu0 }
 0x969   : > { %v15094_v62 = vadd.f32 %v6483_v5, %v14978_v17  ;;  %v12139_v17 = vld [vmem:[#allocation7 + $0x1b8] ss:$36 sps:$4 sm:$0xff]  }
 0x96a   : > { %v6485_v16 = vpop.f32.mrf.mxu0  ;;  %v12165_v5 = vld [vmem:[#allocation7 + $0x9c] ss:$36 sps:$4 sm:$0xff]  }
 0x96b   : > { %v15097_v34 = vadd.f32 %v6485_v16, %v14980_v37  ;;  %v12147_v37 = vld [vmem:[#allocation7 + $0x174] ss:$36 sps:$4 sm:$0xff]  }
 0x96c   : > { %v15099_v55 = vpop.f32.mrf.mxu0 }
 0x96e   : > { %v6925_v41 = vpop.f32.mrf.mxu0 }
 0x970   : > { %v6927_v1 = vpop.f32.mrf.mxu0 }
 0x972   : > { %v6929_v52 = vpop.f32.mrf.mxu0 }
 0x973   : > { %v6964_v10 = vpack.c.bf16 %v6929_v52, %v6925_v41  ;;  %v12163_v41 = vld [vmem:[#allocation7 + $0x98] ss:$36 sps:$4 sm:$0xff]  }
 0x974   : > { %v6931_v6 = vpop.f32.mrf.mxu0  ;;  %v12171_v52 = vld [vmem:[#allocation7 + $0x54] ss:$36 sps:$4 sm:$0xff]  }
 0x975   : > { %v6965_v48 = vpack.c.bf16 %v6931_v6, %v6927_v1 }
 0x976   : > { %v6935_v28 = vpop.f32.mrf.mxu0 }
 0x977   : > { %10728 = vmatprep.mubr.msk.bf16.mxu0 %vm5203_vm1, %v6965_v48 }
 0x978   : > { %v6937_v59 = vpop.f32.mrf.mxu0  ;;  %7138 = vmatmul.mubr.bf16.vlgmr.msra.gmra.mxu0 %v6964_v10  ;;  %v12169_v10 = vld [vmem:[#allocation7 + $0x50] ss:$36 sps:$4 sm:$0xff]  }
 0x979   : > { %8132 = vmatpush1.bf16.msra.mxu0 %v12133_v24 }
 0x97a   : > { %v6939_v63 = vpop.f32.mrf.mxu0  ;;  %8133 = vmatprep.subr.bf16.mxu0 %v12141_v56  ;;  %v12175_v56 = vld [vmem:[#allocation7 + $0x8] ss:$36 sps:$4 sm:$0xff]  }
 0x97b   : > { %v6966_v54 = vpack.c.bf16 %v6939_v63, %v6935_v28  ;;  %v12177_v28 = vld [vmem:[#allocation7 + $0xc] ss:$36 sps:$4 sm:$0xff]   ;;  %v12186_v63 = vld [vmem:[#allocation7 + $0x2d4] ss:$36 sps:$4 sm:$0xff]  }
 0x97c   : > { %v6941_v2 = vpop.f32.mrf.mxu0  ;;  %8084 = vmatprep.subr.bf16.mxu1 %v12186_v63 }
 0x97d   : > { %v6967_v3 = vpack.c.bf16 %v6941_v2, %v6937_v59  ;;  %8134 = vmatpush1.bf16.msra.mxu0 %v12139_v17  ;;  %v12183_v59 = vld [vmem:[#allocation7 + $0x324] ss:$36 sps:$4 sm:$0xff]   ;;  %v12187_v2 = vld [vmem:[#allocation7 + $0x2d8] ss:$36 sps:$4 sm:$0xff]  }
 0x97e   : > { %v6945_v51 = vpop.f32.mrf.mxu0  ;;  %8135 = vmatprep.subr.bf16.mxu0 %v12147_v37  ;;  %v12181_v17 = vld [vmem:[#allocation7 + $0x320] ss:$36 sps:$4 sm:$0xff]  }
 0x97f   : > { %10729 = vmatprep.mubr.msk.bf16.mxu0 %vm5203_vm1, %v6967_v3  ;;  %v12189_v37 = vld [vmem:[#allocation7 + $0x2dc] ss:$36 sps:$4 sm:$0xff]   ;;  %v12192_v3 = vld [vmem:[#allocation7 + $0x28c] ss:$36 sps:$4 sm:$0xff]  }
 0x980   : > { %v6947_v4 = vpop.f32.mrf.mxu0  ;;  %7148 = vmatmul.mubr.bf16.gmra.mxu0 %v6966_v54  ;;  %v12184_v54 = vld [vmem:[#allocation7 + $0x2d0] ss:$36 sps:$4 sm:$0xff]  }
 0x981   : > { %8136 = vmatpush1.bf16.msra.mxu0 %v12145_v9  ;;  %8085 = vmatpush2.bf16.msra.mxu1 %v12184_v54  ;;  %v12195_v9 = vld [vmem:[#allocation7 + $0x294] ss:$36 sps:$4 sm:$0xff]   ;;  %v16313_v54 = vld [vmem:[#allocation18_spill] sm:$0xff] }
 0x982   : > { %v6949_v31 = vpop.f32.mrf.mxu0  ;;  %8137 = vmatprep.subr.bf16.mxu0 %v12153_v30  ;;  %v12193_v30 = vld [vmem:[#allocation7 + $0x290] ss:$36 sps:$4 sm:$0xff]   ;;  %8086 = vmatprep.subr.bf16.mxu1 %v12192_v3 }
 0x983   : > { %v6968_v25 = vpack.c.bf16 %v6949_v31, %v6945_v51  ;;  %v12190_v51 = vld [vmem:[#allocation7 + $0x288] ss:$36 sps:$4 sm:$0xff]   ;;  %v12196_v31 = vld [vmem:[#allocation7 + $0x240] ss:$36 sps:$4 sm:$0xff]  }
 0x984   : > { %v6951_v50 = vpop.f32.mrf.mxu0 }
 0x985   : > { %v6969_v23 = vpack.c.bf16 %v6951_v50, %v6947_v4  ;;  %8138 = vmatpush1.bf16.msra.mxu0 %v12151_v19  ;;  %8087 = vmatpush2.bf16.msra.mxu1 %v12190_v51  ;;  %v12198_v4 = vld [vmem:[#allocation7 + $0x244] ss:$36 sps:$4 sm:$0xff]   ;;  %v12201_v19 = vld [vmem:[#allocation7 + $0x24c] ss:$36 sps:$4 sm:$0xff]   ;;  %v12207_v50 = vld [vmem:[#allocation7 + $0x214] ss:$36 sps:$4 sm:$0xff]  }
 0x986   : > { %v6955_v32 = vpop.f32.mrf.mxu0  ;;  %8139 = vmatprep.subr.bf16.mxu0 %v12159_v12  ;;  %v12199_v12 = vld [vmem:[#allocation7 + $0x248] ss:$36 sps:$4 sm:$0xff]   ;;  %8088 = vmatprep.subr.bf16.mxu1 %v12198_v4 }
 0x987   : > { %10730 = vmatprep.mubr.msk.bf16.mxu0 %vm5203_vm1, %v6969_v23  ;;  %v6795_v23 = vpop.f32.mrf.mxu1 }
 0x988   : > { %v6957_v16 = vpop.f32.mrf.mxu0  ;;  %7158 = vmatmul.mubr.bf16.gmra.mxu0 %v6968_v25  ;;  %v12204_v25 = vld [vmem:[#allocation7 + $0x20c] ss:$36 sps:$4 sm:$0xff]  }
 0x989   : > { %8140 = vmatpush1.bf16.msra.mxu0 %v12157_v44  ;;  %8089 = vmatpush2.bf16.msra.mxu1 %v12196_v31  ;;  %v6797_v44 = vpop.f32.mrf.mxu1 }
 0x98a   : > { %v6959_v1 = vpop.f32.mrf.mxu0  ;;  %8141 = vmatprep.subr.bf16.mxu0 %v12165_v5  ;;  %8204 = vmatprep.subr.bf16.mxu1 %v12204_v25 }
 0x98b   : > { %v6970_v6 = vpack.c.bf16 %v6959_v1, %v6955_v32  ;;  %v6799_v32 = vpop.f32.mrf.mxu1 }
 0x98c   : > { %v6961_v48 = vpop.f32.mrf.mxu0  ;;  %v6836_v3 = vadd.f32 %v6799_v32, %v15064_v53 }
 0x98d   : > { %v6971_v24 = vpack.c.bf16 %v6961_v48, %v6957_v16  ;;  %8142 = vmatpush1.bf16.msra.mxu0 %v12163_v41  ;;  %v6801_v5 = vpop.f32.mrf.mxu1 }
 0x98e   : > { %8143 = vmatprep.subr.bf16.mxu0 %v12171_v52 }
 0x98f   : > { %10731 = vmatprep.mubr.msk.bf16.mxu0 %vm5203_vm1, %v6971_v24  ;;  %v6805_v16 = vpop.f32.mrf.mxu1  ;;  %v7194_v24 = vld [vmem:[%s16230_s10] sm:$0x3] }
 0x990   : > { %7168 = vmatmul.mubr.bf16.gmra.mxu0 %v6970_v6  ;;  %v5442_v6 = vadd.f32 %v14731_v14, %v14729_v49 }
 0x991   : > { %8144 = vmatpush1.bf16.msra.mxu0 %v12169_v10  ;;  %v6807_v41 = vpop.f32.mrf.mxu1 }
 0x992   : > { %8145 = vmatprep.subr.bf16.mxu0 %v12177_v28  ;;  %v5805_v10 = vadd.f32 %v14925_v27, %v5442_v6  ;;  %v6834_v28 = vadd.f32 %v6795_v23, %v15058_v22  ;;  %v15120_v27 = vrot.slane %v7194_v24, %v16307_v45  ;;  %v5452_v22 = vadd.f32 %v14741_v35, %v14739_v7 }
 0x993   : > { %v6809_v1 = vpop.f32.mrf.mxu1  ;;  %v6839_v7 = vadd.f32 %v6807_v41, %v15072_v15 }
 0x995   : > { %8146 = vmatpush1.bf16.msra.mxu0 %v12175_v56  ;;  %v6811_v52 = vpop.f32.mrf.mxu1 }
 0x996   : > { %8155 = vmatprep.subr.bf16.mxu0 %v12183_v59  ;;  %v6149_v59 = vadd.f32 %v14948_v60, %v5805_v10 }
 0x997   : > { %v6815_v48 = vpop.f32.mrf.mxu1 }
 0x998   : > { %v6493_v14 = vadd.f32 %v15066_v46, %v6149_v59  ;;  %v6838_v46 = vadd.f32 %v6805_v16, %v15069_v8  ;;  %v6840_v8 = vadd.f32 %v6809_v1, %v15075_v40  ;;  %v6842_v1 = vadd.f32 %v6815_v48, %v15080_v42 }
 0x999   : > { %8156 = vmatpush2.bf16.msra.mxu0 %v12181_v17  ;;  %v6835_v17 = vadd.f32 %v6797_v44, %v15061_v43  ;;  %v6817_v63 = vpop.f32.mrf.mxu1 }
 0x99a   : > { %8157 = vmatprep.subr.bf16.mxu0 %v12189_v37  ;;  %v6837_v51 = vadd.f32 %v6801_v5, %v6493_v14  ;;  %v12205_v14 = vld [vmem:[#allocation7 + $0x210] ss:$36 sps:$4 sm:$0xff]  }
 0x99b   : > { %v6819_v43 = vpop.f32.mrf.mxu1 }
 0x99d   : > { %8158 = vmatpush2.bf16.msra.mxu0 %v12187_v2  ;;  %v15115_v2 = vrot.slane %v7194_v24, %v16313_v54  ;;  %v6821_v23 = vpop.f32.mrf.mxu1 }
 0x99e   : > { %8159 = vmatprep.subr.bf16.mxu0 %v12195_v9 }
 0x99f   : > { %v6825_v59 = vpop.f32.mrf.mxu1 }
 0x9a1   : > { %8160 = vmatpush2.bf16.msra.mxu0 %v12193_v30  ;;  %v6827_v42 = vpop.f32.mrf.mxu1 }
 0x9a2   : > { %8161 = vmatprep.subr.bf16.mxu0 %v12201_v19  ;;  %v5809_v19 = vadd.f32 %v14930_v11, %v5452_v22  ;;  %v12213_v22 = vld [vmem:[#allocation7 + $0x1cc] ss:$36 sps:$4 sm:$0xff]  }
 0x9a5   : > { %8162 = vmatpush2.bf16.msra.mxu0 %v12199_v12 }
 0x9a6   : > { %8277 = vmatprep.subr.bf16.mxu0 %v12207_v50  ;;  %v6153_v50 = vadd.f32 %v14959_v13, %v5809_v19  ;;  %v5462_v13 = vadd.f32 %v14751_v33, %v14749_v21 }
 0x9a8   : > { %v6497_v11 = vadd.f32 %v15077_v29, %v6153_v50  ;;  %v12202_v29 = vld [vmem:[#allocation7 + $0x208] ss:$36 sps:$4 sm:$0xff]   ;;  %v5813_v40 = vadd.f32 %v14935_v61, %v5462_v13  ;;  %v6843_v61 = vadd.f32 %v6817_v63, %v15083_v58  ;;  %v12216_v63 = vld [vmem:[#allocation7 + $0x17c] ss:$36 sps:$4 sm:$0xff]  }
 0x9aa   : > { %v6841_v41 = vadd.f32 %v6811_v52, %v6497_v11  ;;  %v6157_v52 = vadd.f32 %v14972_v18, %v5813_v40  ;;  %v6844_v18 = vadd.f32 %v6819_v43, %v15086_v38  ;;  %v12214_v43 = vld [vmem:[#allocation7 + $0x178] ss:$36 sps:$4 sm:$0xff]  }
 0x9ab   : > { %v12223_v40 = vld [vmem:[#allocation7 + $0x138] ss:$36 sps:$4 sm:$0xff]  }
 0xa38   : > { %v7139_v56 = vpop.f32.mrf.mxu0 }
 0xa39   : > { %v7178_v37 = vadd.f32 %v7139_v56, %v6834_v28 }
 0xa3a   : > { %v7141_v49 = vpop.f32.mrf.mxu0 }
 0xa3b   : > { %v7179_v9 = vadd.f32 %v7141_v49, %v6835_v17  ;;  %v7206_v30 = vadd.f32 %v15115_v2, %v7178_v37 }
 0xa3c   : > { %v7143_v60 = vpop.f32.mrf.mxu0 }
 0xa3d   : > { %v7180_v4 = vadd.f32 %v7143_v60, %v6836_v3  ;;  %v7207_v53 = vadd.f32 %v15120_v27, %v7179_v9  ;;  %v7222_v44 = vmax.f32 %v7206_v30, 0.0  ;;  %v12210_v9 = vld [vmem:[#allocation7 + $0x1c4] ss:$36 sps:$4 sm:$0xff]  }
 0xa3e   : > { %v7145_v31 = vpop.f32.mrf.mxu0 }
 0xa3f   : > { %v7208_v12 = vadd.f32 %v15115_v2, %v7180_v4  ;;  %v7181_v25 = vadd.f32 %v7145_v31, %v6837_v51  ;;  %v7223_v24 = vmax.f32 %v7207_v53, 0.0  ;;  %v12208_v31 = vld [vmem:[#allocation7 + $0x1c0] ss:$36 sps:$4 sm:$0xff]   ;;  %v6501_v53 = vadd.f32 %v15088_v36, %v6157_v52 }
 0xa40   : > { %v7149_v35 = vpop.f32.mrf.mxu0 }
 0xa41   : > { %v7224_v32 = vmax.f32 %v7208_v12, 0.0  ;;  %v7209_v5 = vadd.f32 %v15120_v27, %v7181_v25  ;;  %v7182_v6 = vadd.f32 %v7149_v35, %v6838_v46  ;;  %v12211_v46 = vld [vmem:[#allocation7 + $0x1c8] ss:$36 sps:$4 sm:$0xff]  }
 0xa42   : > { %v7151_v16 = vpop.f32.mrf.mxu0  ;;  %v12219_v12 = vld [vmem:[#allocation7 + $0x184] ss:$36 sps:$4 sm:$0xff]  }
 0xa43   : > { %v15134_v10 = vpack.c.bf16 %v7224_v32, %v7222_v44  ;;  %v7225_v28 = vmax.f32 %v7209_v5, 0.0  ;;  %v7183_v56 = vadd.f32 %v7151_v16, %v6839_v7  ;;  %v7210_v37 = vadd.f32 %v15115_v2, %v7182_v6  ;;  %v6829_v6 = vpop.f32.mrf.mxu1 }
 0xa44   : > { %v7153_v15 = vpop.f32.mrf.mxu0  ;;  %v5472_v44 = vadd.f32 %v14920_v20, %v14759_v39  ;;  %v6845_v32 = vadd.f32 %v6821_v23, %v6501_v53  ;;  %v12222_v39 = vld [vmem:[#allocation7 + $0x134] ss:$36 sps:$4 sm:$0xff]   ;;  %v12225_v20 = vld [vmem:[#allocation7 + $0x13c] ss:$36 sps:$4 sm:$0xff]  }
 0xa45   : > { %v15138_v17 = vpack.c.bf16 %v7225_v28, %v7223_v24  ;;  %v7184_v49 = vadd.f32 %v7153_v15, %v6840_v8  ;;  %v7211_v60 = vadd.f32 %v15120_v27, %v7183_v56  ;;  %v7226_v48 = vmax.f32 %v7210_v37, 0.0  ;;  %v12217_v8 = vld [vmem:[#allocation7 + $0x180] ss:$36 sps:$4 sm:$0xff]  }
 0xa46   : > { %v7155_v3 = vpop.f32.mrf.mxu0  ;;  %v5817_v16 = vadd.f32 %v14940_v26, %v5472_v44  ;;  %v6846_v24 = vadd.f32 %v6825_v59, %v15091_v57  ;;  %v6847_v57 = vadd.f32 %v6827_v42, %v15094_v62 }
 0xa47   : > { %v7212_v21 = vadd.f32 %v15115_v2, %v7184_v49  ;;  %v7185_v33 = vadd.f32 %v7155_v3, %v6841_v41  ;;  %10840 = vmatprep.mubr.msk.bf16.mxu1 %vm1447_vm0, %v15138_v17  ;;  %10844 = vmatprep.mubr.msk.bf16.mxu0 %vm1447_vm0, %v15138_v17  ;;  %v7227_v25 = vmax.f32 %v7211_v60, 0.0  ;;  %v6831_v41 = vpop.f32.mrf.mxu1  ;;  %v12228_v3 = vld [vmem:[#allocation7 + $0xec] ss:$36 sps:$4 sm:$0xff]  }
 0xa48   : > { %v7159_v51 = vpop.f32.mrf.mxu0  ;;  %8091 = vmatmul.mubr.bf16.vlgmr.msra.gmra.mxu1 %v15134_v10  ;;  %8164 = vmatmul.mubr.bf16.vlgmr.msra.gmra.mxu0 %v15134_v10  ;;  %v6161_v26 = vadd.f32 %v14982_v47, %v5817_v16  ;;  %v6848_v47 = vadd.f32 %v6829_v6, %v15097_v34  ;;  %v12226_v34 = vld [vmem:[#allocation7 + $0xe8] ss:$36 sps:$4 sm:$0xff]   ;;  %v12238_v6 = vld [vmem:[#allocation7 + $0x58] ss:$36 sps:$4 sm:$0xff]  }
 0xa49   : > { %v7228_v30 = vmax.f32 %v7212_v21, 0.0  ;;  %v7213_v4 = vadd.f32 %v15120_v27, %v7185_v33  ;;  %v7186_v19 = vadd.f32 %v7159_v51, %v6842_v1  ;;  %8205 = vmatpush1.bf16.msra.mxu1 %v12202_v29  ;;  %8278 = vmatpush1.bf16.msra.mxu0 %v12205_v14  ;;  %v12220_v14 = vld [vmem:[#allocation7 + $0x130] ss:$36 sps:$4 sm:$0xff]  }
 0xa4a   : > { %v7161_v58 = vpop.f32.mrf.mxu0  ;;  %8206 = vmatprep.subr.bf16.mxu1 %v12210_v9  ;;  %8279 = vmatprep.subr.bf16.mxu0 %v12213_v22  ;;  %v6505_v1 = vadd.f32 %v15099_v55, %v6161_v26  ;;  %v12231_v9 = vld [vmem:[#allocation7 + $0xf4] ss:$36 sps:$4 sm:$0xff]   ;;  %v12252_v16 = vld [vmem:[#allocation7 + $0x32c] ss:$36 sps:$4 sm:$0xff]   ;;  %v12264_v26 = vld [vmem:[#allocation7 + $0x29c] ss:$36 sps:$4 sm:$0xff]  }
 0xa4b   : > { %v15156_v50 = vpack.c.bf16 %v7228_v30, %v7226_v48  ;;  %v7229_v7 = vmax.f32 %v7213_v4, 0.0  ;;  %v7187_v35 = vadd.f32 %v7161_v58, %v6843_v61  ;;  %v7214_v38 = vadd.f32 %v15115_v2, %v7186_v19  ;;  %v12229_v55 = vld [vmem:[#allocation7 + $0xf0] ss:$36 sps:$4 sm:$0xff]   ;;  %v12234_v4 = vld [vmem:[#allocation7 + $0xa4] ss:$36 sps:$4 sm:$0xff]  }
 0xa4c   : > { %v7163_v5 = vpop.f32.mrf.mxu0  ;;  %v6849_v52 = vadd.f32 %v6831_v41, %v6505_v1  ;;  %v12237_v19 = vld [vmem:[#allocation7 + $0xac] ss:$36 sps:$4 sm:$0xff]   ;;  %v12265_v41 = vld [vmem:[#allocation7 + $0x2a0] ss:$36 sps:$4 sm:$0xff]   ;;  %v12277_v1 = vld [vmem:[#allocation7 + $0x218] ss:$36 sps:$4 sm:$0xff]  }
 0xa4d   : > { %v15160_v11 = vpack.c.bf16 %v7229_v7, %v7227_v25  ;;  %v7188_v36 = vadd.f32 %v7163_v5, %v6844_v18  ;;  %8207 = vmatpush1.bf16.msra.mxu1 %v12208_v31  ;;  %8280 = vmatpush1.bf16.msra.mxu0 %v12211_v46  ;;  %v7215_v23 = vadd.f32 %v15120_v27, %v7187_v35  ;;  %v7230_v59 = vmax.f32 %v7214_v38, 0.0  ;;  %v12235_v25 = vld [vmem:[#allocation7 + $0xa8] ss:$36 sps:$4 sm:$0xff]   ;;  %v12241_v38 = vld [vmem:[#allocation7 + $0x60] ss:$36 sps:$4 sm:$0xff]  }
 0xa4e   : > { %v7165_v28 = vpop.f32.mrf.mxu0  ;;  %8208 = vmatprep.subr.bf16.mxu1 %v12216_v63  ;;  %8281 = vmatprep.subr.bf16.mxu0 %v12219_v12  ;;  %v12232_v12 = vld [vmem:[#allocation7 + $0xa0] ss:$36 sps:$4 sm:$0xff]  }
 0xa4f   : > { %v7216_v56 = vadd.f32 %v15115_v2, %v7188_v36  ;;  %v7189_v13 = vadd.f32 %v7165_v28, %v6845_v32  ;;  %10841 = vmatprep.mubr.msk.bf16.mxu1 %vm1447_vm0, %v15160_v11  ;;  %10845 = vmatprep.mubr.msk.bf16.mxu0 %vm1447_vm0, %v15160_v11  ;;  %v7231_v22 = vmax.f32 %v7215_v23, 0.0  ;;  %v12243_v7 = vld [vmem:[#allocation7 + $0x64] ss:$36 sps:$4 sm:$0xff]   ;;  %v12249_v36 = vld [vmem:[#allocation7 + $0x1c] ss:$36 sps:$4 sm:$0xff]  }
 0xa50   : > { %v7169_v15 = vpop.f32.mrf.mxu0  ;;  %8101 = vmatmul.mubr.bf16.gmra.mxu1 %v15156_v50  ;;  %8174 = vmatmul.mubr.bf16.gmra.mxu0 %v15156_v50  ;;  %v12250_v28 = vld [vmem:[#allocation7 + $0x328] ss:$36 sps:$4 sm:$0xff]  }
 0xa51   : > { %v7232_v37 = vmax.f32 %v7216_v56, 0.0  ;;  %v7217_v49 = vadd.f32 %v15120_v27, %v7189_v13  ;;  %v7190_v29 = vadd.f32 %v7169_v15, %v6846_v24  ;;  %8209 = vmatpush1.bf16.msra.mxu1 %v12214_v43  ;;  %8282 = vmatpush1.bf16.msra.mxu0 %v12217_v8  ;;  %v12244_v43 = vld [vmem:[#allocation7 + $0x10] ss:$36 sps:$4 sm:$0xff]   ;;  %v12247_v8 = vld [vmem:[#allocation7 + $0x18] ss:$36 sps:$4 sm:$0xff]  }
 0xa52   : > { %v7171_v62 = vpop.f32.mrf.mxu0  ;;  %8210 = vmatprep.subr.bf16.mxu1 %v12222_v39  ;;  %8283 = vmatprep.subr.bf16.mxu0 %v12225_v20  ;;  %v12255_v24 = vld [vmem:[#allocation7 + $0x334] ss:$36 sps:$4 sm:$0xff]   ;;  %v12258_v20 = vld [vmem:[#allocation7 + $0x2e4] ss:$36 sps:$4 sm:$0xff]   ;;  %v12261_v23 = vld [vmem:[#allocation7 + $0x2ec] ss:$36 sps:$4 sm:$0xff]  }
 0xa53   : > { %v15178_v60 = vpack.c.bf16 %v7232_v37, %v7230_v59  ;;  %v7233_v21 = vmax.f32 %v7217_v49, 0.0  ;;  %v7191_v33 = vadd.f32 %v7171_v62, %v6847_v57  ;;  %v7218_v42 = vadd.f32 %v15115_v2, %v7190_v29  ;;  %v12253_v39 = vld [vmem:[#allocation7 + $0x330] ss:$36 sps:$4 sm:$0xff]   ;;  %v12256_v56 = vld [vmem:[#allocation7 + $0x2e0] ss:$36 sps:$4 sm:$0xff]  }
 0xa54   : > { %v7173_v61 = vpop.f32.mrf.mxu0  ;;  %v12259_v13 = vld [vmem:[#allocation7 + $0x2e8] ss:$36 sps:$4 sm:$0xff]   ;;  %v12262_v15 = vld [vmem:[#allocation7 + $0x298] ss:$36 sps:$4 sm:$0xff]   ;;  %v12268_v49 = vld [vmem:[#allocation7 + $0x250] ss:$36 sps:$4 sm:$0xff]  }
 0xa55   : > { %v15180_v51 = vpack.c.bf16 %v7233_v21, %v7231_v22  ;;  %v7192_v48 = vadd.f32 %v7173_v61, %v6848_v47  ;;  %8211 = vmatpush1.bf16.msra.mxu1 %v12220_v14  ;;  %8284 = vmatpush1.bf16.msra.mxu0 %v12223_v40  ;;  %v7219_v31 = vadd.f32 %v15120_v27, %v7191_v33  ;;  %v7234_v18 = vmax.f32 %v7218_v42, 0.0  ;;  %v12267_v57 = vld [vmem:[#allocation7 + $0x2a4] ss:$36 sps:$4 sm:$0xff]   ;;  %v12270_v59 = vld [vmem:[#allocation7 + $0x254] ss:$36 sps:$4 sm:$0xff]  }
 0xa56   : > { %v7175_v30 = vpop.f32.mrf.mxu0  ;;  %8212 = vmatprep.subr.bf16.mxu1 %v12228_v3  ;;  %8285 = vmatprep.subr.bf16.mxu0 %v12231_v9  ;;  %v12273_v37 = vld [vmem:[#allocation7 + $0x25c] ss:$36 sps:$4 sm:$0xff]   ;;  %v12280_v47 = vld [vmem:[%s16231_s11 + $0x1b4] ss:$36 sps:$4 sm:$0xff]   ;;  %v12284_v33 = vld [vmem:[%s16231_s11 + $0x16c] ss:$36 sps:$4 sm:$0xff]  }
 0xa57   : > { %v7220_v46 = vadd.f32 %v15115_v2, %v7192_v48  ;;  %v7193_v53 = vadd.f32 %v7175_v30, %v6849_v52  ;;  %10842 = vmatprep.mubr.msk.bf16.mxu1 %vm1447_vm0, %v15180_v51  ;;  %10846 = vmatprep.mubr.msk.bf16.mxu0 %vm1447_vm0, %v15180_v51  ;;  %v12240_v2 = vld [vmem:[#allocation7 + $0x5c] ss:$36 sps:$4 sm:$0xff]   ;;  %v7235_v35 = vmax.f32 %v7219_v31, 0.0  ;;  %v12278_v62 = vld [vmem:[%s16231_s11 + $0x1b0] ss:$36 sps:$4 sm:$0xff]   ;;  %v16316_v42 = vld [vmem:[#allocation22_spill] sm:$0xff] }
 0xa58   : > { %8111 = vmatmul.mubr.bf16.gmra.mxu1 %v15178_v60  ;;  %8184 = vmatmul.mubr.bf16.gmra.mxu0 %v15178_v60  ;;  %v12271_v29 = vld [vmem:[#allocation7 + $0x258] ss:$36 sps:$4 sm:$0xff]   ;;  %v12281_v3 = vld [vmem:[#allocation7 + $0x1d0] ss:$36 sps:$4 sm:$0xff]   ;;  %v16315_v22 = vld [vmem:[#allocation21_spill] sm:$0xff] }
 0xa59   : > { %v7236_v58 = vmax.f32 %v7220_v46, 0.0  ;;  %v7221_v63 = vadd.f32 %v15120_v27, %v7193_v53  ;;  %8213 = vmatpush1.bf16.msra.mxu1 %v12226_v34  ;;  %8286 = vmatpush1.bf16.msra.mxu0 %v12229_v55  ;;  %v12246_v27 = vld [vmem:[#allocation7 + $0x14] ss:$36 sps:$4 sm:$0xff]   ;;  %v12276_v14 = vld [vmem:[%s16231_s11 + $0x1fc] ss:$36 sps:$4 sm:$0xff]   ;;  %v16318_v46 = vld [vmem:[#allocation30_spill] sm:$0xff] }
 0xa5a   : > { %8214 = vmatprep.subr.bf16.mxu1 %v12234_v4  ;;  %8287 = vmatprep.subr.bf16.mxu0 %v12237_v19  ;;  %v12274_v40 = vld [vmem:[%s16231_s11 + $0x1f8] ss:$36 sps:$4 sm:$0xff]   ;;  %v12282_v52 = vld [vmem:[%s16231_s11 + $0x168] ss:$36 sps:$4 sm:$0xff]   ;;  %v16317_v55 = vld [vmem:[#allocation29_spill] sm:$0xff] }
 0xa5b   : > { %v15192_v44 = vpack.c.bf16 %v7236_v58, %v7234_v18  ;;  %v7237_v32 = vmax.f32 %v7221_v63, 0.0  ;;  %v16314_v9 = vld [vmem:[#allocation20_spill] sm:$0xff]  ;;  %v12285_v61 = vld [vmem:[#allocation7 + $0x188] ss:$36 sps:$4 sm:$0xff]   ;;  %v12286_v4 = vld [vmem:[%s16231_s11 + $0x120] ss:$36 sps:$4 sm:$0xff]  }
 0xa5c   : > { %v1501_v21 = vadd.f32 %v16315_v22, %v16314_v9  ;;  %v12288_v34 = vld [vmem:[%s16231_s11 + $0x124] ss:$36 sps:$4 sm:$0xff]   ;;  %v12292_v31 = vld [vmem:[%s16231_s11 + $0xdc] ss:$36 sps:$4 sm:$0xff]  }
 0xa5d   : > { %v15194_v5 = vpack.c.bf16 %v7237_v32, %v7235_v35  ;;  %8215 = vmatpush1.bf16.msra.mxu1 %v12232_v12  ;;  %8288 = vmatpush1.bf16.msra.mxu0 %v12235_v25  ;;  %v12289_v19 = vld [vmem:[#allocation7 + $0x140] ss:$36 sps:$4 sm:$0xff]   ;;  %v12290_v18 = vld [vmem:[%s16231_s11 + $0xd8] ss:$36 sps:$4 sm:$0xff]   ;;  %v16319_v63 = vld [vmem:[#allocation38_spill] sm:$0xff] }
 0xa5e   : > { %8216 = vmatprep.subr.bf16.mxu1 %v12240_v2  ;;  %8289 = vmatprep.subr.bf16.mxu0 %v12243_v7  ;;  %v1574_v48 = vadd.f32 %v16316_v42, %v1501_v21  ;;  %v12293_v58 = vld [vmem:[#allocation7 + $0xf8] ss:$36 sps:$4 sm:$0xff]   ;;  %v12294_v2 = vld [vmem:[%s16231_s11 + $0x90] ss:$36 sps:$4 sm:$0xff]   ;;  %v16327_v21 = vld [vmem:[#allocation41_spill] sm:$0xff] }
 0xa5f   : > { %10843 = vmatprep.mubr.msk.bf16.mxu1 %vm1447_vm0, %v15194_v5  ;;  %10847 = vmatprep.mubr.msk.bf16.mxu0 %vm1447_vm0, %v15194_v5  ;;  %v12296_v25 = vld [vmem:[%s16231_s11 + $0x94] ss:$36 sps:$4 sm:$0xff]   ;;  %v12300_v32 = vld [vmem:[%s16231_s11 + $0x4c] ss:$36 sps:$4 sm:$0xff]   ;;  %v12318_v42 = vld [vmem:[%s16231_s11 + $0x240] ss:$36 sps:$4 sm:$0xff]  }
 0xa60   : > { %8121 = vmatmul.mubr.bf16.gmra.mxu1 %v15192_v44  ;;  %8194 = vmatmul.mubr.bf16.gmra.mxu0 %v15192_v44  ;;  %v1647_v30 = vadd.f32 %v16317_v55, %v1574_v48  ;;  %v12297_v7 = vld [vmem:[#allocation7 + $0xb0] ss:$36 sps:$4 sm:$0xff]   ;;  %v12321_v48 = vld [vmem:[#allocation7 + $0x260] ss:$36 sps:$4 sm:$0xff]  }
 0xa61   : > { %8217 = vmatpush1.bf16.msra.mxu1 %v12238_v6  ;;  %8290 = vmatpush1.bf16.msra.mxu0 %v12241_v38  ;;  %v16320_v6 = vld [vmem:[#allocation37_spill] sm:$0xff]  ;;  %v12327_v55 = vld [vmem:[%s16231_s11 + $0x20c] ss:$36 sps:$4 sm:$0xff]  }
 0xa62   : > { %10848 = vmatprep.mubr.msk.bf16.mxu1 %vm1447_vm0, %v15138_v17  ;;  %10852 = vmatprep.mubr.msk.bf16.mxu0 %vm1447_vm0, %v15138_v17  ;;  %v1720_v53 = vadd.f32 %v16318_v46, %v1647_v30  ;;  %v1826_v38 = vmax.f32 %v16320_v6, 0.0  ;;  %v16329_v30 = vld [vmem:[#allocation27_spill] sm:$0xff] }
 0xa63   : > { %8218 = vmatprep.subr.bf16.mxu1 %v12246_v27  ;;  %8291 = vmatprep.subr.bf16.mxu0 %v12249_v36  ;;  %v12298_v27 = vld [vmem:[%s16231_s11 + $0x48] ss:$36 sps:$4 sm:$0xff]   ;;  %v16334_v6 = vld [vmem:[#allocation39_spill] sm:$0xff] }
 0xa64   : > { %v1793_v12 = vadd.f32 %v16319_v63, %v1720_v53  ;;  %v12301_v36 = vld [vmem:[#allocation7 + $0x68] ss:$36 sps:$4 sm:$0xff]   ;;  %v16331_v53 = vld [vmem:[#allocation40_spill] sm:$0xff] }
 0xa65   : > { %8219 = vmatpush1.bf16.msra.mxu1 %v12244_v43  ;;  %8292 = vmatpush1.bf16.msra.mxu0 %v12247_v8  ;;  %v12304_v8 = vld [vmem:[%s16231_s11 + $0x4] ss:$36 sps:$4 sm:$0xff]  }
 0xa66   : > { %8228 = vmatprep.subr.bf16.mxu1 %v12252_v16  ;;  %8301 = vmatprep.subr.bf16.mxu0 %v12255_v24  ;;  %v1828_v35 = vmax.f32 %v1793_v12, 0.0  ;;  %v12302_v16 = vld [vmem:[%s16231_s11] ss:$36 sps:$4 sm:$0xff]   ;;  %v12325_v63 = vld [vmem:[%s16231_s11 + $0x208] ss:$36 sps:$4 sm:$0xff]   ;;  %v16332_v12 = vld [vmem:[#allocation28_spill] sm:$0xff] }
 0xa67   : > { %v12305_v24 = vld [vmem:[#allocation7 + $0x20] ss:$36 sps:$4 sm:$0xff]  }
 0xa68   : > { %v15279_v43 = vpack.c.bf16 %v1828_v35, %v1826_v38  ;;  %v12330_v35 = vld [vmem:[%s16231_s11 + $0x1bc] ss:$36 sps:$4 sm:$0xff]   ;;  %v16335_v38 = vld [vmem:[#allocation35_spill] sm:$0xff] }
 0xa69   : > { %8229 = vmatpush2.bf16.msra.mxu1 %v12250_v28  ;;  %8302 = vmatpush2.bf16.msra.mxu0 %v12253_v39  ;;  %v12308_v28 = vld [vmem:[%s16231_s11 + $0x31c] ss:$36 sps:$4 sm:$0xff]   ;;  %v16321_v39 = vld [vmem:[#allocation23_spill] sm:$0xff] }
 0xa6a   : > { %8230 = vmatprep.subr.bf16.mxu1 %v12258_v20  ;;  %8303 = vmatprep.subr.bf16.mxu0 %v12261_v23  ;;  %v12306_v20 = vld [vmem:[%s16231_s11 + $0x318] ss:$36 sps:$4 sm:$0xff]  }
 0xa6b   : > { %v12309_v23 = vld [vmem:[#allocation7 + $0x338] ss:$36 sps:$4 sm:$0xff]  }
 0xa6d   : > { %8231 = vmatpush2.bf16.msra.mxu1 %v12256_v56  ;;  %8304 = vmatpush2.bf16.msra.mxu0 %v12259_v13  ;;  %v12312_v56 = vld [vmem:[%s16231_s11 + $0x2d4] ss:$36 sps:$4 sm:$0xff]  }
 0xa6e   : > { %8232 = vmatprep.subr.bf16.mxu1 %v12264_v26  ;;  %8305 = vmatprep.subr.bf16.mxu0 %v12267_v57  ;;  %v16322_v13 = vld [vmem:[#allocation24_spill] sm:$0xff]  ;;  %v16323_v57 = vld [vmem:[#allocation31_spill] sm:$0xff] }
 0xa71   : > { %8233 = vmatpush2.bf16.msra.mxu1 %v12262_v15  ;;  %8306 = vmatpush2.bf16.msra.mxu0 %v12265_v41  ;;  %v12310_v41 = vld [vmem:[%s16231_s11 + $0x2d0] ss:$36 sps:$4 sm:$0xff]  }
 0xa72   : > { %8234 = vmatprep.subr.bf16.mxu1 %v12270_v59  ;;  %8307 = vmatprep.subr.bf16.mxu0 %v12273_v37  ;;  %v12313_v59 = vld [vmem:[#allocation7 + $0x2f0] ss:$36 sps:$4 sm:$0xff]  }
 0xa73   : > { %v12316_v37 = vld [vmem:[%s16231_s11 + $0x28c] ss:$36 sps:$4 sm:$0xff]  }
 0xa75   : > { %8235 = vmatpush2.bf16.msra.mxu1 %v12268_v49  ;;  %8308 = vmatpush2.bf16.msra.mxu0 %v12271_v29  ;;  %v16324_v49 = vld [vmem:[#allocation25_spill] sm:$0xff] }
 0xa76   : > { %8350 = vmatprep.subr.bf16.mxu1 %v16312_v0  ;;  %8979 = vmatprep.subr.bf16.mxu0 %v12276_v14  ;;  %v1521_v29 = vadd.f32 %v16324_v49, %v16314_v9  ;;  %v16325_v14 = vld [vmem:[#allocation32_spill] sm:$0xff] }
 0xa78   : > { %8237 = vmatmul.mubr.bf16.vlgmr.msra.gmra.mxu1 %v15134_v10  ;;  %8310 = vmatmul.mubr.bf16.vlgmr.msra.gmra.mxu0 %v15134_v10 }
 0xa79   : > { %10849 = vmatprep.mubr.msk.bf16.mxu1 %vm1447_vm0, %v15160_v11  ;;  %10853 = vmatprep.mubr.msk.bf16.mxu0 %vm1447_vm0, %v15160_v11 }
 0xa7a   : > { %8351 = vmatpush1.bf16.msra.mxu1 %v12277_v1  ;;  %8980 = vmatpush1.bf16.msra.mxu0 %v12274_v40  ;;  %v12314_v1 = vld [vmem:[%s16231_s11 + $0x288] ss:$36 sps:$4 sm:$0xff]  }
 0xa7b   : > { %8352 = vmatprep.subr.bf16.mxu1 %v16312_v0  ;;  %8981 = vmatprep.subr.bf16.mxu0 %v12280_v47  ;;  %v12317_v47 = vld [vmem:[#allocation7 + $0x2a8] ss:$36 sps:$4 sm:$0xff]  }
 0xa7e   : > { %8353 = vmatpush1.bf16.msra.mxu1 %v12281_v3  ;;  %8982 = vmatpush1.bf16.msra.mxu0 %v12278_v62  ;;  %v12320_v62 = vld [vmem:[%s16231_s11 + $0x244] ss:$36 sps:$4 sm:$0xff]  }
 0xa7f   : > { %8354 = vmatprep.subr.bf16.mxu1 %v16312_v0  ;;  %8983 = vmatprep.subr.bf16.mxu0 %v12284_v33  ;;  %v16326_v3 = vld [vmem:[#allocation26_spill] sm:$0xff] }
 0xa80   : > { %8247 = vmatmul.mubr.bf16.gmra.mxu1 %v15156_v50  ;;  %8320 = vmatmul.mubr.bf16.gmra.mxu0 %v15156_v50  ;;  %v1594_v22 = vadd.f32 %v16326_v3, %v1521_v29  ;;  %v16340_v29 = vld [vmem:[#allocation46_spill] sm:$0xff] }
 0xa81   : > { %10850 = vmatprep.mubr.msk.bf16.mxu1 %vm1447_vm0, %v15180_v51  ;;  %10854 = vmatprep.mubr.msk.bf16.mxu0 %vm1447_vm0, %v15180_v51  ;;  %v12357_v3 = vld [vmem:[%s16231_s11 + $0xa4] ss:$36 sps:$4 sm:$0xff]  }
 0xa82   : > { %8355 = vmatpush1.bf16.msra.mxu1 %v12285_v61  ;;  %8984 = vmatpush1.bf16.msra.mxu0 %v12282_v52  ;;  %v16328_v52 = vld [vmem:[#allocation33_spill] sm:$0xff] }
 0xa83   : > { %8356 = vmatprep.subr.bf16.mxu1 %v16312_v0  ;;  %8985 = vmatprep.subr.bf16.mxu0 %v12288_v34  ;;  %v1667_v61 = vadd.f32 %v16328_v52, %v1594_v22  ;;  %v12324_v34 = vld [vmem:[%s16231_s11 + $0x204] ss:$36 sps:$4 sm:$0xff]   ;;  %v12358_v52 = vld [vmem:[%s16231_s11 + $0x50] ss:$36 sps:$4 sm:$0xff]  }
 0xa84   : > { %v16341_v22 = vld [vmem:[#allocation45_spill] sm:$0xff] }
 0xa86   : > { %8357 = vmatpush1.bf16.msra.mxu1 %v12289_v19  ;;  %8986 = vmatpush1.bf16.msra.mxu0 %v12286_v4  ;;  %v1531_v4 = vadd.f32 %v16329_v30, %v16314_v9  ;;  %v12367_v30 = vld [vmem:[%s16231_s11 + $0x10] ss:$36 sps:$4 sm:$0xff]  }
 0xa87   : > { %8358 = vmatprep.subr.bf16.mxu1 %v16312_v0  ;;  %8987 = vmatprep.subr.bf16.mxu0 %v12292_v31  ;;  %v16330_v31 = vld [vmem:[#allocation34_spill] sm:$0xff] }
 0xa88   : > { %8257 = vmatmul.mubr.bf16.gmra.mxu1 %v15178_v60  ;;  %8330 = vmatmul.mubr.bf16.gmra.mxu0 %v15178_v60  ;;  %v1740_v46 = vadd.f32 %v16330_v31, %v1667_v61  ;;  %v12361_v61 = vld [vmem:[%s16231_s11 + $0x58] ss:$36 sps:$4 sm:$0xff]   ;;  %v12373_v31 = vld [vmem:[%s16231_s11 + $0x328] ss:$36 sps:$4 sm:$0xff]  }
 0xa89   : > { %10851 = vmatprep.mubr.msk.bf16.mxu1 %vm1447_vm0, %v15194_v5  ;;  %10855 = vmatprep.mubr.msk.bf16.mxu0 %vm1447_vm0, %v15194_v5 }
 0xa8a   : > { %8359 = vmatpush1.bf16.msra.mxu1 %v12293_v58  ;;  %8988 = vmatpush1.bf16.msra.mxu0 %v12290_v18  ;;  %v1830_v18 = vmax.f32 %v16331_v53, 0.0  ;;  %v12322_v58 = vld [vmem:[%s16231_s11 + $0x200] ss:$36 sps:$4 sm:$0xff]  }
 0xa8b   : > { %8360 = vmatprep.subr.bf16.mxu1 %v16312_v0  ;;  %8989 = vmatprep.subr.bf16.mxu0 %v12296_v25  ;;  %v1604_v25 = vadd.f32 %v16332_v12, %v1531_v4  ;;  %v12375_v4 = vld [vmem:[%s16231_s11 + $0x32c] ss:$36 sps:$4 sm:$0xff]   ;;  %v12381_v53 = vld [vmem:[%s16231_s11 + $0x2e4] ss:$36 sps:$4 sm:$0xff]   ;;  %v12387_v12 = vld [vmem:[%s16231_s11 + $0x29c] ss:$36 sps:$4 sm:$0xff]  }
 0xa8e   : > { %8361 = vmatpush1.bf16.msra.mxu1 %v12297_v7  ;;  %8990 = vmatpush1.bf16.msra.mxu0 %v12294_v2  ;;  %v16333_v2 = vld [vmem:[#allocation44_spill] sm:$0xff] }
 0xa8f   : > { %8362 = vmatprep.subr.bf16.mxu1 %v16312_v0  ;;  %8991 = vmatprep.subr.bf16.mxu0 %v12300_v32  ;;  %v1813_v7 = vadd.f32 %v16333_v2, %v1740_v46  ;;  %v12333_v32 = vld [vmem:[%s16231_s11 + $0x1c4] ss:$36 sps:$4 sm:$0xff]   ;;  %v12378_v46 = vld [vmem:[%s16231_s11 + $0x2dc] ss:$36 sps:$4 sm:$0xff]  }
 0xa90   : > { %8267 = vmatmul.mubr.bf16.gmra.mxu1 %v15192_v44  ;;  %8340 = vmatmul.mubr.bf16.gmra.mxu0 %v15192_v44  ;;  %v12385_v2 = vld [vmem:[%s16231_s11 + $0x298] ss:$36 sps:$4 sm:$0xff]  }
 0xa91   : > { %10856 = vmatprep.mubr.msk.bf16.mxu1 %vm1447_vm0, %v15138_v17  ;;  %10968 = vmatprep.mubr.msk.bf16.mxu0 %vm1447_vm0, %v15279_v43  ;;  %v1511_v17 = vadd.f32 %v16321_v39, %v16314_v9  ;;  %v16337_v39 = vld [vmem:[#allocation43_spill] sm:$0xff] }
 0xa92   : > { %8363 = vmatpush1.bf16.msra.mxu1 %v12301_v36  ;;  %8992 = vmatpush1.bf16.msra.mxu0 %v12298_v27  ;;  %v1677_v27 = vadd.f32 %v16335_v38, %v1604_v25  ;;  %v12328_v36 = vld [vmem:[%s16231_s11 + $0x1b8] ss:$36 sps:$4 sm:$0xff]   ;;  %v12382_v25 = vld [vmem:[%s16231_s11 + $0x290] ss:$36 sps:$4 sm:$0xff]  }
 0xa93   : > { %8364 = vmatprep.subr.bf16.mxu1 %v16312_v0  ;;  %8993 = vmatprep.subr.bf16.mxu0 %v12304_v8  ;;  %v1584_v26 = vadd.f32 %v16322_v13, %v1511_v17  ;;  %v1836_v8 = vmax.f32 %v1813_v7, 0.0  ;;  %v1834_v17 = vmax.f32 %v16337_v39, 0.0  ;;  %v16338_v13 = vld [vmem:[#allocation47_spill] sm:$0xff]  ;;  %v12405_v39 = vld [vmem:[%s16231_s11 + $0x188] ss:$36 sps:$4 sm:$0xff]  }
 0xa94   : > { %v12390_v7 = vld [vmem:[%s16231_s11 + $0x24c] ss:$36 sps:$4 sm:$0xff]  }
 0xa95   : > { %v1657_v15 = vadd.f32 %v16323_v57, %v1584_v26  ;;  %v12342_v57 = vld [vmem:[%s16231_s11 + $0x12c] ss:$36 sps:$4 sm:$0xff]  }
 0xa96   : > { %8365 = vmatpush1.bf16.msra.mxu1 %v12305_v24  ;;  %8994 = vmatpush1.bf16.msra.mxu0 %v12302_v16  ;;  %v12339_v16 = vld [vmem:[%s16231_s11 + $0x17c] ss:$36 sps:$4 sm:$0xff]   ;;  %v12391_v38 = vld [vmem:[%s16231_s11 + $0x250] ss:$36 sps:$4 sm:$0xff]  }
 0xa97   : > { %8374 = vmatprep.subr.bf16.mxu1 %v16312_v0  ;;  %9003 = vmatprep.subr.bf16.mxu0 %v12308_v28  ;;  %v1730_v40 = vadd.f32 %v16325_v14, %v1657_v15  ;;  %v16336_v24 = vld [vmem:[#allocation36_spill] sm:$0xff]  ;;  %v1838_v14 = vmax.f32 %v16340_v29, 0.0 }
 0xa98   : > { %v1750_v28 = vadd.f32 %v16336_v24, %v1677_v27  ;;  %v12345_v15 = vld [vmem:[%s16231_s11 + $0x134] ss:$36 sps:$4 sm:$0xff]   ;;  %v12404_v24 = vld [vmem:[%s16231_s11 + $0x184] ss:$36 sps:$4 sm:$0xff]   ;;  %v12424_v29 = vld [vmem:[%s16231_s11 + $0x1c] ss:$36 sps:$4 sm:$0xff]  }
 0xa99   : > { %v1803_v33 = vadd.f32 %v16327_v21, %v1730_v40  ;;  %v12346_v40 = vld [vmem:[%s16231_s11 + $0xe0] ss:$36 sps:$4 sm:$0xff]   ;;  %v12352_v21 = vld [vmem:[%s16231_s11 + $0x98] ss:$36 sps:$4 sm:$0xff]  }
 0xa9a   : > { %8375 = vmatpush2.bf16.msra.mxu1 %v12309_v23  ;;  %9004 = vmatpush2.bf16.msra.mxu0 %v12306_v20  ;;  %v12334_v20 = vld [vmem:[%s16231_s11 + $0x170] ss:$36 sps:$4 sm:$0xff]   ;;  %v12337_v23 = vld [vmem:[%s16231_s11 + $0x178] ss:$36 sps:$4 sm:$0xff]   ;;  %v1823_v26 = vadd.f32 %v16338_v13, %v1750_v28  ;;  %v12402_v28 = vld [vmem:[%s16231_s11 + $0x180] ss:$36 sps:$4 sm:$0xff]  }
 0xa9b   : > { %8376 = vmatprep.subr.bf16.mxu1 %v16312_v0  ;;  %9005 = vmatprep.subr.bf16.mxu0 %v12312_v56  ;;  %v1832_v19 = vmax.f32 %v1803_v33, 0.0  ;;  %v15386_v56 = vpack.c.bf16 %v1836_v8, %v1834_v17  ;;  %v12355_v33 = vld [vmem:[%s16231_s11 + $0xa0] ss:$36 sps:$4 sm:$0xff]   ;;  %v12396_v27 = vld [vmem:[%s16231_s11 + $0x214] ss:$36 sps:$4 sm:$0xff]  }
 0xa9c   : > { %v1840_v49 = vmax.f32 %v1823_v26, 0.0  ;;  %v12400_v8 = vld [vmem:[%s16231_s11 + $0x1cc] ss:$36 sps:$4 sm:$0xff]   ;;  %v12408_v17 = vld [vmem:[%s16231_s11 + $0x13c] ss:$36 sps:$4 sm:$0xff]  }
 0xa9d   : > { %v15350_v9 = vpack.c.bf16 %v1832_v19, %v1830_v18  ;;  %v12370_v19 = vld [vmem:[%s16231_s11 + $0x320] ss:$36 sps:$4 sm:$0xff]   ;;  %v12376_v18 = vld [vmem:[%s16231_s11 + $0x2d8] ss:$36 sps:$4 sm:$0xff]   ;;  %v12410_v26 = vld [vmem:[%s16231_s11 + $0xf0] ss:$36 sps:$4 sm:$0xff]  }
 0xa9e   : > { %8377 = vmatpush2.bf16.msra.mxu1 %v12313_v59  ;;  %9006 = vmatpush2.bf16.msra.mxu0 %v12310_v41  ;;  %v16339_v41 = vld [vmem:[#allocation42_spill] sm:$0xff]  ;;  %v12412_v13 = vld [vmem:[%s16231_s11 + $0xf4] ss:$36 sps:$4 sm:$0xff]  }
 0xa9f   : > { %8378 = vmatprep.subr.bf16.mxu1 %v16312_v0  ;;  %9007 = vmatprep.subr.bf16.mxu0 %v12316_v37  ;;  %v12340_v59 = vld [vmem:[%s16231_s11 + $0x128] ss:$36 sps:$4 sm:$0xff]   ;;  %v12343_v37 = vld [vmem:[%s16231_s11 + $0x130] ss:$36 sps:$4 sm:$0xff]  }
 0xaa2   : > { %8379 = vmatpush2.bf16.msra.mxu1 %v12317_v47  ;;  %9008 = vmatpush2.bf16.msra.mxu0 %v12314_v1  ;;  %v12349_v1 = vld [vmem:[%s16231_s11 + $0xe8] ss:$36 sps:$4 sm:$0xff]   ;;  %v15420_v47 = vpack.c.bf16 %v1840_v49, %v1838_v14  ;;  %v12422_v14 = vld [vmem:[%s16231_s11 + $0x18] ss:$36 sps:$4 sm:$0xff]  }
 0xaa3   : > { %8380 = vmatprep.subr.bf16.mxu1 %v16312_v0  ;;  %9009 = vmatprep.subr.bf16.mxu0 %v12320_v62  ;;  %v12354_v62 = vld [vmem:[%s16231_s11 + $0x9c] ss:$36 sps:$4 sm:$0xff]   ;;  %v12420_v49 = vld [vmem:[%s16231_s11 + $0x64] ss:$36 sps:$4 sm:$0xff]  }
 0xaa6   : > { %8381 = vmatpush2.bf16.msra.mxu1 %v12321_v48  ;;  %9010 = vmatpush2.bf16.msra.mxu0 %v12318_v42  ;;  %v12366_v42 = vld [vmem:[%s16231_s11 + $0xc] ss:$36 sps:$4 sm:$0xff]   ;;  %v12369_v48 = vld [vmem:[%s16231_s11 + $0x14] ss:$36 sps:$4 sm:$0xff]  }
 0xaa7   : > { %9052 = vmatprep.subr.bf16.mxu1 %v12324_v34  ;;  %9125 = vmatprep.subr.bf16.mxu0 %v12327_v55  ;;  %v16342_v34 = vld [vmem:[#allocation48_spill] sm:$0xff]  ;;  %v12364_v55 = vld [vmem:[%s16231_s11 + $0x8] ss:$36 sps:$4 sm:$0xff]  }
 0xaa9   : > { %8383 = vmatmul.mubr.bf16.vlgmr.msra.gmra.mxu1 %v15134_v10  ;;  %9012 = vmatmul.mubr.bf16.vlgmr.msra.gmra.mxu0 %v16334_v6  ;;  %v12331_v10 = vld [vmem:[%s16231_s11 + $0x1c0] ss:$36 sps:$4 sm:$0xff]  }
 0xaaa   : > { %10857 = vmatprep.mubr.msk.bf16.mxu1 %vm1447_vm0, %v15160_v11  ;;  %10969 = vmatprep.mubr.msk.bf16.mxu0 %vm1447_vm0, %v15350_v9  ;;  %v12336_v11 = vld [vmem:[%s16231_s11 + $0x174] ss:$36 sps:$4 sm:$0xff]  }
 0xaab   : > { %9053 = vmatpush1.bf16.msra.mxu1 %v12322_v58  ;;  %9126 = vmatpush1.bf16.msra.mxu0 %v12325_v63  ;;  %v12379_v58 = vld [vmem:[%s16231_s11 + $0x2e0] ss:$36 sps:$4 sm:$0xff]   ;;  %v12384_v63 = vld [vmem:[%s16231_s11 + $0x294] ss:$36 sps:$4 sm:$0xff]  }
 0xaac   : > { %9054 = vmatprep.subr.bf16.mxu1 %v12330_v35  ;;  %9127 = vmatprep.subr.bf16.mxu0 %v12333_v32  ;;  %v12393_v35 = vld [vmem:[%s16231_s11 + $0x254] ss:$36 sps:$4 sm:$0xff]   ;;  %v12388_v32 = vld [vmem:[%s16231_s11 + $0x248] ss:$36 sps:$4 sm:$0xff]  }
 0xaaf   : > { %9055 = vmatpush1.bf16.msra.mxu1 %v12328_v36  ;;  %9128 = vmatpush1.bf16.msra.mxu0 %v12331_v10  ;;  %v12394_v36 = vld [vmem:[%s16231_s11 + $0x210] ss:$36 sps:$4 sm:$0xff]   ;;  %v12397_v10 = vld [vmem:[%s16231_s11 + $0x218] ss:$36 sps:$4 sm:$0xff]  }
 0xab0   : > { %9056 = vmatprep.subr.bf16.mxu1 %v12336_v11  ;;  %9129 = vmatprep.subr.bf16.mxu0 %v12339_v16  ;;  %v12398_v11 = vld [vmem:[%s16231_s11 + $0x1c8] ss:$36 sps:$4 sm:$0xff]   ;;  %v12401_v16 = vld [vmem:[%s16231_s11 + $0x1d0] ss:$36 sps:$4 sm:$0xff]  }
 0xab1   : > { %8391 = vmatmul.mubr.bf16.gmra.mxu1 %v15156_v50  ;;  %9022 = vmatmul.mubr.bf16.gmra.mxu0 %v16339_v41  ;;  %v12348_v50 = vld [vmem:[%s16231_s11 + $0xe4] ss:$36 sps:$4 sm:$0xff]  }
 0xab2   : > { %10858 = vmatprep.mubr.msk.bf16.mxu1 %vm1447_vm0, %v15180_v51  ;;  %10970 = vmatprep.mubr.msk.bf16.mxu0 %vm1447_vm0, %v15386_v56  ;;  %v12351_v51 = vld [vmem:[%s16231_s11 + $0xec] ss:$36 sps:$4 sm:$0xff]  }
 0xab3   : > { %9057 = vmatpush1.bf16.msra.mxu1 %v12334_v20  ;;  %9130 = vmatpush1.bf16.msra.mxu0 %v12337_v23  ;;  %v12406_v20 = vld [vmem:[%s16231_s11 + $0x138] ss:$36 sps:$4 sm:$0xff]   ;;  %v12409_v23 = vld [vmem:[%s16231_s11 + $0x140] ss:$36 sps:$4 sm:$0xff]  }
 0xab4   : > { %9058 = vmatprep.subr.bf16.mxu1 %v12342_v57  ;;  %9131 = vmatprep.subr.bf16.mxu0 %v12345_v15  ;;  %v12413_v57 = vld [vmem:[%s16231_s11 + $0xf8] ss:$36 sps:$4 sm:$0xff]   ;;  %v12416_v15 = vld [vmem:[%s16231_s11 + $0xac] ss:$36 sps:$4 sm:$0xff]  }
 0xab7   : > { %9059 = vmatpush1.bf16.msra.mxu1 %v12340_v59  ;;  %9132 = vmatpush1.bf16.msra.mxu0 %v12343_v37  ;;  %v12414_v59 = vld [vmem:[%s16231_s11 + $0xa8] ss:$36 sps:$4 sm:$0xff]   ;;  %v12417_v37 = vld [vmem:[%s16231_s11 + $0xb0] ss:$36 sps:$4 sm:$0xff]  }
 0xab8   : > { %9060 = vmatprep.subr.bf16.mxu1 %v12348_v50  ;;  %9133 = vmatprep.subr.bf16.mxu0 %v12351_v51  ;;  %v12418_v50 = vld [vmem:[%s16231_s11 + $0x60] ss:$36 sps:$4 sm:$0xff]   ;;  %v12421_v51 = vld [vmem:[%s16231_s11 + $0x68] ss:$36 sps:$4 sm:$0xff]  }
 0xab9   : > { %8399 = vmatmul.mubr.bf16.gmra.mxu1 %v15178_v60  ;;  %9032 = vmatmul.mubr.bf16.gmra.mxu0 %v16341_v22  ;;  %v12360_v60 = vld [vmem:[%s16231_s11 + $0x54] ss:$36 sps:$4 sm:$0xff]  }
 0xaba   : > { %10859 = vmatprep.mubr.msk.bf16.mxu1 %vm1447_vm0, %v15194_v5  ;;  %10971 = vmatprep.mubr.msk.bf16.mxu0 %vm1447_vm0, %v15420_v47  ;;  %v12363_v5 = vld [vmem:[%s16231_s11 + $0x5c] ss:$36 sps:$4 sm:$0xff]  }
 0xabb   : > { %9061 = vmatpush1.bf16.msra.mxu1 %v12346_v40  ;;  %9134 = vmatpush1.bf16.msra.mxu0 %v12349_v1  ;;  %v12425_v40 = vld [vmem:[%s16231_s11 + $0x20] ss:$36 sps:$4 sm:$0xff]   ;;  %v12428_v1 = vld [vmem:[%s16231_s11 + $0x334] ss:$36 sps:$4 sm:$0xff]  }
 0xabc   : > { %9062 = vmatprep.subr.bf16.mxu1 %v12354_v62  ;;  %9135 = vmatprep.subr.bf16.mxu0 %v12357_v3  ;;  %v12429_v62 = vld [vmem:[%s16231_s11 + $0x338] ss:$36 sps:$4 sm:$0xff]   ;;  %v12432_v3 = vld [vmem:[%s16231_s11 + $0x2ec] ss:$36 sps:$4 sm:$0xff]  }
 0xabf   : > { %9063 = vmatpush1.bf16.msra.mxu1 %v12352_v21  ;;  %9136 = vmatpush1.bf16.msra.mxu0 %v12355_v33  ;;  %v12430_v21 = vld [vmem:[%s16231_s11 + $0x2e8] ss:$36 sps:$4 sm:$0xff]   ;;  %v12433_v33 = vld [vmem:[%s16231_s11 + $0x2f0] ss:$36 sps:$4 sm:$0xff]  }
 0xac0   : > { %9064 = vmatprep.subr.bf16.mxu1 %v12360_v60  ;;  %9137 = vmatprep.subr.bf16.mxu0 %v12363_v5  ;;  %v12436_v60 = vld [vmem:[%s16231_s11 + $0x2a4] ss:$36 sps:$4 sm:$0xff]  }
 0xac1   : > { %8407 = vmatmul.mubr.bf16.gmra.mxu1 %v15192_v44  ;;  %9042 = vmatmul.mubr.bf16.gmra.mxu0 %v16342_v34  ;;  %v12372_v44 = vld [vmem:[%s16231_s11 + $0x324] ss:$36 sps:$4 sm:$0xff]  }
 0xac2   : > { %10972 = vmatprep.mubr.msk.bf16.mxu1 %vm1447_vm0, %v15279_v43  ;;  %10976 = vmatprep.mubr.msk.bf16.mxu0 %vm1447_vm0, %v15279_v43  ;;  %v12434_v5 = vld [vmem:[%s16231_s11 + $0x2a0] ss:$36 sps:$4 sm:$0xff]  }
 0xac3   : > { %9065 = vmatpush1.bf16.msra.mxu1 %v12358_v52  ;;  %9138 = vmatpush1.bf16.msra.mxu0 %v12361_v61  ;;  %v12437_v52 = vld [vmem:[%s16231_s11 + $0x2a8] ss:$36 sps:$4 sm:$0xff]   ;;  %v12440_v61 = vld [vmem:[%s16231_s11 + $0x25c] ss:$36 sps:$4 sm:$0xff]  }
 0xac4   : > { %9066 = vmatprep.subr.bf16.mxu1 %v12366_v42  ;;  %9139 = vmatprep.subr.bf16.mxu0 %v12369_v48  ;;  %v12438_v42 = vld [vmem:[%s16231_s11 + $0x258] ss:$36 sps:$4 sm:$0xff]   ;;  %v12441_v48 = vld [vmem:[%s16231_s11 + $0x260] ss:$36 sps:$4 sm:$0xff]  }
 0xac7   : > { %9067 = vmatpush1.bf16.msra.mxu1 %v12364_v55  ;;  %9140 = vmatpush1.bf16.msra.mxu0 %v12367_v30 }
 0xac8   : > { %9076 = vmatprep.subr.bf16.mxu1 %v12372_v44  ;;  %9149 = vmatprep.subr.bf16.mxu0 %v12375_v4 }
 0xacb   : > { %9077 = vmatpush2.bf16.msra.mxu1 %v12370_v19  ;;  %9150 = vmatpush2.bf16.msra.mxu0 %v12373_v31 }
 0xacc   : > { %9078 = vmatprep.subr.bf16.mxu1 %v12378_v46  ;;  %9151 = vmatprep.subr.bf16.mxu0 %v12381_v53 }
 0xacf   : > { %9079 = vmatpush2.bf16.msra.mxu1 %v12376_v18  ;;  %9152 = vmatpush2.bf16.msra.mxu0 %v12379_v58 }
 0xad0   : > { %9080 = vmatprep.subr.bf16.mxu1 %v12384_v63  ;;  %9153 = vmatprep.subr.bf16.mxu0 %v12387_v12 }
 0xad3   : > { %9081 = vmatpush2.bf16.msra.mxu1 %v12382_v25  ;;  %9154 = vmatpush2.bf16.msra.mxu0 %v12385_v2 }
 0xad4   : > { %9082 = vmatprep.subr.bf16.mxu1 %v12390_v7  ;;  %9155 = vmatprep.subr.bf16.mxu0 %v12393_v35 }
 0xad7   : > { %9083 = vmatpush2.bf16.msra.mxu1 %v12388_v32  ;;  %9156 = vmatpush2.bf16.msra.mxu0 %v12391_v38 }
 0xad8   : > { %9198 = vmatprep.subr.bf16.mxu1 %v12396_v27  ;;  %9271 = vmatprep.subr.bf16.mxu0 %v16312_v0 }
 0xada   : > { %9085 = vmatmul.mubr.bf16.vlgmr.msra.gmra.mxu1 %v16334_v6  ;;  %9158 = vmatmul.mubr.bf16.vlgmr.msra.gmra.mxu0 %v16334_v6 }
 0xadb   : > { %10973 = vmatprep.mubr.msk.bf16.mxu1 %vm1447_vm0, %v15350_v9  ;;  %10977 = vmatprep.mubr.msk.bf16.mxu0 %vm1447_vm0, %v15350_v9 }
 0xadc   : > { %9199 = vmatpush1.bf16.msra.mxu1 %v12394_v36  ;;  %9272 = vmatpush1.bf16.msra.mxu0 %v12397_v10 }
 0xadd   : > { %9200 = vmatprep.subr.bf16.mxu1 %v12400_v8  ;;  %9273 = vmatprep.subr.bf16.mxu0 %v16312_v0 }
 0xae0   : > { %9201 = vmatpush1.bf16.msra.mxu1 %v12398_v11  ;;  %9274 = vmatpush1.bf16.msra.mxu0 %v12401_v16 }
 0xae1   : > { %9202 = vmatprep.subr.bf16.mxu1 %v12404_v24  ;;  %9275 = vmatprep.subr.bf16.mxu0 %v16312_v0 }
 0xae2   : > { %9095 = vmatmul.mubr.bf16.gmra.mxu1 %v16339_v41  ;;  %9168 = vmatmul.mubr.bf16.gmra.mxu0 %v16339_v41 }
 0xae3   : > { %10974 = vmatprep.mubr.msk.bf16.mxu1 %vm1447_vm0, %v15386_v56  ;;  %10978 = vmatprep.mubr.msk.bf16.mxu0 %vm1447_vm0, %v15386_v56 }
 0xae4   : > { %9203 = vmatpush1.bf16.msra.mxu1 %v12402_v28  ;;  %9276 = vmatpush1.bf16.msra.mxu0 %v12405_v39 }
 0xae5   : > { %9204 = vmatprep.subr.bf16.mxu1 %v12408_v17  ;;  %9277 = vmatprep.subr.bf16.mxu0 %v16312_v0 }
 0xae8   : > { %9205 = vmatpush1.bf16.msra.mxu1 %v12406_v20  ;;  %9278 = vmatpush1.bf16.msra.mxu0 %v12409_v23 }
 0xae9   : > { %9206 = vmatprep.subr.bf16.mxu1 %v12412_v13  ;;  %9279 = vmatprep.subr.bf16.mxu0 %v16312_v0 }
 0xaea   : > { %9105 = vmatmul.mubr.bf16.gmra.mxu1 %v16341_v22  ;;  %9178 = vmatmul.mubr.bf16.gmra.mxu0 %v16341_v22 }
 0xaeb   : > { %10975 = vmatprep.mubr.msk.bf16.mxu1 %vm1447_vm0, %v15420_v47  ;;  %10979 = vmatprep.mubr.msk.bf16.mxu0 %vm1447_vm0, %v15420_v47 }
 0xaec   : > { %9207 = vmatpush1.bf16.msra.mxu1 %v12410_v26  ;;  %9280 = vmatpush1.bf16.msra.mxu0 %v12413_v57 }
 0xaed   : > { %9208 = vmatprep.subr.bf16.mxu1 %v12416_v15  ;;  %9281 = vmatprep.subr.bf16.mxu0 %v16312_v0 }
 0xaf0   : > { %9209 = vmatpush1.bf16.msra.mxu1 %v12414_v59  ;;  %9282 = vmatpush1.bf16.msra.mxu0 %v12417_v37 }
 0xaf1   : > { %9210 = vmatprep.subr.bf16.mxu1 %v12420_v49  ;;  %9283 = vmatprep.subr.bf16.mxu0 %v16312_v0 }
 0xaf2   : > { %9115 = vmatmul.mubr.bf16.gmra.mxu1 %v16342_v34  ;;  %9188 = vmatmul.mubr.bf16.gmra.mxu0 %v16342_v34 }
 0xaf3   : > { %10980 = vmatprep.mubr.msk.bf16.mxu1 %vm1447_vm0, %v15279_v43  ;;  %10984 = vmatprep.mubr.msk.bf16.mxu0 %vm1447_vm0, %v15279_v43  ;;  %v12426_v43 = vld [vmem:[%s16231_s11 + $0x330] ss:$36 sps:$4 sm:$0xff]  }
 0xaf4   : > { %9211 = vmatpush1.bf16.msra.mxu1 %v12418_v50  ;;  %9284 = vmatpush1.bf16.msra.mxu0 %v12421_v51 }
 0xaf5   : > { %9212 = vmatprep.subr.bf16.mxu1 %v12424_v29  ;;  %9285 = vmatprep.subr.bf16.mxu0 %v16312_v0 }
 0xaf8   : > { %9213 = vmatpush1.bf16.msra.mxu1 %v12422_v14  ;;  %9286 = vmatpush1.bf16.msra.mxu0 %v12425_v40 }
 0xaf9   : > { %9222 = vmatprep.subr.bf16.mxu1 %v12428_v1  ;;  %9295 = vmatprep.subr.bf16.mxu0 %v16312_v0 }
 0xafc   : > { %9223 = vmatpush2.bf16.msra.mxu1 %v12426_v43  ;;  %9296 = vmatpush2.bf16.msra.mxu0 %v12429_v62 }
 0xafd   : > { %9224 = vmatprep.subr.bf16.mxu1 %v12432_v3  ;;  %9297 = vmatprep.subr.bf16.mxu0 %v16312_v0 }
 0xb00   : > { %9225 = vmatpush2.bf16.msra.mxu1 %v12430_v21  ;;  %9298 = vmatpush2.bf16.msra.mxu0 %v12433_v33 }
 0xb01   : > { %9226 = vmatprep.subr.bf16.mxu1 %v12436_v60  ;;  %9299 = vmatprep.subr.bf16.mxu0 %v16312_v0 }
 0xb04   : > { %9227 = vmatpush2.bf16.msra.mxu1 %v12434_v5  ;;  %9300 = vmatpush2.bf16.msra.mxu0 %v12437_v52 }
 0xb05   : > { %9228 = vmatprep.subr.bf16.mxu1 %v12440_v61  ;;  %9301 = vmatprep.subr.bf16.mxu0 %v16312_v0 }
 0xb08   : > { %9229 = vmatpush2.bf16.msra.mxu1 %v12438_v42  ;;  %9302 = vmatpush2.bf16.msra.mxu0 %v12441_v48  ;;  %v15662_v55 = vpop.f32.mrf.mxu1  ;;  %v15664_v30 = vpop.f32.mrf.mxu0 }
 0xb0a   : > { %v15666_v44 = vpop.f32.mrf.mxu1  ;;  %v15668_v4 = vpop.f32.mrf.mxu0 }
 0xb0b   : > { %9231 = vmatmul.mubr.bf16.vlgmr.msra.gmra.mxu1 %v16334_v6  ;;  %9304 = vmatmul.mubr.bf16.vlgmr.msra.gmra.mxu0 %v16334_v6 }
 0xb0c   : > { %10981 = vmatprep.mubr.msk.bf16.mxu1 %vm1447_vm0, %v15350_v9  ;;  %10985 = vmatprep.mubr.msk.bf16.mxu0 %vm1447_vm0, %v15350_v9  ;;  %v15676_v0 = vpop.f32.mrf.mxu1  ;;  %v15678_v19 = vpop.f32.mrf.mxu0 }
 0xb0e   : > { %v15680_v31 = vpop.f32.mrf.mxu1  ;;  %v15682_v46 = vpop.f32.mrf.mxu0 }
 0xb10   : > { %v15684_v53 = vpop.f32.mrf.mxu1  ;;  %v15686_v18 = vpop.f32.mrf.mxu0 }
 0xb12   : > { %v15688_v58 = vpop.f32.mrf.mxu1  ;;  %v15690_v6 = vpop.f32.mrf.mxu0 }
 0xb13   : > { %9241 = vmatmul.mubr.bf16.gmra.mxu1 %v16339_v41  ;;  %9312 = vmatmul.mubr.bf16.gmra.mxu0 %v16339_v41 }
 0xb14   : > { %10982 = vmatprep.mubr.msk.bf16.mxu1 %vm1447_vm0, %v15386_v56  ;;  %10986 = vmatprep.mubr.msk.bf16.mxu0 %vm1447_vm0, %v15386_v56  ;;  %v15698_v9 = vpop.f32.mrf.mxu1  ;;  %v15700_v63 = vpop.f32.mrf.mxu0 }
 0xb16   : > { %v15702_v12 = vpop.f32.mrf.mxu1  ;;  %v15704_v25 = vpop.f32.mrf.mxu0 }
 0xb18   : > { %v15706_v2 = vpop.f32.mrf.mxu1  ;;  %v15708_v7 = vpop.f32.mrf.mxu0 }
 0xb1a   : > { %v15716_v56 = vpop.f32.mrf.mxu1  ;;  %v15718_v41 = vpop.f32.mrf.mxu0 }
 0xb1b   : > { %9251 = vmatmul.mubr.bf16.gmra.mxu1 %v16341_v22  ;;  %9320 = vmatmul.mubr.bf16.gmra.mxu0 %v16341_v22 }
 0xb1c   : > { %10983 = vmatprep.mubr.msk.bf16.mxu1 %vm1447_vm0, %v15420_v47  ;;  %10987 = vmatprep.mubr.msk.bf16.mxu0 %vm1447_vm0, %v15420_v47  ;;  %v15720_v35 = vpop.f32.mrf.mxu1  ;;  %v15722_v32 = vpop.f32.mrf.mxu0 }
 0xb1e   : > { %v15726_v38 = vpop.f32.mrf.mxu1  ;;  %v15728_v22 = vpop.f32.mrf.mxu0 }
 0xb20   : > { %v15730_v27 = vpop.f32.mrf.mxu1  ;;  %v15732_v36 = vpop.f32.mrf.mxu0 }
 0xb22   : > { %v15734_v47 = vpop.f32.mrf.mxu1  ;;  %v15736_v10 = vpop.f32.mrf.mxu0 }
 0xb23   : > { %9261 = vmatmul.mubr.bf16.gmra.mxu1 %v16342_v34  ;;  %9328 = vmatmul.mubr.bf16.gmra.mxu0 %v16342_v34 }
 0xb24   : > { %v15738_v8 = vpop.f32.mrf.mxu1  ;;  %v15740_v11 = vpop.f32.mrf.mxu0 }
 0xb26   : > { %v15742_v16 = vpop.f32.mrf.mxu1  ;;  %v15744_v24 = vpop.f32.mrf.mxu0 }
 0xb27   : > { %16343 = vst [vmem:[#allocation19_spill] sm:$0xff] %v15744_v24  ;;  %v12443_v24 = vld [vmem:[%s12979_s15 + $0x8] sm:$0xff] }
 0xb38   : > { %v15746_v34 = vpop.f32.mrf.mxu1  ;;  %v15748_v28 = vpop.f32.mrf.mxu0 }
 0xb39   : > { %16344 = vst [vmem:[#allocation51_spill] sm:$0xff] %v15748_v28 }
 0xb3a   : > { %v15750_v39 = vpop.f32.mrf.mxu1  ;;  %v15752_v17 = vpop.f32.mrf.mxu0 }
 0xb3b   : > { %16345 = vst [vmem:[#allocation49_spill] sm:$0xff] %v15752_v17 }
 0xb3c   : > { %v15754_v20 = vpop.f32.mrf.mxu1  ;;  %v15756_v23 = vpop.f32.mrf.mxu0 }
 0xb3d   : > { %16346 = vst [vmem:[#allocation50_spill] sm:$0xff] %v15756_v23 }
 0xb3e   : > { %v15758_v13 = vpop.f32.mrf.mxu1  ;;  %v15760_v26 = vpop.f32.mrf.mxu0 }
 0xb3f   : > { %16347 = vst [vmem:[#allocation52_spill] sm:$0xff] %v15760_v26 }
 0xb40   : > { %v15762_v57 = vpop.f32.mrf.mxu1  ;;  %v15764_v15 = vpop.f32.mrf.mxu0 }
 0xb41   : > { %16348 = vst [vmem:[#allocation18_spill] sm:$0xff] %v15764_v15 }
 0xb42   : > { %v15766_v59 = vpop.f32.mrf.mxu1  ;;  %v15768_v37 = vpop.f32.mrf.mxu0 }
 0xb43   : > { %16349 = vst [vmem:[#allocation20_spill] sm:$0xff] %v15768_v37 }
 0xb44   : > { %v15770_v49 = vpop.f32.mrf.mxu1  ;;  %v15772_v50 = vpop.f32.mrf.mxu0 }
 0xb45   : > { %16350 = vst [vmem:[#allocation21_spill] sm:$0xff] %v15772_v50 }
 0xb46   : > { %v15774_v51 = vpop.f32.mrf.mxu1  ;;  %v15776_v29 = vpop.f32.mrf.mxu0 }
 0xb47   : > { %16351 = vst [vmem:[#allocation22_spill] sm:$0xff] %v15776_v29 }
 0xb48   : > { %v15778_v14 = vpop.f32.mrf.mxu1  ;;  %v15780_v40 = vpop.f32.mrf.mxu0 }
 0xb49   : > { %16352 = vst [vmem:[#allocation29_spill] sm:$0xff] %v15780_v40 }
 0xb4a   : > { %v15782_v1 = vpop.f32.mrf.mxu1  ;;  %v15784_v43 = vpop.f32.mrf.mxu0 }
 0xb4b   : > { %16353 = vst [vmem:[#allocation30_spill] sm:$0xff] %v15784_v43 }
 0xb4c   : > { %v15786_v62 = vpop.f32.mrf.mxu1  ;;  %v15788_v3 = vpop.f32.mrf.mxu0 }
 0xb4d   : > { %16354 = vst [vmem:[#allocation38_spill] sm:$0xff] %v15788_v3  ;;  %v15809_v3 = vld [vmem:[%s16233_s13] sm:$0xff] }
 0xb4e   : > { %v15790_v21 = vpop.f32.mrf.mxu1  ;;  %v15792_v33 = vpop.f32.mrf.mxu0  ;;  %v15825_v29 = vrot.slane %v15809_v3, %v16307_v45 }
 0xb4f   : > { %16355 = vst [vmem:[#allocation37_spill] sm:$0xff] %v15792_v33 }
 0xb50   : > { %v15794_v60 = vpop.f32.mrf.mxu1  ;;  %v15796_v5 = vpop.f32.mrf.mxu0 }
 0xb51   : > { %16356 = vst [vmem:[#allocation23_spill] sm:$0xff] %v15796_v5  ;;  %v15817_v5 = vrot.slane %v15809_v3, %v16313_v54 }
 0xb52   : > { %v15798_v52 = vpop.f32.mrf.mxu1  ;;  %v15800_v61 = vpop.f32.mrf.mxu0 }
 0xb53   : > { %16357 = vst [vmem:[#allocation24_spill] sm:$0xff] %v15800_v61 }
 0xb54   : > { %v15802_v42 = vpop.f32.mrf.mxu1  ;;  %v15804_v48 = vpop.f32.mrf.mxu0 }
 0xb55   : > { %16358 = vst [vmem:[#allocation31_spill] sm:$0xff] %v15802_v42  ;;  %16359 = vst [vmem:[#allocation25_spill] sm:$0xff] %v15804_v48 }
 0xb56   : > { %v15811_v43 = vpop.f32.mrf.mxu1  ;;  %v15813_v33 = vpop.f32.mrf.mxu0 }
 0xb57   : > { %16360 = vst [vmem:[#allocation32_spill] sm:$0xff] %v15811_v43  ;;  %16361 = vst [vmem:[#allocation26_spill] sm:$0xff] %v15813_v33 }
 0xb69   : > { %v15819_v40 = vpop.f32.mrf.mxu1  ;;  %v9013_v61 = vpop.f32.mrf.mxu0 }
 0xb6a   : > { %16362 = vst [vmem:[#allocation41_spill] sm:$0xff] %v15819_v40  ;;  %v9014_v48 = vadd.f32 %v9013_v61, %v15662_v55  ;;  %v12442_v40 = vld [vmem:[%s12979_s15] sm:$0xff] }
 0xb6b   : > { %v8386_v50 = vpop.f32.mrf.mxu1  ;;  %v9015_v37 = vpop.f32.mrf.mxu0 }
 0xb6c   : > { %v9385_v15 = vadd.f32 %v15817_v5, %v9014_v48  ;;  %v9016_v33 = vadd.f32 %v9015_v37, %v15666_v44 }
 0xb6d   : > { %v15831_v54 = vpop.f32.mrf.mxu1  ;;  %v9017_v26 = vpop.f32.mrf.mxu0 }
 0xb6e   : > { %16363 = vst [vmem:[#allocation33_spill] sm:$0xff] %v15831_v54  ;;  %v9457_v23 = vmul.f32 0.17, %v9385_v15  ;;  %v9386_v17 = vadd.f32 %v15825_v29, %v9016_v33  ;;  %v9018_v55 = vadd.f32 %v9017_v26, %v15676_v0 }
 0xb6f   : > { %v8389_v61 = vpop.f32.mrf.mxu1  ;;  %v9019_v45 = vpop.f32.mrf.mxu0 }
 0xb70   : > { %v9529_v50 = vadd.f32 %v12442_v40, %v9457_v23  ;;  %v9458_v28 = vmul.f32 0.17, %v9386_v17  ;;  %v9394_v48 = vadd.f32 %v15817_v5, %v9018_v55  ;;  %v9020_v44 = vadd.f32 %v9019_v45, %v15680_v31  ;;  %v12444_v17 = vld [vmem:[%s12979_s15 + $0x48] sm:$0xff]  ;;  %v12445_v45 = vld [vmem:[%s12979_s15 + $0x50] sm:$0xff] }
 0xb71   : > { %v15838_v37 = vpop.f32.mrf.mxu1  ;;  %v9023_v43 = vpop.f32.mrf.mxu0 }
 0xb72   : > { %v9601_v54 = vmax.f32 %v9529_v50, 0.0  ;;  %v9530_v15 = vadd.f32 %v12443_v24, %v9458_v28  ;;  %v9466_v42 = vmul.f32 0.17, %v9394_v48  ;;  %v9395_v33 = vadd.f32 %v15825_v29, %v9020_v44 }
 0xb73   : > { %v9024_v0 = vadd.f32 %v9023_v43, %v15684_v53  ;;  %v8394_v26 = vpop.f32.mrf.mxu1  ;;  %v9025_v23 = vpop.f32.mrf.mxu0 }
 0xb74   : > { %9673 = vst [vmem:[%s15843_s19] sm:$0xff] %v9601_v54  ;;  %v9602_v31 = vmax.f32 %v9530_v15, 0.0  ;;  %v9538_v40 = vadd.f32 %v12444_v17, %v9466_v42  ;;  %v9467_v55 = vmul.f32 0.17, %v9395_v33  ;;  %v9026_v24 = vadd.f32 %v9025_v23, %v15688_v58  ;;  %v12446_v23 = vld [vmem:[%s12979_s15 + $0x90] sm:$0xff] }
 0xb75   : > { %v9403_v28 = vadd.f32 %v15817_v5, %v9024_v0  ;;  %v15849_v61 = vpop.f32.mrf.mxu1  ;;  %v9027_v53 = vpop.f32.mrf.mxu0 }
 0xb76   : > { %9674 = vst [vmem:[%s15843_s19 + $0x8] sm:$0xff] %v9602_v31  ;;  %v9610_v43 = vmax.f32 %v9538_v40, 0.0  ;;  %v9539_v50 = vadd.f32 %v12445_v45, %v9467_v55  ;;  %v9404_v54 = vadd.f32 %v15825_v29, %v9026_v24  ;;  %v9028_v48 = vadd.f32 %v9027_v53, %v15698_v9  ;;  %v12447_v55 = vld [vmem:[%s12979_s15 + $0x98] sm:$0xff] }
 0xb77   : > { %v9475_v42 = vmul.f32 0.17, %v9403_v28  ;;  %v8397_v44 = vpop.f32.mrf.mxu1  ;;  %v9029_v15 = vpop.f32.mrf.mxu0 }
 0xb78   : > { %9682 = vst [vmem:[%s15843_s19 + $0x48] sm:$0xff] %v9610_v43  ;;  %v9611_v58 = vmax.f32 %v9539_v50, 0.0  ;;  %v9476_v33 = vmul.f32 0.17, %v9404_v54  ;;  %v9412_v0 = vadd.f32 %v15817_v5, %v9028_v48  ;;  %v9030_v26 = vadd.f32 %v9029_v15, %v15702_v12  ;;  %v12448_v54 = vld [vmem:[%s12979_s15 + $0xd8] sm:$0xff] }
 0xb79   : > { %v9547_v31 = vadd.f32 %v12446_v23, %v9475_v42  ;;  %v15859_v17 = vpop.f32.mrf.mxu1  ;;  %v9033_v40 = vpop.f32.mrf.mxu0 }
 0xb7a   : > { %9683 = vst [vmem:[%s15843_s19 + $0x50] sm:$0xff] %v9611_v58  ;;  %v9548_v9 = vadd.f32 %v12447_v55, %v9476_v33  ;;  %v9484_v24 = vmul.f32 0.17, %v9412_v0  ;;  %v9413_v28 = vadd.f32 %v15825_v29, %v9030_v26  ;;  %v9034_v53 = vadd.f32 %v9033_v40, %v15706_v2  ;;  %v12449_v2 = vld [vmem:[%s12979_s15 + $0xe0] sm:$0xff] }
 0xb7b   : > { %v9619_v43 = vmax.f32 %v9547_v31, 0.0  ;;  %v8402_v45 = vpop.f32.mrf.mxu1  ;;  %v9035_v50 = vpop.f32.mrf.mxu0 }
 0xb7c   : > { %v9620_v12 = vmax.f32 %v9548_v9, 0.0  ;;  %v9556_v48 = vadd.f32 %v12448_v54, %v9484_v24  ;;  %v9485_v42 = vmul.f32 0.17, %v9413_v28  ;;  %v9421_v44 = vadd.f32 %v15817_v5, %v9034_v53  ;;  %v12450_v28 = vld [vmem:[%s12979_s15 + $0x120] sm:$0xff] }
 0xb7d   : > { %9691 = vst [vmem:[%s15843_s19 + $0x90] sm:$0xff] %v9619_v43  ;;  %v9036_v15 = vadd.f32 %v9035_v50, %v15716_v56  ;;  %v15869_v58 = vpop.f32.mrf.mxu1  ;;  %v9037_v33 = vpop.f32.mrf.mxu0 }
 0xb7e   : > { %9692 = vst [vmem:[%s15843_s19 + $0x98] sm:$0xff] %v9620_v12  ;;  %v9628_v0 = vmax.f32 %v9556_v48, 0.0  ;;  %v9557_v26 = vadd.f32 %v12449_v2, %v9485_v42  ;;  %v9493_v23 = vmul.f32 0.17, %v9421_v44  ;;  %v9038_v31 = vadd.f32 %v9037_v33, %v15720_v35  ;;  %v12451_v44 = vld [vmem:[%s12979_s15 + $0x128] sm:$0xff] }
 0xb7f   : > { %v9422_v40 = vadd.f32 %v15825_v29, %v9036_v15  ;;  %v8405_v55 = vpop.f32.mrf.mxu1  ;;  %v9039_v9 = vpop.f32.mrf.mxu0  ;;  %v12452_v2 = vld [vmem:[%s12979_s15 + $0x168] sm:$0xff] }
 0xb80   : > { %9700 = vst [vmem:[%s15843_s19 + $0xd8] sm:$0xff] %v9628_v0  ;;  %v9629_v24 = vmax.f32 %v9557_v26, 0.0  ;;  %v9565_v56 = vadd.f32 %v12450_v28, %v9493_v23  ;;  %v9430_v53 = vadd.f32 %v15817_v5, %v9038_v31  ;;  %v9040_v43 = vadd.f32 %v9039_v9, %v15726_v38 }
 0xb81   : > { %v9494_v45 = vmul.f32 0.17, %v9422_v40  ;;  %v15879_v50 = vpop.f32.mrf.mxu1  ;;  %v9043_v12 = vpop.f32.mrf.mxu0 }
 0xb82   : > { %9701 = vst [vmem:[%s15843_s19 + $0xe0] sm:$0xff] %v9629_v24  ;;  %v9637_v35 = vmax.f32 %v9565_v56, 0.0  ;;  %v9502_v54 = vmul.f32 0.17, %v9430_v53  ;;  %v9431_v48 = vadd.f32 %v15825_v29, %v9040_v43  ;;  %v9044_v42 = vadd.f32 %v9043_v12, %v15730_v27  ;;  %v12453_v24 = vld [vmem:[%s12979_s15 + $0x170] sm:$0xff] }
 0xb83   : > { %v9566_v15 = vadd.f32 %v12451_v44, %v9494_v45  ;;  %v8410_v33 = vpop.f32.mrf.mxu1  ;;  %v9045_v0 = vpop.f32.mrf.mxu0 }
 0xb84   : > { %9709 = vst [vmem:[%s15843_s19 + $0x120] sm:$0xff] %v9637_v35  ;;  %v9574_v38 = vadd.f32 %v12452_v2, %v9502_v54  ;;  %v9503_v26 = vmul.f32 0.17, %v9431_v48  ;;  %v9439_v23 = vadd.f32 %v15817_v5, %v9044_v42  ;;  %v9046_v31 = vadd.f32 %v9045_v0, %v15734_v47  ;;  %v12454_v35 = vld [vmem:[%s12979_s15 + $0x1b0] sm:$0xff] }
 0xb85   : > { %v9638_v40 = vmax.f32 %v9566_v15, 0.0  ;;  %v15889_v55 = vpop.f32.mrf.mxu1  ;;  %v9047_v9 = vpop.f32.mrf.mxu0 }
 0xb86   : > { %v9646_v27 = vmax.f32 %v9574_v38, 0.0  ;;  %v9575_v28 = vadd.f32 %v12453_v24, %v9503_v26  ;;  %v9511_v56 = vmul.f32 0.17, %v9439_v23  ;;  %v9440_v53 = vadd.f32 %v15825_v29, %v9046_v31  ;;  %v12456_v23 = vld [vmem:[%s12979_s15 + $0x1f8] sm:$0xff] }
 0xb87   : > { %9710 = vst [vmem:[%s15843_s19 + $0x128] sm:$0xff] %v9638_v40  ;;  %v9048_v43 = vadd.f32 %v9047_v9, %v15738_v8  ;;  %v8413_v45 = vpop.f32.mrf.mxu1  ;;  %v9049_v12 = vpop.f32.mrf.mxu0  ;;  %v12455_v8 = vld [vmem:[%s12979_s15 + $0x1b8] sm:$0xff]  ;;  %v12457_v40 = vld [vmem:[%s12979_s15 + $0x200] sm:$0xff] }
 0xb88   : > { %9718 = vst [vmem:[%s15843_s19 + $0x168] sm:$0xff] %v9646_v27  ;;  %v9647_v47 = vmax.f32 %v9575_v28, 0.0  ;;  %v9583_v54 = vadd.f32 %v12454_v35, %v9511_v56  ;;  %v9512_v48 = vmul.f32 0.17, %v9440_v53  ;;  %v9050_v42 = vadd.f32 %v9049_v12, %v15742_v16 }
 0xb89   : > { %v9448_v44 = vadd.f32 %v15817_v5, %v9048_v43  ;;  %v16364_v5 = vld [vmem:[#allocation17_spill] sm:$0xff] }
 0xb8a   : > { %9719 = vst [vmem:[%s15843_s19 + $0x170] sm:$0xff] %v9647_v47  ;;  %v9655_v15 = vmax.f32 %v9583_v54, 0.0  ;;  %v9584_v33 = vadd.f32 %v12455_v8, %v9512_v48  ;;  %v9449_v0 = vadd.f32 %v15825_v29, %v9050_v42  ;;  %v9350_v24 = vsub.s32 2, %v16364_v5 }
 0xb8b   : > { %v9520_v2 = vmul.f32 0.17, %v9448_v44  ;;  %v9358_v28 = vsub.s32 4, %v16364_v5  ;;  %v9354_v56 = vsub.s32 3, %v16364_v5  ;;  %v9362_v29 = vsub.s32 5, %v16364_v5 }
 0xb8c   : > { %9727 = vst [vmem:[%s15843_s19 + $0x1b0] sm:$0xff] %v9655_v15  ;;  %v9656_v38 = vmax.f32 %v9584_v33, 0.0  ;;  %v9521_v26 = vmul.f32 0.17, %v9449_v0  ;;  %v15913_v53 = vrot.slane %v15809_v3, %v9350_v24  ;;  %v12459_v24 = vld [vmem:[%s12979_s15 + $0x20] sm:$0xff] }
 0xb8d   : > { %v9592_v31 = vadd.f32 %v12456_v23, %v9520_v2  ;;  %v15916_v43 = vrot.slane %v15809_v3, %v9358_v28  ;;  %v15921_v54 = vrot.slane %v15809_v3, %v9354_v56  ;;  %v15924_v48 = vrot.slane %v15809_v3, %v9362_v29 }
 0xb8e   : > { %9728 = vst [vmem:[%s15843_s19 + $0x1b8] sm:$0xff] %v9656_v38  ;;  %v9593_v9 = vadd.f32 %v12457_v40, %v9521_v26 }
 0xb8f   : > { %v9664_v16 = vmax.f32 %v9592_v31, 0.0 }
 0xb90   : > { %v9665_v27 = vmax.f32 %v9593_v9, 0.0 }
 0xb91   : > { %9736 = vst [vmem:[%s15843_s19 + $0x1f8] sm:$0xff] %v9664_v16 }
 0xb92   : > { %9737 = vst [vmem:[%s15843_s19 + $0x200] sm:$0xff] %v9665_v27  ;;  %v12458_v27 = vld [vmem:[%s12979_s15 + $0x10] sm:$0xff] }
 0xb9a   : > { %v9086_v45 = vpop.f32.mrf.mxu1  ;;  %v9159_v12 = vpop.f32.mrf.mxu0 }
 0xb9b   : > { %v9087_v47 = vadd.f32 %v9086_v45, %v15664_v30  ;;  %v9160_v35 = vadd.f32 %v9159_v12, %v15746_v34 }
 0xb9c   : > { %v9088_v42 = vpop.f32.mrf.mxu1  ;;  %v9161_v44 = vpop.f32.mrf.mxu0 }
 0xb9d   : > { %v9387_v15 = vadd.f32 %v15913_v53, %v9087_v47  ;;  %v9389_v8 = vadd.f32 %v15916_v43, %v9160_v35  ;;  %v9089_v33 = vadd.f32 %v9088_v42, %v15668_v4  ;;  %v9162_v30 = vadd.f32 %v9161_v44, %v15750_v39  ;;  %v12460_v44 = vld [vmem:[%s12979_s15 + $0x18] sm:$0xff] }
 0xb9e   : > { %v9090_v0 = vpop.f32.mrf.mxu1  ;;  %v9163_v34 = vpop.f32.mrf.mxu0 }
 0xb9f   : > { %v9459_v2 = vmul.f32 0.17, %v9387_v15  ;;  %v9461_v38 = vmul.f32 0.17, %v9389_v8  ;;  %v9388_v26 = vadd.f32 %v15921_v54, %v9089_v33  ;;  %v9390_v23 = vadd.f32 %v15924_v48, %v9162_v30  ;;  %v12461_v8 = vld [vmem:[%s12979_s15 + $0x28] sm:$0xff] }
 0xba0   : > { %v9091_v31 = vadd.f32 %v9090_v0, %v15678_v19  ;;  %v9164_v40 = vadd.f32 %v9163_v34, %v15754_v20  ;;  %v9092_v9 = vpop.f32.mrf.mxu1  ;;  %v9165_v16 = vpop.f32.mrf.mxu0 }
 0xba1   : > { %v9531_v4 = vadd.f32 %v12458_v27, %v9459_v2  ;;  %v9533_v39 = vadd.f32 %v12459_v24, %v9461_v38  ;;  %v9460_v28 = vmul.f32 0.17, %v9388_v26  ;;  %v9462_v56 = vmul.f32 0.17, %v9390_v23 }
 0xba2   : > { %v9396_v29 = vadd.f32 %v15913_v53, %v9091_v31  ;;  %v9398_v45 = vadd.f32 %v15916_v43, %v9164_v40  ;;  %v9093_v12 = vadd.f32 %v9092_v9, %v15682_v46  ;;  %v9166_v19 = vadd.f32 %v9165_v16, %v15758_v13  ;;  %v9096_v20 = vpop.f32.mrf.mxu1  ;;  %v9169_v47 = vpop.f32.mrf.mxu0  ;;  %v12462_v40 = vld [vmem:[%s12979_s15 + $0x58] sm:$0xff]  ;;  %v12463_v16 = vld [vmem:[%s12979_s15 + $0x68] sm:$0xff] }
 0xba3   : > { %v9603_v35 = vmax.f32 %v9531_v4, 0.0  ;;  %v9605_v42 = vmax.f32 %v9533_v39, 0.0  ;;  %v9532_v15 = vadd.f32 %v12460_v44, %v9460_v28  ;;  %v9534_v33 = vadd.f32 %v12461_v8, %v9462_v56 }
 0xba4   : > { %v9468_v30 = vmul.f32 0.17, %v9396_v29  ;;  %v9470_v0 = vmul.f32 0.17, %v9398_v45  ;;  %v9397_v34 = vadd.f32 %v15921_v54, %v9093_v12  ;;  %v9399_v46 = vadd.f32 %v15924_v48, %v9166_v19  ;;  %v9098_v2 = vpop.f32.mrf.mxu1  ;;  %v9171_v13 = vpop.f32.mrf.mxu0  ;;  %v12464_v19 = vld [vmem:[%s12979_s15 + $0x60] sm:$0xff] }
 0xba5   : > { %9675 = vst [vmem:[%s15843_s19 + $0x10] sm:$0xff] %v9603_v35  ;;  %9677 = vst [vmem:[%s15843_s19 + $0x20] sm:$0xff] %v9605_v42  ;;  %v9604_v38 = vmax.f32 %v9532_v15, 0.0  ;;  %v9606_v26 = vmax.f32 %v9534_v33, 0.0  ;;  %v9097_v23 = vadd.f32 %v9096_v20, %v15686_v18  ;;  %v9170_v31 = vadd.f32 %v9169_v47, %v15762_v57  ;;  %v12465_v47 = vld [vmem:[%s12979_s15 + $0x70] sm:$0xff] }
 0xba6   : > { %v9540_v9 = vadd.f32 %v12462_v40, %v9468_v30  ;;  %v9542_v27 = vadd.f32 %v12463_v16, %v9470_v0  ;;  %v9469_v4 = vmul.f32 0.17, %v9397_v34  ;;  %v9471_v24 = vmul.f32 0.17, %v9399_v46  ;;  %v9100_v39 = vpop.f32.mrf.mxu1  ;;  %v9173_v28 = vpop.f32.mrf.mxu0 }
 0xba7   : > { %9676 = vst [vmem:[%s15843_s19 + $0x18] sm:$0xff] %v9604_v38  ;;  %9678 = vst [vmem:[%s15843_s19 + $0x28] sm:$0xff] %v9606_v26  ;;  %v9405_v56 = vadd.f32 %v15913_v53, %v9097_v23  ;;  %v9407_v29 = vadd.f32 %v15916_v43, %v9170_v31  ;;  %v9099_v18 = vadd.f32 %v9098_v2, %v15690_v6  ;;  %v12467_v26 = vld [vmem:[%s12979_s15 + $0xb0] sm:$0xff] }
 0xba8   : > { %v9172_v57 = vadd.f32 %v9171_v13, %v15766_v59  ;;  %v9612_v45 = vmax.f32 %v9540_v9, 0.0  ;;  %v9614_v12 = vmax.f32 %v9542_v27, 0.0  ;;  %v9541_v20 = vadd.f32 %v12464_v19, %v9469_v4  ;;  %v9102_v42 = vpop.f32.mrf.mxu1  ;;  %v9175_v44 = vpop.f32.mrf.mxu0  ;;  %v12466_v13 = vld [vmem:[%s12979_s15 + $0xa0] sm:$0xff] }
 0xba9   : > { %v9543_v35 = vadd.f32 %v12465_v47, %v9471_v24  ;;  %v9477_v15 = vmul.f32 0.17, %v9405_v56  ;;  %v9479_v8 = vmul.f32 0.17, %v9407_v29  ;;  %v9406_v33 = vadd.f32 %v15921_v54, %v9099_v18  ;;  %v12469_v29 = vld [vmem:[%s12979_s15 + $0xb8] sm:$0xff] }
 0xbaa   : > { %v9408_v30 = vadd.f32 %v15924_v48, %v9172_v57  ;;  %9684 = vst [vmem:[%s15843_s19 + $0x58] sm:$0xff] %v9612_v45  ;;  %9686 = vst [vmem:[%s15843_s19 + $0x68] sm:$0xff] %v9614_v12  ;;  %v9613_v6 = vmax.f32 %v9541_v20, 0.0  ;;  %v9101_v0 = vadd.f32 %v9100_v39, %v15700_v63  ;;  %v9174_v34 = vadd.f32 %v9173_v28, %v15770_v49  ;;  %v9106_v46 = vpop.f32.mrf.mxu1  ;;  %v9179_v2 = vpop.f32.mrf.mxu0  ;;  %v12468_v28 = vld [vmem:[%s12979_s15 + $0xa8] sm:$0xff] }
 0xbab   : > { %v9615_v59 = vmax.f32 %v9543_v35, 0.0  ;;  %v9549_v38 = vadd.f32 %v12466_v13, %v9477_v15  ;;  %v9551_v23 = vadd.f32 %v12467_v26, %v9479_v8  ;;  %v9478_v31 = vmul.f32 0.17, %v9406_v33  ;;  %v12471_v8 = vld [vmem:[%s12979_s15 + $0xf8] sm:$0xff] }
 0xbac   : > { %v9480_v40 = vmul.f32 0.17, %v9408_v30  ;;  %9685 = vst [vmem:[%s15843_s19 + $0x60] sm:$0xff] %v9613_v6  ;;  %v9414_v9 = vadd.f32 %v15913_v53, %v9101_v0  ;;  %v9416_v16 = vadd.f32 %v15916_v43, %v9174_v34  ;;  %v9103_v63 = vadd.f32 %v9102_v42, %v15704_v25  ;;  %v9108_v27 = vpop.f32.mrf.mxu1  ;;  %v9181_v4 = vpop.f32.mrf.mxu0 }
 0xbad   : > { %9687 = vst [vmem:[%s15843_s19 + $0x70] sm:$0xff] %v9615_v59  ;;  %v9176_v49 = vadd.f32 %v9175_v44, %v15774_v51  ;;  %v9621_v24 = vmax.f32 %v9549_v38, 0.0  ;;  %v9623_v39 = vmax.f32 %v9551_v23, 0.0  ;;  %v9550_v56 = vadd.f32 %v12468_v28, %v9478_v31  ;;  %v12470_v44 = vld [vmem:[%s12979_s15 + $0xe8] sm:$0xff]  ;;  %v12472_v38 = vld [vmem:[%s12979_s15 + $0xf0] sm:$0xff]  ;;  %v12473_v23 = vld [vmem:[%s12979_s15 + $0x100] sm:$0xff] }
 0xbae   : > { %v9552_v18 = vadd.f32 %v12469_v29, %v9480_v40  ;;  %v9486_v57 = vmul.f32 0.17, %v9414_v9  ;;  %v9488_v45 = vmul.f32 0.17, %v9416_v16  ;;  %v9415_v12 = vadd.f32 %v15921_v54, %v9103_v63  ;;  %v9110_v19 = vpop.f32.mrf.mxu1  ;;  %v9183_v51 = vpop.f32.mrf.mxu0 }
 0xbaf   : > { %v9417_v25 = vadd.f32 %v15924_v48, %v9176_v49  ;;  %9693 = vst [vmem:[%s15843_s19 + $0xa0] sm:$0xff] %v9621_v24  ;;  %9695 = vst [vmem:[%s15843_s19 + $0xb0] sm:$0xff] %v9623_v39  ;;  %v9622_v20 = vmax.f32 %v9550_v56, 0.0  ;;  %v9107_v35 = vadd.f32 %v9106_v46, %v15708_v7  ;;  %v9180_v42 = vadd.f32 %v9179_v2, %v15778_v14  ;;  %v12474_v39 = vld [vmem:[%s12979_s15 + $0x130] sm:$0xff]  ;;  %v12475_v56 = vld [vmem:[%s12979_s15 + $0x140] sm:$0xff] }
 0xbb0   : > { %v9624_v47 = vmax.f32 %v9552_v18, 0.0  ;;  %v9558_v15 = vadd.f32 %v12470_v44, %v9486_v57  ;;  %v9560_v33 = vadd.f32 %v12471_v8, %v9488_v45  ;;  %v9487_v30 = vmul.f32 0.17, %v9415_v12  ;;  %v9112_v59 = vpop.f32.mrf.mxu1  ;;  %v9185_v0 = vpop.f32.mrf.mxu0 }
 0xbb1   : > { %v9489_v6 = vmul.f32 0.17, %v9417_v25  ;;  %9694 = vst [vmem:[%s15843_s19 + $0xa8] sm:$0xff] %v9622_v20  ;;  %v9423_v34 = vadd.f32 %v15913_v53, %v9107_v35  ;;  %v9425_v13 = vadd.f32 %v15916_v43, %v9180_v42  ;;  %v9109_v7 = vadd.f32 %v9108_v27, %v15718_v41  ;;  %v12477_v42 = vld [vmem:[%s12979_s15 + $0x148] sm:$0xff] }
 0xbb2   : > { %9696 = vst [vmem:[%s15843_s19 + $0xb8] sm:$0xff] %v9624_v47  ;;  %v9182_v14 = vadd.f32 %v9181_v4, %v15782_v1  ;;  %v9630_v46 = vmax.f32 %v9558_v15, 0.0  ;;  %v9632_v2 = vmax.f32 %v9560_v33, 0.0  ;;  %v9559_v26 = vadd.f32 %v12472_v38, %v9487_v30  ;;  %v9116_v40 = vpop.f32.mrf.mxu1  ;;  %v9189_v9 = vpop.f32.mrf.mxu0  ;;  %v12476_v47 = vld [vmem:[%s12979_s15 + $0x138] sm:$0xff] }
 0xbb3   : > { %v9561_v31 = vadd.f32 %v12473_v23, %v9489_v6  ;;  %v9495_v16 = vmul.f32 0.17, %v9423_v34  ;;  %v9497_v63 = vmul.f32 0.17, %v9425_v13  ;;  %v9424_v49 = vadd.f32 %v15921_v54, %v9109_v7  ;;  %v12478_v13 = vld [vmem:[%s12979_s15 + $0x178] sm:$0xff] }
 0xbb4   : > { %v9426_v24 = vadd.f32 %v15924_v48, %v9182_v14  ;;  %9702 = vst [vmem:[%s15843_s19 + $0xe8] sm:$0xff] %v9630_v46  ;;  %9704 = vst [vmem:[%s15843_s19 + $0xf8] sm:$0xff] %v9632_v2  ;;  %v9631_v41 = vmax.f32 %v9559_v26, 0.0  ;;  %v9111_v27 = vadd.f32 %v9110_v19, %v15722_v32  ;;  %v9184_v4 = vadd.f32 %v9183_v51, %v15786_v62  ;;  %v9118_v45 = vpop.f32.mrf.mxu1  ;;  %v9191_v12 = vpop.f32.mrf.mxu0  ;;  %v12479_v14 = vld [vmem:[%s12979_s15 + $0x188] sm:$0xff] }
 0xbb5   : > { %v9633_v1 = vmax.f32 %v9561_v31, 0.0  ;;  %v9567_v28 = vadd.f32 %v12474_v39, %v9495_v16  ;;  %v9569_v29 = vadd.f32 %v12475_v56, %v9497_v63  ;;  %v9496_v18 = vmul.f32 0.17, %v9424_v49  ;;  %v12481_v63 = vld [vmem:[%s12979_s15 + $0x190] sm:$0xff] }
 0xbb6   : > { %v9498_v57 = vmul.f32 0.17, %v9426_v24  ;;  %9703 = vst [vmem:[%s15843_s19 + $0xf0] sm:$0xff] %v9631_v41  ;;  %v9432_v25 = vadd.f32 %v15913_v53, %v9111_v27  ;;  %v9434_v32 = vadd.f32 %v15916_v43, %v9184_v4  ;;  %v9113_v62 = vadd.f32 %v9112_v59, %v15728_v22  ;;  %v9193_v34 = vpop.f32.mrf.mxu0  ;;  %v16365_v56 = vld [vmem:[#allocation31_spill] sm:$0xff] }
 0xbb7   : > { %9705 = vst [vmem:[%s15843_s19 + $0x100] sm:$0xff] %v9633_v1  ;;  %v9186_v19 = vadd.f32 %v9185_v0, %v15790_v21  ;;  %v9639_v51 = vmax.f32 %v9567_v28, 0.0  ;;  %v9641_v20 = vmax.f32 %v9569_v29, 0.0  ;;  %v9568_v35 = vadd.f32 %v12476_v47, %v9496_v18  ;;  %v9120_v0 = vpop.f32.mrf.mxu1  ;;  %v12482_v18 = vld [vmem:[%s12979_s15 + $0x1c0] sm:$0xff] }
 0xbb8   : > { %v9570_v44 = vadd.f32 %v12477_v42, %v9498_v57  ;;  %v9504_v15 = vmul.f32 0.17, %v9432_v25  ;;  %v9506_v8 = vmul.f32 0.17, %v9434_v32  ;;  %v9433_v33 = vadd.f32 %v15921_v54, %v9113_v62 }
 0xbb9   : > { %v9435_v30 = vadd.f32 %v15924_v48, %v9186_v19  ;;  %9711 = vst [vmem:[%s15843_s19 + $0x130] sm:$0xff] %v9639_v51  ;;  %9713 = vst [vmem:[%s15843_s19 + $0x140] sm:$0xff] %v9641_v20  ;;  %v9640_v22 = vmax.f32 %v9568_v35, 0.0  ;;  %v9117_v6 = vadd.f32 %v9116_v40, %v15732_v36  ;;  %v9190_v59 = vadd.f32 %v9189_v9, %v15794_v60  ;;  %v12480_v9 = vld [vmem:[%s12979_s15 + $0x180] sm:$0xff]  ;;  %v9122_v4 = vpop.f32.mrf.mxu1  ;;  %v16366_v51 = vld [vmem:[#allocation19_spill] sm:$0xff] }
 0xbba   : > { %v9642_v21 = vmax.f32 %v9570_v44, 0.0  ;;  %v9576_v7 = vadd.f32 %v12478_v13, %v9504_v15  ;;  %v9578_v46 = vadd.f32 %v12479_v14, %v9506_v8  ;;  %v9505_v2 = vmul.f32 0.17, %v9433_v33  ;;  %v16367_v20 = vld [vmem:[#allocation32_spill] sm:$0xff]  ;;  %v12484_v44 = vld [vmem:[%s12979_s15 + $0x1c8] sm:$0xff] }
 0xbbb   : > { %v9507_v38 = vmul.f32 0.17, %v9435_v30  ;;  %9712 = vst [vmem:[%s15843_s19 + $0x138] sm:$0xff] %v9640_v22  ;;  %v9441_v26 = vadd.f32 %v15913_v53, %v9117_v6  ;;  %v9443_v23 = vadd.f32 %v15916_v43, %v9190_v59  ;;  %v9119_v36 = vadd.f32 %v9118_v45, %v15736_v10  ;;  %v9195_v10 = vpop.f32.mrf.mxu0  ;;  %v12483_v45 = vld [vmem:[%s12979_s15 + $0x1d0] sm:$0xff]  ;;  %v12485_v8 = vld [vmem:[%s12979_s15 + $0x1d8] sm:$0xff]  ;;  %v12486_v59 = vld [vmem:[%s12979_s15 + $0x208] sm:$0xff] }
 0xbbc   : > { %9714 = vst [vmem:[%s15843_s19 + $0x148] sm:$0xff] %v9642_v21  ;;  %v9192_v60 = vadd.f32 %v9191_v12, %v15798_v52  ;;  %v9648_v31 = vmax.f32 %v9576_v7, 0.0  ;;  %v9650_v40 = vmax.f32 %v9578_v46, 0.0  ;;  %v9577_v16 = vadd.f32 %v12480_v9, %v9505_v2  ;;  %v12488_v2 = vld [vmem:[%s12979_s15 + $0x210] sm:$0xff] }
 0xbbd   : > { %v9579_v49 = vadd.f32 %v12481_v63, %v9507_v38  ;;  %v9513_v24 = vmul.f32 0.17, %v9441_v26  ;;  %v9515_v41 = vmul.f32 0.17, %v9443_v23  ;;  %v9442_v1 = vadd.f32 %v15921_v54, %v9119_v36  ;;  %v12489_v26 = vld [vmem:[%s12979_s15 + $0x220] sm:$0xff] }
 0xbbe   : > { %v9444_v27 = vadd.f32 %v15924_v48, %v9192_v60  ;;  %9720 = vst [vmem:[%s15843_s19 + $0x178] sm:$0xff] %v9648_v31  ;;  %9722 = vst [vmem:[%s15843_s19 + $0x188] sm:$0xff] %v9650_v40  ;;  %v9649_v52 = vmax.f32 %v9577_v16, 0.0  ;;  %v9121_v28 = vadd.f32 %v9120_v0, %v15740_v11  ;;  %v9194_v29 = vadd.f32 %v9193_v34, %v16365_v56  ;;  %v12487_v34 = vld [vmem:[%s12979_s15 + $0x218] sm:$0xff]  ;;  %v16060_v63 = vld [vmem:[%s16233_s13 + $0x8] ss:$0 sm:$0xff] }
 0xbbf   : > { %v9651_v39 = vmax.f32 %v9579_v49, 0.0  ;;  %v9585_v57 = vadd.f32 %v12482_v18, %v9513_v24  ;;  %v9587_v12 = vadd.f32 %v12483_v45, %v9515_v41  ;;  %v9514_v25 = vmul.f32 0.17, %v9442_v1  ;;  %v16368_v49 = vld [vmem:[#allocation51_spill] sm:$0xff]  ;;  %v16369_v41 = vld [vmem:[#allocation41_spill] sm:$0xff] }
 0xbc0   : > { %v9516_v32 = vmul.f32 0.17, %v9444_v27  ;;  %9721 = vst [vmem:[%s15843_s19 + $0x180] sm:$0xff] %v9649_v52  ;;  %v9450_v62 = vadd.f32 %v15913_v53, %v9121_v28  ;;  %v9452_v19 = vadd.f32 %v15916_v43, %v9194_v29  ;;  %v9123_v11 = vadd.f32 %v9122_v4, %v16366_v51  ;;  %v12490_v51 = vld [vmem:[%s12979_s15 + $0x30] sm:$0xff] }
 0xbc1   : > { %9723 = vst [vmem:[%s15843_s19 + $0x190] sm:$0xff] %v9651_v39  ;;  %v9196_v47 = vadd.f32 %v9195_v10, %v16367_v20  ;;  %v9657_v35 = vmax.f32 %v9585_v57, 0.0  ;;  %v9659_v42 = vmax.f32 %v9587_v12, 0.0  ;;  %v9586_v15 = vadd.f32 %v12484_v44, %v9514_v25  ;;  %v16370_v39 = vld [vmem:[#allocation49_spill] sm:$0xff]  ;;  %v16371_v12 = vld [vmem:[#allocation50_spill] sm:$0xff] }
 0xbc2   : > { %v9588_v33 = vadd.f32 %v12485_v8, %v9516_v32  ;;  %v9522_v30 = vmul.f32 0.17, %v9450_v62  ;;  %v9524_v22 = vmul.f32 0.17, %v9452_v19  ;;  %v9451_v53 = vadd.f32 %v15921_v54, %v9123_v11  ;;  %v16372_v32 = vld [vmem:[#allocation33_spill] sm:$0xff] }
 0xbc3   : > { %v9453_v43 = vadd.f32 %v15924_v48, %v9196_v47  ;;  %9729 = vst [vmem:[%s15843_s19 + $0x1c0] sm:$0xff] %v9657_v35  ;;  %9731 = vst [vmem:[%s15843_s19 + $0x1d0] sm:$0xff] %v9659_v42  ;;  %v9658_v21 = vmax.f32 %v9586_v15, 0.0  ;;  %v9366_v54 = vsub.s32 6, %v16364_v5  ;;  %v9370_v31 = vsub.s32 7, %v16364_v5  ;;  %v12491_v20 = vld [vmem:[%s12979_s15 + $0x40] sm:$0xff] }
 0xbc4   : > { %v9660_v6 = vmax.f32 %v9588_v33, 0.0  ;;  %v9594_v0 = vadd.f32 %v12486_v59, %v9522_v30  ;;  %v9596_v13 = vadd.f32 %v12487_v34, %v9524_v22  ;;  %v9523_v7 = vmul.f32 0.17, %v9451_v53  ;;  %v16373_v15 = vld [vmem:[#allocation52_spill] sm:$0xff]  ;;  %v16374_v34 = vld [vmem:[#allocation18_spill] sm:$0xff] }
 0xbc5   : > { %v9525_v14 = vmul.f32 0.17, %v9453_v43  ;;  %9730 = vst [vmem:[%s15843_s19 + $0x1c8] sm:$0xff] %v9658_v21  ;;  %v16055_v40 = vrot.slane %v15809_v3, %v9366_v54  ;;  %v16065_v27 = vrot.slane %v15809_v3, %v9370_v31  ;;  %v12492_v43 = vld [vmem:[%s12979_s15 + $0x38] sm:$0xff] }
 0xbc6   : > { %9732 = vst [vmem:[%s15843_s19 + $0x1d8] sm:$0xff] %v9660_v6  ;;  %v9666_v48 = vmax.f32 %v9594_v0, 0.0  ;;  %v9668_v46 = vmax.f32 %v9596_v13, 0.0  ;;  %v9595_v38 = vadd.f32 %v12488_v2, %v9523_v7 }
 0xbc7   : > { %v9597_v23 = vadd.f32 %v12489_v26, %v9525_v14 }
 0xbc8   : > { %9738 = vst [vmem:[%s15843_s19 + $0x208] sm:$0xff] %v9666_v48  ;;  %9740 = vst [vmem:[%s15843_s19 + $0x218] sm:$0xff] %v9668_v46  ;;  %v9667_v36 = vmax.f32 %v9595_v38, 0.0  ;;  %v12493_v46 = vld [vmem:[%s12979_s15 + $0x78] sm:$0xff] }
 0xbc9   : > { %v9669_v60 = vmax.f32 %v9597_v23, 0.0  ;;  %v16375_v38 = vld [vmem:[#allocation20_spill] sm:$0xff]  ;;  %v12494_v23 = vld [vmem:[%s12979_s15 + $0x88] sm:$0xff] }
 0xbca   : > { %9739 = vst [vmem:[%s15843_s19 + $0x210] sm:$0xff] %v9667_v36 }
 0xbcb   : > { %9741 = vst [vmem:[%s15843_s19 + $0x220] sm:$0xff] %v9669_v60  ;;  %v9232_v9 = vpop.f32.mrf.mxu1  ;;  %v9305_v16 = vpop.f32.mrf.mxu0 }
 0xbcc   : > { %v9233_v24 = vadd.f32 %v9232_v9, %v16368_v49  ;;  %v9306_v1 = vadd.f32 %v9305_v16, %v16369_v41  ;;  %v16376_v41 = vld [vmem:[#allocation21_spill] sm:$0xff] }
 0xbcd   : > { %v9234_v5 = vpop.f32.mrf.mxu1  ;;  %v9307_v4 = vpop.f32.mrf.mxu0 }
 0xbce   : > { %v9391_v10 = vadd.f32 %v16055_v40, %v9233_v24  ;;  %v9393_v52 = vadd.f32 %v16060_v63, %v9306_v1  ;;  %v9235_v28 = vadd.f32 %v9234_v5, %v16370_v39 }
 0xbcf   : > { %v9236_v56 = vpop.f32.mrf.mxu1  ;;  %v9308_v29 = vpop.f32.mrf.mxu0 }
 0xbd0   : > { %v9463_v18 = vmul.f32 0.17, %v9391_v10  ;;  %v9465_v57 = vmul.f32 0.17, %v9393_v52  ;;  %v9392_v45 = vadd.f32 %v16065_v27, %v9235_v28  ;;  %v9237_v25 = vadd.f32 %v9236_v56, %v16371_v12  ;;  %v12495_v10 = vld [vmem:[%s12979_s15 + $0x80] sm:$0xff]  ;;  %v16377_v12 = vld [vmem:[#allocation22_spill] sm:$0xff] }
 0xbd1   : > { %v9309_v3 = vadd.f32 %v9308_v29, %v16372_v32  ;;  %v9238_v62 = vpop.f32.mrf.mxu1  ;;  %v9310_v19 = vpop.f32.mrf.mxu0  ;;  %v12496_v32 = vld [vmem:[%s12979_s15 + $0xc0] sm:$0xff] }
 0xbd2   : > { %v9535_v11 = vadd.f32 %v12490_v51, %v9463_v18  ;;  %v9537_v47 = vadd.f32 %v12491_v20, %v9465_v57  ;;  %v9464_v35 = vmul.f32 0.17, %v9392_v45  ;;  %v9400_v42 = vadd.f32 %v16055_v40, %v9237_v25  ;;  %v12498_v20 = vld [vmem:[%s12979_s15 + $0xc8] sm:$0xff] }
 0xbd3   : > { %v9402_v44 = vadd.f32 %v16060_v63, %v9309_v3  ;;  %v9239_v8 = vadd.f32 %v9238_v62, %v16373_v15  ;;  %v9242_v33 = vpop.f32.mrf.mxu1  ;;  %v9313_v30 = vpop.f32.mrf.mxu0  ;;  %v12497_v62 = vld [vmem:[%s12979_s15 + $0xd0] sm:$0xff] }
 0xbd4   : > { %v9607_v22 = vmax.f32 %v9535_v11, 0.0  ;;  %v9609_v53 = vmax.f32 %v9537_v47, 0.0  ;;  %v9536_v21 = vadd.f32 %v12492_v43, %v9464_v35  ;;  %v9472_v6 = vmul.f32 0.17, %v9400_v42 }
 0xbd5   : > { %v9474_v59 = vmul.f32 0.17, %v9402_v44  ;;  %v9401_v0 = vadd.f32 %v16065_v27, %v9239_v8  ;;  %v9243_v13 = vadd.f32 %v9242_v33, %v16374_v34  ;;  %v9314_v7 = vadd.f32 %v9313_v30, %v15838_v37  ;;  %v9244_v14 = vpop.f32.mrf.mxu1  ;;  %v9315_v54 = vpop.f32.mrf.mxu0  ;;  %v16378_v33 = vld [vmem:[#allocation29_spill] sm:$0xff] }
 0xbd6   : > { %9679 = vst [vmem:[%s15843_s19 + $0x30] sm:$0xff] %v9607_v22  ;;  %9681 = vst.msk [vmem:[%s15843_s19 + $0x40] sm:$0xff] %vm1447_vm0, %v9609_v53  ;;  %v9608_v48 = vmax.f32 %v9536_v21, 0.0  ;;  %v9544_v2 = vadd.f32 %v12493_v46, %v9472_v6  ;;  %v9245_v26 = vadd.f32 %v9244_v14, %v16375_v38  ;;  %v12499_v6 = vld [vmem:[%s12979_s15 + $0x108] sm:$0xff] }
 0xbd7   : > { %v9546_v36 = vadd.f32 %v12494_v23, %v9474_v59  ;;  %v9473_v60 = vmul.f32 0.17, %v9401_v0  ;;  %v9409_v31 = vadd.f32 %v16055_v40, %v9243_v13  ;;  %v9411_v37 = vadd.f32 %v16060_v63, %v9314_v7  ;;  %v9246_v9 = vpop.f32.mrf.mxu1  ;;  %v9316_v16 = vpop.f32.mrf.mxu0  ;;  %v12500_v0 = vld [vmem:[%s12979_s15 + $0x118] sm:$0xff]  ;;  %v16379_v54 = vld [vmem:[#allocation30_spill] sm:$0xff] }
 0xbd8   : > { %9680 = vst [vmem:[%s15843_s19 + $0x38] sm:$0xff] %v9608_v48  ;;  %v9616_v49 = vmax.f32 %v9544_v2, 0.0  ;;  %v9410_v24 = vadd.f32 %v16065_v27, %v9245_v26  ;;  %v9247_v1 = vadd.f32 %v9246_v9, %v16376_v41  ;;  %v9317_v5 = vadd.f32 %v9316_v16, %v15849_v61  ;;  %v12501_v26 = vld [vmem:[%s12979_s15 + $0x110] sm:$0xff] }
 0xbd9   : > { %v9618_v4 = vmax.f32 %v9546_v36, 0.0  ;;  %v9545_v52 = vadd.f32 %v12495_v10, %v9473_v60  ;;  %v9481_v39 = vmul.f32 0.17, %v9409_v31  ;;  %v9483_v28 = vmul.f32 0.17, %v9411_v37  ;;  %v9248_v56 = vpop.f32.mrf.mxu1  ;;  %v9318_v29 = vpop.f32.mrf.mxu0  ;;  %v16380_v36 = vld [vmem:[#allocation38_spill] sm:$0xff] }
 0xbda   : > { %9688 = vst [vmem:[%s15843_s19 + $0x78] sm:$0xff] %v9616_v49  ;;  %v9482_v18 = vmul.f32 0.17, %v9410_v24  ;;  %v9418_v57 = vadd.f32 %v16055_v40, %v9247_v1  ;;  %v9420_v45 = vadd.f32 %v16060_v63, %v9317_v5  ;;  %v9249_v25 = vadd.f32 %v9248_v56, %v16377_v12  ;;  %v16381_v5 = vld [vmem:[#allocation37_spill] sm:$0xff]  ;;  %v12502_v10 = vld [vmem:[%s12979_s15 + $0x150] sm:$0xff] }
 0xbdb   : > { %9690 = vst.msk [vmem:[%s15843_s19 + $0x88] sm:$0xff] %vm1447_vm0, %v9618_v4  ;;  %v9617_v61 = vmax.f32 %v9545_v52, 0.0  ;;  %v9553_v3 = vadd.f32 %v12496_v32, %v9481_v39  ;;  %v9555_v19 = vadd.f32 %v12497_v62, %v9483_v28  ;;  %v9252_v51 = vpop.f32.mrf.mxu1  ;;  %v9321_v11 = vpop.f32.mrf.mxu0  ;;  %v12503_v39 = vld [vmem:[%s12979_s15 + $0x160] sm:$0xff]  ;;  %v16382_v12 = vld [vmem:[#allocation23_spill] sm:$0xff]  ;;  %v12504_v62 = vld [vmem:[%s12979_s15 + $0x158] sm:$0xff] }
 0xbdc   : > { %v9554_v47 = vadd.f32 %v12498_v20, %v9482_v18  ;;  %v9490_v35 = vmul.f32 0.17, %v9418_v57  ;;  %v9492_v42 = vmul.f32 0.17, %v9420_v45  ;;  %v9419_v44 = vadd.f32 %v16065_v27, %v9249_v25 }
 0xbdd   : > { %9689 = vst [vmem:[%s15843_s19 + $0x80] sm:$0xff] %v9617_v61  ;;  %v9625_v15 = vmax.f32 %v9553_v3, 0.0  ;;  %v9627_v8 = vmax.f32 %v9555_v19, 0.0  ;;  %v9253_v30 = vadd.f32 %v9252_v51, %v16378_v33  ;;  %v9322_v22 = vadd.f32 %v9321_v11, %v15859_v17  ;;  %v9254_v53 = vpop.f32.mrf.mxu1  ;;  %v9323_v43 = vpop.f32.mrf.mxu0 }
 0xbde   : > { %v9626_v21 = vmax.f32 %v9554_v47, 0.0  ;;  %v9562_v59 = vadd.f32 %v12499_v6, %v9490_v35  ;;  %v9564_v34 = vadd.f32 %v12500_v0, %v9492_v42  ;;  %v9491_v13 = vmul.f32 0.17, %v9419_v44  ;;  %v12505_v47 = vld [vmem:[%s12979_s15 + $0x198] sm:$0xff]  ;;  %v12507_v6 = vld [vmem:[%s12979_s15 + $0x1a0] sm:$0xff] }
 0xbdf   : > { %9697 = vst [vmem:[%s15843_s19 + $0xc0] sm:$0xff] %v9625_v15  ;;  %9699 = vst.msk [vmem:[%s15843_s19 + $0xd0] sm:$0xff] %vm1447_vm0, %v9627_v8  ;;  %v9427_v7 = vadd.f32 %v16055_v40, %v9253_v30  ;;  %v9429_v14 = vadd.f32 %v16060_v63, %v9322_v22  ;;  %v9255_v17 = vadd.f32 %v9254_v53, %v16379_v54  ;;  %v9256_v48 = vpop.f32.mrf.mxu1  ;;  %v9324_v46 = vpop.f32.mrf.mxu0  ;;  %v12506_v8 = vld [vmem:[%s12979_s15 + $0x1a8] sm:$0xff]  ;;  %v16383_v30 = vld [vmem:[#allocation24_spill] sm:$0xff] }
 0xbe0   : > { %9698 = vst [vmem:[%s15843_s19 + $0xc8] sm:$0xff] %v9626_v21  ;;  %v9634_v2 = vmax.f32 %v9562_v59, 0.0  ;;  %v9636_v38 = vmax.f32 %v9564_v34, 0.0  ;;  %v9563_v23 = vadd.f32 %v12501_v26, %v9491_v13  ;;  %v9257_v60 = vadd.f32 %v9256_v48, %v16380_v36 }
 0xbe1   : > { %v9499_v31 = vmul.f32 0.17, %v9427_v7  ;;  %v9501_v37 = vmul.f32 0.17, %v9429_v14  ;;  %v9428_v9 = vadd.f32 %v16065_v27, %v9255_v17  ;;  %v9325_v16 = vadd.f32 %v9324_v46, %v15869_v58  ;;  %v9258_v49 = vpop.f32.mrf.mxu1  ;;  %v9326_v24 = vpop.f32.mrf.mxu0  ;;  %v16384_v14 = vld [vmem:[#allocation25_spill] sm:$0xff] }
 0xbe2   : > { %9706 = vst [vmem:[%s15843_s19 + $0x108] sm:$0xff] %v9634_v2  ;;  %9708 = vst.msk [vmem:[%s15843_s19 + $0x118] sm:$0xff] %vm1447_vm0, %v9636_v38  ;;  %v9635_v41 = vmax.f32 %v9563_v23, 0.0  ;;  %v9436_v1 = vadd.f32 %v16055_v40, %v9257_v60  ;;  %v9259_v4 = vadd.f32 %v9258_v49, %v16381_v5  ;;  %v12508_v38 = vld [vmem:[%s12979_s15 + $0x1e0] sm:$0xff]  ;;  %v12509_v23 = vld [vmem:[%s12979_s15 + $0x1f0] sm:$0xff] }
 0xbe3   : > { %v9571_v52 = vadd.f32 %v12502_v10, %v9499_v31  ;;  %v9573_v28 = vadd.f32 %v12503_v39, %v9501_v37  ;;  %v9500_v56 = vmul.f32 0.17, %v9428_v9  ;;  %v9438_v58 = vadd.f32 %v16060_v63, %v9325_v16  ;;  %v9262_v29 = vpop.f32.mrf.mxu1  ;;  %v9329_v18 = vpop.f32.mrf.mxu0  ;;  %v16385_v60 = vld [vmem:[#allocation26_spill] sm:$0xff]  ;;  %v12512_v39 = vld [vmem:[%s12979_s15 + $0x238] sm:$0xff] }
 0xbe4   : > { %9707 = vst [vmem:[%s15843_s19 + $0x110] sm:$0xff] %v9635_v41  ;;  %v9508_v57 = vmul.f32 0.17, %v9436_v1  ;;  %v9437_v45 = vadd.f32 %v16065_v27, %v9259_v4  ;;  %v9263_v25 = vadd.f32 %v9262_v29, %v16382_v12  ;;  %v9330_v61 = vadd.f32 %v9329_v18, %v15879_v50  ;;  %v12510_v41 = vld [vmem:[%s12979_s15 + $0x1e8] sm:$0xff] }
 0xbe5   : > { %v9643_v32 = vmax.f32 %v9571_v52, 0.0  ;;  %v9645_v3 = vmax.f32 %v9573_v28, 0.0  ;;  %v9572_v19 = vadd.f32 %v12504_v62, %v9500_v56  ;;  %v9510_v51 = vmul.f32 0.17, %v9438_v58  ;;  %v9264_v11 = vpop.f32.mrf.mxu1  ;;  %v9331_v20 = vpop.f32.mrf.mxu0  ;;  %v12511_v10 = vld [vmem:[%s12979_s15 + $0x228] sm:$0xff] }
 0xbe6   : > { %v9580_v35 = vadd.f32 %v12505_v47, %v9508_v57  ;;  %v9509_v42 = vmul.f32 0.17, %v9437_v45  ;;  %v9445_v44 = vadd.f32 %v16055_v40, %v9263_v25  ;;  %v9447_v15 = vadd.f32 %v16060_v63, %v9330_v61 }
 0xbe7   : > { %9715 = vst [vmem:[%s15843_s19 + $0x150] sm:$0xff] %v9643_v32  ;;  %9717 = vst.msk [vmem:[%s15843_s19 + $0x160] sm:$0xff] %vm1447_vm0, %v9645_v3  ;;  %v9644_v50 = vmax.f32 %v9572_v19, 0.0  ;;  %v9582_v33 = vadd.f32 %v12506_v8, %v9510_v51  ;;  %v9265_v22 = vadd.f32 %v9264_v11, %v16383_v30  ;;  %v9266_v53 = vpop.f32.mrf.mxu1  ;;  %v9332_v43 = vpop.f32.mrf.mxu0 }
 0xbe8   : > { %v9652_v21 = vmax.f32 %v9580_v35, 0.0  ;;  %v9581_v59 = vadd.f32 %v12507_v6, %v9509_v42  ;;  %v9517_v0 = vmul.f32 0.17, %v9445_v44  ;;  %v9519_v34 = vmul.f32 0.17, %v9447_v15 }
 0xbe9   : > { %9716 = vst [vmem:[%s15843_s19 + $0x158] sm:$0xff] %v9644_v50  ;;  %v9654_v13 = vmax.f32 %v9582_v33, 0.0  ;;  %v9446_v7 = vadd.f32 %v16065_v27, %v9265_v22  ;;  %v9267_v54 = vadd.f32 %v9266_v53, %v16384_v14  ;;  %v9333_v17 = vadd.f32 %v9332_v43, %v15889_v55  ;;  %v9268_v48 = vpop.f32.mrf.mxu1  ;;  %v9334_v46 = vpop.f32.mrf.mxu0 }
 0xbea   : > { %9724 = vst [vmem:[%s15843_s19 + $0x198] sm:$0xff] %v9652_v21  ;;  %v9653_v2 = vmax.f32 %v9581_v59, 0.0  ;;  %v9589_v26 = vadd.f32 %v12508_v38, %v9517_v0  ;;  %v9591_v36 = vadd.f32 %v12509_v23, %v9519_v34  ;;  %v9269_v31 = vadd.f32 %v9268_v48, %v16385_v60 }
 0xbeb   : > { %9726 = vst.msk [vmem:[%s15843_s19 + $0x1a8] sm:$0xff] %vm1447_vm0, %v9654_v13  ;;  %v9518_v37 = vmul.f32 0.17, %v9446_v7  ;;  %v9454_v55 = vadd.f32 %v16055_v40, %v9267_v54  ;;  %v9456_v9 = vadd.f32 %v16060_v63, %v9333_v17 }
 0xbec   : > { %9725 = vst [vmem:[%s15843_s19 + $0x1a0] sm:$0xff] %v9653_v2  ;;  %v9661_v16 = vmax.f32 %v9589_v26, 0.0  ;;  %v9663_v49 = vmax.f32 %v9591_v36, 0.0  ;;  %v9455_v24 = vadd.f32 %v16065_v27, %v9269_v31  ;;  %v12513_v27 = vld [vmem:[%s12979_s15 + $0x230] sm:$0xff]  ;;  %s16180_s15 = scalar_lea.sflag [#allocation4], %s502_s20 }
 0xbed   : > { %v9590_v1 = vadd.f32 %v12510_v41, %v9518_v37  ;;  %v9526_v5 = vmul.f32 0.17, %v9454_v55  ;;  %v9528_v4 = vmul.f32 0.17, %v9456_v9 }
 0xbee   : > { %9733 = vst [vmem:[%s15843_s19 + $0x1e0] sm:$0xff] %v9661_v16  ;;  %9735 = vst.msk [vmem:[%s15843_s19 + $0x1f0] sm:$0xff] %vm1447_vm0, %v9663_v49  ;;  %v9527_v40 = vmul.f32 0.17, %v9455_v24 }
 0xbef   : > { %v9662_v63 = vmax.f32 %v9590_v1, 0.0  ;;  %v9598_v52 = vadd.f32 %v12511_v10, %v9526_v5  ;;  %v9600_v28 = vadd.f32 %v12512_v39, %v9528_v4 }
 0xbf0   : > { %v9599_v56 = vadd.f32 %v12513_v27, %v9527_v40 }
 0xbf1   : > { %9734 = vst [vmem:[%s15843_s19 + $0x1e8] sm:$0xff] %v9662_v63  ;;  %v9670_v58 = vmax.f32 %v9598_v52, 0.0  ;;  %v9672_v29 = vmax.f32 %v9600_v28, 0.0 }
 0xbf2   : > { %v9671_v18 = vmax.f32 %v9599_v56, 0.0 }
 0xbf3   : > { %9742 = vst [vmem:[%s15843_s19 + $0x228] sm:$0xff] %v9670_v58  ;;  %9744 = vst.msk [vmem:[%s15843_s19 + $0x238] sm:$0xff] %vm1447_vm0, %v9672_v29 }
 0xbf4   : > { %9743 = vst [vmem:[%s15843_s19 + $0x230] sm:$0xff] %v9671_v18 }
 0xbf5   : > { %12605 = shalt.err (!%p12602_p0)
}
 0xbf6   : > { %s12606_s20 = scalar_lea.hbm %s16170_s27, 9216  ;;  %s12610_s21 = scalar_lea.hbm %s16234_s14, 18432 }
 0xbf7   : > { %p12607_p6 = scmp.ne.s32.totalorder %s16170_s27, %s12606_s20  ;;  %p12611_p5 = scmp.lt.s32.totalorder %s16170_s27, %s16234_s14 }
 0xbf8   : > { %p12612_p1 = scmp.lt.s32.totalorder %s12610_s21, %s12606_s20 }
 0xbf9   : > { %p12608_p9 = pnand %p12607_p6, %p16386_p3 }
 0xbfa   : > { %p12613_p10 = por %p12612_p1, %p12611_p5 }
 0xbfb   : > { %p12609_p13 = pneg %p12608_p9 }
 0xbfd   : > { %p12614_p12 = pnand %p12613_p10, %p12609_p13 }
 0xbff   : > { %12617 = shalt.err (!%p12614_p12)
}
 0xc00   : > { %s12671_s29 = smov 1152   ;;  %s12672_s28 = smov 72  }
 0xc01   : > { %11359 = dma.vmem_to_hbm [thread:$0]  (%p16386_p3), %s16172_s18, 9216, %s16170_s27, %s16180_s15, %s12671_s29, %s12671_s29, %s12672_s28  }
 0xc02 PF: > { %s16387_s22 = sld [smem:[#allocation12_spill]]  ;;  %p11381_p2 = scmp.ge.s32.totalorder %s12660_s16, 2 }
 0xc03   : > { %s16388_s26 = sld [smem:[#allocation16_spill]] }
 0xc08   : > { %s9774_s19 = sand.u32 1, %s16387_s22  }
 0xc09   : > { %p16389_p4 = scmp.ne.s32.totalorder %s16388_s26, 0  ;;  %s9775_s20 = scalar_lea.sflag [#allocation4], %s9774_s19 }
 0xc0b   : > { %p11372_p7 = pnand %p11381_p2, %p16389_p4 }
 0xc0d   : > { %p11373_p8 = pneg %p11372_p7 }
 0xc0f   : > { %12643 = dma.done.wait (%p11373_p8), %s9775_s20, 9216  }
 0xc10   : > { %12645 = vsyncadd (%p11373_p8), %s9775_s20, 4294958080  ;;  %s16390_s16 = sld [smem:[#allocation14_spill]]  ;;  %s16393_s29 = smov %s12652_s30 }
 0xc11   : > { %s16391_s25 = sld [smem:[#allocation13_spill]] }
 0xc12   : > { %s16392_s15 = sld [smem:[#allocation15_spill]] }
 0xc16   : > { %p26_p11 = scmp.ge.s32.totalorder %s16390_s16, 4  }
 0xc17   : > { %s16394_s30 = smov %s16391_s25 }
 0xc18   :  { %28 = sbr.rel (!%p26_p11) target bundleno = 5 (0x5), region = 148 }
 0xc1d   :  { %9780 = vsyncpa [#allocation3], 1 }
 0xc1e   :  { %9782 = vsyncpa [#allocation3 + $0x1], 1 }
 0xc1f   :  { %9783 = vsyncpa [#allocation6], 1 }
 0xc20   :  { %9784 = vsyncpa [#allocation4], 1 }
 0xc21   :  { %9786 = vsyncpa [#allocation4 + $0x1], 1 }

</bundles_post_ra>
